<compile_context>
chip_gen: v6e
topology: v6e:2x2x1
jax: 0.10.0
libtpu: 0.0.40
codegen_flags: <defaults>
</compile_context>

<pallas_src>
import functools
import math

import jax
import jax.numpy as jnp
from jax.experimental import pallas as pl
from jax.experimental.pallas import tpu as pltpu


# ----------------------------------------------------------------------------
# small in-kernel helpers
# ----------------------------------------------------------------------------
def _silu(x):
    return x * jax.nn.sigmoid(x)


def _layernorm(x, g, b, eps):
    mu = jnp.mean(x, axis=-1, keepdims=True)
    var = jnp.mean((x - mu) ** 2, axis=-1, keepdims=True)
    return (x - mu) * jax.lax.rsqrt(var + eps) * g + b


# ----------------------------------------------------------------------------
# Fused kernel: crystal encoder + spectral encoder + cross-attn + predictor
# ----------------------------------------------------------------------------
def _fused_adapter_kernel(
    # data
    pos_ref, lat_ref, mrow_ref, mcol_ref, spec_ref,
    # crystal position / lattice MLPs
    pw1_ref, pb1_ref, pw2_ref, pb2_ref,
    lw1_ref, lb1_ref, lw2_ref, lb2_ref,
    # crystal attention (per-head contiguous, transposed -> lane-dense)
    wqkvT_ref, bqkv_ref, woh_ref, bo_ref,
    # crystal projection + LayerNorm
    prw1_ref, prb1_ref, prw2_ref, prb2_ref, clng_ref, clnb_ref,
    # spectral encoder
    iw_ref, ib_ref, pe_ref,
    wvo_ref, bvo_ref, l1g_ref, l1b_ref,
    fw1_ref, fb1_ref, fw2_ref, fb2_ref, l2g_ref, l2b_ref,
    spw_ref, spb_ref, slng_ref, slnb_ref,
    # cross-attention (folded V/O)
    cw_ref, cb_ref,
    # property predictor
    tw0_ref, tb0_ref, twr_ref, tbr_ref, hw_ref, hb_ref,
    # outputs
    crys_ref, enc_ref, mv_ref,
    *, batch, atoms, num_heads, num_props, eps):
    f32 = jnp.float32
    bn = batch * atoms
    hc = pw2_ref.shape[1]
    dh = hc // num_heads
    n_cl = wqkvT_ref.shape[0]
    n_sl = wvo_ref.shape[0]

    def w(ref, *idx):
        """Load a (possibly bf16) weight tile and upcast to f32."""
        if not idx:
            v = ref[...]
        elif len(idx) == 1:
            v = ref[idx[0]]
        else:
            v = ref[idx]
        return v.astype(f32)

    def mm(a, b):
        return jnp.dot(a, b, preferred_element_type=f32)

    def mm_t(a, b):                       # a @ b.T  (contract last dims)
        return jax.lax.dot_general(a, b, (((1,), (1,)), ((), ())),
                                   preferred_element_type=f32)

    def mm_tl(a, b):                      # a.T @ b  (contract first dims)
        return jax.lax.dot_general(a, b, (((0,), (0,)), ((), ())),
                                   preferred_element_type=f32)

    # ----------------- crystal structure encoder ------------------------
    # position MLP on the whole stacked batch: (B*N, 3) -> (B*N, Hc)
    h = _silu(mm(pos_ref[...], w(pw1_ref)) + pb1_ref[...])
    pos_feat = mm(h, w(pw2_ref)) + pb2_ref[...]

    # lattice MLP: (B, 6) -> (B, Hc)
    hl = _silu(mm(lat_ref[...], w(lw1_ref)) + lb1_ref[...])
    lat_feat = mm(hl, w(lw2_ref)) + lb2_ref[...]

    # block selector (B*N, B): expand[i, b] = 1 iff stacked row i belongs to b
    row_i = jax.lax.broadcasted_iota(jnp.int32, (bn, batch), 0)
    col_s = jax.lax.broadcasted_iota(jnp.int32, (bn, batch), 1) * atoms
    expand = jnp.logical_and(row_i >= col_s, row_i < col_s + atoms).astype(f32)

    # broadcast lattice features over the atoms of each element (MXU, no repeat)
    x = pos_feat + mm(expand, lat_feat)                       # (B*N, Hc)

    mrow = mrow_ref[...]                                      # (1, B*N)
    mcol = mcol_ref[...]                                      # (B*N, 1)
    same_batch = mm_t(expand, expand)                         # (B*N, B*N)
    # key_padding_mask semantics restricted to the element's own block
    allowed = (same_batch * mrow) > 0.0

    for layer in range(n_cl):
        attn = jnp.zeros((bn, hc), f32)
        bo_l = bo_ref[layer]                                  # (1, Hc)
        for hd in range(num_heads):
            w3 = w(wqkvT_ref, layer, hd)                      # (3*dh, Hc) lane-dense
            b3 = bqkv_ref[layer, hd]                          # (3, dh)
            q = mm_t(x, w3[0:dh]) + b3[0:1]                   # scale folded into Q
            k = mm_t(x, w3[dh:2 * dh]) + b3[1:2]
            v = mm_t(x, w3[2 * dh:3 * dh]) + b3[2:3]
            s = mm_t(q, k)                                    # (B*N, B*N)
            s = jnp.where(allowed, s, -1e30)
            s = s - jnp.max(s, axis=-1, keepdims=True)
            p = jnp.exp(s)
            p = p / jnp.sum(p, axis=-1, keepdims=True)        # exact divide
            # per-head accumulation through Wo rows (== concat-heads @ Wo)
            attn = attn + mm(mm(p, v), w(woh_ref, layer, hd))
        x = x + attn + bo_l

    # masked mean-pool per batch element (via the block selector)
    counts = mm_tl(expand, mcol)                              # (B, 1)
    pooled = mm_tl(expand, x * mcol)                          # (B, Hc)
    pooled = pooled / jnp.maximum(counts, 1.0)

    hp = _silu(mm(pooled, w(prw1_ref)) + prb1_ref[...])
    crys = mm(hp, w(prw2_ref)) + prb2_ref[...]
    crys_ref[...] = _layernorm(crys, clng_ref[...], clnb_ref[...], eps)

    # ----------------- spectroscopy encoder -----------------------------
    hs = _silu(mm(spec_ref[...], w(iw_ref)) + ib_ref[...])    # (B, Hs)
    hs = hs + pe_ref[...]                                     # positional enc row 0
    for layer in range(n_sl):
        # length-1 self-attention folded to one linear (Wv@Wo, bv@Wo+bo)
        sa = mm(hs, w(wvo_ref, layer)) + bvo_ref[layer]
        hs = _layernorm(hs + sa, l1g_ref[layer], l1b_ref[layer], eps)
        ff = jnp.maximum(mm(hs, w(fw1_ref, layer)) + fb1_ref[layer], 0.0)   # ReLU
        ff = mm(ff, w(fw2_ref, layer)) + fb2_ref[layer]
        hs = _layernorm(hs + ff, l2g_ref[layer], l2b_ref[layer], eps)
    enc = mm(hs, w(spw_ref)) + spb_ref[...]
    enc = _layernorm(enc, slng_ref[...], slnb_ref[...], eps)

    # cross-attention over length-1 sequences: folded V/O projection (exact;
    # the crystal-encoding query cancels because softmax over one key == 1)
    fused = mm(enc, w(cw_ref)) + cb_ref[...]
    enc_ref[...] = fused

    # ----------------- property predictor --------------------------------
    z = _silu(mm(fused, w(tw0_ref)) + tb0_ref[...])
    for layer in range(twr_ref.shape[0]):
        z = _silu(mm(z, w(twr_ref, layer)) + tbr_ref[layer])
    mv = mm(z, w(hw_ref)) + hb_ref[...]
    col = jax.lax.broadcasted_iota(jnp.int32, mv.shape, 1)
    mv_ref[...] = jnp.where(col < num_props, mv, jnp.logaddexp(mv, 0.0))


# ----------------------------------------------------------------------------
# Wrapper
# ----------------------------------------------------------------------------
def adapter_forward(params, atom_types, positions, lattice, spectral, mask=None):
    B, N = atom_types.shape
    if mask is None:
        mask = (atom_types > 0).astype(jnp.float32)
    # NOTE: the reference computes atom_embedding(atom_types) but never uses it.
    c = params["crystal"]
    s = params["spec_head"]
    E = c["ln_g"].shape[-1]
    twop = s["head_w"].shape[-1]
    num_heads = c["wqkvT"].shape[1]

    pos_flat = positions.reshape(B * N, 3).astype(jnp.float32)
    mrow = mask.reshape(1, B * N).astype(jnp.float32)
    mcol = mask.reshape(B * N, 1).astype(jnp.float32)

    weights = (c["pos_w1"], c["pos_b1"], c["pos_w2"], c["pos_b2"],
               c["lat_w1"], c["lat_b1"], c["lat_w2"], c["lat_b2"],
               c["wqkvT"], c["bqkv"], c["wo_h"], c["bo"],
               c["proj_w1"], c["proj_b1"], c["proj_w2"], c["proj_b2"],
               c["ln_g"], c["ln_b"],
               s["init_w"], s["init_b"], s["pe0"],
               s["wvo"], s["bvo"], s["ln1_g"], s["ln1_b"],
               s["ff_w1"], s["ff_b1"], s["ff_w2"], s["ff_b2"],
               s["ln2_g"], s["ln2_b"],
               s["proj_w"], s["proj_b"], s["proj_ln_g"], s["proj_ln_b"],
               s["cross_w"], s["cross_b"],
               s["trunk_w0"], s["trunk_b0"], s["trunk_wr"], s["trunk_br"],
               s["head_w"], s["head_b"])

    operands = (pos_flat, lattice.astype(jnp.float32), mrow, mcol,
                spectral.astype(jnp.float32)) + weights

    out_shapes = (jax.ShapeDtypeStruct((B, E), jnp.float32),    # crystal enc
                  jax.ShapeDtypeStruct((B, E), jnp.float32),    # fused encoding
                  jax.ShapeDtypeStruct((B, twop), jnp.float32)) # mean | var

    # advisory cost estimate: this kernel is weight-DMA bound
    bytes_in = sum(int(a.size) * a.dtype.itemsize for a in operands)
    bytes_out = 4 * (B * E + B * E + B * twop)
    mat_elems = sum(int(a.size) for a in weights if a.dtype == jnp.bfloat16)
    cost = pl.CostEstimate(flops=int(2 * B * N * mat_elems),
                           transcendentals=int(16 * B * N * E),
                           bytes_accessed=int(bytes_in + bytes_out))

    kernel = functools.partial(
        _fused_adapter_kernel, batch=B, atoms=N, num_heads=num_heads,
        num_props=twop // 2, eps=1e-5)

    crys, fused, mv = pl.pallas_call(
        kernel,
        out_shape=out_shapes,
        compiler_params=pltpu.CompilerParams(vmem_limit_bytes=32 * 1024 * 1024),
        cost_estimate=cost,
    )(*operands)

    del crys  # only feeds the length-1 cross-attention query, which cancels
    n_props = twop // 2
    return {"encoding": fused, "mean": mv[:, :n_props], "var": mv[:, n_props:]}


# ----------------------------------------------------------------------------
# Parameter construction (deterministic, synthetic)
# ----------------------------------------------------------------------------
class KeyGen:
    def __init__(self, key):
        self.key = key

    def __call__(self):
        self.key, sub = jax.random.split(self.key)
        return sub


def init_linear(kg, din, dout):
    lim = 1.0 / math.sqrt(din)
    w = jax.random.uniform(kg(), (din, dout), jnp.float32, -lim, lim)
    b = jax.random.uniform(kg(), (1, dout), jnp.float32, -lim, lim)
    return w, b


def init_layernorm(d):
    return jnp.ones((1, d), jnp.float32), jnp.zeros((1, d), jnp.float32)


def _bf16(x):
    return x.astype(jnp.bfloat16)


def build_params(kg, *, Hc, Hs, Hp, E, SPEC_DIM, NUM_PROPS,
                 NUM_LAYERS=3, NUM_HEADS=4):
    dh = Hc // NUM_HEADS
    scale = 1.0 / math.sqrt(dh)

    # ---- crystal structure encoder ----
    c = {}
    w, b = init_linear(kg, 3, Hc // 2);       c["pos_w1"], c["pos_b1"] = _bf16(w), b
    w, b = init_linear(kg, Hc // 2, Hc);      c["pos_w2"], c["pos_b2"] = _bf16(w), b
    w, b = init_linear(kg, 6, Hc // 2);       c["lat_w1"], c["lat_b1"] = _bf16(w), b
    w, b = init_linear(kg, Hc // 2, Hc);      c["lat_w2"], c["lat_b2"] = _bf16(w), b

    wqkvT, bqkv, woh, bos = [], [], [], []
    for _ in range(NUM_LAYERS):
        wq, bq = init_linear(kg, Hc, Hc)
        wk, bk = init_linear(kg, Hc, Hc)
        wv, bv = init_linear(kg, Hc, Hc)
        wo, bo = init_linear(kg, Hc, Hc)
        hw_, hb_, hwo_ = [], [], []
        for h in range(NUM_HEADS):
            sl = slice(h * dh, (h + 1) * dh)
            # per-head weights, transposed to (dh, Hc) -> lane-dense operands;
            # the 1/sqrt(head_dim) attention scale is folded into Q (exact)
            hw_.append(jnp.concatenate([(wq[:, sl] * scale).T,
                                        wk[:, sl].T,
                                        wv[:, sl].T], axis=0))        # (3*dh, Hc)
            hb_.append(jnp.stack([bq[0, sl] * scale, bk[0, sl], bv[0, sl]],
                                 axis=0))                             # (3, dh)
            hwo_.append(wo[sl, :])                                    # (dh, Hc)
        wqkvT.append(jnp.stack(hw_))
        bqkv.append(jnp.stack(hb_))
        woh.append(jnp.stack(hwo_))
        bos.append(bo)
    c["wqkvT"] = _bf16(jnp.stack(wqkvT))     # (L, nh, 3*dh, Hc)
    c["bqkv"] = jnp.stack(bqkv)              # (L, nh, 3, dh)
    c["wo_h"] = _bf16(jnp.stack(woh))        # (L, nh, dh, Hc)
    c["bo"] = jnp.stack(bos)                 # (L, 1, Hc)

    w, b = init_linear(kg, Hc, Hc);           c["proj_w1"], c["proj_b1"] = _bf16(w), b
    w, b = init_linear(kg, Hc, E);            c["proj_w2"], c["proj_b2"] = _bf16(w), b
    c["ln_g"], c["ln_b"] = init_layernorm(E)

    # ---- spectroscopy encoder + cross-attention + property predictor ----
    s = {}
    w, b = init_linear(kg, SPEC_DIM, Hs);     s["init_w"], s["init_b"] = _bf16(w), b
    # positional encoding row 0: sin(0)=0 on even dims, cos(0)=1 on odd dims
    s["pe0"] = jnp.tile(jnp.array([0.0, 1.0], jnp.float32), Hs // 2).reshape(1, Hs)

    wvo, bvo, l1g, l1b, fw1, fb1, fw2, fb2, l2g, l2b = ([] for _ in range(10))
    for _ in range(NUM_LAYERS):
        wv, bv = init_linear(kg, Hs, Hs)
        wo, bo = init_linear(kg, Hs, Hs)
        # length-1 self-attention: softmax == 1 -> Wv/Wo fold to one linear (exact)
        wvo.append(wv @ wo)
        bvo.append(bv @ wo + bo)
        g, b = init_layernorm(Hs); l1g.append(g); l1b.append(b)
        w1, b1 = init_linear(kg, Hs, 4 * Hs); fw1.append(w1); fb1.append(b1)
        w2, b2 = init_linear(kg, 4 * Hs, Hs); fw2.append(w2); fb2.append(b2)
        g, b = init_layernorm(Hs); l2g.append(g); l2b.append(b)
    s["wvo"] = _bf16(jnp.stack(wvo));   s["bvo"] = jnp.stack(bvo)
    s["ln1_g"] = jnp.stack(l1g);        s["ln1_b"] = jnp.stack(l1b)
    s["ff_w1"] = _bf16(jnp.stack(fw1)); s["ff_b1"] = jnp.stack(fb1)
    s["ff_w2"] = _bf16(jnp.stack(fw2)); s["ff_b2"] = jnp.stack(fb2)
    s["ln2_g"] = jnp.stack(l2g);        s["ln2_b"] = jnp.stack(l2b)
    w, b = init_linear(kg, Hs, E);      s["proj_w"], s["proj_b"] = _bf16(w), b
    s["proj_ln_g"], s["proj_ln_b"] = init_layernorm(E)

    # cross attention: both sequences have length 1 -> only V/O projections matter
    cwv, cbv = init_linear(kg, E, E)
    cwo, cbo = init_linear(kg, E, E)
    s["cross_w"] = _bf16(cwv @ cwo)
    s["cross_b"] = cbv @ cwo + cbo

    # TODO(synk): exact models.uncertainty.UncertaintyMLP source not provided;
    # implementing a standard heteroscedastic MLP (shared SiLU trunk, mean head,
    # softplus variance head), dropout in eval mode.
    w, b = init_linear(kg, E, Hp);      s["trunk_w0"], s["trunk_b0"] = _bf16(w), b
    twr, tbr = [], []
    for _ in range(NUM_LAYERS - 1):
        w, b = init_linear(kg, Hp, Hp)
        twr.append(w); tbr.append(b)
    s["trunk_wr"] = _bf16(jnp.stack(twr))    # (L-1, Hp, Hp)
    s["trunk_br"] = jnp.stack(tbr)
    mw, mb = init_linear(kg, Hp, NUM_PROPS)
    vw, vb = init_linear(kg, Hp, NUM_PROPS)
    s["head_w"] = _bf16(jnp.concatenate([mw, vw], axis=1))   # (Hp, 2*NP) mean|var
    s["head_b"] = jnp.concatenate([mb, vb], axis=1)

    return {"crystal": c, "spec_head": s}


# ----------------------------------------------------------------------------
# Main
# ----------------------------------------------------------------------------
if __name__ == "__main__":
    B, N = 2, 8          # batch, num atoms
    Hc = 128             # crystal hidden dim (4 heads -> head_dim 32)
    Hs = 128             # spectral hidden dim
    Hp = 128             # property-predictor hidden dim
    E = 128              # common embed dim
    SPEC_DIM = 256       # spectrum length
    NUM_PROPS = 5

    root = jax.random.PRNGKey(0)
    data_key, param_key = jax.random.split(root)
    kg = KeyGen(param_key)
    params = build_params(kg, Hc=Hc, Hs=Hs, Hp=Hp, E=E,
                          SPEC_DIM=SPEC_DIM, NUM_PROPS=NUM_PROPS)

    dk = jax.random.split(data_key, 4)
    atom_types = jax.random.randint(dk[0], (B, N), 1, 119, dtype=jnp.int32)
    positions = jax.random.normal(dk[1], (B, N, 3), jnp.float32)
    lattice = jax.random.normal(dk[2], (B, 6), jnp.float32)
    spectral = jax.random.normal(dk[3], (B, SPEC_DIM), jnp.float32)

    fwd = jax.jit(adapter_forward)
    out = fwd(params, atom_types, positions, lattice, spectral)
    jax.block_until_ready(out)

    assert out["encoding"].shape == (B, E)
    assert out["mean"].shape == (B, NUM_PROPS)
    assert out["var"].shape == (B, NUM_PROPS)
    assert bool(jnp.all(jnp.isfinite(out["encoding"])))
    assert bool(jnp.all(jnp.isfinite(out["mean"])))
    assert bool(jnp.all(out["var"] >= 0.0))
    print("KERNEL_OK")
</pallas_src>

<mosaic_0001>
module attributes {stable_mosaic.version = 11 : i64} {
  func.func @_fused_adapter_kernel(%arg0: memref<16x3xf32, #tpu.memory_space<vmem>>, %arg1: memref<2x6xf32, #tpu.memory_space<vmem>>, %arg2: memref<1x16xf32, #tpu.memory_space<vmem>>, %arg3: memref<16x1xf32, #tpu.memory_space<vmem>>, %arg4: memref<2x256xf32, #tpu.memory_space<vmem>>, %arg5: memref<3x64xbf16, #tpu.memory_space<vmem>>, %arg6: memref<1x64xf32, #tpu.memory_space<vmem>>, %arg7: memref<64x128xbf16, #tpu.memory_space<vmem>>, %arg8: memref<1x128xf32, #tpu.memory_space<vmem>>, %arg9: memref<6x64xbf16, #tpu.memory_space<vmem>>, %arg10: memref<1x64xf32, #tpu.memory_space<vmem>>, %arg11: memref<64x128xbf16, #tpu.memory_space<vmem>>, %arg12: memref<1x128xf32, #tpu.memory_space<vmem>>, %arg13: memref<3x4x96x128xbf16, #tpu.memory_space<vmem>>, %arg14: memref<3x4x3x32xf32, #tpu.memory_space<vmem>>, %arg15: memref<3x4x32x128xbf16, #tpu.memory_space<vmem>>, %arg16: memref<3x1x128xf32, #tpu.memory_space<vmem>>, %arg17: memref<128x128xbf16, #tpu.memory_space<vmem>>, %arg18: memref<1x128xf32, #tpu.memory_space<vmem>>, %arg19: memref<128x128xbf16, #tpu.memory_space<vmem>>, %arg20: memref<1x128xf32, #tpu.memory_space<vmem>>, %arg21: memref<1x128xf32, #tpu.memory_space<vmem>>, %arg22: memref<1x128xf32, #tpu.memory_space<vmem>>, %arg23: memref<256x128xbf16, #tpu.memory_space<vmem>>, %arg24: memref<1x128xf32, #tpu.memory_space<vmem>>, %arg25: memref<1x128xf32, #tpu.memory_space<vmem>>, %arg26: memref<3x128x128xbf16, #tpu.memory_space<vmem>>, %arg27: memref<3x1x128xf32, #tpu.memory_space<vmem>>, %arg28: memref<3x1x128xf32, #tpu.memory_space<vmem>>, %arg29: memref<3x1x128xf32, #tpu.memory_space<vmem>>, %arg30: memref<3x128x512xbf16, #tpu.memory_space<vmem>>, %arg31: memref<3x1x512xf32, #tpu.memory_space<vmem>>, %arg32: memref<3x512x128xbf16, #tpu.memory_space<vmem>>, %arg33: memref<3x1x128xf32, #tpu.memory_space<vmem>>, %arg34: memref<3x1x128xf32, #tpu.memory_space<vmem>>, %arg35: memref<3x1x128xf32, #tpu.memory_space<vmem>>, %arg36: memref<128x128xbf16, #tpu.memory_space<vmem>>, %arg37: memref<1x128xf32, #tpu.memory_space<vmem>>, %arg38: memref<1x128xf32, #tpu.memory_space<vmem>>, %arg39: memref<1x128xf32, #tpu.memory_space<vmem>>, %arg40: memref<128x128xbf16, #tpu.memory_space<vmem>>, %arg41: memref<1x128xf32, #tpu.memory_space<vmem>>, %arg42: memref<128x128xbf16, #tpu.memory_space<vmem>>, %arg43: memref<1x128xf32, #tpu.memory_space<vmem>>, %arg44: memref<2x128x128xbf16, #tpu.memory_space<vmem>>, %arg45: memref<2x1x128xf32, #tpu.memory_space<vmem>>, %arg46: memref<128x10xbf16, #tpu.memory_space<vmem>>, %arg47: memref<1x10xf32, #tpu.memory_space<vmem>>, %arg48: memref<2x128xf32, #tpu.memory_space<vmem>>, %arg49: memref<2x128xf32, #tpu.memory_space<vmem>>, %arg50: memref<2x10xf32, #tpu.memory_space<vmem>>) attributes {dimension_semantics = [], scalar_prefetch = 0 : i64, scratch_operands = 0 : i64, tpu.core_type = #tpu.core_type<tc>} {
    %c0 = arith.constant 0 : index
    %c0_0 = arith.constant 0 : index
    %0 = vector.load %arg0[%c0, %c0_0] : memref<16x3xf32, #tpu.memory_space<vmem>>, vector<16x3xf32>
    %c0_1 = arith.constant 0 : index
    %c0_2 = arith.constant 0 : index
    %1 = vector.load %arg5[%c0_1, %c0_2] : memref<3x64xbf16, #tpu.memory_space<vmem>>, vector<3x64xbf16>
    %2 = arith.extf %1 : vector<3x64xbf16> to vector<3x64xf32>
    %cst = arith.constant dense<0.000000e+00> : vector<16x64xf32>
    %3 = tpu.matmul %0, %2, %cst {dimension_numbers = #tpu.dot_dimension_numbers<[1], [0], [0], [1], [0, 0, 1, 1], [], []>} : vector<16x3xf32>, vector<3x64xf32>, vector<16x64xf32> -> vector<16x64xf32>
    %c0_3 = arith.constant 0 : index
    %c0_4 = arith.constant 0 : index
    %4 = vector.load %arg6[%c0_3, %c0_4] : memref<1x64xf32, #tpu.memory_space<vmem>>, vector<1x64xf32>
    %5 = vector.broadcast %4 : vector<1x64xf32> to vector<16x64xf32>
    %6 = arith.addf %3, %5 : vector<16x64xf32>
    %7 = arith.negf %6 : vector<16x64xf32>
    %8 = math.exp %7 : vector<16x64xf32>
    %cst_5 = arith.constant 1.000000e+00 : f32
    %9 = vector.broadcast %cst_5 : f32 to vector<16x64xf32>
    %10 = arith.addf %9, %8 : vector<16x64xf32>
    %11 = arith.divf %9, %10 : vector<16x64xf32>
    %12 = arith.mulf %6, %11 : vector<16x64xf32>
    %c0_6 = arith.constant 0 : index
    %c0_7 = arith.constant 0 : index
    %13 = vector.load %arg7[%c0_6, %c0_7] : memref<64x128xbf16, #tpu.memory_space<vmem>>, vector<64x128xbf16>
    %14 = arith.extf %13 : vector<64x128xbf16> to vector<64x128xf32>
    %cst_8 = arith.constant dense<0.000000e+00> : vector<16x128xf32>
    %15 = tpu.matmul %12, %14, %cst_8 {dimension_numbers = #tpu.dot_dimension_numbers<[1], [0], [0], [1], [0, 0, 1, 1], [], []>} : vector<16x64xf32>, vector<64x128xf32>, vector<16x128xf32> -> vector<16x128xf32>
    %c0_9 = arith.constant 0 : index
    %c0_10 = arith.constant 0 : index
    %16 = vector.load %arg8[%c0_9, %c0_10] : memref<1x128xf32, #tpu.memory_space<vmem>>, vector<1x128xf32>
    %17 = vector.broadcast %16 : vector<1x128xf32> to vector<16x128xf32>
    %18 = arith.addf %15, %17 : vector<16x128xf32>
    %c0_11 = arith.constant 0 : index
    %c0_12 = arith.constant 0 : index
    %19 = vector.load %arg1[%c0_11, %c0_12] : memref<2x6xf32, #tpu.memory_space<vmem>>, vector<2x6xf32>
    %c0_13 = arith.constant 0 : index
    %c0_14 = arith.constant 0 : index
    %20 = vector.load %arg9[%c0_13, %c0_14] : memref<6x64xbf16, #tpu.memory_space<vmem>>, vector<6x64xbf16>
    %21 = arith.extf %20 : vector<6x64xbf16> to vector<6x64xf32>
    %cst_15 = arith.constant dense<0.000000e+00> : vector<2x64xf32>
    %22 = tpu.matmul %19, %21, %cst_15 {dimension_numbers = #tpu.dot_dimension_numbers<[1], [0], [0], [1], [0, 0, 1, 1], [], []>} : vector<2x6xf32>, vector<6x64xf32>, vector<2x64xf32> -> vector<2x64xf32>
    %c0_16 = arith.constant 0 : index
    %c0_17 = arith.constant 0 : index
    %23 = vector.load %arg10[%c0_16, %c0_17] : memref<1x64xf32, #tpu.memory_space<vmem>>, vector<1x64xf32>
    %24 = vector.broadcast %23 : vector<1x64xf32> to vector<2x64xf32>
    %25 = arith.addf %22, %24 : vector<2x64xf32>
    %26 = arith.negf %25 : vector<2x64xf32>
    %27 = math.exp %26 : vector<2x64xf32>
    %cst_18 = arith.constant 1.000000e+00 : f32
    %28 = vector.broadcast %cst_18 : f32 to vector<2x64xf32>
    %29 = arith.addf %28, %27 : vector<2x64xf32>
    %30 = arith.divf %28, %29 : vector<2x64xf32>
    %31 = arith.mulf %25, %30 : vector<2x64xf32>
    %c0_19 = arith.constant 0 : index
    %c0_20 = arith.constant 0 : index
    %32 = vector.load %arg11[%c0_19, %c0_20] : memref<64x128xbf16, #tpu.memory_space<vmem>>, vector<64x128xbf16>
    %33 = arith.extf %32 : vector<64x128xbf16> to vector<64x128xf32>
    %cst_21 = arith.constant dense<0.000000e+00> : vector<2x128xf32>
    %34 = tpu.matmul %31, %33, %cst_21 {dimension_numbers = #tpu.dot_dimension_numbers<[1], [0], [0], [1], [0, 0, 1, 1], [], []>} : vector<2x64xf32>, vector<64x128xf32>, vector<2x128xf32> -> vector<2x128xf32>
    %c0_22 = arith.constant 0 : index
    %c0_23 = arith.constant 0 : index
    %35 = vector.load %arg12[%c0_22, %c0_23] : memref<1x128xf32, #tpu.memory_space<vmem>>, vector<1x128xf32>
    %36 = vector.broadcast %35 : vector<1x128xf32> to vector<2x128xf32>
    %37 = arith.addf %34, %36 : vector<2x128xf32>
    %38 = tpu.iota {dimensions = array<i32: 0>} : vector<16x2xi32>
    %39 = tpu.iota {dimensions = array<i32: 1>} : vector<16x2xi32>
    %c8_i32 = arith.constant 8 : i32
    %40 = vector.broadcast %c8_i32 : i32 to vector<16x2xi32>
    %41 = arith.muli %39, %40 : vector<16x2xi32>
    %42 = arith.cmpi sge, %38, %41 : vector<16x2xi32>
    %c8_i32_24 = arith.constant 8 : i32
    %43 = vector.broadcast %c8_i32_24 : i32 to vector<16x2xi32>
    %44 = arith.addi %41, %43 : vector<16x2xi32>
    %45 = arith.cmpi slt, %38, %44 : vector<16x2xi32>
    %46 = arith.andi %42, %45 : vector<16x2xi1>
    %47 = arith.extui %46 : vector<16x2xi1> to vector<16x2xi32>
    %48 = arith.sitofp %47 : vector<16x2xi32> to vector<16x2xf32>
    %cst_25 = arith.constant dense<0.000000e+00> : vector<16x128xf32>
    %49 = tpu.matmul %48, %37, %cst_25 {dimension_numbers = #tpu.dot_dimension_numbers<[1], [0], [0], [1], [0, 0, 1, 1], [], []>} : vector<16x2xf32>, vector<2x128xf32>, vector<16x128xf32> -> vector<16x128xf32>
    %50 = arith.addf %18, %49 : vector<16x128xf32>
    %c0_26 = arith.constant 0 : index
    %c0_27 = arith.constant 0 : index
    %51 = vector.load %arg2[%c0_26, %c0_27] : memref<1x16xf32, #tpu.memory_space<vmem>>, vector<1x16xf32>
    %c0_28 = arith.constant 0 : index
    %c0_29 = arith.constant 0 : index
    %52 = vector.load %arg3[%c0_28, %c0_29] : memref<16x1xf32, #tpu.memory_space<vmem>>, vector<16x1xf32>
    %cst_30 = arith.constant dense<0.000000e+00> : vector<16x16xf32>
    %53 = tpu.matmul %48, %48, %cst_30 {dimension_numbers = #tpu.dot_dimension_numbers<[1], [1], [0], [0], [0, 0, 1, 0], [], []>} : vector<16x2xf32>, vector<16x2xf32>, vector<16x16xf32> -> vector<16x16xf32>
    %54 = vector.broadcast %51 : vector<1x16xf32> to vector<16x16xf32>
    %55 = arith.mulf %53, %54 : vector<16x16xf32>
    %cst_31 = arith.constant 0.000000e+00 : f32
    %56 = vector.broadcast %cst_31 : f32 to vector<16x16xf32>
    %57 = arith.cmpf ogt, %55, %56 : vector<16x16xf32>
    %cst_32 = arith.constant 0.000000e+00 : f32
    %58 = vector.broadcast %cst_32 : f32 to vector<16x128xf32>
    %c0_33 = arith.constant 0 : index
    %c0_34 = arith.constant 0 : index
    %c0_35 = arith.constant 0 : index
    %59 = vector.load %arg16[%c0_33, %c0_34, %c0_35] : memref<3x1x128xf32, #tpu.memory_space<vmem>>, vector<1x1x128xf32>
    %60 = vector.shape_cast %59 : vector<1x1x128xf32> to vector<1x128xf32>
    %c0_36 = arith.constant 0 : index
    %c0_37 = arith.constant 0 : index
    %c0_38 = arith.constant 0 : index
    %c0_39 = arith.constant 0 : index
    %61 = vector.load %arg13[%c0_36, %c0_37, %c0_38, %c0_39] : memref<3x4x96x128xbf16, #tpu.memory_space<vmem>>, vector<1x1x96x128xbf16>
    %62 = vector.shape_cast %61 : vector<1x1x96x128xbf16> to vector<96x128xbf16>
    %63 = arith.extf %62 : vector<96x128xbf16> to vector<96x128xf32>
    %c0_40 = arith.constant 0 : index
    %c0_41 = arith.constant 0 : index
    %c0_42 = arith.constant 0 : index
    %c0_43 = arith.constant 0 : index
    %64 = vector.load %arg14[%c0_40, %c0_41, %c0_42, %c0_43] : memref<3x4x3x32xf32, #tpu.memory_space<vmem>>, vector<1x1x3x32xf32>
    %65 = vector.shape_cast %64 : vector<1x1x3x32xf32> to vector<3x32xf32>
    %66 = vector.extract_strided_slice %63 {offsets = [0, 0], sizes = [32, 128], strides = [1, 1]} : vector<96x128xf32> to vector<32x128xf32>
    %cst_44 = arith.constant dense<0.000000e+00> : vector<16x32xf32>
    %67 = tpu.matmul %50, %66, %cst_44 {dimension_numbers = #tpu.dot_dimension_numbers<[1], [1], [0], [0], [0, 0, 1, 0], [], []>} : vector<16x128xf32>, vector<32x128xf32>, vector<16x32xf32> -> vector<16x32xf32>
    %68 = vector.extract_strided_slice %65 {offsets = [0, 0], sizes = [1, 32], strides = [1, 1]} : vector<3x32xf32> to vector<1x32xf32>
    %69 = vector.broadcast %68 : vector<1x32xf32> to vector<16x32xf32>
    %70 = arith.addf %67, %69 : vector<16x32xf32>
    %71 = vector.extract_strided_slice %63 {offsets = [32, 0], sizes = [32, 128], strides = [1, 1]} : vector<96x128xf32> to vector<32x128xf32>
    %cst_45 = arith.constant dense<0.000000e+00> : vector<16x32xf32>
    %72 = tpu.matmul %50, %71, %cst_45 {dimension_numbers = #tpu.dot_dimension_numbers<[1], [1], [0], [0], [0, 0, 1, 0], [], []>} : vector<16x128xf32>, vector<32x128xf32>, vector<16x32xf32> -> vector<16x32xf32>
    %73 = vector.extract_strided_slice %65 {offsets = [1, 0], sizes = [1, 32], strides = [1, 1]} : vector<3x32xf32> to vector<1x32xf32>
    %74 = vector.broadcast %73 : vector<1x32xf32> to vector<16x32xf32>
    %75 = arith.addf %72, %74 : vector<16x32xf32>
    %76 = vector.extract_strided_slice %63 {offsets = [64, 0], sizes = [32, 128], strides = [1, 1]} : vector<96x128xf32> to vector<32x128xf32>
    %cst_46 = arith.constant dense<0.000000e+00> : vector<16x32xf32>
    %77 = tpu.matmul %50, %76, %cst_46 {dimension_numbers = #tpu.dot_dimension_numbers<[1], [1], [0], [0], [0, 0, 1, 0], [], []>} : vector<16x128xf32>, vector<32x128xf32>, vector<16x32xf32> -> vector<16x32xf32>
    %78 = vector.extract_strided_slice %65 {offsets = [2, 0], sizes = [1, 32], strides = [1, 1]} : vector<3x32xf32> to vector<1x32xf32>
    %79 = vector.broadcast %78 : vector<1x32xf32> to vector<16x32xf32>
    %80 = arith.addf %77, %79 : vector<16x32xf32>
    %cst_47 = arith.constant dense<0.000000e+00> : vector<16x16xf32>
    %81 = tpu.matmul %70, %75, %cst_47 {dimension_numbers = #tpu.dot_dimension_numbers<[1], [1], [0], [0], [0, 0, 1, 0], [], []>} : vector<16x32xf32>, vector<16x32xf32>, vector<16x16xf32> -> vector<16x16xf32>
    %cst_48 = arith.constant -1.000000e+30 : f32
    %82 = vector.broadcast %cst_48 : f32 to vector<16x16xf32>
    %83 = arith.select %57, %81, %82 : vector<16x16xi1>, vector<16x16xf32>
    %cst_49 = arith.constant dense<0xFF800000> : vector<16xf32>
    %84 = vector.multi_reduction <maximumf>, %83, %cst_49 [1] : vector<16x16xf32> to vector<16xf32>
    %85 = vector.shape_cast %84 : vector<16xf32> to vector<16x1xf32>
    %86 = vector.broadcast %85 : vector<16x1xf32> to vector<16x16xf32>
    %87 = arith.subf %83, %86 : vector<16x16xf32>
    %88 = math.exp %87 : vector<16x16xf32>
    %cst_50 = arith.constant dense<0.000000e+00> : vector<16xf32>
    %89 = vector.multi_reduction <add>, %88, %cst_50 [1] : vector<16x16xf32> to vector<16xf32>
    %90 = vector.shape_cast %89 : vector<16xf32> to vector<16x1xf32>
    %91 = vector.broadcast %90 : vector<16x1xf32> to vector<16x16xf32>
    %92 = arith.divf %88, %91 : vector<16x16xf32>
    %cst_51 = arith.constant dense<0.000000e+00> : vector<16x32xf32>
    %93 = tpu.matmul %92, %80, %cst_51 {dimension_numbers = #tpu.dot_dimension_numbers<[1], [0], [0], [1], [0, 0, 1, 1], [], []>} : vector<16x16xf32>, vector<16x32xf32>, vector<16x32xf32> -> vector<16x32xf32>
    %c0_52 = arith.constant 0 : index
    %c0_53 = arith.constant 0 : index
    %c0_54 = arith.constant 0 : index
    %c0_55 = arith.constant 0 : index
    %94 = vector.load %arg15[%c0_52, %c0_53, %c0_54, %c0_55] : memref<3x4x32x128xbf16, #tpu.memory_space<vmem>>, vector<1x1x32x128xbf16>
    %95 = vector.shape_cast %94 : vector<1x1x32x128xbf16> to vector<32x128xbf16>
    %96 = arith.extf %95 : vector<32x128xbf16> to vector<32x128xf32>
    %cst_56 = arith.constant dense<0.000000e+00> : vector<16x128xf32>
    %97 = tpu.matmul %93, %96, %cst_56 {dimension_numbers = #tpu.dot_dimension_numbers<[1], [0], [0], [1], [0, 0, 1, 1], [], []>} : vector<16x32xf32>, vector<32x128xf32>, vector<16x128xf32> -> vector<16x128xf32>
    %98 = arith.addf %58, %97 : vector<16x128xf32>
    %c0_57 = arith.constant 0 : index
    %c1 = arith.constant 1 : index
    %c0_58 = arith.constant 0 : index
    %c0_59 = arith.constant 0 : index
    %99 = vector.load %arg13[%c0_57, %c1, %c0_58, %c0_59] : memref<3x4x96x128xbf16, #tpu.memory_space<vmem>>, vector<1x1x96x128xbf16>
    %100 = vector.shape_cast %99 : vector<1x1x96x128xbf16> to vector<96x128xbf16>
    %101 = arith.extf %100 : vector<96x128xbf16> to vector<96x128xf32>
    %c0_60 = arith.constant 0 : index
    %c1_61 = arith.constant 1 : index
    %c0_62 = arith.constant 0 : index
    %c0_63 = arith.constant 0 : index
    %102 = vector.load %arg14[%c0_60, %c1_61, %c0_62, %c0_63] : memref<3x4x3x32xf32, #tpu.memory_space<vmem>>, vector<1x1x3x32xf32>
    %103 = vector.shape_cast %102 : vector<1x1x3x32xf32> to vector<3x32xf32>
    %104 = vector.extract_strided_slice %101 {offsets = [0, 0], sizes = [32, 128], strides = [1, 1]} : vector<96x128xf32> to vector<32x128xf32>
    %cst_64 = arith.constant dense<0.000000e+00> : vector<16x32xf32>
    %105 = tpu.matmul %50, %104, %cst_64 {dimension_numbers = #tpu.dot_dimension_numbers<[1], [1], [0], [0], [0, 0, 1, 0], [], []>} : vector<16x128xf32>, vector<32x128xf32>, vector<16x32xf32> -> vector<16x32xf32>
    %106 = vector.extract_strided_slice %103 {offsets = [0, 0], sizes = [1, 32], strides = [1, 1]} : vector<3x32xf32> to vector<1x32xf32>
    %107 = vector.broadcast %106 : vector<1x32xf32> to vector<16x32xf32>
    %108 = arith.addf %105, %107 : vector<16x32xf32>
    %109 = vector.extract_strided_slice %101 {offsets = [32, 0], sizes = [32, 128], strides = [1, 1]} : vector<96x128xf32> to vector<32x128xf32>
    %cst_65 = arith.constant dense<0.000000e+00> : vector<16x32xf32>
    %110 = tpu.matmul %50, %109, %cst_65 {dimension_numbers = #tpu.dot_dimension_numbers<[1], [1], [0], [0], [0, 0, 1, 0], [], []>} : vector<16x128xf32>, vector<32x128xf32>, vector<16x32xf32> -> vector<16x32xf32>
    %111 = vector.extract_strided_slice %103 {offsets = [1, 0], sizes = [1, 32], strides = [1, 1]} : vector<3x32xf32> to vector<1x32xf32>
    %112 = vector.broadcast %111 : vector<1x32xf32> to vector<16x32xf32>
    %113 = arith.addf %110, %112 : vector<16x32xf32>
    %114 = vector.extract_strided_slice %101 {offsets = [64, 0], sizes = [32, 128], strides = [1, 1]} : vector<96x128xf32> to vector<32x128xf32>
    %cst_66 = arith.constant dense<0.000000e+00> : vector<16x32xf32>
    %115 = tpu.matmul %50, %114, %cst_66 {dimension_numbers = #tpu.dot_dimension_numbers<[1], [1], [0], [0], [0, 0, 1, 0], [], []>} : vector<16x128xf32>, vector<32x128xf32>, vector<16x32xf32> -> vector<16x32xf32>
    %116 = vector.extract_strided_slice %103 {offsets = [2, 0], sizes = [1, 32], strides = [1, 1]} : vector<3x32xf32> to vector<1x32xf32>
    %117 = vector.broadcast %116 : vector<1x32xf32> to vector<16x32xf32>
    %118 = arith.addf %115, %117 : vector<16x32xf32>
    %cst_67 = arith.constant dense<0.000000e+00> : vector<16x16xf32>
    %119 = tpu.matmul %108, %113, %cst_67 {dimension_numbers = #tpu.dot_dimension_numbers<[1], [1], [0], [0], [0, 0, 1, 0], [], []>} : vector<16x32xf32>, vector<16x32xf32>, vector<16x16xf32> -> vector<16x16xf32>
    %cst_68 = arith.constant -1.000000e+30 : f32
    %120 = vector.broadcast %cst_68 : f32 to vector<16x16xf32>
    %121 = arith.select %57, %119, %120 : vector<16x16xi1>, vector<16x16xf32>
    %cst_69 = arith.constant dense<0xFF800000> : vector<16xf32>
    %122 = vector.multi_reduction <maximumf>, %121, %cst_69 [1] : vector<16x16xf32> to vector<16xf32>
    %123 = vector.shape_cast %122 : vector<16xf32> to vector<16x1xf32>
    %124 = vector.broadcast %123 : vector<16x1xf32> to vector<16x16xf32>
    %125 = arith.subf %121, %124 : vector<16x16xf32>
    %126 = math.exp %125 : vector<16x16xf32>
    %cst_70 = arith.constant dense<0.000000e+00> : vector<16xf32>
    %127 = vector.multi_reduction <add>, %126, %cst_70 [1] : vector<16x16xf32> to vector<16xf32>
    %128 = vector.shape_cast %127 : vector<16xf32> to vector<16x1xf32>
    %129 = vector.broadcast %128 : vector<16x1xf32> to vector<16x16xf32>
    %130 = arith.divf %126, %129 : vector<16x16xf32>
    %cst_71 = arith.constant dense<0.000000e+00> : vector<16x32xf32>
    %131 = tpu.matmul %130, %118, %cst_71 {dimension_numbers = #tpu.dot_dimension_numbers<[1], [0], [0], [1], [0, 0, 1, 1], [], []>} : vector<16x16xf32>, vector<16x32xf32>, vector<16x32xf32> -> vector<16x32xf32>
    %c0_72 = arith.constant 0 : index
    %c1_73 = arith.constant 1 : index
    %c0_74 = arith.constant 0 : index
    %c0_75 = arith.constant 0 : index
    %132 = vector.load %arg15[%c0_72, %c1_73, %c0_74, %c0_75] : memref<3x4x32x128xbf16, #tpu.memory_space<vmem>>, vector<1x1x32x128xbf16>
    %133 = vector.shape_cast %132 : vector<1x1x32x128xbf16> to vector<32x128xbf16>
    %134 = arith.extf %133 : vector<32x128xbf16> to vector<32x128xf32>
    %cst_76 = arith.constant dense<0.000000e+00> : vector<16x128xf32>
    %135 = tpu.matmul %131, %134, %cst_76 {dimension_numbers = #tpu.dot_dimension_numbers<[1], [0], [0], [1], [0, 0, 1, 1], [], []>} : vector<16x32xf32>, vector<32x128xf32>, vector<16x128xf32> -> vector<16x128xf32>
    %136 = arith.addf %98, %135 : vector<16x128xf32>
    %c0_77 = arith.constant 0 : index
    %c2 = arith.constant 2 : index
    %c0_78 = arith.constant 0 : index
    %c0_79 = arith.constant 0 : index
    %137 = vector.load %arg13[%c0_77, %c2, %c0_78, %c0_79] : memref<3x4x96x128xbf16, #tpu.memory_space<vmem>>, vector<1x1x96x128xbf16>
    %138 = vector.shape_cast %137 : vector<1x1x96x128xbf16> to vector<96x128xbf16>
    %139 = arith.extf %138 : vector<96x128xbf16> to vector<96x128xf32>
    %c0_80 = arith.constant 0 : index
    %c2_81 = arith.constant 2 : index
    %c0_82 = arith.constant 0 : index
    %c0_83 = arith.constant 0 : index
    %140 = vector.load %arg14[%c0_80, %c2_81, %c0_82, %c0_83] : memref<3x4x3x32xf32, #tpu.memory_space<vmem>>, vector<1x1x3x32xf32>
    %141 = vector.shape_cast %140 : vector<1x1x3x32xf32> to vector<3x32xf32>
    %142 = vector.extract_strided_slice %139 {offsets = [0, 0], sizes = [32, 128], strides = [1, 1]} : vector<96x128xf32> to vector<32x128xf32>
    %cst_84 = arith.constant dense<0.000000e+00> : vector<16x32xf32>
    %143 = tpu.matmul %50, %142, %cst_84 {dimension_numbers = #tpu.dot_dimension_numbers<[1], [1], [0], [0], [0, 0, 1, 0], [], []>} : vector<16x128xf32>, vector<32x128xf32>, vector<16x32xf32> -> vector<16x32xf32>
    %144 = vector.extract_strided_slice %141 {offsets = [0, 0], sizes = [1, 32], strides = [1, 1]} : vector<3x32xf32> to vector<1x32xf32>
    %145 = vector.broadcast %144 : vector<1x32xf32> to vector<16x32xf32>
    %146 = arith.addf %143, %145 : vector<16x32xf32>
    %147 = vector.extract_strided_slice %139 {offsets = [32, 0], sizes = [32, 128], strides = [1, 1]} : vector<96x128xf32> to vector<32x128xf32>
    %cst_85 = arith.constant dense<0.000000e+00> : vector<16x32xf32>
    %148 = tpu.matmul %50, %147, %cst_85 {dimension_numbers = #tpu.dot_dimension_numbers<[1], [1], [0], [0], [0, 0, 1, 0], [], []>} : vector<16x128xf32>, vector<32x128xf32>, vector<16x32xf32> -> vector<16x32xf32>
    %149 = vector.extract_strided_slice %141 {offsets = [1, 0], sizes = [1, 32], strides = [1, 1]} : vector<3x32xf32> to vector<1x32xf32>
    %150 = vector.broadcast %149 : vector<1x32xf32> to vector<16x32xf32>
    %151 = arith.addf %148, %150 : vector<16x32xf32>
    %152 = vector.extract_strided_slice %139 {offsets = [64, 0], sizes = [32, 128], strides = [1, 1]} : vector<96x128xf32> to vector<32x128xf32>
    %cst_86 = arith.constant dense<0.000000e+00> : vector<16x32xf32>
    %153 = tpu.matmul %50, %152, %cst_86 {dimension_numbers = #tpu.dot_dimension_numbers<[1], [1], [0], [0], [0, 0, 1, 0], [], []>} : vector<16x128xf32>, vector<32x128xf32>, vector<16x32xf32> -> vector<16x32xf32>
    %154 = vector.extract_strided_slice %141 {offsets = [2, 0], sizes = [1, 32], strides = [1, 1]} : vector<3x32xf32> to vector<1x32xf32>
    %155 = vector.broadcast %154 : vector<1x32xf32> to vector<16x32xf32>
    %156 = arith.addf %153, %155 : vector<16x32xf32>
    %cst_87 = arith.constant dense<0.000000e+00> : vector<16x16xf32>
    %157 = tpu.matmul %146, %151, %cst_87 {dimension_numbers = #tpu.dot_dimension_numbers<[1], [1], [0], [0], [0, 0, 1, 0], [], []>} : vector<16x32xf32>, vector<16x32xf32>, vector<16x16xf32> -> vector<16x16xf32>
    %cst_88 = arith.constant -1.000000e+30 : f32
    %158 = vector.broadcast %cst_88 : f32 to vector<16x16xf32>
    %159 = arith.select %57, %157, %158 : vector<16x16xi1>, vector<16x16xf32>
    %cst_89 = arith.constant dense<0xFF800000> : vector<16xf32>
    %160 = vector.multi_reduction <maximumf>, %159, %cst_89 [1] : vector<16x16xf32> to vector<16xf32>
    %161 = vector.shape_cast %160 : vector<16xf32> to vector<16x1xf32>
    %162 = vector.broadcast %161 : vector<16x1xf32> to vector<16x16xf32>
    %163 = arith.subf %159, %162 : vector<16x16xf32>
    %164 = math.exp %163 : vector<16x16xf32>
    %cst_90 = arith.constant dense<0.000000e+00> : vector<16xf32>
    %165 = vector.multi_reduction <add>, %164, %cst_90 [1] : vector<16x16xf32> to vector<16xf32>
    %166 = vector.shape_cast %165 : vector<16xf32> to vector<16x1xf32>
    %167 = vector.broadcast %166 : vector<16x1xf32> to vector<16x16xf32>
    %168 = arith.divf %164, %167 : vector<16x16xf32>
    %cst_91 = arith.constant dense<0.000000e+00> : vector<16x32xf32>
    %169 = tpu.matmul %168, %156, %cst_91 {dimension_numbers = #tpu.dot_dimension_numbers<[1], [0], [0], [1], [0, 0, 1, 1], [], []>} : vector<16x16xf32>, vector<16x32xf32>, vector<16x32xf32> -> vector<16x32xf32>
    %c0_92 = arith.constant 0 : index
    %c2_93 = arith.constant 2 : index
    %c0_94 = arith.constant 0 : index
    %c0_95 = arith.constant 0 : index
    %170 = vector.load %arg15[%c0_92, %c2_93, %c0_94, %c0_95] : memref<3x4x32x128xbf16, #tpu.memory_space<vmem>>, vector<1x1x32x128xbf16>
    %171 = vector.shape_cast %170 : vector<1x1x32x128xbf16> to vector<32x128xbf16>
    %172 = arith.extf %171 : vector<32x128xbf16> to vector<32x128xf32>
    %cst_96 = arith.constant dense<0.000000e+00> : vector<16x128xf32>
    %173 = tpu.matmul %169, %172, %cst_96 {dimension_numbers = #tpu.dot_dimension_numbers<[1], [0], [0], [1], [0, 0, 1, 1], [], []>} : vector<16x32xf32>, vector<32x128xf32>, vector<16x128xf32> -> vector<16x128xf32>
    %174 = arith.addf %136, %173 : vector<16x128xf32>
    %c0_97 = arith.constant 0 : index
    %c3 = arith.constant 3 : index
    %c0_98 = arith.constant 0 : index
    %c0_99 = arith.constant 0 : index
    %175 = vector.load %arg13[%c0_97, %c3, %c0_98, %c0_99] : memref<3x4x96x128xbf16, #tpu.memory_space<vmem>>, vector<1x1x96x128xbf16>
    %176 = vector.shape_cast %175 : vector<1x1x96x128xbf16> to vector<96x128xbf16>
    %177 = arith.extf %176 : vector<96x128xbf16> to vector<96x128xf32>
    %c0_100 = arith.constant 0 : index
    %c3_101 = arith.constant 3 : index
    %c0_102 = arith.constant 0 : index
    %c0_103 = arith.constant 0 : index
    %178 = vector.load %arg14[%c0_100, %c3_101, %c0_102, %c0_103] : memref<3x4x3x32xf32, #tpu.memory_space<vmem>>, vector<1x1x3x32xf32>
    %179 = vector.shape_cast %178 : vector<1x1x3x32xf32> to vector<3x32xf32>
    %180 = vector.extract_strided_slice %177 {offsets = [0, 0], sizes = [32, 128], strides = [1, 1]} : vector<96x128xf32> to vector<32x128xf32>
    %cst_104 = arith.constant dense<0.000000e+00> : vector<16x32xf32>
    %181 = tpu.matmul %50, %180, %cst_104 {dimension_numbers = #tpu.dot_dimension_numbers<[1], [1], [0], [0], [0, 0, 1, 0], [], []>} : vector<16x128xf32>, vector<32x128xf32>, vector<16x32xf32> -> vector<16x32xf32>
    %182 = vector.extract_strided_slice %179 {offsets = [0, 0], sizes = [1, 32], strides = [1, 1]} : vector<3x32xf32> to vector<1x32xf32>
    %183 = vector.broadcast %182 : vector<1x32xf32> to vector<16x32xf32>
    %184 = arith.addf %181, %183 : vector<16x32xf32>
    %185 = vector.extract_strided_slice %177 {offsets = [32, 0], sizes = [32, 128], strides = [1, 1]} : vector<96x128xf32> to vector<32x128xf32>
    %cst_105 = arith.constant dense<0.000000e+00> : vector<16x32xf32>
    %186 = tpu.matmul %50, %185, %cst_105 {dimension_numbers = #tpu.dot_dimension_numbers<[1], [1], [0], [0], [0, 0, 1, 0], [], []>} : vector<16x128xf32>, vector<32x128xf32>, vector<16x32xf32> -> vector<16x32xf32>
    %187 = vector.extract_strided_slice %179 {offsets = [1, 0], sizes = [1, 32], strides = [1, 1]} : vector<3x32xf32> to vector<1x32xf32>
    %188 = vector.broadcast %187 : vector<1x32xf32> to vector<16x32xf32>
    %189 = arith.addf %186, %188 : vector<16x32xf32>
    %190 = vector.extract_strided_slice %177 {offsets = [64, 0], sizes = [32, 128], strides = [1, 1]} : vector<96x128xf32> to vector<32x128xf32>
    %cst_106 = arith.constant dense<0.000000e+00> : vector<16x32xf32>
    %191 = tpu.matmul %50, %190, %cst_106 {dimension_numbers = #tpu.dot_dimension_numbers<[1], [1], [0], [0], [0, 0, 1, 0], [], []>} : vector<16x128xf32>, vector<32x128xf32>, vector<16x32xf32> -> vector<16x32xf32>
    %192 = vector.extract_strided_slice %179 {offsets = [2, 0], sizes = [1, 32], strides = [1, 1]} : vector<3x32xf32> to vector<1x32xf32>
    %193 = vector.broadcast %192 : vector<1x32xf32> to vector<16x32xf32>
    %194 = arith.addf %191, %193 : vector<16x32xf32>
    %cst_107 = arith.constant dense<0.000000e+00> : vector<16x16xf32>
    %195 = tpu.matmul %184, %189, %cst_107 {dimension_numbers = #tpu.dot_dimension_numbers<[1], [1], [0], [0], [0, 0, 1, 0], [], []>} : vector<16x32xf32>, vector<16x32xf32>, vector<16x16xf32> -> vector<16x16xf32>
    %cst_108 = arith.constant -1.000000e+30 : f32
    %196 = vector.broadcast %cst_108 : f32 to vector<16x16xf32>
    %197 = arith.select %57, %195, %196 : vector<16x16xi1>, vector<16x16xf32>
    %cst_109 = arith.constant dense<0xFF800000> : vector<16xf32>
    %198 = vector.multi_reduction <maximumf>, %197, %cst_109 [1] : vector<16x16xf32> to vector<16xf32>
    %199 = vector.shape_cast %198 : vector<16xf32> to vector<16x1xf32>
    %200 = vector.broadcast %199 : vector<16x1xf32> to vector<16x16xf32>
    %201 = arith.subf %197, %200 : vector<16x16xf32>
    %202 = math.exp %201 : vector<16x16xf32>
    %cst_110 = arith.constant dense<0.000000e+00> : vector<16xf32>
    %203 = vector.multi_reduction <add>, %202, %cst_110 [1] : vector<16x16xf32> to vector<16xf32>
    %204 = vector.shape_cast %203 : vector<16xf32> to vector<16x1xf32>
    %205 = vector.broadcast %204 : vector<16x1xf32> to vector<16x16xf32>
    %206 = arith.divf %202, %205 : vector<16x16xf32>
    %cst_111 = arith.constant dense<0.000000e+00> : vector<16x32xf32>
    %207 = tpu.matmul %206, %194, %cst_111 {dimension_numbers = #tpu.dot_dimension_numbers<[1], [0], [0], [1], [0, 0, 1, 1], [], []>} : vector<16x16xf32>, vector<16x32xf32>, vector<16x32xf32> -> vector<16x32xf32>
    %c0_112 = arith.constant 0 : index
    %c3_113 = arith.constant 3 : index
    %c0_114 = arith.constant 0 : index
    %c0_115 = arith.constant 0 : index
    %208 = vector.load %arg15[%c0_112, %c3_113, %c0_114, %c0_115] : memref<3x4x32x128xbf16, #tpu.memory_space<vmem>>, vector<1x1x32x128xbf16>
    %209 = vector.shape_cast %208 : vector<1x1x32x128xbf16> to vector<32x128xbf16>
    %210 = arith.extf %209 : vector<32x128xbf16> to vector<32x128xf32>
    %cst_116 = arith.constant dense<0.000000e+00> : vector<16x128xf32>
    %211 = tpu.matmul %207, %210, %cst_116 {dimension_numbers = #tpu.dot_dimension_numbers<[1], [0], [0], [1], [0, 0, 1, 1], [], []>} : vector<16x32xf32>, vector<32x128xf32>, vector<16x128xf32> -> vector<16x128xf32>
    %212 = arith.addf %174, %211 : vector<16x128xf32>
    %213 = arith.addf %50, %212 : vector<16x128xf32>
    %214 = vector.broadcast %60 : vector<1x128xf32> to vector<16x128xf32>
    %215 = arith.addf %213, %214 : vector<16x128xf32>
    %cst_117 = arith.constant 0.000000e+00 : f32
    %216 = vector.broadcast %cst_117 : f32 to vector<16x128xf32>
    %c1_118 = arith.constant 1 : index
    %c0_119 = arith.constant 0 : index
    %c0_120 = arith.constant 0 : index
    %217 = vector.load %arg16[%c1_118, %c0_119, %c0_120] : memref<3x1x128xf32, #tpu.memory_space<vmem>>, vector<1x1x128xf32>
    %218 = vector.shape_cast %217 : vector<1x1x128xf32> to vector<1x128xf32>
    %c1_121 = arith.constant 1 : index
    %c0_122 = arith.constant 0 : index
    %c0_123 = arith.constant 0 : index
    %c0_124 = arith.constant 0 : index
    %219 = vector.load %arg13[%c1_121, %c0_122, %c0_123, %c0_124] : memref<3x4x96x128xbf16, #tpu.memory_space<vmem>>, vector<1x1x96x128xbf16>
    %220 = vector.shape_cast %219 : vector<1x1x96x128xbf16> to vector<96x128xbf16>
    %221 = arith.extf %220 : vector<96x128xbf16> to vector<96x128xf32>
    %c1_125 = arith.constant 1 : index
    %c0_126 = arith.constant 0 : index
    %c0_127 = arith.constant 0 : index
    %c0_128 = arith.constant 0 : index
    %222 = vector.load %arg14[%c1_125, %c0_126, %c0_127, %c0_128] : memref<3x4x3x32xf32, #tpu.memory_space<vmem>>, vector<1x1x3x32xf32>
    %223 = vector.shape_cast %222 : vector<1x1x3x32xf32> to vector<3x32xf32>
    %224 = vector.extract_strided_slice %221 {offsets = [0, 0], sizes = [32, 128], strides = [1, 1]} : vector<96x128xf32> to vector<32x128xf32>
    %cst_129 = arith.constant dense<0.000000e+00> : vector<16x32xf32>
    %225 = tpu.matmul %215, %224, %cst_129 {dimension_numbers = #tpu.dot_dimension_numbers<[1], [1], [0], [0], [0, 0, 1, 0], [], []>} : vector<16x128xf32>, vector<32x128xf32>, vector<16x32xf32> -> vector<16x32xf32>
    %226 = vector.extract_strided_slice %223 {offsets = [0, 0], sizes = [1, 32], strides = [1, 1]} : vector<3x32xf32> to vector<1x32xf32>
    %227 = vector.broadcast %226 : vector<1x32xf32> to vector<16x32xf32>
    %228 = arith.addf %225, %227 : vector<16x32xf32>
    %229 = vector.extract_strided_slice %221 {offsets = [32, 0], sizes = [32, 128], strides = [1, 1]} : vector<96x128xf32> to vector<32x128xf32>
    %cst_130 = arith.constant dense<0.000000e+00> : vector<16x32xf32>
    %230 = tpu.matmul %215, %229, %cst_130 {dimension_numbers = #tpu.dot_dimension_numbers<[1], [1], [0], [0], [0, 0, 1, 0], [], []>} : vector<16x128xf32>, vector<32x128xf32>, vector<16x32xf32> -> vector<16x32xf32>
    %231 = vector.extract_strided_slice %223 {offsets = [1, 0], sizes = [1, 32], strides = [1, 1]} : vector<3x32xf32> to vector<1x32xf32>
    %232 = vector.broadcast %231 : vector<1x32xf32> to vector<16x32xf32>
    %233 = arith.addf %230, %232 : vector<16x32xf32>
    %234 = vector.extract_strided_slice %221 {offsets = [64, 0], sizes = [32, 128], strides = [1, 1]} : vector<96x128xf32> to vector<32x128xf32>
    %cst_131 = arith.constant dense<0.000000e+00> : vector<16x32xf32>
    %235 = tpu.matmul %215, %234, %cst_131 {dimension_numbers = #tpu.dot_dimension_numbers<[1], [1], [0], [0], [0, 0, 1, 0], [], []>} : vector<16x128xf32>, vector<32x128xf32>, vector<16x32xf32> -> vector<16x32xf32>
    %236 = vector.extract_strided_slice %223 {offsets = [2, 0], sizes = [1, 32], strides = [1, 1]} : vector<3x32xf32> to vector<1x32xf32>
    %237 = vector.broadcast %236 : vector<1x32xf32> to vector<16x32xf32>
    %238 = arith.addf %235, %237 : vector<16x32xf32>
    %cst_132 = arith.constant dense<0.000000e+00> : vector<16x16xf32>
    %239 = tpu.matmul %228, %233, %cst_132 {dimension_numbers = #tpu.dot_dimension_numbers<[1], [1], [0], [0], [0, 0, 1, 0], [], []>} : vector<16x32xf32>, vector<16x32xf32>, vector<16x16xf32> -> vector<16x16xf32>
    %cst_133 = arith.constant -1.000000e+30 : f32
    %240 = vector.broadcast %cst_133 : f32 to vector<16x16xf32>
    %241 = arith.select %57, %239, %240 : vector<16x16xi1>, vector<16x16xf32>
    %cst_134 = arith.constant dense<0xFF800000> : vector<16xf32>
    %242 = vector.multi_reduction <maximumf>, %241, %cst_134 [1] : vector<16x16xf32> to vector<16xf32>
    %243 = vector.shape_cast %242 : vector<16xf32> to vector<16x1xf32>
    %244 = vector.broadcast %243 : vector<16x1xf32> to vector<16x16xf32>
    %245 = arith.subf %241, %244 : vector<16x16xf32>
    %246 = math.exp %245 : vector<16x16xf32>
    %cst_135 = arith.constant dense<0.000000e+00> : vector<16xf32>
    %247 = vector.multi_reduction <add>, %246, %cst_135 [1] : vector<16x16xf32> to vector<16xf32>
    %248 = vector.shape_cast %247 : vector<16xf32> to vector<16x1xf32>
    %249 = vector.broadcast %248 : vector<16x1xf32> to vector<16x16xf32>
    %250 = arith.divf %246, %249 : vector<16x16xf32>
    %cst_136 = arith.constant dense<0.000000e+00> : vector<16x32xf32>
    %251 = tpu.matmul %250, %238, %cst_136 {dimension_numbers = #tpu.dot_dimension_numbers<[1], [0], [0], [1], [0, 0, 1, 1], [], []>} : vector<16x16xf32>, vector<16x32xf32>, vector<16x32xf32> -> vector<16x32xf32>
    %c1_137 = arith.constant 1 : index
    %c0_138 = arith.constant 0 : index
    %c0_139 = arith.constant 0 : index
    %c0_140 = arith.constant 0 : index
    %252 = vector.load %arg15[%c1_137, %c0_138, %c0_139, %c0_140] : memref<3x4x32x128xbf16, #tpu.memory_space<vmem>>, vector<1x1x32x128xbf16>
    %253 = vector.shape_cast %252 : vector<1x1x32x128xbf16> to vector<32x128xbf16>
    %254 = arith.extf %253 : vector<32x128xbf16> to vector<32x128xf32>
    %cst_141 = arith.constant dense<0.000000e+00> : vector<16x128xf32>
    %255 = tpu.matmul %251, %254, %cst_141 {dimension_numbers = #tpu.dot_dimension_numbers<[1], [0], [0], [1], [0, 0, 1, 1], [], []>} : vector<16x32xf32>, vector<32x128xf32>, vector<16x128xf32> -> vector<16x128xf32>
    %256 = arith.addf %216, %255 : vector<16x128xf32>
    %c1_142 = arith.constant 1 : index
    %c1_143 = arith.constant 1 : index
    %c0_144 = arith.constant 0 : index
    %c0_145 = arith.constant 0 : index
    %257 = vector.load %arg13[%c1_142, %c1_143, %c0_144, %c0_145] : memref<3x4x96x128xbf16, #tpu.memory_space<vmem>>, vector<1x1x96x128xbf16>
    %258 = vector.shape_cast %257 : vector<1x1x96x128xbf16> to vector<96x128xbf16>
    %259 = arith.extf %258 : vector<96x128xbf16> to vector<96x128xf32>
    %c1_146 = arith.constant 1 : index
    %c1_147 = arith.constant 1 : index
    %c0_148 = arith.constant 0 : index
    %c0_149 = arith.constant 0 : index
    %260 = vector.load %arg14[%c1_146, %c1_147, %c0_148, %c0_149] : memref<3x4x3x32xf32, #tpu.memory_space<vmem>>, vector<1x1x3x32xf32>
    %261 = vector.shape_cast %260 : vector<1x1x3x32xf32> to vector<3x32xf32>
    %262 = vector.extract_strided_slice %259 {offsets = [0, 0], sizes = [32, 128], strides = [1, 1]} : vector<96x128xf32> to vector<32x128xf32>
    %cst_150 = arith.constant dense<0.000000e+00> : vector<16x32xf32>
    %263 = tpu.matmul %215, %262, %cst_150 {dimension_numbers = #tpu.dot_dimension_numbers<[1], [1], [0], [0], [0, 0, 1, 0], [], []>} : vector<16x128xf32>, vector<32x128xf32>, vector<16x32xf32> -> vector<16x32xf32>
    %264 = vector.extract_strided_slice %261 {offsets = [0, 0], sizes = [1, 32], strides = [1, 1]} : vector<3x32xf32> to vector<1x32xf32>
    %265 = vector.broadcast %264 : vector<1x32xf32> to vector<16x32xf32>
    %266 = arith.addf %263, %265 : vector<16x32xf32>
    %267 = vector.extract_strided_slice %259 {offsets = [32, 0], sizes = [32, 128], strides = [1, 1]} : vector<96x128xf32> to vector<32x128xf32>
    %cst_151 = arith.constant dense<0.000000e+00> : vector<16x32xf32>
    %268 = tpu.matmul %215, %267, %cst_151 {dimension_numbers = #tpu.dot_dimension_numbers<[1], [1], [0], [0], [0, 0, 1, 0], [], []>} : vector<16x128xf32>, vector<32x128xf32>, vector<16x32xf32> -> vector<16x32xf32>
    %269 = vector.extract_strided_slice %261 {offsets = [1, 0], sizes = [1, 32], strides = [1, 1]} : vector<3x32xf32> to vector<1x32xf32>
    %270 = vector.broadcast %269 : vector<1x32xf32> to vector<16x32xf32>
    %271 = arith.addf %268, %270 : vector<16x32xf32>
    %272 = vector.extract_strided_slice %259 {offsets = [64, 0], sizes = [32, 128], strides = [1, 1]} : vector<96x128xf32> to vector<32x128xf32>
    %cst_152 = arith.constant dense<0.000000e+00> : vector<16x32xf32>
    %273 = tpu.matmul %215, %272, %cst_152 {dimension_numbers = #tpu.dot_dimension_numbers<[1], [1], [0], [0], [0, 0, 1, 0], [], []>} : vector<16x128xf32>, vector<32x128xf32>, vector<16x32xf32> -> vector<16x32xf32>
    %274 = vector.extract_strided_slice %261 {offsets = [2, 0], sizes = [1, 32], strides = [1, 1]} : vector<3x32xf32> to vector<1x32xf32>
    %275 = vector.broadcast %274 : vector<1x32xf32> to vector<16x32xf32>
    %276 = arith.addf %273, %275 : vector<16x32xf32>
    %cst_153 = arith.constant dense<0.000000e+00> : vector<16x16xf32>
    %277 = tpu.matmul %266, %271, %cst_153 {dimension_numbers = #tpu.dot_dimension_numbers<[1], [1], [0], [0], [0, 0, 1, 0], [], []>} : vector<16x32xf32>, vector<16x32xf32>, vector<16x16xf32> -> vector<16x16xf32>
    %cst_154 = arith.constant -1.000000e+30 : f32
    %278 = vector.broadcast %cst_154 : f32 to vector<16x16xf32>
    %279 = arith.select %57, %277, %278 : vector<16x16xi1>, vector<16x16xf32>
    %cst_155 = arith.constant dense<0xFF800000> : vector<16xf32>
    %280 = vector.multi_reduction <maximumf>, %279, %cst_155 [1] : vector<16x16xf32> to vector<16xf32>
    %281 = vector.shape_cast %280 : vector<16xf32> to vector<16x1xf32>
    %282 = vector.broadcast %281 : vector<16x1xf32> to vector<16x16xf32>
    %283 = arith.subf %279, %282 : vector<16x16xf32>
    %284 = math.exp %283 : vector<16x16xf32>
    %cst_156 = arith.constant dense<0.000000e+00> : vector<16xf32>
    %285 = vector.multi_reduction <add>, %284, %cst_156 [1] : vector<16x16xf32> to vector<16xf32>
    %286 = vector.shape_cast %285 : vector<16xf32> to vector<16x1xf32>
    %287 = vector.broadcast %286 : vector<16x1xf32> to vector<16x16xf32>
    %288 = arith.divf %284, %287 : vector<16x16xf32>
    %cst_157 = arith.constant dense<0.000000e+00> : vector<16x32xf32>
    %289 = tpu.matmul %288, %276, %cst_157 {dimension_numbers = #tpu.dot_dimension_numbers<[1], [0], [0], [1], [0, 0, 1, 1], [], []>} : vector<16x16xf32>, vector<16x32xf32>, vector<16x32xf32> -> vector<16x32xf32>
    %c1_158 = arith.constant 1 : index
    %c1_159 = arith.constant 1 : index
    %c0_160 = arith.constant 0 : index
    %c0_161 = arith.constant 0 : index
    %290 = vector.load %arg15[%c1_158, %c1_159, %c0_160, %c0_161] : memref<3x4x32x128xbf16, #tpu.memory_space<vmem>>, vector<1x1x32x128xbf16>
    %291 = vector.shape_cast %290 : vector<1x1x32x128xbf16> to vector<32x128xbf16>
    %292 = arith.extf %291 : vector<32x128xbf16> to vector<32x128xf32>
    %cst_162 = arith.constant dense<0.000000e+00> : vector<16x128xf32>
    %293 = tpu.matmul %289, %292, %cst_162 {dimension_numbers = #tpu.dot_dimension_numbers<[1], [0], [0], [1], [0, 0, 1, 1], [], []>} : vector<16x32xf32>, vector<32x128xf32>, vector<16x128xf32> -> vector<16x128xf32>
    %294 = arith.addf %256, %293 : vector<16x128xf32>
    %c1_163 = arith.constant 1 : index
    %c2_164 = arith.constant 2 : index
    %c0_165 = arith.constant 0 : index
    %c0_166 = arith.constant 0 : index
    %295 = vector.load %arg13[%c1_163, %c2_164, %c0_165, %c0_166] : memref<3x4x96x128xbf16, #tpu.memory_space<vmem>>, vector<1x1x96x128xbf16>
    %296 = vector.shape_cast %295 : vector<1x1x96x128xbf16> to vector<96x128xbf16>
    %297 = arith.extf %296 : vector<96x128xbf16> to vector<96x128xf32>
    %c1_167 = arith.constant 1 : index
    %c2_168 = arith.constant 2 : index
    %c0_169 = arith.constant 0 : index
    %c0_170 = arith.constant 0 : index
    %298 = vector.load %arg14[%c1_167, %c2_168, %c0_169, %c0_170] : memref<3x4x3x32xf32, #tpu.memory_space<vmem>>, vector<1x1x3x32xf32>
    %299 = vector.shape_cast %298 : vector<1x1x3x32xf32> to vector<3x32xf32>
    %300 = vector.extract_strided_slice %297 {offsets = [0, 0], sizes = [32, 128], strides = [1, 1]} : vector<96x128xf32> to vector<32x128xf32>
    %cst_171 = arith.constant dense<0.000000e+00> : vector<16x32xf32>
    %301 = tpu.matmul %215, %300, %cst_171 {dimension_numbers = #tpu.dot_dimension_numbers<[1], [1], [0], [0], [0, 0, 1, 0], [], []>} : vector<16x128xf32>, vector<32x128xf32>, vector<16x32xf32> -> vector<16x32xf32>
    %302 = vector.extract_strided_slice %299 {offsets = [0, 0], sizes = [1, 32], strides = [1, 1]} : vector<3x32xf32> to vector<1x32xf32>
    %303 = vector.broadcast %302 : vector<1x32xf32> to vector<16x32xf32>
    %304 = arith.addf %301, %303 : vector<16x32xf32>
    %305 = vector.extract_strided_slice %297 {offsets = [32, 0], sizes = [32, 128], strides = [1, 1]} : vector<96x128xf32> to vector<32x128xf32>
    %cst_172 = arith.constant dense<0.000000e+00> : vector<16x32xf32>
    %306 = tpu.matmul %215, %305, %cst_172 {dimension_numbers = #tpu.dot_dimension_numbers<[1], [1], [0], [0], [0, 0, 1, 0], [], []>} : vector<16x128xf32>, vector<32x128xf32>, vector<16x32xf32> -> vector<16x32xf32>
    %307 = vector.extract_strided_slice %299 {offsets = [1, 0], sizes = [1, 32], strides = [1, 1]} : vector<3x32xf32> to vector<1x32xf32>
    %308 = vector.broadcast %307 : vector<1x32xf32> to vector<16x32xf32>
    %309 = arith.addf %306, %308 : vector<16x32xf32>
    %310 = vector.extract_strided_slice %297 {offsets = [64, 0], sizes = [32, 128], strides = [1, 1]} : vector<96x128xf32> to vector<32x128xf32>
    %cst_173 = arith.constant dense<0.000000e+00> : vector<16x32xf32>
    %311 = tpu.matmul %215, %310, %cst_173 {dimension_numbers = #tpu.dot_dimension_numbers<[1], [1], [0], [0], [0, 0, 1, 0], [], []>} : vector<16x128xf32>, vector<32x128xf32>, vector<16x32xf32> -> vector<16x32xf32>
    %312 = vector.extract_strided_slice %299 {offsets = [2, 0], sizes = [1, 32], strides = [1, 1]} : vector<3x32xf32> to vector<1x32xf32>
    %313 = vector.broadcast %312 : vector<1x32xf32> to vector<16x32xf32>
    %314 = arith.addf %311, %313 : vector<16x32xf32>
    %cst_174 = arith.constant dense<0.000000e+00> : vector<16x16xf32>
    %315 = tpu.matmul %304, %309, %cst_174 {dimension_numbers = #tpu.dot_dimension_numbers<[1], [1], [0], [0], [0, 0, 1, 0], [], []>} : vector<16x32xf32>, vector<16x32xf32>, vector<16x16xf32> -> vector<16x16xf32>
    %cst_175 = arith.constant -1.000000e+30 : f32
    %316 = vector.broadcast %cst_175 : f32 to vector<16x16xf32>
    %317 = arith.select %57, %315, %316 : vector<16x16xi1>, vector<16x16xf32>
    %cst_176 = arith.constant dense<0xFF800000> : vector<16xf32>
    %318 = vector.multi_reduction <maximumf>, %317, %cst_176 [1] : vector<16x16xf32> to vector<16xf32>
    %319 = vector.shape_cast %318 : vector<16xf32> to vector<16x1xf32>
    %320 = vector.broadcast %319 : vector<16x1xf32> to vector<16x16xf32>
    %321 = arith.subf %317, %320 : vector<16x16xf32>
    %322 = math.exp %321 : vector<16x16xf32>
    %cst_177 = arith.constant dense<0.000000e+00> : vector<16xf32>
    %323 = vector.multi_reduction <add>, %322, %cst_177 [1] : vector<16x16xf32> to vector<16xf32>
    %324 = vector.shape_cast %323 : vector<16xf32> to vector<16x1xf32>
    %325 = vector.broadcast %324 : vector<16x1xf32> to vector<16x16xf32>
    %326 = arith.divf %322, %325 : vector<16x16xf32>
    %cst_178 = arith.constant dense<0.000000e+00> : vector<16x32xf32>
    %327 = tpu.matmul %326, %314, %cst_178 {dimension_numbers = #tpu.dot_dimension_numbers<[1], [0], [0], [1], [0, 0, 1, 1], [], []>} : vector<16x16xf32>, vector<16x32xf32>, vector<16x32xf32> -> vector<16x32xf32>
    %c1_179 = arith.constant 1 : index
    %c2_180 = arith.constant 2 : index
    %c0_181 = arith.constant 0 : index
    %c0_182 = arith.constant 0 : index
    %328 = vector.load %arg15[%c1_179, %c2_180, %c0_181, %c0_182] : memref<3x4x32x128xbf16, #tpu.memory_space<vmem>>, vector<1x1x32x128xbf16>
    %329 = vector.shape_cast %328 : vector<1x1x32x128xbf16> to vector<32x128xbf16>
    %330 = arith.extf %329 : vector<32x128xbf16> to vector<32x128xf32>
    %cst_183 = arith.constant dense<0.000000e+00> : vector<16x128xf32>
    %331 = tpu.matmul %327, %330, %cst_183 {dimension_numbers = #tpu.dot_dimension_numbers<[1], [0], [0], [1], [0, 0, 1, 1], [], []>} : vector<16x32xf32>, vector<32x128xf32>, vector<16x128xf32> -> vector<16x128xf32>
    %332 = arith.addf %294, %331 : vector<16x128xf32>
    %c1_184 = arith.constant 1 : index
    %c3_185 = arith.constant 3 : index
    %c0_186 = arith.constant 0 : index
    %c0_187 = arith.constant 0 : index
    %333 = vector.load %arg13[%c1_184, %c3_185, %c0_186, %c0_187] : memref<3x4x96x128xbf16, #tpu.memory_space<vmem>>, vector<1x1x96x128xbf16>
    %334 = vector.shape_cast %333 : vector<1x1x96x128xbf16> to vector<96x128xbf16>
    %335 = arith.extf %334 : vector<96x128xbf16> to vector<96x128xf32>
    %c1_188 = arith.constant 1 : index
    %c3_189 = arith.constant 3 : index
    %c0_190 = arith.constant 0 : index
    %c0_191 = arith.constant 0 : index
    %336 = vector.load %arg14[%c1_188, %c3_189, %c0_190, %c0_191] : memref<3x4x3x32xf32, #tpu.memory_space<vmem>>, vector<1x1x3x32xf32>
    %337 = vector.shape_cast %336 : vector<1x1x3x32xf32> to vector<3x32xf32>
    %338 = vector.extract_strided_slice %335 {offsets = [0, 0], sizes = [32, 128], strides = [1, 1]} : vector<96x128xf32> to vector<32x128xf32>
    %cst_192 = arith.constant dense<0.000000e+00> : vector<16x32xf32>
    %339 = tpu.matmul %215, %338, %cst_192 {dimension_numbers = #tpu.dot_dimension_numbers<[1], [1], [0], [0], [0, 0, 1, 0], [], []>} : vector<16x128xf32>, vector<32x128xf32>, vector<16x32xf32> -> vector<16x32xf32>
    %340 = vector.extract_strided_slice %337 {offsets = [0, 0], sizes = [1, 32], strides = [1, 1]} : vector<3x32xf32> to vector<1x32xf32>
    %341 = vector.broadcast %340 : vector<1x32xf32> to vector<16x32xf32>
    %342 = arith.addf %339, %341 : vector<16x32xf32>
    %343 = vector.extract_strided_slice %335 {offsets = [32, 0], sizes = [32, 128], strides = [1, 1]} : vector<96x128xf32> to vector<32x128xf32>
    %cst_193 = arith.constant dense<0.000000e+00> : vector<16x32xf32>
    %344 = tpu.matmul %215, %343, %cst_193 {dimension_numbers = #tpu.dot_dimension_numbers<[1], [1], [0], [0], [0, 0, 1, 0], [], []>} : vector<16x128xf32>, vector<32x128xf32>, vector<16x32xf32> -> vector<16x32xf32>
    %345 = vector.extract_strided_slice %337 {offsets = [1, 0], sizes = [1, 32], strides = [1, 1]} : vector<3x32xf32> to vector<1x32xf32>
    %346 = vector.broadcast %345 : vector<1x32xf32> to vector<16x32xf32>
    %347 = arith.addf %344, %346 : vector<16x32xf32>
    %348 = vector.extract_strided_slice %335 {offsets = [64, 0], sizes = [32, 128], strides = [1, 1]} : vector<96x128xf32> to vector<32x128xf32>
    %cst_194 = arith.constant dense<0.000000e+00> : vector<16x32xf32>
    %349 = tpu.matmul %215, %348, %cst_194 {dimension_numbers = #tpu.dot_dimension_numbers<[1], [1], [0], [0], [0, 0, 1, 0], [], []>} : vector<16x128xf32>, vector<32x128xf32>, vector<16x32xf32> -> vector<16x32xf32>
    %350 = vector.extract_strided_slice %337 {offsets = [2, 0], sizes = [1, 32], strides = [1, 1]} : vector<3x32xf32> to vector<1x32xf32>
    %351 = vector.broadcast %350 : vector<1x32xf32> to vector<16x32xf32>
    %352 = arith.addf %349, %351 : vector<16x32xf32>
    %cst_195 = arith.constant dense<0.000000e+00> : vector<16x16xf32>
    %353 = tpu.matmul %342, %347, %cst_195 {dimension_numbers = #tpu.dot_dimension_numbers<[1], [1], [0], [0], [0, 0, 1, 0], [], []>} : vector<16x32xf32>, vector<16x32xf32>, vector<16x16xf32> -> vector<16x16xf32>
    %cst_196 = arith.constant -1.000000e+30 : f32
    %354 = vector.broadcast %cst_196 : f32 to vector<16x16xf32>
    %355 = arith.select %57, %353, %354 : vector<16x16xi1>, vector<16x16xf32>
    %cst_197 = arith.constant dense<0xFF800000> : vector<16xf32>
    %356 = vector.multi_reduction <maximumf>, %355, %cst_197 [1] : vector<16x16xf32> to vector<16xf32>
    %357 = vector.shape_cast %356 : vector<16xf32> to vector<16x1xf32>
    %358 = vector.broadcast %357 : vector<16x1xf32> to vector<16x16xf32>
    %359 = arith.subf %355, %358 : vector<16x16xf32>
    %360 = math.exp %359 : vector<16x16xf32>
    %cst_198 = arith.constant dense<0.000000e+00> : vector<16xf32>
    %361 = vector.multi_reduction <add>, %360, %cst_198 [1] : vector<16x16xf32> to vector<16xf32>
    %362 = vector.shape_cast %361 : vector<16xf32> to vector<16x1xf32>
    %363 = vector.broadcast %362 : vector<16x1xf32> to vector<16x16xf32>
    %364 = arith.divf %360, %363 : vector<16x16xf32>
    %cst_199 = arith.constant dense<0.000000e+00> : vector<16x32xf32>
    %365 = tpu.matmul %364, %352, %cst_199 {dimension_numbers = #tpu.dot_dimension_numbers<[1], [0], [0], [1], [0, 0, 1, 1], [], []>} : vector<16x16xf32>, vector<16x32xf32>, vector<16x32xf32> -> vector<16x32xf32>
    %c1_200 = arith.constant 1 : index
    %c3_201 = arith.constant 3 : index
    %c0_202 = arith.constant 0 : index
    %c0_203 = arith.constant 0 : index
    %366 = vector.load %arg15[%c1_200, %c3_201, %c0_202, %c0_203] : memref<3x4x32x128xbf16, #tpu.memory_space<vmem>>, vector<1x1x32x128xbf16>
    %367 = vector.shape_cast %366 : vector<1x1x32x128xbf16> to vector<32x128xbf16>
    %368 = arith.extf %367 : vector<32x128xbf16> to vector<32x128xf32>
    %cst_204 = arith.constant dense<0.000000e+00> : vector<16x128xf32>
    %369 = tpu.matmul %365, %368, %cst_204 {dimension_numbers = #tpu.dot_dimension_numbers<[1], [0], [0], [1], [0, 0, 1, 1], [], []>} : vector<16x32xf32>, vector<32x128xf32>, vector<16x128xf32> -> vector<16x128xf32>
    %370 = arith.addf %332, %369 : vector<16x128xf32>
    %371 = arith.addf %215, %370 : vector<16x128xf32>
    %372 = vector.broadcast %218 : vector<1x128xf32> to vector<16x128xf32>
    %373 = arith.addf %371, %372 : vector<16x128xf32>
    %cst_205 = arith.constant 0.000000e+00 : f32
    %374 = vector.broadcast %cst_205 : f32 to vector<16x128xf32>
    %c2_206 = arith.constant 2 : index
    %c0_207 = arith.constant 0 : index
    %c0_208 = arith.constant 0 : index
    %375 = vector.load %arg16[%c2_206, %c0_207, %c0_208] : memref<3x1x128xf32, #tpu.memory_space<vmem>>, vector<1x1x128xf32>
    %376 = vector.shape_cast %375 : vector<1x1x128xf32> to vector<1x128xf32>
    %c2_209 = arith.constant 2 : index
    %c0_210 = arith.constant 0 : index
    %c0_211 = arith.constant 0 : index
    %c0_212 = arith.constant 0 : index
    %377 = vector.load %arg13[%c2_209, %c0_210, %c0_211, %c0_212] : memref<3x4x96x128xbf16, #tpu.memory_space<vmem>>, vector<1x1x96x128xbf16>
    %378 = vector.shape_cast %377 : vector<1x1x96x128xbf16> to vector<96x128xbf16>
    %379 = arith.extf %378 : vector<96x128xbf16> to vector<96x128xf32>
    %c2_213 = arith.constant 2 : index
    %c0_214 = arith.constant 0 : index
    %c0_215 = arith.constant 0 : index
    %c0_216 = arith.constant 0 : index
    %380 = vector.load %arg14[%c2_213, %c0_214, %c0_215, %c0_216] : memref<3x4x3x32xf32, #tpu.memory_space<vmem>>, vector<1x1x3x32xf32>
    %381 = vector.shape_cast %380 : vector<1x1x3x32xf32> to vector<3x32xf32>
    %382 = vector.extract_strided_slice %379 {offsets = [0, 0], sizes = [32, 128], strides = [1, 1]} : vector<96x128xf32> to vector<32x128xf32>
    %cst_217 = arith.constant dense<0.000000e+00> : vector<16x32xf32>
    %383 = tpu.matmul %373, %382, %cst_217 {dimension_numbers = #tpu.dot_dimension_numbers<[1], [1], [0], [0], [0, 0, 1, 0], [], []>} : vector<16x128xf32>, vector<32x128xf32>, vector<16x32xf32> -> vector<16x32xf32>
    %384 = vector.extract_strided_slice %381 {offsets = [0, 0], sizes = [1, 32], strides = [1, 1]} : vector<3x32xf32> to vector<1x32xf32>
    %385 = vector.broadcast %384 : vector<1x32xf32> to vector<16x32xf32>
    %386 = arith.addf %383, %385 : vector<16x32xf32>
    %387 = vector.extract_strided_slice %379 {offsets = [32, 0], sizes = [32, 128], strides = [1, 1]} : vector<96x128xf32> to vector<32x128xf32>
    %cst_218 = arith.constant dense<0.000000e+00> : vector<16x32xf32>
    %388 = tpu.matmul %373, %387, %cst_218 {dimension_numbers = #tpu.dot_dimension_numbers<[1], [1], [0], [0], [0, 0, 1, 0], [], []>} : vector<16x128xf32>, vector<32x128xf32>, vector<16x32xf32> -> vector<16x32xf32>
    %389 = vector.extract_strided_slice %381 {offsets = [1, 0], sizes = [1, 32], strides = [1, 1]} : vector<3x32xf32> to vector<1x32xf32>
    %390 = vector.broadcast %389 : vector<1x32xf32> to vector<16x32xf32>
    %391 = arith.addf %388, %390 : vector<16x32xf32>
    %392 = vector.extract_strided_slice %379 {offsets = [64, 0], sizes = [32, 128], strides = [1, 1]} : vector<96x128xf32> to vector<32x128xf32>
    %cst_219 = arith.constant dense<0.000000e+00> : vector<16x32xf32>
    %393 = tpu.matmul %373, %392, %cst_219 {dimension_numbers = #tpu.dot_dimension_numbers<[1], [1], [0], [0], [0, 0, 1, 0], [], []>} : vector<16x128xf32>, vector<32x128xf32>, vector<16x32xf32> -> vector<16x32xf32>
    %394 = vector.extract_strided_slice %381 {offsets = [2, 0], sizes = [1, 32], strides = [1, 1]} : vector<3x32xf32> to vector<1x32xf32>
    %395 = vector.broadcast %394 : vector<1x32xf32> to vector<16x32xf32>
    %396 = arith.addf %393, %395 : vector<16x32xf32>
    %cst_220 = arith.constant dense<0.000000e+00> : vector<16x16xf32>
    %397 = tpu.matmul %386, %391, %cst_220 {dimension_numbers = #tpu.dot_dimension_numbers<[1], [1], [0], [0], [0, 0, 1, 0], [], []>} : vector<16x32xf32>, vector<16x32xf32>, vector<16x16xf32> -> vector<16x16xf32>
    %cst_221 = arith.constant -1.000000e+30 : f32
    %398 = vector.broadcast %cst_221 : f32 to vector<16x16xf32>
    %399 = arith.select %57, %397, %398 : vector<16x16xi1>, vector<16x16xf32>
    %cst_222 = arith.constant dense<0xFF800000> : vector<16xf32>
    %400 = vector.multi_reduction <maximumf>, %399, %cst_222 [1] : vector<16x16xf32> to vector<16xf32>
    %401 = vector.shape_cast %400 : vector<16xf32> to vector<16x1xf32>
    %402 = vector.broadcast %401 : vector<16x1xf32> to vector<16x16xf32>
    %403 = arith.subf %399, %402 : vector<16x16xf32>
    %404 = math.exp %403 : vector<16x16xf32>
    %cst_223 = arith.constant dense<0.000000e+00> : vector<16xf32>
    %405 = vector.multi_reduction <add>, %404, %cst_223 [1] : vector<16x16xf32> to vector<16xf32>
    %406 = vector.shape_cast %405 : vector<16xf32> to vector<16x1xf32>
    %407 = vector.broadcast %406 : vector<16x1xf32> to vector<16x16xf32>
    %408 = arith.divf %404, %407 : vector<16x16xf32>
    %cst_224 = arith.constant dense<0.000000e+00> : vector<16x32xf32>
    %409 = tpu.matmul %408, %396, %cst_224 {dimension_numbers = #tpu.dot_dimension_numbers<[1], [0], [0], [1], [0, 0, 1, 1], [], []>} : vector<16x16xf32>, vector<16x32xf32>, vector<16x32xf32> -> vector<16x32xf32>
    %c2_225 = arith.constant 2 : index
    %c0_226 = arith.constant 0 : index
    %c0_227 = arith.constant 0 : index
    %c0_228 = arith.constant 0 : index
    %410 = vector.load %arg15[%c2_225, %c0_226, %c0_227, %c0_228] : memref<3x4x32x128xbf16, #tpu.memory_space<vmem>>, vector<1x1x32x128xbf16>
    %411 = vector.shape_cast %410 : vector<1x1x32x128xbf16> to vector<32x128xbf16>
    %412 = arith.extf %411 : vector<32x128xbf16> to vector<32x128xf32>
    %cst_229 = arith.constant dense<0.000000e+00> : vector<16x128xf32>
    %413 = tpu.matmul %409, %412, %cst_229 {dimension_numbers = #tpu.dot_dimension_numbers<[1], [0], [0], [1], [0, 0, 1, 1], [], []>} : vector<16x32xf32>, vector<32x128xf32>, vector<16x128xf32> -> vector<16x128xf32>
    %414 = arith.addf %374, %413 : vector<16x128xf32>
    %c2_230 = arith.constant 2 : index
    %c1_231 = arith.constant 1 : index
    %c0_232 = arith.constant 0 : index
    %c0_233 = arith.constant 0 : index
    %415 = vector.load %arg13[%c2_230, %c1_231, %c0_232, %c0_233] : memref<3x4x96x128xbf16, #tpu.memory_space<vmem>>, vector<1x1x96x128xbf16>
    %416 = vector.shape_cast %415 : vector<1x1x96x128xbf16> to vector<96x128xbf16>
    %417 = arith.extf %416 : vector<96x128xbf16> to vector<96x128xf32>
    %c2_234 = arith.constant 2 : index
    %c1_235 = arith.constant 1 : index
    %c0_236 = arith.constant 0 : index
    %c0_237 = arith.constant 0 : index
    %418 = vector.load %arg14[%c2_234, %c1_235, %c0_236, %c0_237] : memref<3x4x3x32xf32, #tpu.memory_space<vmem>>, vector<1x1x3x32xf32>
    %419 = vector.shape_cast %418 : vector<1x1x3x32xf32> to vector<3x32xf32>
    %420 = vector.extract_strided_slice %417 {offsets = [0, 0], sizes = [32, 128], strides = [1, 1]} : vector<96x128xf32> to vector<32x128xf32>
    %cst_238 = arith.constant dense<0.000000e+00> : vector<16x32xf32>
    %421 = tpu.matmul %373, %420, %cst_238 {dimension_numbers = #tpu.dot_dimension_numbers<[1], [1], [0], [0], [0, 0, 1, 0], [], []>} : vector<16x128xf32>, vector<32x128xf32>, vector<16x32xf32> -> vector<16x32xf32>
    %422 = vector.extract_strided_slice %419 {offsets = [0, 0], sizes = [1, 32], strides = [1, 1]} : vector<3x32xf32> to vector<1x32xf32>
    %423 = vector.broadcast %422 : vector<1x32xf32> to vector<16x32xf32>
    %424 = arith.addf %421, %423 : vector<16x32xf32>
    %425 = vector.extract_strided_slice %417 {offsets = [32, 0], sizes = [32, 128], strides = [1, 1]} : vector<96x128xf32> to vector<32x128xf32>
    %cst_239 = arith.constant dense<0.000000e+00> : vector<16x32xf32>
    %426 = tpu.matmul %373, %425, %cst_239 {dimension_numbers = #tpu.dot_dimension_numbers<[1], [1], [0], [0], [0, 0, 1, 0], [], []>} : vector<16x128xf32>, vector<32x128xf32>, vector<16x32xf32> -> vector<16x32xf32>
    %427 = vector.extract_strided_slice %419 {offsets = [1, 0], sizes = [1, 32], strides = [1, 1]} : vector<3x32xf32> to vector<1x32xf32>
    %428 = vector.broadcast %427 : vector<1x32xf32> to vector<16x32xf32>
    %429 = arith.addf %426, %428 : vector<16x32xf32>
    %430 = vector.extract_strided_slice %417 {offsets = [64, 0], sizes = [32, 128], strides = [1, 1]} : vector<96x128xf32> to vector<32x128xf32>
    %cst_240 = arith.constant dense<0.000000e+00> : vector<16x32xf32>
    %431 = tpu.matmul %373, %430, %cst_240 {dimension_numbers = #tpu.dot_dimension_numbers<[1], [1], [0], [0], [0, 0, 1, 0], [], []>} : vector<16x128xf32>, vector<32x128xf32>, vector<16x32xf32> -> vector<16x32xf32>
    %432 = vector.extract_strided_slice %419 {offsets = [2, 0], sizes = [1, 32], strides = [1, 1]} : vector<3x32xf32> to vector<1x32xf32>
    %433 = vector.broadcast %432 : vector<1x32xf32> to vector<16x32xf32>
    %434 = arith.addf %431, %433 : vector<16x32xf32>
    %cst_241 = arith.constant dense<0.000000e+00> : vector<16x16xf32>
    %435 = tpu.matmul %424, %429, %cst_241 {dimension_numbers = #tpu.dot_dimension_numbers<[1], [1], [0], [0], [0, 0, 1, 0], [], []>} : vector<16x32xf32>, vector<16x32xf32>, vector<16x16xf32> -> vector<16x16xf32>
    %cst_242 = arith.constant -1.000000e+30 : f32
    %436 = vector.broadcast %cst_242 : f32 to vector<16x16xf32>
    %437 = arith.select %57, %435, %436 : vector<16x16xi1>, vector<16x16xf32>
    %cst_243 = arith.constant dense<0xFF800000> : vector<16xf32>
    %438 = vector.multi_reduction <maximumf>, %437, %cst_243 [1] : vector<16x16xf32> to vector<16xf32>
    %439 = vector.shape_cast %438 : vector<16xf32> to vector<16x1xf32>
    %440 = vector.broadcast %439 : vector<16x1xf32> to vector<16x16xf32>
    %441 = arith.subf %437, %440 : vector<16x16xf32>
    %442 = math.exp %441 : vector<16x16xf32>
    %cst_244 = arith.constant dense<0.000000e+00> : vector<16xf32>
    %443 = vector.multi_reduction <add>, %442, %cst_244 [1] : vector<16x16xf32> to vector<16xf32>
    %444 = vector.shape_cast %443 : vector<16xf32> to vector<16x1xf32>
    %445 = vector.broadcast %444 : vector<16x1xf32> to vector<16x16xf32>
    %446 = arith.divf %442, %445 : vector<16x16xf32>
    %cst_245 = arith.constant dense<0.000000e+00> : vector<16x32xf32>
    %447 = tpu.matmul %446, %434, %cst_245 {dimension_numbers = #tpu.dot_dimension_numbers<[1], [0], [0], [1], [0, 0, 1, 1], [], []>} : vector<16x16xf32>, vector<16x32xf32>, vector<16x32xf32> -> vector<16x32xf32>
    %c2_246 = arith.constant 2 : index
    %c1_247 = arith.constant 1 : index
    %c0_248 = arith.constant 0 : index
    %c0_249 = arith.constant 0 : index
    %448 = vector.load %arg15[%c2_246, %c1_247, %c0_248, %c0_249] : memref<3x4x32x128xbf16, #tpu.memory_space<vmem>>, vector<1x1x32x128xbf16>
    %449 = vector.shape_cast %448 : vector<1x1x32x128xbf16> to vector<32x128xbf16>
    %450 = arith.extf %449 : vector<32x128xbf16> to vector<32x128xf32>
    %cst_250 = arith.constant dense<0.000000e+00> : vector<16x128xf32>
    %451 = tpu.matmul %447, %450, %cst_250 {dimension_numbers = #tpu.dot_dimension_numbers<[1], [0], [0], [1], [0, 0, 1, 1], [], []>} : vector<16x32xf32>, vector<32x128xf32>, vector<16x128xf32> -> vector<16x128xf32>
    %452 = arith.addf %414, %451 : vector<16x128xf32>
    %c2_251 = arith.constant 2 : index
    %c2_252 = arith.constant 2 : index
    %c0_253 = arith.constant 0 : index
    %c0_254 = arith.constant 0 : index
    %453 = vector.load %arg13[%c2_251, %c2_252, %c0_253, %c0_254] : memref<3x4x96x128xbf16, #tpu.memory_space<vmem>>, vector<1x1x96x128xbf16>
    %454 = vector.shape_cast %453 : vector<1x1x96x128xbf16> to vector<96x128xbf16>
    %455 = arith.extf %454 : vector<96x128xbf16> to vector<96x128xf32>
    %c2_255 = arith.constant 2 : index
    %c2_256 = arith.constant 2 : index
    %c0_257 = arith.constant 0 : index
    %c0_258 = arith.constant 0 : index
    %456 = vector.load %arg14[%c2_255, %c2_256, %c0_257, %c0_258] : memref<3x4x3x32xf32, #tpu.memory_space<vmem>>, vector<1x1x3x32xf32>
    %457 = vector.shape_cast %456 : vector<1x1x3x32xf32> to vector<3x32xf32>
    %458 = vector.extract_strided_slice %455 {offsets = [0, 0], sizes = [32, 128], strides = [1, 1]} : vector<96x128xf32> to vector<32x128xf32>
    %cst_259 = arith.constant dense<0.000000e+00> : vector<16x32xf32>
    %459 = tpu.matmul %373, %458, %cst_259 {dimension_numbers = #tpu.dot_dimension_numbers<[1], [1], [0], [0], [0, 0, 1, 0], [], []>} : vector<16x128xf32>, vector<32x128xf32>, vector<16x32xf32> -> vector<16x32xf32>
    %460 = vector.extract_strided_slice %457 {offsets = [0, 0], sizes = [1, 32], strides = [1, 1]} : vector<3x32xf32> to vector<1x32xf32>
    %461 = vector.broadcast %460 : vector<1x32xf32> to vector<16x32xf32>
    %462 = arith.addf %459, %461 : vector<16x32xf32>
    %463 = vector.extract_strided_slice %455 {offsets = [32, 0], sizes = [32, 128], strides = [1, 1]} : vector<96x128xf32> to vector<32x128xf32>
    %cst_260 = arith.constant dense<0.000000e+00> : vector<16x32xf32>
    %464 = tpu.matmul %373, %463, %cst_260 {dimension_numbers = #tpu.dot_dimension_numbers<[1], [1], [0], [0], [0, 0, 1, 0], [], []>} : vector<16x128xf32>, vector<32x128xf32>, vector<16x32xf32> -> vector<16x32xf32>
    %465 = vector.extract_strided_slice %457 {offsets = [1, 0], sizes = [1, 32], strides = [1, 1]} : vector<3x32xf32> to vector<1x32xf32>
    %466 = vector.broadcast %465 : vector<1x32xf32> to vector<16x32xf32>
    %467 = arith.addf %464, %466 : vector<16x32xf32>
    %468 = vector.extract_strided_slice %455 {offsets = [64, 0], sizes = [32, 128], strides = [1, 1]} : vector<96x128xf32> to vector<32x128xf32>
    %cst_261 = arith.constant dense<0.000000e+00> : vector<16x32xf32>
    %469 = tpu.matmul %373, %468, %cst_261 {dimension_numbers = #tpu.dot_dimension_numbers<[1], [1], [0], [0], [0, 0, 1, 0], [], []>} : vector<16x128xf32>, vector<32x128xf32>, vector<16x32xf32> -> vector<16x32xf32>
    %470 = vector.extract_strided_slice %457 {offsets = [2, 0], sizes = [1, 32], strides = [1, 1]} : vector<3x32xf32> to vector<1x32xf32>
    %471 = vector.broadcast %470 : vector<1x32xf32> to vector<16x32xf32>
    %472 = arith.addf %469, %471 : vector<16x32xf32>
    %cst_262 = arith.constant dense<0.000000e+00> : vector<16x16xf32>
    %473 = tpu.matmul %462, %467, %cst_262 {dimension_numbers = #tpu.dot_dimension_numbers<[1], [1], [0], [0], [0, 0, 1, 0], [], []>} : vector<16x32xf32>, vector<16x32xf32>, vector<16x16xf32> -> vector<16x16xf32>
    %cst_263 = arith.constant -1.000000e+30 : f32
    %474 = vector.broadcast %cst_263 : f32 to vector<16x16xf32>
    %475 = arith.select %57, %473, %474 : vector<16x16xi1>, vector<16x16xf32>
    %cst_264 = arith.constant dense<0xFF800000> : vector<16xf32>
    %476 = vector.multi_reduction <maximumf>, %475, %cst_264 [1] : vector<16x16xf32> to vector<16xf32>
    %477 = vector.shape_cast %476 : vector<16xf32> to vector<16x1xf32>
    %478 = vector.broadcast %477 : vector<16x1xf32> to vector<16x16xf32>
    %479 = arith.subf %475, %478 : vector<16x16xf32>
    %480 = math.exp %479 : vector<16x16xf32>
    %cst_265 = arith.constant dense<0.000000e+00> : vector<16xf32>
    %481 = vector.multi_reduction <add>, %480, %cst_265 [1] : vector<16x16xf32> to vector<16xf32>
    %482 = vector.shape_cast %481 : vector<16xf32> to vector<16x1xf32>
    %483 = vector.broadcast %482 : vector<16x1xf32> to vector<16x16xf32>
    %484 = arith.divf %480, %483 : vector<16x16xf32>
    %cst_266 = arith.constant dense<0.000000e+00> : vector<16x32xf32>
    %485 = tpu.matmul %484, %472, %cst_266 {dimension_numbers = #tpu.dot_dimension_numbers<[1], [0], [0], [1], [0, 0, 1, 1], [], []>} : vector<16x16xf32>, vector<16x32xf32>, vector<16x32xf32> -> vector<16x32xf32>
    %c2_267 = arith.constant 2 : index
    %c2_268 = arith.constant 2 : index
    %c0_269 = arith.constant 0 : index
    %c0_270 = arith.constant 0 : index
    %486 = vector.load %arg15[%c2_267, %c2_268, %c0_269, %c0_270] : memref<3x4x32x128xbf16, #tpu.memory_space<vmem>>, vector<1x1x32x128xbf16>
    %487 = vector.shape_cast %486 : vector<1x1x32x128xbf16> to vector<32x128xbf16>
    %488 = arith.extf %487 : vector<32x128xbf16> to vector<32x128xf32>
    %cst_271 = arith.constant dense<0.000000e+00> : vector<16x128xf32>
    %489 = tpu.matmul %485, %488, %cst_271 {dimension_numbers = #tpu.dot_dimension_numbers<[1], [0], [0], [1], [0, 0, 1, 1], [], []>} : vector<16x32xf32>, vector<32x128xf32>, vector<16x128xf32> -> vector<16x128xf32>
    %490 = arith.addf %452, %489 : vector<16x128xf32>
    %c2_272 = arith.constant 2 : index
    %c3_273 = arith.constant 3 : index
    %c0_274 = arith.constant 0 : index
    %c0_275 = arith.constant 0 : index
    %491 = vector.load %arg13[%c2_272, %c3_273, %c0_274, %c0_275] : memref<3x4x96x128xbf16, #tpu.memory_space<vmem>>, vector<1x1x96x128xbf16>
    %492 = vector.shape_cast %491 : vector<1x1x96x128xbf16> to vector<96x128xbf16>
    %493 = arith.extf %492 : vector<96x128xbf16> to vector<96x128xf32>
    %c2_276 = arith.constant 2 : index
    %c3_277 = arith.constant 3 : index
    %c0_278 = arith.constant 0 : index
    %c0_279 = arith.constant 0 : index
    %494 = vector.load %arg14[%c2_276, %c3_277, %c0_278, %c0_279] : memref<3x4x3x32xf32, #tpu.memory_space<vmem>>, vector<1x1x3x32xf32>
    %495 = vector.shape_cast %494 : vector<1x1x3x32xf32> to vector<3x32xf32>
    %496 = vector.extract_strided_slice %493 {offsets = [0, 0], sizes = [32, 128], strides = [1, 1]} : vector<96x128xf32> to vector<32x128xf32>
    %cst_280 = arith.constant dense<0.000000e+00> : vector<16x32xf32>
    %497 = tpu.matmul %373, %496, %cst_280 {dimension_numbers = #tpu.dot_dimension_numbers<[1], [1], [0], [0], [0, 0, 1, 0], [], []>} : vector<16x128xf32>, vector<32x128xf32>, vector<16x32xf32> -> vector<16x32xf32>
    %498 = vector.extract_strided_slice %495 {offsets = [0, 0], sizes = [1, 32], strides = [1, 1]} : vector<3x32xf32> to vector<1x32xf32>
    %499 = vector.broadcast %498 : vector<1x32xf32> to vector<16x32xf32>
    %500 = arith.addf %497, %499 : vector<16x32xf32>
    %501 = vector.extract_strided_slice %493 {offsets = [32, 0], sizes = [32, 128], strides = [1, 1]} : vector<96x128xf32> to vector<32x128xf32>
    %cst_281 = arith.constant dense<0.000000e+00> : vector<16x32xf32>
    %502 = tpu.matmul %373, %501, %cst_281 {dimension_numbers = #tpu.dot_dimension_numbers<[1], [1], [0], [0], [0, 0, 1, 0], [], []>} : vector<16x128xf32>, vector<32x128xf32>, vector<16x32xf32> -> vector<16x32xf32>
    %503 = vector.extract_strided_slice %495 {offsets = [1, 0], sizes = [1, 32], strides = [1, 1]} : vector<3x32xf32> to vector<1x32xf32>
    %504 = vector.broadcast %503 : vector<1x32xf32> to vector<16x32xf32>
    %505 = arith.addf %502, %504 : vector<16x32xf32>
    %506 = vector.extract_strided_slice %493 {offsets = [64, 0], sizes = [32, 128], strides = [1, 1]} : vector<96x128xf32> to vector<32x128xf32>
    %cst_282 = arith.constant dense<0.000000e+00> : vector<16x32xf32>
    %507 = tpu.matmul %373, %506, %cst_282 {dimension_numbers = #tpu.dot_dimension_numbers<[1], [1], [0], [0], [0, 0, 1, 0], [], []>} : vector<16x128xf32>, vector<32x128xf32>, vector<16x32xf32> -> vector<16x32xf32>
    %508 = vector.extract_strided_slice %495 {offsets = [2, 0], sizes = [1, 32], strides = [1, 1]} : vector<3x32xf32> to vector<1x32xf32>
    %509 = vector.broadcast %508 : vector<1x32xf32> to vector<16x32xf32>
    %510 = arith.addf %507, %509 : vector<16x32xf32>
    %cst_283 = arith.constant dense<0.000000e+00> : vector<16x16xf32>
    %511 = tpu.matmul %500, %505, %cst_283 {dimension_numbers = #tpu.dot_dimension_numbers<[1], [1], [0], [0], [0, 0, 1, 0], [], []>} : vector<16x32xf32>, vector<16x32xf32>, vector<16x16xf32> -> vector<16x16xf32>
    %cst_284 = arith.constant -1.000000e+30 : f32
    %512 = vector.broadcast %cst_284 : f32 to vector<16x16xf32>
    %513 = arith.select %57, %511, %512 : vector<16x16xi1>, vector<16x16xf32>
    %cst_285 = arith.constant dense<0xFF800000> : vector<16xf32>
    %514 = vector.multi_reduction <maximumf>, %513, %cst_285 [1] : vector<16x16xf32> to vector<16xf32>
    %515 = vector.shape_cast %514 : vector<16xf32> to vector<16x1xf32>
    %516 = vector.broadcast %515 : vector<16x1xf32> to vector<16x16xf32>
    %517 = arith.subf %513, %516 : vector<16x16xf32>
    %518 = math.exp %517 : vector<16x16xf32>
    %cst_286 = arith.constant dense<0.000000e+00> : vector<16xf32>
    %519 = vector.multi_reduction <add>, %518, %cst_286 [1] : vector<16x16xf32> to vector<16xf32>
    %520 = vector.shape_cast %519 : vector<16xf32> to vector<16x1xf32>
    %521 = vector.broadcast %520 : vector<16x1xf32> to vector<16x16xf32>
    %522 = arith.divf %518, %521 : vector<16x16xf32>
    %cst_287 = arith.constant dense<0.000000e+00> : vector<16x32xf32>
    %523 = tpu.matmul %522, %510, %cst_287 {dimension_numbers = #tpu.dot_dimension_numbers<[1], [0], [0], [1], [0, 0, 1, 1], [], []>} : vector<16x16xf32>, vector<16x32xf32>, vector<16x32xf32> -> vector<16x32xf32>
    %c2_288 = arith.constant 2 : index
    %c3_289 = arith.constant 3 : index
    %c0_290 = arith.constant 0 : index
    %c0_291 = arith.constant 0 : index
    %524 = vector.load %arg15[%c2_288, %c3_289, %c0_290, %c0_291] : memref<3x4x32x128xbf16, #tpu.memory_space<vmem>>, vector<1x1x32x128xbf16>
    %525 = vector.shape_cast %524 : vector<1x1x32x128xbf16> to vector<32x128xbf16>
    %526 = arith.extf %525 : vector<32x128xbf16> to vector<32x128xf32>
    %cst_292 = arith.constant dense<0.000000e+00> : vector<16x128xf32>
    %527 = tpu.matmul %523, %526, %cst_292 {dimension_numbers = #tpu.dot_dimension_numbers<[1], [0], [0], [1], [0, 0, 1, 1], [], []>} : vector<16x32xf32>, vector<32x128xf32>, vector<16x128xf32> -> vector<16x128xf32>
    %528 = arith.addf %490, %527 : vector<16x128xf32>
    %529 = arith.addf %373, %528 : vector<16x128xf32>
    %530 = vector.broadcast %376 : vector<1x128xf32> to vector<16x128xf32>
    %531 = arith.addf %529, %530 : vector<16x128xf32>
    %cst_293 = arith.constant dense<0.000000e+00> : vector<2x1xf32>
    %532 = tpu.matmul %48, %52, %cst_293 {dimension_numbers = #tpu.dot_dimension_numbers<[0], [0], [1], [1], [0, 1, 1, 1], [], []>} : vector<16x2xf32>, vector<16x1xf32>, vector<2x1xf32> -> vector<2x1xf32>
    %533 = vector.broadcast %52 : vector<16x1xf32> to vector<16x128xf32>
    %534 = arith.mulf %531, %533 : vector<16x128xf32>
    %cst_294 = arith.constant dense<0.000000e+00> : vector<2x128xf32>
    %535 = tpu.matmul %48, %534, %cst_294 {dimension_numbers = #tpu.dot_dimension_numbers<[0], [0], [1], [1], [0, 1, 1, 1], [], []>} : vector<16x2xf32>, vector<16x128xf32>, vector<2x128xf32> -> vector<2x128xf32>
    %cst_295 = arith.constant 1.000000e+00 : f32
    %536 = vector.broadcast %cst_295 : f32 to vector<2x1xf32>
    %537 = arith.maximumf %532, %536 : vector<2x1xf32>
    %538 = vector.broadcast %537 : vector<2x1xf32> to vector<2x128xf32>
    %539 = arith.divf %535, %538 : vector<2x128xf32>
    %c0_296 = arith.constant 0 : index
    %c0_297 = arith.constant 0 : index
    %540 = vector.load %arg17[%c0_296, %c0_297] : memref<128x128xbf16, #tpu.memory_space<vmem>>, vector<128x128xbf16>
    %541 = arith.extf %540 : vector<128x128xbf16> to vector<128x128xf32>
    %cst_298 = arith.constant dense<0.000000e+00> : vector<2x128xf32>
    %542 = tpu.matmul %539, %541, %cst_298 {dimension_numbers = #tpu.dot_dimension_numbers<[1], [0], [0], [1], [0, 0, 1, 1], [], []>} : vector<2x128xf32>, vector<128x128xf32>, vector<2x128xf32> -> vector<2x128xf32>
    %c0_299 = arith.constant 0 : index
    %c0_300 = arith.constant 0 : index
    %543 = vector.load %arg18[%c0_299, %c0_300] : memref<1x128xf32, #tpu.memory_space<vmem>>, vector<1x128xf32>
    %544 = vector.broadcast %543 : vector<1x128xf32> to vector<2x128xf32>
    %545 = arith.addf %542, %544 : vector<2x128xf32>
    %546 = arith.negf %545 : vector<2x128xf32>
    %547 = math.exp %546 : vector<2x128xf32>
    %cst_301 = arith.constant 1.000000e+00 : f32
    %548 = vector.broadcast %cst_301 : f32 to vector<2x128xf32>
    %549 = arith.addf %548, %547 : vector<2x128xf32>
    %550 = arith.divf %548, %549 : vector<2x128xf32>
    %551 = arith.mulf %545, %550 : vector<2x128xf32>
    %c0_302 = arith.constant 0 : index
    %c0_303 = arith.constant 0 : index
    %552 = vector.load %arg19[%c0_302, %c0_303] : memref<128x128xbf16, #tpu.memory_space<vmem>>, vector<128x128xbf16>
    %553 = arith.extf %552 : vector<128x128xbf16> to vector<128x128xf32>
    %cst_304 = arith.constant dense<0.000000e+00> : vector<2x128xf32>
    %554 = tpu.matmul %551, %553, %cst_304 {dimension_numbers = #tpu.dot_dimension_numbers<[1], [0], [0], [1], [0, 0, 1, 1], [], []>} : vector<2x128xf32>, vector<128x128xf32>, vector<2x128xf32> -> vector<2x128xf32>
    %c0_305 = arith.constant 0 : index
    %c0_306 = arith.constant 0 : index
    %555 = vector.load %arg20[%c0_305, %c0_306] : memref<1x128xf32, #tpu.memory_space<vmem>>, vector<1x128xf32>
    %556 = vector.broadcast %555 : vector<1x128xf32> to vector<2x128xf32>
    %557 = arith.addf %554, %556 : vector<2x128xf32>
    %c0_307 = arith.constant 0 : index
    %c0_308 = arith.constant 0 : index
    %558 = vector.load %arg21[%c0_307, %c0_308] : memref<1x128xf32, #tpu.memory_space<vmem>>, vector<1x128xf32>
    %c0_309 = arith.constant 0 : index
    %c0_310 = arith.constant 0 : index
    %559 = vector.load %arg22[%c0_309, %c0_310] : memref<1x128xf32, #tpu.memory_space<vmem>>, vector<1x128xf32>
    %cst_311 = arith.constant dense<0.000000e+00> : vector<2xf32>
    %560 = vector.multi_reduction <add>, %557, %cst_311 [1] : vector<2x128xf32> to vector<2xf32>
    %561 = vector.shape_cast %560 : vector<2xf32> to vector<2x1xf32>
    %cst_312 = arith.constant 1.280000e+02 : f32
    %562 = vector.broadcast %cst_312 : f32 to vector<2x1xf32>
    %563 = arith.divf %561, %562 : vector<2x1xf32>
    %564 = vector.broadcast %563 : vector<2x1xf32> to vector<2x128xf32>
    %565 = arith.subf %557, %564 : vector<2x128xf32>
    %566 = arith.mulf %565, %565 : vector<2x128xf32>
    %cst_313 = arith.constant dense<0.000000e+00> : vector<2xf32>
    %567 = vector.multi_reduction <add>, %566, %cst_313 [1] : vector<2x128xf32> to vector<2xf32>
    %568 = vector.shape_cast %567 : vector<2xf32> to vector<2x1xf32>
    %cst_314 = arith.constant 1.280000e+02 : f32
    %569 = vector.broadcast %cst_314 : f32 to vector<2x1xf32>
    %570 = arith.divf %568, %569 : vector<2x1xf32>
    %571 = vector.broadcast %563 : vector<2x1xf32> to vector<2x128xf32>
    %572 = arith.subf %557, %571 : vector<2x128xf32>
    %cst_315 = arith.constant 9.99999974E-6 : f32
    %573 = vector.broadcast %cst_315 : f32 to vector<2x1xf32>
    %574 = arith.addf %570, %573 : vector<2x1xf32>
    %575 = math.rsqrt %574 : vector<2x1xf32>
    %576 = vector.broadcast %575 : vector<2x1xf32> to vector<2x128xf32>
    %577 = arith.mulf %572, %576 : vector<2x128xf32>
    %578 = vector.broadcast %558 : vector<1x128xf32> to vector<2x128xf32>
    %579 = arith.mulf %577, %578 : vector<2x128xf32>
    %580 = vector.broadcast %559 : vector<1x128xf32> to vector<2x128xf32>
    %581 = arith.addf %579, %580 : vector<2x128xf32>
    %c0_316 = arith.constant 0 : index
    %c0_317 = arith.constant 0 : index
    %582 = vector.load %arg48[%c0_316, %c0_317] : memref<2x128xf32, #tpu.memory_space<vmem>>, vector<2x128xf32>
    tpu.vector_store %arg48[%c0_316, %c0_317], %581 {strides = array<i32>} : memref<2x128xf32, #tpu.memory_space<vmem>>, vector<2x128xf32>,
    %c0_318 = arith.constant 0 : index
    %c0_319 = arith.constant 0 : index
    %583 = vector.load %arg4[%c0_318, %c0_319] : memref<2x256xf32, #tpu.memory_space<vmem>>, vector<2x256xf32>
    %c0_320 = arith.constant 0 : index
    %c0_321 = arith.constant 0 : index
    %584 = vector.load %arg23[%c0_320, %c0_321] : memref<256x128xbf16, #tpu.memory_space<vmem>>, vector<256x128xbf16>
    %585 = arith.extf %584 : vector<256x128xbf16> to vector<256x128xf32>
    %cst_322 = arith.constant dense<0.000000e+00> : vector<2x128xf32>
    %586 = tpu.matmul %583, %585, %cst_322 {dimension_numbers = #tpu.dot_dimension_numbers<[1], [0], [0], [1], [0, 0, 1, 1], [], []>} : vector<2x256xf32>, vector<256x128xf32>, vector<2x128xf32> -> vector<2x128xf32>
    %c0_323 = arith.constant 0 : index
    %c0_324 = arith.constant 0 : index
    %587 = vector.load %arg24[%c0_323, %c0_324] : memref<1x128xf32, #tpu.memory_space<vmem>>, vector<1x128xf32>
    %588 = vector.broadcast %587 : vector<1x128xf32> to vector<2x128xf32>
    %589 = arith.addf %586, %588 : vector<2x128xf32>
    %590 = arith.negf %589 : vector<2x128xf32>
    %591 = math.exp %590 : vector<2x128xf32>
    %cst_325 = arith.constant 1.000000e+00 : f32
    %592 = vector.broadcast %cst_325 : f32 to vector<2x128xf32>
    %593 = arith.addf %592, %591 : vector<2x128xf32>
    %594 = arith.divf %592, %593 : vector<2x128xf32>
    %595 = arith.mulf %589, %594 : vector<2x128xf32>
    %c0_326 = arith.constant 0 : index
    %c0_327 = arith.constant 0 : index
    %596 = vector.load %arg25[%c0_326, %c0_327] : memref<1x128xf32, #tpu.memory_space<vmem>>, vector<1x128xf32>
    %597 = vector.broadcast %596 : vector<1x128xf32> to vector<2x128xf32>
    %598 = arith.addf %595, %597 : vector<2x128xf32>
    %c0_328 = arith.constant 0 : index
    %c0_329 = arith.constant 0 : index
    %c0_330 = arith.constant 0 : index
    %599 = vector.load %arg26[%c0_328, %c0_329, %c0_330] : memref<3x128x128xbf16, #tpu.memory_space<vmem>>, vector<1x128x128xbf16>
    %600 = vector.shape_cast %599 : vector<1x128x128xbf16> to vector<128x128xbf16>
    %601 = arith.extf %600 : vector<128x128xbf16> to vector<128x128xf32>
    %cst_331 = arith.constant dense<0.000000e+00> : vector<2x128xf32>
    %602 = tpu.matmul %598, %601, %cst_331 {dimension_numbers = #tpu.dot_dimension_numbers<[1], [0], [0], [1], [0, 0, 1, 1], [], []>} : vector<2x128xf32>, vector<128x128xf32>, vector<2x128xf32> -> vector<2x128xf32>
    %c0_332 = arith.constant 0 : index
    %c0_333 = arith.constant 0 : index
    %c0_334 = arith.constant 0 : index
    %603 = vector.load %arg27[%c0_332, %c0_333, %c0_334] : memref<3x1x128xf32, #tpu.memory_space<vmem>>, vector<1x1x128xf32>
    %604 = vector.shape_cast %603 : vector<1x1x128xf32> to vector<1x128xf32>
    %605 = vector.broadcast %604 : vector<1x128xf32> to vector<2x128xf32>
    %606 = arith.addf %602, %605 : vector<2x128xf32>
    %607 = arith.addf %598, %606 : vector<2x128xf32>
    %c0_335 = arith.constant 0 : index
    %c0_336 = arith.constant 0 : index
    %c0_337 = arith.constant 0 : index
    %608 = vector.load %arg28[%c0_335, %c0_336, %c0_337] : memref<3x1x128xf32, #tpu.memory_space<vmem>>, vector<1x1x128xf32>
    %609 = vector.shape_cast %608 : vector<1x1x128xf32> to vector<1x128xf32>
    %c0_338 = arith.constant 0 : index
    %c0_339 = arith.constant 0 : index
    %c0_340 = arith.constant 0 : index
    %610 = vector.load %arg29[%c0_338, %c0_339, %c0_340] : memref<3x1x128xf32, #tpu.memory_space<vmem>>, vector<1x1x128xf32>
    %611 = vector.shape_cast %610 : vector<1x1x128xf32> to vector<1x128xf32>
    %cst_341 = arith.constant dense<0.000000e+00> : vector<2xf32>
    %612 = vector.multi_reduction <add>, %607, %cst_341 [1] : vector<2x128xf32> to vector<2xf32>
    %613 = vector.shape_cast %612 : vector<2xf32> to vector<2x1xf32>
    %cst_342 = arith.constant 1.280000e+02 : f32
    %614 = vector.broadcast %cst_342 : f32 to vector<2x1xf32>
    %615 = arith.divf %613, %614 : vector<2x1xf32>
    %616 = vector.broadcast %615 : vector<2x1xf32> to vector<2x128xf32>
    %617 = arith.subf %607, %616 : vector<2x128xf32>
    %618 = arith.mulf %617, %617 : vector<2x128xf32>
    %cst_343 = arith.constant dense<0.000000e+00> : vector<2xf32>
    %619 = vector.multi_reduction <add>, %618, %cst_343 [1] : vector<2x128xf32> to vector<2xf32>
    %620 = vector.shape_cast %619 : vector<2xf32> to vector<2x1xf32>
    %cst_344 = arith.constant 1.280000e+02 : f32
    %621 = vector.broadcast %cst_344 : f32 to vector<2x1xf32>
    %622 = arith.divf %620, %621 : vector<2x1xf32>
    %623 = vector.broadcast %615 : vector<2x1xf32> to vector<2x128xf32>
    %624 = arith.subf %607, %623 : vector<2x128xf32>
    %cst_345 = arith.constant 9.99999974E-6 : f32
    %625 = vector.broadcast %cst_345 : f32 to vector<2x1xf32>
    %626 = arith.addf %622, %625 : vector<2x1xf32>
    %627 = math.rsqrt %626 : vector<2x1xf32>
    %628 = vector.broadcast %627 : vector<2x1xf32> to vector<2x128xf32>
    %629 = arith.mulf %624, %628 : vector<2x128xf32>
    %630 = vector.broadcast %609 : vector<1x128xf32> to vector<2x128xf32>
    %631 = arith.mulf %629, %630 : vector<2x128xf32>
    %632 = vector.broadcast %611 : vector<1x128xf32> to vector<2x128xf32>
    %633 = arith.addf %631, %632 : vector<2x128xf32>
    %c0_346 = arith.constant 0 : index
    %c0_347 = arith.constant 0 : index
    %c0_348 = arith.constant 0 : index
    %634 = vector.load %arg30[%c0_346, %c0_347, %c0_348] : memref<3x128x512xbf16, #tpu.memory_space<vmem>>, vector<1x128x512xbf16>
    %635 = vector.shape_cast %634 : vector<1x128x512xbf16> to vector<128x512xbf16>
    %636 = arith.extf %635 : vector<128x512xbf16> to vector<128x512xf32>
    %cst_349 = arith.constant dense<0.000000e+00> : vector<2x512xf32>
    %637 = tpu.matmul %633, %636, %cst_349 {dimension_numbers = #tpu.dot_dimension_numbers<[1], [0], [0], [1], [0, 0, 1, 1], [], []>} : vector<2x128xf32>, vector<128x512xf32>, vector<2x512xf32> -> vector<2x512xf32>
    %c0_350 = arith.constant 0 : index
    %c0_351 = arith.constant 0 : index
    %c0_352 = arith.constant 0 : index
    %638 = vector.load %arg31[%c0_350, %c0_351, %c0_352] : memref<3x1x512xf32, #tpu.memory_space<vmem>>, vector<1x1x512xf32>
    %639 = vector.shape_cast %638 : vector<1x1x512xf32> to vector<1x512xf32>
    %640 = vector.broadcast %639 : vector<1x512xf32> to vector<2x512xf32>
    %641 = arith.addf %637, %640 : vector<2x512xf32>
    %cst_353 = arith.constant 0.000000e+00 : f32
    %642 = vector.broadcast %cst_353 : f32 to vector<2x512xf32>
    %643 = arith.maximumf %641, %642 : vector<2x512xf32>
    %c0_354 = arith.constant 0 : index
    %c0_355 = arith.constant 0 : index
    %c0_356 = arith.constant 0 : index
    %644 = vector.load %arg32[%c0_354, %c0_355, %c0_356] : memref<3x512x128xbf16, #tpu.memory_space<vmem>>, vector<1x512x128xbf16>
    %645 = vector.shape_cast %644 : vector<1x512x128xbf16> to vector<512x128xbf16>
    %646 = arith.extf %645 : vector<512x128xbf16> to vector<512x128xf32>
    %cst_357 = arith.constant dense<0.000000e+00> : vector<2x128xf32>
    %647 = tpu.matmul %643, %646, %cst_357 {dimension_numbers = #tpu.dot_dimension_numbers<[1], [0], [0], [1], [0, 0, 1, 1], [], []>} : vector<2x512xf32>, vector<512x128xf32>, vector<2x128xf32> -> vector<2x128xf32>
    %c0_358 = arith.constant 0 : index
    %c0_359 = arith.constant 0 : index
    %c0_360 = arith.constant 0 : index
    %648 = vector.load %arg33[%c0_358, %c0_359, %c0_360] : memref<3x1x128xf32, #tpu.memory_space<vmem>>, vector<1x1x128xf32>
    %649 = vector.shape_cast %648 : vector<1x1x128xf32> to vector<1x128xf32>
    %650 = vector.broadcast %649 : vector<1x128xf32> to vector<2x128xf32>
    %651 = arith.addf %647, %650 : vector<2x128xf32>
    %652 = arith.addf %633, %651 : vector<2x128xf32>
    %c0_361 = arith.constant 0 : index
    %c0_362 = arith.constant 0 : index
    %c0_363 = arith.constant 0 : index
    %653 = vector.load %arg34[%c0_361, %c0_362, %c0_363] : memref<3x1x128xf32, #tpu.memory_space<vmem>>, vector<1x1x128xf32>
    %654 = vector.shape_cast %653 : vector<1x1x128xf32> to vector<1x128xf32>
    %c0_364 = arith.constant 0 : index
    %c0_365 = arith.constant 0 : index
    %c0_366 = arith.constant 0 : index
    %655 = vector.load %arg35[%c0_364, %c0_365, %c0_366] : memref<3x1x128xf32, #tpu.memory_space<vmem>>, vector<1x1x128xf32>
    %656 = vector.shape_cast %655 : vector<1x1x128xf32> to vector<1x128xf32>
    %cst_367 = arith.constant dense<0.000000e+00> : vector<2xf32>
    %657 = vector.multi_reduction <add>, %652, %cst_367 [1] : vector<2x128xf32> to vector<2xf32>
    %658 = vector.shape_cast %657 : vector<2xf32> to vector<2x1xf32>
    %cst_368 = arith.constant 1.280000e+02 : f32
    %659 = vector.broadcast %cst_368 : f32 to vector<2x1xf32>
    %660 = arith.divf %658, %659 : vector<2x1xf32>
    %661 = vector.broadcast %660 : vector<2x1xf32> to vector<2x128xf32>
    %662 = arith.subf %652, %661 : vector<2x128xf32>
    %663 = arith.mulf %662, %662 : vector<2x128xf32>
    %cst_369 = arith.constant dense<0.000000e+00> : vector<2xf32>
    %664 = vector.multi_reduction <add>, %663, %cst_369 [1] : vector<2x128xf32> to vector<2xf32>
    %665 = vector.shape_cast %664 : vector<2xf32> to vector<2x1xf32>
    %cst_370 = arith.constant 1.280000e+02 : f32
    %666 = vector.broadcast %cst_370 : f32 to vector<2x1xf32>
    %667 = arith.divf %665, %666 : vector<2x1xf32>
    %668 = vector.broadcast %660 : vector<2x1xf32> to vector<2x128xf32>
    %669 = arith.subf %652, %668 : vector<2x128xf32>
    %cst_371 = arith.constant 9.99999974E-6 : f32
    %670 = vector.broadcast %cst_371 : f32 to vector<2x1xf32>
    %671 = arith.addf %667, %670 : vector<2x1xf32>
    %672 = math.rsqrt %671 : vector<2x1xf32>
    %673 = vector.broadcast %672 : vector<2x1xf32> to vector<2x128xf32>
    %674 = arith.mulf %669, %673 : vector<2x128xf32>
    %675 = vector.broadcast %654 : vector<1x128xf32> to vector<2x128xf32>
    %676 = arith.mulf %674, %675 : vector<2x128xf32>
    %677 = vector.broadcast %656 : vector<1x128xf32> to vector<2x128xf32>
    %678 = arith.addf %676, %677 : vector<2x128xf32>
    %c1_372 = arith.constant 1 : index
    %c0_373 = arith.constant 0 : index
    %c0_374 = arith.constant 0 : index
    %679 = vector.load %arg26[%c1_372, %c0_373, %c0_374] : memref<3x128x128xbf16, #tpu.memory_space<vmem>>, vector<1x128x128xbf16>
    %680 = vector.shape_cast %679 : vector<1x128x128xbf16> to vector<128x128xbf16>
    %681 = arith.extf %680 : vector<128x128xbf16> to vector<128x128xf32>
    %cst_375 = arith.constant dense<0.000000e+00> : vector<2x128xf32>
    %682 = tpu.matmul %678, %681, %cst_375 {dimension_numbers = #tpu.dot_dimension_numbers<[1], [0], [0], [1], [0, 0, 1, 1], [], []>} : vector<2x128xf32>, vector<128x128xf32>, vector<2x128xf32> -> vector<2x128xf32>
    %c1_376 = arith.constant 1 : index
    %c0_377 = arith.constant 0 : index
    %c0_378 = arith.constant 0 : index
    %683 = vector.load %arg27[%c1_376, %c0_377, %c0_378] : memref<3x1x128xf32, #tpu.memory_space<vmem>>, vector<1x1x128xf32>
    %684 = vector.shape_cast %683 : vector<1x1x128xf32> to vector<1x128xf32>
    %685 = vector.broadcast %684 : vector<1x128xf32> to vector<2x128xf32>
    %686 = arith.addf %682, %685 : vector<2x128xf32>
    %687 = arith.addf %678, %686 : vector<2x128xf32>
    %c1_379 = arith.constant 1 : index
    %c0_380 = arith.constant 0 : index
    %c0_381 = arith.constant 0 : index
    %688 = vector.load %arg28[%c1_379, %c0_380, %c0_381] : memref<3x1x128xf32, #tpu.memory_space<vmem>>, vector<1x1x128xf32>
    %689 = vector.shape_cast %688 : vector<1x1x128xf32> to vector<1x128xf32>
    %c1_382 = arith.constant 1 : index
    %c0_383 = arith.constant 0 : index
    %c0_384 = arith.constant 0 : index
    %690 = vector.load %arg29[%c1_382, %c0_383, %c0_384] : memref<3x1x128xf32, #tpu.memory_space<vmem>>, vector<1x1x128xf32>
    %691 = vector.shape_cast %690 : vector<1x1x128xf32> to vector<1x128xf32>
    %cst_385 = arith.constant dense<0.000000e+00> : vector<2xf32>
    %692 = vector.multi_reduction <add>, %687, %cst_385 [1] : vector<2x128xf32> to vector<2xf32>
    %693 = vector.shape_cast %692 : vector<2xf32> to vector<2x1xf32>
    %cst_386 = arith.constant 1.280000e+02 : f32
    %694 = vector.broadcast %cst_386 : f32 to vector<2x1xf32>
    %695 = arith.divf %693, %694 : vector<2x1xf32>
    %696 = vector.broadcast %695 : vector<2x1xf32> to vector<2x128xf32>
    %697 = arith.subf %687, %696 : vector<2x128xf32>
    %698 = arith.mulf %697, %697 : vector<2x128xf32>
    %cst_387 = arith.constant dense<0.000000e+00> : vector<2xf32>
    %699 = vector.multi_reduction <add>, %698, %cst_387 [1] : vector<2x128xf32> to vector<2xf32>
    %700 = vector.shape_cast %699 : vector<2xf32> to vector<2x1xf32>
    %cst_388 = arith.constant 1.280000e+02 : f32
    %701 = vector.broadcast %cst_388 : f32 to vector<2x1xf32>
    %702 = arith.divf %700, %701 : vector<2x1xf32>
    %703 = vector.broadcast %695 : vector<2x1xf32> to vector<2x128xf32>
    %704 = arith.subf %687, %703 : vector<2x128xf32>
    %cst_389 = arith.constant 9.99999974E-6 : f32
    %705 = vector.broadcast %cst_389 : f32 to vector<2x1xf32>
    %706 = arith.addf %702, %705 : vector<2x1xf32>
    %707 = math.rsqrt %706 : vector<2x1xf32>
    %708 = vector.broadcast %707 : vector<2x1xf32> to vector<2x128xf32>
    %709 = arith.mulf %704, %708 : vector<2x128xf32>
    %710 = vector.broadcast %689 : vector<1x128xf32> to vector<2x128xf32>
    %711 = arith.mulf %709, %710 : vector<2x128xf32>
    %712 = vector.broadcast %691 : vector<1x128xf32> to vector<2x128xf32>
    %713 = arith.addf %711, %712 : vector<2x128xf32>
    %c1_390 = arith.constant 1 : index
    %c0_391 = arith.constant 0 : index
    %c0_392 = arith.constant 0 : index
    %714 = vector.load %arg30[%c1_390, %c0_391, %c0_392] : memref<3x128x512xbf16, #tpu.memory_space<vmem>>, vector<1x128x512xbf16>
    %715 = vector.shape_cast %714 : vector<1x128x512xbf16> to vector<128x512xbf16>
    %716 = arith.extf %715 : vector<128x512xbf16> to vector<128x512xf32>
    %cst_393 = arith.constant dense<0.000000e+00> : vector<2x512xf32>
    %717 = tpu.matmul %713, %716, %cst_393 {dimension_numbers = #tpu.dot_dimension_numbers<[1], [0], [0], [1], [0, 0, 1, 1], [], []>} : vector<2x128xf32>, vector<128x512xf32>, vector<2x512xf32> -> vector<2x512xf32>
    %c1_394 = arith.constant 1 : index
    %c0_395 = arith.constant 0 : index
    %c0_396 = arith.constant 0 : index
    %718 = vector.load %arg31[%c1_394, %c0_395, %c0_396] : memref<3x1x512xf32, #tpu.memory_space<vmem>>, vector<1x1x512xf32>
    %719 = vector.shape_cast %718 : vector<1x1x512xf32> to vector<1x512xf32>
    %720 = vector.broadcast %719 : vector<1x512xf32> to vector<2x512xf32>
    %721 = arith.addf %717, %720 : vector<2x512xf32>
    %cst_397 = arith.constant 0.000000e+00 : f32
    %722 = vector.broadcast %cst_397 : f32 to vector<2x512xf32>
    %723 = arith.maximumf %721, %722 : vector<2x512xf32>
    %c1_398 = arith.constant 1 : index
    %c0_399 = arith.constant 0 : index
    %c0_400 = arith.constant 0 : index
    %724 = vector.load %arg32[%c1_398, %c0_399, %c0_400] : memref<3x512x128xbf16, #tpu.memory_space<vmem>>, vector<1x512x128xbf16>
    %725 = vector.shape_cast %724 : vector<1x512x128xbf16> to vector<512x128xbf16>
    %726 = arith.extf %725 : vector<512x128xbf16> to vector<512x128xf32>
    %cst_401 = arith.constant dense<0.000000e+00> : vector<2x128xf32>
    %727 = tpu.matmul %723, %726, %cst_401 {dimension_numbers = #tpu.dot_dimension_numbers<[1], [0], [0], [1], [0, 0, 1, 1], [], []>} : vector<2x512xf32>, vector<512x128xf32>, vector<2x128xf32> -> vector<2x128xf32>
    %c1_402 = arith.constant 1 : index
    %c0_403 = arith.constant 0 : index
    %c0_404 = arith.constant 0 : index
    %728 = vector.load %arg33[%c1_402, %c0_403, %c0_404] : memref<3x1x128xf32, #tpu.memory_space<vmem>>, vector<1x1x128xf32>
    %729 = vector.shape_cast %728 : vector<1x1x128xf32> to vector<1x128xf32>
    %730 = vector.broadcast %729 : vector<1x128xf32> to vector<2x128xf32>
    %731 = arith.addf %727, %730 : vector<2x128xf32>
    %732 = arith.addf %713, %731 : vector<2x128xf32>
    %c1_405 = arith.constant 1 : index
    %c0_406 = arith.constant 0 : index
    %c0_407 = arith.constant 0 : index
    %733 = vector.load %arg34[%c1_405, %c0_406, %c0_407] : memref<3x1x128xf32, #tpu.memory_space<vmem>>, vector<1x1x128xf32>
    %734 = vector.shape_cast %733 : vector<1x1x128xf32> to vector<1x128xf32>
    %c1_408 = arith.constant 1 : index
    %c0_409 = arith.constant 0 : index
    %c0_410 = arith.constant 0 : index
    %735 = vector.load %arg35[%c1_408, %c0_409, %c0_410] : memref<3x1x128xf32, #tpu.memory_space<vmem>>, vector<1x1x128xf32>
    %736 = vector.shape_cast %735 : vector<1x1x128xf32> to vector<1x128xf32>
    %cst_411 = arith.constant dense<0.000000e+00> : vector<2xf32>
    %737 = vector.multi_reduction <add>, %732, %cst_411 [1] : vector<2x128xf32> to vector<2xf32>
    %738 = vector.shape_cast %737 : vector<2xf32> to vector<2x1xf32>
    %cst_412 = arith.constant 1.280000e+02 : f32
    %739 = vector.broadcast %cst_412 : f32 to vector<2x1xf32>
    %740 = arith.divf %738, %739 : vector<2x1xf32>
    %741 = vector.broadcast %740 : vector<2x1xf32> to vector<2x128xf32>
    %742 = arith.subf %732, %741 : vector<2x128xf32>
    %743 = arith.mulf %742, %742 : vector<2x128xf32>
    %cst_413 = arith.constant dense<0.000000e+00> : vector<2xf32>
    %744 = vector.multi_reduction <add>, %743, %cst_413 [1] : vector<2x128xf32> to vector<2xf32>
    %745 = vector.shape_cast %744 : vector<2xf32> to vector<2x1xf32>
    %cst_414 = arith.constant 1.280000e+02 : f32
    %746 = vector.broadcast %cst_414 : f32 to vector<2x1xf32>
    %747 = arith.divf %745, %746 : vector<2x1xf32>
    %748 = vector.broadcast %740 : vector<2x1xf32> to vector<2x128xf32>
    %749 = arith.subf %732, %748 : vector<2x128xf32>
    %cst_415 = arith.constant 9.99999974E-6 : f32
    %750 = vector.broadcast %cst_415 : f32 to vector<2x1xf32>
    %751 = arith.addf %747, %750 : vector<2x1xf32>
    %752 = math.rsqrt %751 : vector<2x1xf32>
    %753 = vector.broadcast %752 : vector<2x1xf32> to vector<2x128xf32>
    %754 = arith.mulf %749, %753 : vector<2x128xf32>
    %755 = vector.broadcast %734 : vector<1x128xf32> to vector<2x128xf32>
    %756 = arith.mulf %754, %755 : vector<2x128xf32>
    %757 = vector.broadcast %736 : vector<1x128xf32> to vector<2x128xf32>
    %758 = arith.addf %756, %757 : vector<2x128xf32>
    %c2_416 = arith.constant 2 : index
    %c0_417 = arith.constant 0 : index
    %c0_418 = arith.constant 0 : index
    %759 = vector.load %arg26[%c2_416, %c0_417, %c0_418] : memref<3x128x128xbf16, #tpu.memory_space<vmem>>, vector<1x128x128xbf16>
    %760 = vector.shape_cast %759 : vector<1x128x128xbf16> to vector<128x128xbf16>
    %761 = arith.extf %760 : vector<128x128xbf16> to vector<128x128xf32>
    %cst_419 = arith.constant dense<0.000000e+00> : vector<2x128xf32>
    %762 = tpu.matmul %758, %761, %cst_419 {dimension_numbers = #tpu.dot_dimension_numbers<[1], [0], [0], [1], [0, 0, 1, 1], [], []>} : vector<2x128xf32>, vector<128x128xf32>, vector<2x128xf32> -> vector<2x128xf32>
    %c2_420 = arith.constant 2 : index
    %c0_421 = arith.constant 0 : index
    %c0_422 = arith.constant 0 : index
    %763 = vector.load %arg27[%c2_420, %c0_421, %c0_422] : memref<3x1x128xf32, #tpu.memory_space<vmem>>, vector<1x1x128xf32>
    %764 = vector.shape_cast %763 : vector<1x1x128xf32> to vector<1x128xf32>
    %765 = vector.broadcast %764 : vector<1x128xf32> to vector<2x128xf32>
    %766 = arith.addf %762, %765 : vector<2x128xf32>
    %767 = arith.addf %758, %766 : vector<2x128xf32>
    %c2_423 = arith.constant 2 : index
    %c0_424 = arith.constant 0 : index
    %c0_425 = arith.constant 0 : index
    %768 = vector.load %arg28[%c2_423, %c0_424, %c0_425] : memref<3x1x128xf32, #tpu.memory_space<vmem>>, vector<1x1x128xf32>
    %769 = vector.shape_cast %768 : vector<1x1x128xf32> to vector<1x128xf32>
    %c2_426 = arith.constant 2 : index
    %c0_427 = arith.constant 0 : index
    %c0_428 = arith.constant 0 : index
    %770 = vector.load %arg29[%c2_426, %c0_427, %c0_428] : memref<3x1x128xf32, #tpu.memory_space<vmem>>, vector<1x1x128xf32>
    %771 = vector.shape_cast %770 : vector<1x1x128xf32> to vector<1x128xf32>
    %cst_429 = arith.constant dense<0.000000e+00> : vector<2xf32>
    %772 = vector.multi_reduction <add>, %767, %cst_429 [1] : vector<2x128xf32> to vector<2xf32>
    %773 = vector.shape_cast %772 : vector<2xf32> to vector<2x1xf32>
    %cst_430 = arith.constant 1.280000e+02 : f32
    %774 = vector.broadcast %cst_430 : f32 to vector<2x1xf32>
    %775 = arith.divf %773, %774 : vector<2x1xf32>
    %776 = vector.broadcast %775 : vector<2x1xf32> to vector<2x128xf32>
    %777 = arith.subf %767, %776 : vector<2x128xf32>
    %778 = arith.mulf %777, %777 : vector<2x128xf32>
    %cst_431 = arith.constant dense<0.000000e+00> : vector<2xf32>
    %779 = vector.multi_reduction <add>, %778, %cst_431 [1] : vector<2x128xf32> to vector<2xf32>
    %780 = vector.shape_cast %779 : vector<2xf32> to vector<2x1xf32>
    %cst_432 = arith.constant 1.280000e+02 : f32
    %781 = vector.broadcast %cst_432 : f32 to vector<2x1xf32>
    %782 = arith.divf %780, %781 : vector<2x1xf32>
    %783 = vector.broadcast %775 : vector<2x1xf32> to vector<2x128xf32>
    %784 = arith.subf %767, %783 : vector<2x128xf32>
    %cst_433 = arith.constant 9.99999974E-6 : f32
    %785 = vector.broadcast %cst_433 : f32 to vector<2x1xf32>
    %786 = arith.addf %782, %785 : vector<2x1xf32>
    %787 = math.rsqrt %786 : vector<2x1xf32>
    %788 = vector.broadcast %787 : vector<2x1xf32> to vector<2x128xf32>
    %789 = arith.mulf %784, %788 : vector<2x128xf32>
    %790 = vector.broadcast %769 : vector<1x128xf32> to vector<2x128xf32>
    %791 = arith.mulf %789, %790 : vector<2x128xf32>
    %792 = vector.broadcast %771 : vector<1x128xf32> to vector<2x128xf32>
    %793 = arith.addf %791, %792 : vector<2x128xf32>
    %c2_434 = arith.constant 2 : index
    %c0_435 = arith.constant 0 : index
    %c0_436 = arith.constant 0 : index
    %794 = vector.load %arg30[%c2_434, %c0_435, %c0_436] : memref<3x128x512xbf16, #tpu.memory_space<vmem>>, vector<1x128x512xbf16>
    %795 = vector.shape_cast %794 : vector<1x128x512xbf16> to vector<128x512xbf16>
    %796 = arith.extf %795 : vector<128x512xbf16> to vector<128x512xf32>
    %cst_437 = arith.constant dense<0.000000e+00> : vector<2x512xf32>
    %797 = tpu.matmul %793, %796, %cst_437 {dimension_numbers = #tpu.dot_dimension_numbers<[1], [0], [0], [1], [0, 0, 1, 1], [], []>} : vector<2x128xf32>, vector<128x512xf32>, vector<2x512xf32> -> vector<2x512xf32>
    %c2_438 = arith.constant 2 : index
    %c0_439 = arith.constant 0 : index
    %c0_440 = arith.constant 0 : index
    %798 = vector.load %arg31[%c2_438, %c0_439, %c0_440] : memref<3x1x512xf32, #tpu.memory_space<vmem>>, vector<1x1x512xf32>
    %799 = vector.shape_cast %798 : vector<1x1x512xf32> to vector<1x512xf32>
    %800 = vector.broadcast %799 : vector<1x512xf32> to vector<2x512xf32>
    %801 = arith.addf %797, %800 : vector<2x512xf32>
    %cst_441 = arith.constant 0.000000e+00 : f32
    %802 = vector.broadcast %cst_441 : f32 to vector<2x512xf32>
    %803 = arith.maximumf %801, %802 : vector<2x512xf32>
    %c2_442 = arith.constant 2 : index
    %c0_443 = arith.constant 0 : index
    %c0_444 = arith.constant 0 : index
    %804 = vector.load %arg32[%c2_442, %c0_443, %c0_444] : memref<3x512x128xbf16, #tpu.memory_space<vmem>>, vector<1x512x128xbf16>
    %805 = vector.shape_cast %804 : vector<1x512x128xbf16> to vector<512x128xbf16>
    %806 = arith.extf %805 : vector<512x128xbf16> to vector<512x128xf32>
    %cst_445 = arith.constant dense<0.000000e+00> : vector<2x128xf32>
    %807 = tpu.matmul %803, %806, %cst_445 {dimension_numbers = #tpu.dot_dimension_numbers<[1], [0], [0], [1], [0, 0, 1, 1], [], []>} : vector<2x512xf32>, vector<512x128xf32>, vector<2x128xf32> -> vector<2x128xf32>
    %c2_446 = arith.constant 2 : index
    %c0_447 = arith.constant 0 : index
    %c0_448 = arith.constant 0 : index
    %808 = vector.load %arg33[%c2_446, %c0_447, %c0_448] : memref<3x1x128xf32, #tpu.memory_space<vmem>>, vector<1x1x128xf32>
    %809 = vector.shape_cast %808 : vector<1x1x128xf32> to vector<1x128xf32>
    %810 = vector.broadcast %809 : vector<1x128xf32> to vector<2x128xf32>
    %811 = arith.addf %807, %810 : vector<2x128xf32>
    %812 = arith.addf %793, %811 : vector<2x128xf32>
    %c2_449 = arith.constant 2 : index
    %c0_450 = arith.constant 0 : index
    %c0_451 = arith.constant 0 : index
    %813 = vector.load %arg34[%c2_449, %c0_450, %c0_451] : memref<3x1x128xf32, #tpu.memory_space<vmem>>, vector<1x1x128xf32>
    %814 = vector.shape_cast %813 : vector<1x1x128xf32> to vector<1x128xf32>
    %c2_452 = arith.constant 2 : index
    %c0_453 = arith.constant 0 : index
    %c0_454 = arith.constant 0 : index
    %815 = vector.load %arg35[%c2_452, %c0_453, %c0_454] : memref<3x1x128xf32, #tpu.memory_space<vmem>>, vector<1x1x128xf32>
    %816 = vector.shape_cast %815 : vector<1x1x128xf32> to vector<1x128xf32>
    %cst_455 = arith.constant dense<0.000000e+00> : vector<2xf32>
    %817 = vector.multi_reduction <add>, %812, %cst_455 [1] : vector<2x128xf32> to vector<2xf32>
    %818 = vector.shape_cast %817 : vector<2xf32> to vector<2x1xf32>
    %cst_456 = arith.constant 1.280000e+02 : f32
    %819 = vector.broadcast %cst_456 : f32 to vector<2x1xf32>
    %820 = arith.divf %818, %819 : vector<2x1xf32>
    %821 = vector.broadcast %820 : vector<2x1xf32> to vector<2x128xf32>
    %822 = arith.subf %812, %821 : vector<2x128xf32>
    %823 = arith.mulf %822, %822 : vector<2x128xf32>
    %cst_457 = arith.constant dense<0.000000e+00> : vector<2xf32>
    %824 = vector.multi_reduction <add>, %823, %cst_457 [1] : vector<2x128xf32> to vector<2xf32>
    %825 = vector.shape_cast %824 : vector<2xf32> to vector<2x1xf32>
    %cst_458 = arith.constant 1.280000e+02 : f32
    %826 = vector.broadcast %cst_458 : f32 to vector<2x1xf32>
    %827 = arith.divf %825, %826 : vector<2x1xf32>
    %828 = vector.broadcast %820 : vector<2x1xf32> to vector<2x128xf32>
    %829 = arith.subf %812, %828 : vector<2x128xf32>
    %cst_459 = arith.constant 9.99999974E-6 : f32
    %830 = vector.broadcast %cst_459 : f32 to vector<2x1xf32>
    %831 = arith.addf %827, %830 : vector<2x1xf32>
    %832 = math.rsqrt %831 : vector<2x1xf32>
    %833 = vector.broadcast %832 : vector<2x1xf32> to vector<2x128xf32>
    %834 = arith.mulf %829, %833 : vector<2x128xf32>
    %835 = vector.broadcast %814 : vector<1x128xf32> to vector<2x128xf32>
    %836 = arith.mulf %834, %835 : vector<2x128xf32>
    %837 = vector.broadcast %816 : vector<1x128xf32> to vector<2x128xf32>
    %838 = arith.addf %836, %837 : vector<2x128xf32>
    %c0_460 = arith.constant 0 : index
    %c0_461 = arith.constant 0 : index
    %839 = vector.load %arg36[%c0_460, %c0_461] : memref<128x128xbf16, #tpu.memory_space<vmem>>, vector<128x128xbf16>
    %840 = arith.extf %839 : vector<128x128xbf16> to vector<128x128xf32>
    %cst_462 = arith.constant dense<0.000000e+00> : vector<2x128xf32>
    %841 = tpu.matmul %838, %840, %cst_462 {dimension_numbers = #tpu.dot_dimension_numbers<[1], [0], [0], [1], [0, 0, 1, 1], [], []>} : vector<2x128xf32>, vector<128x128xf32>, vector<2x128xf32> -> vector<2x128xf32>
    %c0_463 = arith.constant 0 : index
    %c0_464 = arith.constant 0 : index
    %842 = vector.load %arg37[%c0_463, %c0_464] : memref<1x128xf32, #tpu.memory_space<vmem>>, vector<1x128xf32>
    %843 = vector.broadcast %842 : vector<1x128xf32> to vector<2x128xf32>
    %844 = arith.addf %841, %843 : vector<2x128xf32>
    %c0_465 = arith.constant 0 : index
    %c0_466 = arith.constant 0 : index
    %845 = vector.load %arg38[%c0_465, %c0_466] : memref<1x128xf32, #tpu.memory_space<vmem>>, vector<1x128xf32>
    %c0_467 = arith.constant 0 : index
    %c0_468 = arith.constant 0 : index
    %846 = vector.load %arg39[%c0_467, %c0_468] : memref<1x128xf32, #tpu.memory_space<vmem>>, vector<1x128xf32>
    %cst_469 = arith.constant dense<0.000000e+00> : vector<2xf32>
    %847 = vector.multi_reduction <add>, %844, %cst_469 [1] : vector<2x128xf32> to vector<2xf32>
    %848 = vector.shape_cast %847 : vector<2xf32> to vector<2x1xf32>
    %cst_470 = arith.constant 1.280000e+02 : f32
    %849 = vector.broadcast %cst_470 : f32 to vector<2x1xf32>
    %850 = arith.divf %848, %849 : vector<2x1xf32>
    %851 = vector.broadcast %850 : vector<2x1xf32> to vector<2x128xf32>
    %852 = arith.subf %844, %851 : vector<2x128xf32>
    %853 = arith.mulf %852, %852 : vector<2x128xf32>
    %cst_471 = arith.constant dense<0.000000e+00> : vector<2xf32>
    %854 = vector.multi_reduction <add>, %853, %cst_471 [1] : vector<2x128xf32> to vector<2xf32>
    %855 = vector.shape_cast %854 : vector<2xf32> to vector<2x1xf32>
    %cst_472 = arith.constant 1.280000e+02 : f32
    %856 = vector.broadcast %cst_472 : f32 to vector<2x1xf32>
    %857 = arith.divf %855, %856 : vector<2x1xf32>
    %858 = vector.broadcast %850 : vector<2x1xf32> to vector<2x128xf32>
    %859 = arith.subf %844, %858 : vector<2x128xf32>
    %cst_473 = arith.constant 9.99999974E-6 : f32
    %860 = vector.broadcast %cst_473 : f32 to vector<2x1xf32>
    %861 = arith.addf %857, %860 : vector<2x1xf32>
    %862 = math.rsqrt %861 : vector<2x1xf32>
    %863 = vector.broadcast %862 : vector<2x1xf32> to vector<2x128xf32>
    %864 = arith.mulf %859, %863 : vector<2x128xf32>
    %865 = vector.broadcast %845 : vector<1x128xf32> to vector<2x128xf32>
    %866 = arith.mulf %864, %865 : vector<2x128xf32>
    %867 = vector.broadcast %846 : vector<1x128xf32> to vector<2x128xf32>
    %868 = arith.addf %866, %867 : vector<2x128xf32>
    %c0_474 = arith.constant 0 : index
    %c0_475 = arith.constant 0 : index
    %869 = vector.load %arg40[%c0_474, %c0_475] : memref<128x128xbf16, #tpu.memory_space<vmem>>, vector<128x128xbf16>
    %870 = arith.extf %869 : vector<128x128xbf16> to vector<128x128xf32>
    %cst_476 = arith.constant dense<0.000000e+00> : vector<2x128xf32>
    %871 = tpu.matmul %868, %870, %cst_476 {dimension_numbers = #tpu.dot_dimension_numbers<[1], [0], [0], [1], [0, 0, 1, 1], [], []>} : vector<2x128xf32>, vector<128x128xf32>, vector<2x128xf32> -> vector<2x128xf32>
    %c0_477 = arith.constant 0 : index
    %c0_478 = arith.constant 0 : index
    %872 = vector.load %arg41[%c0_477, %c0_478] : memref<1x128xf32, #tpu.memory_space<vmem>>, vector<1x128xf32>
    %873 = vector.broadcast %872 : vector<1x128xf32> to vector<2x128xf32>
    %874 = arith.addf %871, %873 : vector<2x128xf32>
    %c0_479 = arith.constant 0 : index
    %c0_480 = arith.constant 0 : index
    %875 = vector.load %arg49[%c0_479, %c0_480] : memref<2x128xf32, #tpu.memory_space<vmem>>, vector<2x128xf32>
    tpu.vector_store %arg49[%c0_479, %c0_480], %874 {strides = array<i32>} : memref<2x128xf32, #tpu.memory_space<vmem>>, vector<2x128xf32>,
    %c0_481 = arith.constant 0 : index
    %c0_482 = arith.constant 0 : index
    %876 = vector.load %arg42[%c0_481, %c0_482] : memref<128x128xbf16, #tpu.memory_space<vmem>>, vector<128x128xbf16>
    %877 = arith.extf %876 : vector<128x128xbf16> to vector<128x128xf32>
    %cst_483 = arith.constant dense<0.000000e+00> : vector<2x128xf32>
    %878 = tpu.matmul %874, %877, %cst_483 {dimension_numbers = #tpu.dot_dimension_numbers<[1], [0], [0], [1], [0, 0, 1, 1], [], []>} : vector<2x128xf32>, vector<128x128xf32>, vector<2x128xf32> -> vector<2x128xf32>
    %c0_484 = arith.constant 0 : index
    %c0_485 = arith.constant 0 : index
    %879 = vector.load %arg43[%c0_484, %c0_485] : memref<1x128xf32, #tpu.memory_space<vmem>>, vector<1x128xf32>
    %880 = vector.broadcast %879 : vector<1x128xf32> to vector<2x128xf32>
    %881 = arith.addf %878, %880 : vector<2x128xf32>
    %882 = arith.negf %881 : vector<2x128xf32>
    %883 = math.exp %882 : vector<2x128xf32>
    %cst_486 = arith.constant 1.000000e+00 : f32
    %884 = vector.broadcast %cst_486 : f32 to vector<2x128xf32>
    %885 = arith.addf %884, %883 : vector<2x128xf32>
    %886 = arith.divf %884, %885 : vector<2x128xf32>
    %887 = arith.mulf %881, %886 : vector<2x128xf32>
    %c0_487 = arith.constant 0 : index
    %c0_488 = arith.constant 0 : index
    %c0_489 = arith.constant 0 : index
    %888 = vector.load %arg44[%c0_487, %c0_488, %c0_489] : memref<2x128x128xbf16, #tpu.memory_space<vmem>>, vector<1x128x128xbf16>
    %889 = vector.shape_cast %888 : vector<1x128x128xbf16> to vector<128x128xbf16>
    %890 = arith.extf %889 : vector<128x128xbf16> to vector<128x128xf32>
    %cst_490 = arith.constant dense<0.000000e+00> : vector<2x128xf32>
    %891 = tpu.matmul %887, %890, %cst_490 {dimension_numbers = #tpu.dot_dimension_numbers<[1], [0], [0], [1], [0, 0, 1, 1], [], []>} : vector<2x128xf32>, vector<128x128xf32>, vector<2x128xf32> -> vector<2x128xf32>
    %c0_491 = arith.constant 0 : index
    %c0_492 = arith.constant 0 : index
    %c0_493 = arith.constant 0 : index
    %892 = vector.load %arg45[%c0_491, %c0_492, %c0_493] : memref<2x1x128xf32, #tpu.memory_space<vmem>>, vector<1x1x128xf32>
    %893 = vector.shape_cast %892 : vector<1x1x128xf32> to vector<1x128xf32>
    %894 = vector.broadcast %893 : vector<1x128xf32> to vector<2x128xf32>
    %895 = arith.addf %891, %894 : vector<2x128xf32>
    %896 = arith.negf %895 : vector<2x128xf32>
    %897 = math.exp %896 : vector<2x128xf32>
    %cst_494 = arith.constant 1.000000e+00 : f32
    %898 = vector.broadcast %cst_494 : f32 to vector<2x128xf32>
    %899 = arith.addf %898, %897 : vector<2x128xf32>
    %900 = arith.divf %898, %899 : vector<2x128xf32>
    %901 = arith.mulf %895, %900 : vector<2x128xf32>
    %c1_495 = arith.constant 1 : index
    %c0_496 = arith.constant 0 : index
    %c0_497 = arith.constant 0 : index
    %902 = vector.load %arg44[%c1_495, %c0_496, %c0_497] : memref<2x128x128xbf16, #tpu.memory_space<vmem>>, vector<1x128x128xbf16>
    %903 = vector.shape_cast %902 : vector<1x128x128xbf16> to vector<128x128xbf16>
    %904 = arith.extf %903 : vector<128x128xbf16> to vector<128x128xf32>
    %cst_498 = arith.constant dense<0.000000e+00> : vector<2x128xf32>
    %905 = tpu.matmul %901, %904, %cst_498 {dimension_numbers = #tpu.dot_dimension_numbers<[1], [0], [0], [1], [0, 0, 1, 1], [], []>} : vector<2x128xf32>, vector<128x128xf32>, vector<2x128xf32> -> vector<2x128xf32>
    %c1_499 = arith.constant 1 : index
    %c0_500 = arith.constant 0 : index
    %c0_501 = arith.constant 0 : index
    %906 = vector.load %arg45[%c1_499, %c0_500, %c0_501] : memref<2x1x128xf32, #tpu.memory_space<vmem>>, vector<1x1x128xf32>
    %907 = vector.shape_cast %906 : vector<1x1x128xf32> to vector<1x128xf32>
    %908 = vector.broadcast %907 : vector<1x128xf32> to vector<2x128xf32>
    %909 = arith.addf %905, %908 : vector<2x128xf32>
    %910 = arith.negf %909 : vector<2x128xf32>
    %911 = math.exp %910 : vector<2x128xf32>
    %cst_502 = arith.constant 1.000000e+00 : f32
    %912 = vector.broadcast %cst_502 : f32 to vector<2x128xf32>
    %913 = arith.addf %912, %911 : vector<2x128xf32>
    %914 = arith.divf %912, %913 : vector<2x128xf32>
    %915 = arith.mulf %909, %914 : vector<2x128xf32>
    %c0_503 = arith.constant 0 : index
    %c0_504 = arith.constant 0 : index
    %916 = vector.load %arg46[%c0_503, %c0_504] : memref<128x10xbf16, #tpu.memory_space<vmem>>, vector<128x10xbf16>
    %917 = arith.extf %916 : vector<128x10xbf16> to vector<128x10xf32>
    %cst_505 = arith.constant dense<0.000000e+00> : vector<2x10xf32>
    %918 = tpu.matmul %915, %917, %cst_505 {dimension_numbers = #tpu.dot_dimension_numbers<[1], [0], [0], [1], [0, 0, 1, 1], [], []>} : vector<2x128xf32>, vector<128x10xf32>, vector<2x10xf32> -> vector<2x10xf32>
    %c0_506 = arith.constant 0 : index
    %c0_507 = arith.constant 0 : index
    %919 = vector.load %arg47[%c0_506, %c0_507] : memref<1x10xf32, #tpu.memory_space<vmem>>, vector<1x10xf32>
    %920 = vector.broadcast %919 : vector<1x10xf32> to vector<2x10xf32>
    %921 = arith.addf %918, %920 : vector<2x10xf32>
    %922 = tpu.iota {dimensions = array<i32: 1>} : vector<2x10xi32>
    %c5_i32 = arith.constant 5 : i32
    %923 = vector.broadcast %c5_i32 : i32 to vector<2x10xi32>
    %924 = arith.cmpi slt, %922, %923 : vector<2x10xi32>
    %cst_508 = arith.constant 0.000000e+00 : f32
    %925 = vector.broadcast %cst_508 : f32 to vector<2x10xf32>
    %926 = arith.maximumf %921, %925 : vector<2x10xf32>
    %927 = vector.broadcast %cst_508 : f32 to vector<2x10xf32>
    %928 = arith.subf %921, %927 : vector<2x10xf32>
    %929 = arith.cmpf one, %928, %928 : vector<2x10xf32>
    %930 = vector.broadcast %cst_508 : f32 to vector<2x10xf32>
    %931 = arith.addf %921, %930 : vector<2x10xf32>
    %932 = math.absf %928 : vector<2x10xf32>
    %cst_509 = arith.constant 0.000000e+00 : f32
    %933 = vector.broadcast %cst_509 : f32 to vector<2x10xf32>
    %934 = arith.subf %933, %932 : vector<2x10xf32>
    %935 = math.exp %934 : vector<2x10xf32>
    %936 = math.log1p %935 : vector<2x10xf32>
    %937 = arith.addf %926, %936 : vector<2x10xf32>
    %938 = arith.select %929, %931, %937 : vector<2x10xi1>, vector<2x10xf32>
    %939 = arith.select %924, %921, %938 : vector<2x10xi1>, vector<2x10xf32>
    %c0_510 = arith.constant 0 : index
    %c0_511 = arith.constant 0 : index
    %940 = vector.load %arg50[%c0_510, %c0_511] : memref<2x10xf32, #tpu.memory_space<vmem>>, vector<2x10xf32>
    tpu.vector_store %arg50[%c0_510, %c0_511], %939 {strides = array<i32>} : memref<2x10xf32, #tpu.memory_space<vmem>>, vector<2x10xf32>,
    return
  }
}

</mosaic_0001>

<bundles_post_ra>
// kernel: adapter_forward.1
= control target key start
LH: loop header
LB: loop body
LE: loop exit
PB: predicated region body
PF: predicated region fallthrough
CT: control target
= control target key end

     0   :  { %s16251_s6 = smov 1   ;;  %s16252_s10 = smov 2   ;;  %s17609_s0 = inlined_call_operand.smem [shape: u32[51], index: -1, kind: input, shape index: {}] }
   0x1   :  { %s16356_s5 = sld [smem:[%s17609_s0]]   ;;  %s16253_s14 = smov 3  }
   0x2   :  { %s16361_s9 = sld [smem:[%s17609_s0 + %s16251_s6]]   ;;  %s16254_s18 = smov 4  }
   0x3   :  { %s16366_s13 = sld [smem:[%s17609_s0 + %s16252_s10]]   ;;  %s16255_s22 = smov 5  }
   0x4   :  { %s16371_s17 = sld [smem:[%s17609_s0 + %s16253_s14]]   ;;  %s16256_s26 = smov 6  }
   0x5   :  { %s16376_s21 = sld [smem:[%s17609_s0 + %s16254_s18]]   ;;  %s16257_s30 = smov 7  }
   0x6   :  { %s16381_s25 = sld [smem:[%s17609_s0 + %s16255_s22]]   ;;  %s16258_s4 = smov 8  }
   0x7   :  { %17617 = sst [smem:[#allocation83_spill]] %s16356_s5  ;;  %s16259_s10 = smov 9  }
   0x8   :  { %17618 = sst [smem:[#allocation84_spill]] %s16361_s9  ;;  %s16260_s15 = smov 10  }
   0x9   :  { %17619 = sst [smem:[#allocation85_spill]] %s16366_s13  ;;  %s16261_s20 = smov 11  }
   0xa   :  { %17620 = sst [smem:[#allocation86_spill]] %s16371_s17  ;;  %s16263_s1 = smov 13  }
   0xb   :  { %17621 = sst [smem:[#allocation87_spill]] %s16376_s21  ;;  %s16264_s7 = smov 14  }
   0xc   :  { %17622 = sst [smem:[#allocation88_spill]] %s16381_s25  ;;  %s16266_s22 = smov 16  }
   0xd   :  { %s16386_s29 = sld [smem:[%s17609_s0 + %s16256_s26]]   ;;  %s16262_s26 = smov 12  }
   0xe   :  { %s16391_s3 = sld [smem:[%s17609_s0 + %s16257_s30]]   ;;  %s16267_s28 = smov 17  }
   0xf   :  { %s16396_s8 = sld [smem:[%s17609_s0 + %s16258_s4]]  }
  0x10   :  { %s16401_s14 = sld [smem:[%s17609_s0 + %s16259_s10]]  }
  0x11   :  { %s16406_s19 = sld [smem:[%s17609_s0 + %s16260_s15]]   ;;  %s16265_s15 = smov 15  }
  0x12   :  { %s16411_s24 = sld [smem:[%s17609_s0 + %s16261_s20]]  }
  0x13   :  { %s16416_s30 = sld [smem:[%s17609_s0 + %s16262_s26]]  }
  0x14   :  { %17623 = sst [smem:[#allocation89_spill]] %s16391_s3 }
  0x15   :  { %s16421_s6 = sld [smem:[%s17609_s0 + %s16263_s1]]  }
  0x16   :  { %17624 = sst [smem:[#allocation90_spill]] %s16401_s14 }
  0x17   :  { %s16426_s12 = sld [smem:[%s17609_s0 + %s16264_s7]]   ;;  %s16268_s7 = smov 18  }
  0x18   :  { %17625 = sst [smem:[#allocation91_spill]] %s16411_s24 }
  0x19   :  { %s16431_s20 = sld [smem:[%s17609_s0 + %s16265_s15]]   ;;  %s16269_s15 = smov 19  }
  0x1a   :  { %s16436_s27 = sld [smem:[%s17609_s0 + %s16266_s22]]   ;;  %s16270_s22 = smov 20  }
  0x1b   :  { %17626 = sst [smem:[#allocation92_spill]] %s16421_s6 }
  0x1c   :  { %s16441_s4 = sld [smem:[%s17609_s0 + %s16267_s28]]   ;;  %s16271_s28 = smov 21  }
  0x1d   :  { %17627 = sst [smem:[#allocation93_spill]] %s16426_s12 }
  0x1e   :  { %s16446_s21 = sld [smem:[%s17609_s0 + %s16268_s7]]   ;;  %s16272_s7 = smov 22  }
  0x1f   :  { %17628 = sst [smem:[#allocation94_spill]] %s16431_s20 }
  0x20   :  { %s16451_s17 = sld [smem:[%s17609_s0 + %s16269_s15]]   ;;  %s16273_s15 = smov 23  }
  0x21   :  { %s16456_s20 = sld [smem:[%s17609_s0 + %s16270_s22]]   ;;  %s16274_s22 = smov 24  }
  0x22   :  { %17629 = sst [smem:[#allocation95_spill]] %s16441_s4 }
  0x23   :  { %s16461_s13 = sld [smem:[%s17609_s0 + %s16271_s28]]   ;;  %s16275_s28 = smov 25  }
  0x24   :  { %s16466_s12 = sld [smem:[%s17609_s0 + %s16272_s7]]   ;;  %s16276_s7 = smov 26  }
  0x25   :  { %s16471_s9 = sld [smem:[%s17609_s0 + %s16273_s15]]   ;;  %s16277_s15 = smov 27  }
  0x26   :  { %17630 = sst [smem:[#allocation96_spill]] %s16451_s17 }
  0x27   :  { %s16476_s5 = sld [smem:[%s17609_s0 + %s16274_s22]]   ;;  %s16278_s22 = smov 28  }
  0x28   :  { %s16486_s17 = sld [smem:[%s17609_s0 + %s16276_s7]]   ;;  %s16280_s7 = smov 30  }
  0x29   :  { %17631 = sst [smem:[#allocation97_spill]] %s16461_s13 }
  0x2a   :  { %s16481_s13 = sld [smem:[%s17609_s0 + %s16275_s28]]   ;;  %s16279_s28 = smov 29  }
  0x2b   :  { %17632 = sst [smem:[#allocation98_spill]] %s16471_s9 }
  0x2c   :  { %s16491_s9 = sld [smem:[%s17609_s0 + %s16277_s15]]   ;;  %s16281_s15 = smov 31  }
  0x2d   :  { %s16496_s4 = sld [smem:[%s17609_s0 + %s16278_s22]]   ;;  %s16282_s22 = smov 32  }
  0x2e   :  { %s16506_s6 = sld [smem:[%s17609_s0 + %s16280_s7]]   ;;  %s16284_s7 = smov 34  }
  0x2f   :  { %s16516_s24 = sld [smem:[%s17609_s0 + %s16282_s22]]   ;;  %s16286_s22 = smov 36  }
  0x30   :  { %17633 = sst [smem:[#allocation99_spill]] %s16481_s13 }
  0x31   :  { %s16501_s13 = sld [smem:[%s17609_s0 + %s16279_s28]]   ;;  %s16283_s28 = smov 33  }
  0x32   :  { %17634 = sst [smem:[#allocation100_spill]] %s16491_s9 }
  0x33   :  { %s16511_s9 = sld [smem:[%s17609_s0 + %s16281_s15]]   ;;  %s16285_s15 = smov 35  }
  0x34   :  { %s16526_s14 = sld [smem:[%s17609_s0 + %s16284_s7]]   ;;  %s16288_s7 = smov 38  }
  0x35   :  { %s16536_s3 = sld [smem:[%s17609_s0 + %s16286_s22]]   ;;  %s16290_s22 = smov 40  }
  0x36   :  { %s16546_s25 = sld [smem:[%s17609_s0 + %s16288_s7]]   ;;  %s16292_s7 = smov 42  }
  0x37   :  { %17635 = sst [smem:[#allocation101_spill]] %s16501_s13 }
  0x38   :  { %s16521_s13 = sld [smem:[%s17609_s0 + %s16283_s28]]   ;;  %s16287_s28 = smov 37  }
  0x39   :  { %17636 = sst [smem:[#allocation102_spill]] %s16511_s9 }
  0x3a   :  { %s16531_s9 = sld [smem:[%s17609_s0 + %s16285_s15]]   ;;  %s16289_s15 = smov 39  }
  0x3b   :  { %17639 = sst [smem:[#allocation105_spill]] %s16536_s3 }
  0x3c   :  { %17641 = sst [smem:[#allocation107_spill]] %s16546_s25 }
  0x3d   :  { %s16556_s3 = sld [smem:[%s17609_s0 + %s16290_s22]]   ;;  %s16294_s22 = smov 44  }
  0x3e   :  { %17637 = sst [smem:[#allocation103_spill]] %s16521_s13 }
  0x3f   :  { %s16541_s13 = sld [smem:[%s17609_s0 + %s16287_s28]]   ;;  %s16291_s28 = smov 41  }
  0x40   :  { %17638 = sst [smem:[#allocation104_spill]] %s16531_s9 }
  0x41   :  { %s16551_s9 = sld [smem:[%s17609_s0 + %s16289_s15]]   ;;  %s16293_s15 = smov 43  }
  0x42   :  { %s16566_s25 = sld [smem:[%s17609_s0 + %s16292_s7]]   ;;  %s16296_s7 = smov 46  }
  0x43   :  { %17643 = sst [smem:[#allocation109_spill]] %s16556_s3 }
  0x44   :  { %s16576_s3 = sld [smem:[%s17609_s0 + %s16294_s22]]   ;;  %s16298_s22 = smov 48  }
  0x45   :  { %17640 = sst [smem:[#allocation106_spill]] %s16541_s13 }
  0x46   :  { %s16561_s13 = sld [smem:[%s17609_s0 + %s16291_s28]]   ;;  %s16295_s28 = smov 45  }
  0x47   :  { %17642 = sst [smem:[#allocation108_spill]] %s16551_s9 }
  0x48   :  { %17645 = sst [smem:[#allocation111_spill]] %s16566_s25 }
  0x49   :  { %s16571_s9 = sld [smem:[%s17609_s0 + %s16293_s15]]   ;;  %s16297_s15 = smov 47  }
  0x4a   :  { %17647 = sst [smem:[#allocation113_spill]] %s16576_s3 }
  0x4b   :  { %s16586_s25 = sld [smem:[%s17609_s0 + %s16296_s7]]   ;;  %s16300_s7 = smov 50  }
  0x4c   :  { %17644 = sst [smem:[#allocation110_spill]] %s16561_s13 }
  0x4d   :  { %s16581_s13 = sld [smem:[%s17609_s0 + %s16295_s28]]   ;;  %s16299_s28 = smov 49  }
  0x4e   :  { %s16596_s3 = sld [smem:[%s17609_s0 + %s16298_s22]]  }
  0x4f   :  { %17646 = sst [smem:[#allocation112_spill]] %s16571_s9 }
  0x50   :  { %s16591_s9 = sld [smem:[%s17609_s0 + %s16297_s15]]  }
  0x51   :  { %17649 = sst [smem:[#allocation115_spill]] %s16586_s25 }
  0x52   :  { %s16606_s25 = sld [smem:[%s17609_s0 + %s16300_s7]]  }
  0x53   :  { %17648 = sst [smem:[#allocation114_spill]] %s16581_s13 }
  0x54   :  { %s16601_s13 = sld [smem:[%s17609_s0 + %s16299_s28]]  }
  0x55   :  { %107 = vsyncpa [#allocation3], 0 }
  0x56   :  { %108 = vsyncpa [#allocation6], 0 }
  0x57   :  { %109 = vsyncpa [#allocation9], 0 }
  0x58   :  { %110 = vsyncpa [#allocation12], 0 }
  0x59   :  { %111 = vsyncpa [#allocation15], 0 }
  0x5a   :  { %112 = vsyncpa [#allocation18], 0 }
  0x5b   :  { %113 = vsyncpa [#allocation21], 0 }
  0x5c   :  { %114 = vsyncpa [#allocation24], 0 }
  0x5d   :  { %115 = vsyncpa [#allocation27], 0 }
  0x5e   :  { %116 = vsyncpa [#allocation30], 0 }
  0x5f   :  { %117 = vsyncpa [#allocation33], 0 }
  0x60   :  { %118 = vsyncpa [#allocation36], 0 }
  0x61   :  { %119 = vsyncpa [#allocation39], 0 }
  0x62   :  { %120 = vsyncpa [#allocation42], 0 }
  0x63   :  { %121 = vsyncpa [#allocation45], 0 }
  0x64   :  { %122 = vsyncpa [#allocation48], 0 }
  0x65   :  { %123 = vsyncpa [#allocation51], 0 }
  0x66   :  { %124 = vsyncpa [#allocation54], 0 }
  0x67   :  { %125 = vsyncpa [#allocation57], 0 }
  0x68   :  { %126 = vsyncpa [#allocation4], 0 }
  0x69   :  { %127 = vsyncpa [#allocation61], 0  ;;  %s16301_s0 = smov [#allocation5]   ;;  %s16302_s16 = smov [#allocation8]  }
  0x6a   :  { %s154_s15 = sshll.u32 %s16301_s0, 4  ;;  %s176_s18 = sshll.u32 %s16302_s16, 4  ;;  %s155_s15 = int_to_ptr.vmem [resolvable:$true] %s154_s15  ;;  %s177_s18 = int_to_ptr.vmem [resolvable:$true] %s176_s18 }
  0x6b   :  { %s15437_s22 = scalar_lea.vmem %s155_s15, 16  ;;  %s15441_s23 = scalar_lea.vmem %s155_s15, 32 }
  0x6c   :  { %p15438_p0 = scmp.ne.s32.totalorder %s155_s15, %s15437_s22  ;;  %p15442_p1 = scmp.lt.s32.totalorder %s155_s15, %s155_s15 }
  0x6d   :  { %p15443_p2 = scmp.lt.s32.totalorder %s15441_s23, %s15437_s22 }
  0x6f   :  { %p15444_p3 = por %p15443_p2, %p15442_p1 }
  0x71   :  { %p15445_p4 = pnand %p15444_p3, %p15438_p0 }
  0x73   :  { %15448 = shalt.err (!%p15445_p4)
}
  0x74   :  { %157 = dma.hbm_to_vmem [thread:$0]  %s16386_s29, 16, %s155_s15, [#allocation6]  }
  0x75   :  { %s15457_s26 = scalar_lea.vmem %s177_s18, 16  ;;  %s15461_s28 = scalar_lea.vmem %s177_s18, 32 }
  0x76   :  { %p15458_p5 = scmp.ne.s32.totalorder %s177_s18, %s15457_s26  ;;  %p15462_p6 = scmp.lt.s32.totalorder %s177_s18, %s177_s18 }
  0x77   :  { %p15463_p7 = scmp.lt.s32.totalorder %s15461_s28, %s15457_s26 }
  0x79   :  { %p15464_p8 = por %p15463_p7, %p15462_p6 }
  0x7b   :  { %p15465_p9 = pnand %p15464_p8, %p15458_p5 }
  0x7d   :  { %15468 = shalt.err (!%p15465_p9)
}
  0x7e   :  { %179 = dma.hbm_to_vmem [thread:$0]  %s16396_s8, 16, %s177_s18, [#allocation9]  }
  0x7f   :  { %s16303_s1 = smov [#allocation11]   ;;  %s16304_s7 = smov [#allocation14]  }
  0x80   :  { %s196_s2 = sshll.u32 %s16303_s1, 4  ;;  %s218_s10 = sshll.u32 %s16304_s7, 4  ;;  %s197_s2 = int_to_ptr.vmem [resolvable:$true] %s196_s2  ;;  %s219_s10 = int_to_ptr.vmem [resolvable:$true] %s218_s10 }
  0x81   :  { %s15477_s11 = scalar_lea.vmem %s197_s2, 16  ;;  %s15481_s0 = scalar_lea.vmem %s197_s2, 32 }
  0x82   :  { %p15478_p10 = scmp.ne.s32.totalorder %s197_s2, %s15477_s11  ;;  %p15482_p11 = scmp.lt.s32.totalorder %s197_s2, %s197_s2 }
  0x83   :  { %p15483_p12 = scmp.lt.s32.totalorder %s15481_s0, %s15477_s11 }
  0x85   :  { %p15484_p13 = por %p15483_p12, %p15482_p11 }
  0x87   :  { %p15485_p0 = pnand %p15484_p13, %p15478_p10 }
  0x89   :  { %15488 = shalt.err (!%p15485_p0)
}
  0x8a   :  { %199 = dma.hbm_to_vmem [thread:$0]  %s16406_s19, 16, %s197_s2, [#allocation12]  }
  0x8b   :  { %s15497_s29 = scalar_lea.vmem %s219_s10, 16  ;;  %s15501_s15 = scalar_lea.vmem %s219_s10, 32 }
  0x8c   :  { %p15498_p1 = scmp.ne.s32.totalorder %s219_s10, %s15497_s29  ;;  %p15502_p2 = scmp.lt.s32.totalorder %s219_s10, %s219_s10 }
  0x8d   :  { %p15503_p3 = scmp.lt.s32.totalorder %s15501_s15, %s15497_s29 }
  0x8f   :  { %p15504_p4 = por %p15503_p3, %p15502_p2 }
  0x91   :  { %p15505_p5 = pnand %p15504_p4, %p15498_p1 }
  0x93   :  { %15508 = shalt.err (!%p15505_p5)
}
  0x94   :  { %221 = dma.hbm_to_vmem [thread:$0]  %s16416_s30, 16, %s219_s10, [#allocation15]  }
  0x95   :  { %s16305_s8 = smov [#allocation17]  }
  0x96   :  { %s243_s16 = sshll.u32 %s16305_s8, 4  ;;  %s244_s16 = int_to_ptr.vmem [resolvable:$true] %s243_s16 }
  0x97   :  { %s15517_s18 = scalar_lea.vmem %s244_s16, 48  ;;  %s15521_s22 = scalar_lea.vmem %s244_s16, 64 }
  0x98   :  { %p15518_p6 = scmp.ne.s32.totalorder %s244_s16, %s15517_s18  ;;  %p15522_p7 = scmp.lt.s32.totalorder %s244_s16, %s244_s16 }
  0x99   :  { %p15523_p8 = scmp.lt.s32.totalorder %s15521_s22, %s15517_s18 }
  0x9b   :  { %p15524_p9 = por %p15523_p8, %p15522_p7 }
  0x9d   :  { %p15525_p10 = pnand %p15524_p9, %p15518_p6 }
  0x9f   :  { %15528 = shalt.err (!%p15525_p10)
}
  0xa0   :  { %s16306_s19 = smov 16   ;;  %s16307_s23 = smov 1  }
  0xa1   :  { %249 = dma.hbm_to_vmem [thread:$0]  %s16436_s27, 48, %s244_s16, [#allocation18], %s16306_s19, %s16306_s19, %s16307_s23  }
  0xa2   :  { %s16308_s26 = smov [#allocation20]   ;;  %s16309_s28 = smov [#allocation23]  }
  0xa3   :  { %s268_s30 = sshll.u32 %s16308_s26, 4  ;;  %s290_s1 = sshll.u32 %s16309_s28, 4  ;;  %s269_s30 = int_to_ptr.vmem [resolvable:$true] %s268_s30  ;;  %s291_s1 = int_to_ptr.vmem [resolvable:$true] %s290_s1 }
  0xa4   :  { %s15537_s2 = scalar_lea.vmem %s269_s30, 16  ;;  %s15541_s7 = scalar_lea.vmem %s269_s30, 32 }
  0xa5   :  { %p15538_p11 = scmp.ne.s32.totalorder %s269_s30, %s15537_s2  ;;  %p15542_p12 = scmp.lt.s32.totalorder %s269_s30, %s269_s30 }
  0xa6   :  { %p15543_p13 = scmp.lt.s32.totalorder %s15541_s7, %s15537_s2 }
  0xa8   :  { %p15544_p0 = por %p15543_p13, %p15542_p12 }
  0xaa   :  { %p15545_p1 = pnand %p15544_p0, %p15538_p11 }
  0xac   :  { %15548 = shalt.err (!%p15545_p1)
}
  0xad   :  { %271 = dma.hbm_to_vmem [thread:$0]  %s16446_s21, 16, %s269_s30, [#allocation21]  }
  0xae   :  { %s15557_s10 = scalar_lea.vmem %s291_s1, 16  ;;  %s15561_s11 = scalar_lea.vmem %s291_s1, 32 }
  0xaf   :  { %p15558_p2 = scmp.ne.s32.totalorder %s291_s1, %s15557_s10  ;;  %p15562_p3 = scmp.lt.s32.totalorder %s291_s1, %s291_s1 }
  0xb0   :  { %p15563_p4 = scmp.lt.s32.totalorder %s15561_s11, %s15557_s10 }
  0xb2   :  { %p15564_p5 = por %p15563_p4, %p15562_p3 }
  0xb4   :  { %p15565_p6 = pnand %p15564_p5, %p15558_p2 }
  0xb6   :  { %15568 = shalt.err (!%p15565_p6)
}
  0xb7   :  { %293 = dma.hbm_to_vmem [thread:$0]  %s16456_s20, 16, %s291_s1, [#allocation24]  }
  0xb8   :  { %s16310_s27 = smov [#allocation26]   ;;  %s16311_s29 = smov [#allocation29]  }
  0xb9   :  { %s310_s0 = sshll.u32 %s16310_s27, 4  ;;  %s332_s15 = sshll.u32 %s16311_s29, 4  ;;  %s311_s0 = int_to_ptr.vmem [resolvable:$true] %s310_s0  ;;  %s333_s15 = int_to_ptr.vmem [resolvable:$true] %s332_s15 }
  0xba   :  { %s15577_s8 = scalar_lea.vmem %s311_s0, 16  ;;  %s15581_s16 = scalar_lea.vmem %s311_s0, 32 }
  0xbb   :  { %p15578_p7 = scmp.ne.s32.totalorder %s311_s0, %s15577_s8  ;;  %p15582_p8 = scmp.lt.s32.totalorder %s311_s0, %s311_s0 }
  0xbc   :  { %p15583_p9 = scmp.lt.s32.totalorder %s15581_s16, %s15577_s8 }
  0xbe   :  { %p15584_p10 = por %p15583_p9, %p15582_p8 }
  0xc0   :  { %p15585_p11 = pnand %p15584_p10, %p15578_p7 }
  0xc2   :  { %15588 = shalt.err (!%p15585_p11)
}
  0xc3   :  { %313 = dma.hbm_to_vmem [thread:$0]  %s16466_s12, 16, %s311_s0, [#allocation27]  }
  0xc4   :  { %s15597_s21 = scalar_lea.vmem %s333_s15, 16  ;;  %s15601_s18 = scalar_lea.vmem %s333_s15, 32 }
  0xc5   :  { %p15598_p12 = scmp.ne.s32.totalorder %s333_s15, %s15597_s21  ;;  %p15602_p13 = scmp.lt.s32.totalorder %s333_s15, %s333_s15 }
  0xc6   :  { %p15603_p0 = scmp.lt.s32.totalorder %s15601_s18, %s15597_s21 }
  0xc8   :  { %p15604_p1 = por %p15603_p0, %p15602_p13 }
  0xca   :  { %p15605_p2 = pnand %p15604_p1, %p15598_p12 }
  0xcc   :  { %15608 = shalt.err (!%p15605_p2)
}
  0xcd   :  { %335 = dma.hbm_to_vmem [thread:$0]  %s16476_s5, 16, %s333_s15, [#allocation30]  }
  0xce   :  { %s16312_s20 = smov [#allocation32]   ;;  %s16313_s26 = smov [#allocation35]  }
  0xcf   :  { %s351_s22 = sshll.u32 %s16312_s20, 4  ;;  %s375_s30 = sshll.u32 %s16313_s26, 4  ;;  %s352_s22 = int_to_ptr.vmem [resolvable:$true] %s351_s22  ;;  %s376_s30 = int_to_ptr.vmem [resolvable:$true] %s375_s30 }
  0xd0   :  { %s15617_s28 = scalar_lea.vmem %s352_s22, 3072  ;;  %p15622_p4 = scmp.lt.s32.totalorder %s352_s22, %s352_s22 }
  0xd1   :  { %p15618_p3 = scmp.ne.s32.totalorder %s352_s22, %s15617_s28  ;;  %p15623_p5 = scmp.lt.s32.totalorder %s15617_s28, %s15617_s28 }
  0xd3   :  { %p15624_p6 = por %p15623_p5, %p15622_p4 }
  0xd5   :  { %p15625_p7 = pnand %p15624_p6, %p15618_p3 }
  0xd7   :  { %15628 = shalt.err (!%p15625_p7)
}
  0xd8   :  { %s16314_s12 = smov 64   ;;  %s16315_s1 = smov 4  }
  0xd9   :  { %357 = dma.hbm_to_vmem [thread:$0]  %s16486_s17, 3072, %s352_s22, [#allocation33], %s16314_s12, %s16314_s12, %s16315_s1  }
  0xda   :  { %s15637_s5 = scalar_lea.vmem %s376_s30, 48  ;;  %s15641_s2 = scalar_lea.vmem %s376_s30, 64 }
  0xdb   :  { %p15638_p8 = scmp.ne.s32.totalorder %s376_s30, %s15637_s5  ;;  %p15642_p9 = scmp.lt.s32.totalorder %s376_s30, %s376_s30 }
  0xdc   :  { %p15643_p10 = scmp.lt.s32.totalorder %s15641_s2, %s15637_s5 }
  0xde   :  { %p15644_p11 = por %p15643_p10, %p15642_p9 }
  0xe0   :  { %p15645_p12 = pnand %p15644_p11, %p15638_p8 }
  0xe2   :  { %15648 = shalt.err (!%p15645_p12)
}
  0xe3   :  { %381 = dma.hbm_to_vmem [thread:$0]  %s16496_s4, 48, %s376_s30, [#allocation36], %s16306_s19, %s16306_s19, %s16307_s23  }
  0xe4   :  { %s16316_s7 = smov [#allocation38]  }
  0xe5   :  { %s399_s10 = sshll.u32 %s16316_s7, 4  ;;  %s400_s10 = int_to_ptr.vmem [resolvable:$true] %s399_s10 }
  0xe6   :  { %s15657_s11 = scalar_lea.vmem %s400_s10, 12288  ;;  %p15662_p0 = scmp.lt.s32.totalorder %s400_s10, %s400_s10 }
  0xe7   :  { %p15658_p13 = scmp.ne.s32.totalorder %s400_s10, %s15657_s11  ;;  %p15663_p1 = scmp.lt.s32.totalorder %s15657_s11, %s15657_s11 }
  0xe9   :  { %p15664_p2 = por %p15663_p1, %p15662_p0 }
  0xeb   :  { %p15665_p3 = pnand %p15664_p2, %p15658_p13 }
  0xed   :  { %15668 = shalt.err (!%p15665_p3)
}
  0xee   :  { %s16317_s17 = smov 256   ;;  %s16318_s27 = smov [#allocation41]  }
  0xef   :  { %405 = dma.hbm_to_vmem [thread:$0]  %s16506_s6, 12288, %s400_s10, [#allocation39], %s16317_s17, %s16317_s17, %s16306_s19  }
  0xf0   :  { %s423_s0 = sshll.u32 %s16318_s27, 4  ;;  %s16319_s29 = smov [#allocation44]   ;;  %s424_s0 = int_to_ptr.vmem [resolvable:$true] %s423_s0 }
  0xf1   :  { %s447_s15 = sshll.u32 %s16319_s29, 4  ;;  %s15677_s4 = scalar_lea.vmem %s424_s0, 12288  ;;  %s448_s15 = int_to_ptr.vmem [resolvable:$true] %s447_s15 }
  0xf2   :  { %p15678_p4 = scmp.ne.s32.totalorder %s424_s0, %s15677_s4  ;;  %p15682_p5 = scmp.lt.s32.totalorder %s424_s0, %s424_s0 }
  0xf3   :  { %p15683_p6 = scmp.lt.s32.totalorder %s15677_s4, %s15677_s4 }
  0xf5   :  { %p15684_p7 = por %p15683_p6, %p15682_p5 }
  0xf7   :  { %p15685_p8 = pnand %p15684_p7, %p15678_p4 }
  0xf9   :  { %15688 = shalt.err (!%p15685_p8)
}
  0xfa   :  { %429 = dma.hbm_to_vmem [thread:$0]  %s16516_s24, 12288, %s424_s0, [#allocation42], %s16314_s12, %s16314_s12, %s16315_s1  }
  0xfb   :  { %s15697_s8 = scalar_lea.vmem %s448_s15, 48  ;;  %s15701_s6 = scalar_lea.vmem %s448_s15, 64 }
  0xfc   :  { %p15698_p9 = scmp.ne.s32.totalorder %s448_s15, %s15697_s8  ;;  %p15702_p10 = scmp.lt.s32.totalorder %s448_s15, %s448_s15 }
  0xfd   :  { %p15703_p11 = scmp.lt.s32.totalorder %s15701_s6, %s15697_s8 }
  0xff   :  { %p15704_p12 = por %p15703_p11, %p15702_p10 }
 0x101   :  { %p15705_p13 = pnand %p15704_p12, %p15698_p9 }
 0x103   :  { %15708 = shalt.err (!%p15705_p13)
}
 0x104   :  { %453 = dma.hbm_to_vmem [thread:$0]  %s16526_s14, 48, %s448_s15, [#allocation45], %s16306_s19, %s16306_s19, %s16307_s23  }
 0x105   :  { %s16320_s16 = smov [#allocation47]   ;;  %s16321_s18 = smov [#allocation50]  }
 0x106   :  { %s474_s21 = sshll.u32 %s16320_s16, 4  ;;  %s494_s20 = sshll.u32 %s16321_s18, 4  ;;  %s475_s21 = int_to_ptr.vmem [resolvable:$true] %s474_s21  ;;  %s495_s20 = int_to_ptr.vmem [resolvable:$true] %s494_s20 }
 0x107   :  { %s15717_s24 = scalar_lea.vmem %s475_s21, 16  ;;  %s15721_s22 = scalar_lea.vmem %s475_s21, 32 }
 0x108   :  { %p15718_p0 = scmp.ne.s32.totalorder %s475_s21, %s15717_s24  ;;  %p15722_p1 = scmp.lt.s32.totalorder %s475_s21, %s475_s21 }
 0x109   :  { %p15723_p2 = scmp.lt.s32.totalorder %s15721_s22, %s15717_s24 }
 0x10b   :  { %p15724_p3 = por %p15723_p2, %p15722_p1 }
 0x10d   :  { %p15725_p4 = pnand %p15724_p3, %p15718_p0 }
 0x10f   :  { %15728 = shalt.err (!%p15725_p4)
}
 0x110   :  { %s17650_s26 = sld [smem:[#allocation106_spill]]  ;;  %s15737_s30 = scalar_lea.vmem %s495_s20, 16 }
 0x111   :  { %p15738_p5 = scmp.ne.s32.totalorder %s495_s20, %s15737_s30  ;;  %s15741_s28 = scalar_lea.vmem %s495_s20, 32 }
 0x112   :  { %p15742_p6 = scmp.lt.s32.totalorder %s495_s20, %s495_s20  ;;  %p15743_p7 = scmp.lt.s32.totalorder %s15741_s28, %s15737_s30 }
 0x114   :  { %p15744_p8 = por %p15743_p7, %p15742_p6 }
 0x116   :  { %477 = dma.hbm_to_vmem [thread:$0]  %s17650_s26, 16, %s475_s21, [#allocation48]  }
 0x117   :  { %p15745_p9 = pnand %p15744_p8, %p15738_p5 }
 0x119   :  { %15748 = shalt.err (!%p15745_p9)
}
 0x11a   :  { %s17651_s14 = sld [smem:[#allocation108_spill]]  ;;  %s16322_s5 = smov [#allocation53]  }
 0x11b   :  { %s516_s2 = sshll.u32 %s16322_s5, 4  ;;  %s16323_s7 = smov [#allocation56]   ;;  %s517_s2 = int_to_ptr.vmem [resolvable:$true] %s516_s2 }
 0x11c   :  { %s539_s10 = sshll.u32 %s16323_s7, 4  ;;  %s15757_s11 = scalar_lea.vmem %s517_s2, 16  ;;  %s540_s10 = int_to_ptr.vmem [resolvable:$true] %s539_s10 }
 0x11d   :  { %p15758_p10 = scmp.ne.s32.totalorder %s517_s2, %s15757_s11  ;;  %s15761_s17 = scalar_lea.vmem %s517_s2, 32 }
 0x11e   :  { %p15762_p11 = scmp.lt.s32.totalorder %s517_s2, %s517_s2  ;;  %p15763_p12 = scmp.lt.s32.totalorder %s15761_s17, %s15757_s11 }
 0x120   :  { %497 = dma.hbm_to_vmem [thread:$0]  %s17651_s14, 16, %s495_s20, [#allocation51]  }
 0x121   :  { %p15764_p13 = por %p15763_p12, %p15762_p11 }
 0x123   :  { %p15765_p0 = pnand %p15764_p13, %p15758_p10 }
 0x125   :  { %15768 = shalt.err (!%p15765_p0)
}
 0x126   :  { %s17652_s27 = sld [smem:[#allocation110_spill]]  ;;  %s15777_s0 = scalar_lea.vmem %s540_s10, 2048 }
 0x127   :  { %p15778_p1 = scmp.ne.s32.totalorder %s540_s10, %s15777_s0  ;;  %p15782_p2 = scmp.lt.s32.totalorder %s540_s10, %s540_s10 }
 0x128   :  { %p15783_p3 = scmp.lt.s32.totalorder %s15777_s0, %s15777_s0 }
 0x12a   :  { %p15784_p4 = por %p15783_p3, %p15782_p2 }
 0x12c   :  { %519 = dma.hbm_to_vmem [thread:$0]  %s17652_s27, 16, %s517_s2, [#allocation54]  }
 0x12d   :  { %p15785_p5 = pnand %p15784_p4, %p15778_p1 }
 0x12f   :  { %15788 = shalt.err (!%p15785_p5)
}
 0x130   :  { %s17653_s29 = sld [smem:[#allocation113_spill]]  ;;  %s16324_s15 = smov [#allocation2]  }
 0x131   :  { %s144_s4 = sshll.u32 %s16324_s15, 4  ;;  %s16325_s8 = smov [#allocation7]   ;;  %s145_s4 = int_to_ptr.vmem [resolvable:$true] %s144_s4 }
 0x132   :  { %s163_s6 = sshll.u32 %s16325_s8, 4  ;;  %s15797_s16 = scalar_lea.vmem %s145_s4, 32  ;;  %s164_s6 = int_to_ptr.vmem [resolvable:$true] %s163_s6 }
 0x133   :  { %p15798_p6 = scmp.ne.s32.totalorder %s145_s4, %s15797_s16  ;;  %p15802_p7 = scmp.lt.s32.totalorder %s145_s4, %s145_s4 }
 0x134   :  { %p15803_p8 = scmp.lt.s32.totalorder %s15797_s16, %s15797_s16 }
 0x136   :  { %545 = dma.hbm_to_vmem [thread:$0]  %s17653_s29, 2048, %s540_s10, [#allocation57], %s16314_s12, %s16314_s12, %s16315_s1  }
 0x137   :  { %p15804_p9 = por %p15803_p8, %p15802_p7 }
 0x139   :  { %p15805_p10 = pnand %p15804_p9, %p15798_p6 }
 0x13b   :  { %15808 = shalt.err (!%p15805_p10)
}
 0x13c   :  { %s17654_s21 = sld [smem:[#allocation88_spill]]  ;;  %s15817_s18 = scalar_lea.vmem %s164_s6, 512 }
 0x13d   :  { %p15818_p11 = scmp.ne.s32.totalorder %s164_s6, %s15817_s18  ;;  %p15822_p12 = scmp.lt.s32.totalorder %s164_s6, %s164_s6 }
 0x13e   :  { %p15823_p13 = scmp.lt.s32.totalorder %s15817_s18, %s15817_s18 }
 0x140   :  { %p15824_p0 = por %p15823_p13, %p15822_p12 }
 0x142   :  { %147 = dma.hbm_to_vmem [thread:$0]  %s17654_s21, 32, %s145_s4, [#allocation3]  }
 0x143   :  { %p15825_p1 = pnand %p15824_p0, %p15818_p11 }
 0x145   :  { %15828 = shalt.err (!%p15825_p1)
}
 0x146   :  { %s17655_s20 = sld [smem:[#allocation89_spill]]  ;;  %s16326_s24 = smov [#allocation10]  }
 0x147   :  { %s186_s22 = sshll.u32 %s16326_s24, 4  ;;  %s16327_s26 = smov [#allocation13]   ;;  %s187_s22 = int_to_ptr.vmem [resolvable:$true] %s186_s22 }
 0x148   :  { %s205_s30 = sshll.u32 %s16327_s26, 4  ;;  %s15837_s28 = scalar_lea.vmem %s187_s22, 64  ;;  %s206_s30 = int_to_ptr.vmem [resolvable:$true] %s205_s30 }
 0x149   :  { %p15838_p2 = scmp.ne.s32.totalorder %s187_s22, %s15837_s28  ;;  %p15842_p3 = scmp.lt.s32.totalorder %s187_s22, %s187_s22 }
 0x14a   :  { %p15843_p4 = scmp.lt.s32.totalorder %s15837_s28, %s15837_s28 }
 0x14c   :  { %169 = dma.hbm_to_vmem [thread:$0]  %s17655_s20, 512, %s164_s6, [#allocation6], %s16314_s12, %s16314_s12, %s16315_s1  }
 0x14d   :  { %p15844_p5 = por %p15843_p4, %p15842_p3 }
 0x14f   :  { %p15845_p6 = pnand %p15844_p5, %p15838_p2 }
 0x151   :  { %15848 = shalt.err (!%p15845_p6)
}
 0x152   :  { %s17656_s14 = sld [smem:[#allocation90_spill]]  ;;  %s15857_s5 = scalar_lea.vmem %s206_s30, 512 }
 0x153   :  { %p15858_p7 = scmp.ne.s32.totalorder %s206_s30, %s15857_s5  ;;  %p15862_p8 = scmp.lt.s32.totalorder %s206_s30, %s206_s30 }
 0x154   :  { %p15863_p9 = scmp.lt.s32.totalorder %s15857_s5, %s15857_s5 }
 0x156   :  { %p15864_p10 = por %p15863_p9, %p15862_p8 }
 0x158   :  { %189 = dma.hbm_to_vmem [thread:$0]  %s17656_s14, 64, %s187_s22, [#allocation9]  }
 0x159   :  { %p15865_p11 = pnand %p15864_p10, %p15858_p7 }
 0x15b   :  { %15868 = shalt.err (!%p15865_p11)
}
 0x15c   :  { %s17657_s2 = sld [smem:[#allocation91_spill]]  ;;  %s16328_s7 = smov [#allocation16]  }
 0x15d   :  { %s227_s10 = sshll.u32 %s16328_s7, 4  ;;  %s16329_s11 = smov [#allocation19]   ;;  %s228_s10 = int_to_ptr.vmem [resolvable:$true] %s227_s10 }
 0x15e   :  { %s255_s17 = sshll.u32 %s16329_s11, 4  ;;  %s15877_s27 = scalar_lea.vmem %s228_s10, 9216  ;;  %s256_s17 = int_to_ptr.vmem [resolvable:$true] %s255_s17 }
 0x15f   :  { %p15878_p12 = scmp.ne.s32.totalorder %s228_s10, %s15877_s27  ;;  %p15882_p13 = scmp.lt.s32.totalorder %s228_s10, %s228_s10 }
 0x160   :  { %p15883_p0 = scmp.lt.s32.totalorder %s15877_s27, %s15877_s27 }
 0x162   :  { %211 = dma.hbm_to_vmem [thread:$0]  %s17657_s2, 512, %s206_s30, [#allocation12], %s16314_s12, %s16314_s12, %s16315_s1  }
 0x163   :  { %p15884_p1 = por %p15883_p0, %p15882_p13 }
 0x165   :  { %p15885_p2 = pnand %p15884_p1, %p15878_p12 }
 0x167   :  { %15888 = shalt.err (!%p15885_p2)
}
 0x168   :  { %s17658_s0 = sld [smem:[#allocation92_spill]]  ;;  %s15897_s29 = scalar_lea.vmem %s256_s17, 1024 }
 0x169   :  { %p15898_p3 = scmp.ne.s32.totalorder %s256_s17, %s15897_s29  ;;  %p15902_p4 = scmp.lt.s32.totalorder %s256_s17, %s256_s17 }
 0x16a   :  { %p15903_p5 = scmp.lt.s32.totalorder %s15897_s29, %s15897_s29 }
 0x16c   :  { %p15904_p6 = por %p15903_p5, %p15902_p4 }
 0x16e   :  { %233 = dma.hbm_to_vmem [thread:$0]  %s17658_s0, 9216, %s228_s10, [#allocation15], %s16314_s12, %s16314_s12, %s16315_s1  }
 0x16f   :  { %p15905_p7 = pnand %p15904_p6, %p15898_p3 }
 0x171   :  { %15908 = shalt.err (!%p15905_p7)
}
 0x172   :  { %s17659_s15 = sld [smem:[#allocation95_spill]]  ;;  %s16330_s4 = smov [#allocation22]  }
 0x173   :  { %s277_s8 = sshll.u32 %s16330_s4, 4  ;;  %s16331_s6 = smov [#allocation25]   ;;  %s278_s8 = int_to_ptr.vmem [resolvable:$true] %s277_s8 }
 0x174   :  { %s300_s16 = sshll.u32 %s16331_s6, 4  ;;  %s15917_s21 = scalar_lea.vmem %s278_s8, 1024  ;;  %s301_s16 = int_to_ptr.vmem [resolvable:$true] %s300_s16 }
 0x175   :  { %p15918_p8 = scmp.ne.s32.totalorder %s278_s8, %s15917_s21  ;;  %p15922_p9 = scmp.lt.s32.totalorder %s278_s8, %s278_s8 }
 0x176   :  { %p15923_p10 = scmp.lt.s32.totalorder %s15917_s21, %s15917_s21 }
 0x178   :  { %261 = dma.hbm_to_vmem [thread:$0]  %s17659_s15, 1024, %s256_s17, [#allocation18], %s16314_s12, %s16314_s12, %s16315_s1  }
 0x179   :  { %p15924_p11 = por %p15923_p10, %p15922_p9 }
 0x17b   :  { %p15925_p12 = pnand %p15924_p11, %p15918_p8 }
 0x17d   :  { %15928 = shalt.err (!%p15925_p12)
}
 0x17e   :  { %s17660_s18 = sld [smem:[#allocation96_spill]]  ;;  %s15937_s20 = scalar_lea.vmem %s301_s16, 16 }
 0x17f   :  { %p15938_p13 = scmp.ne.s32.totalorder %s301_s16, %s15937_s20  ;;  %s15941_s24 = scalar_lea.vmem %s301_s16, 32 }
 0x180   :  { %p15942_p0 = scmp.lt.s32.totalorder %s301_s16, %s301_s16  ;;  %p15943_p1 = scmp.lt.s32.totalorder %s15941_s24, %s15937_s20 }
 0x182   :  { %p15944_p2 = por %p15943_p1, %p15942_p0 }
 0x184   :  { %283 = dma.hbm_to_vmem [thread:$0]  %s17660_s18, 1024, %s278_s8, [#allocation21], %s16314_s12, %s16314_s12, %s16315_s1  }
 0x185   :  { %p15945_p3 = pnand %p15944_p2, %p15938_p13 }
 0x187   :  { %15948 = shalt.err (!%p15945_p3)
}
 0x188   :  { %s17661_s22 = sld [smem:[#allocation97_spill]]  ;;  %s16332_s26 = smov [#allocation28]  }
 0x189   :  { %s319_s30 = sshll.u32 %s16332_s26, 4  ;;  %s16333_s28 = smov [#allocation31]   ;;  %s320_s30 = int_to_ptr.vmem [resolvable:$true] %s319_s30 }
 0x18a   :  { %s342_s14 = sshll.u32 %s16333_s28, 4  ;;  %s15957_s5 = scalar_lea.vmem %s320_s30, 2048  ;;  %s343_s14 = int_to_ptr.vmem [resolvable:$true] %s342_s14 }
 0x18b   :  { %p15958_p4 = scmp.ne.s32.totalorder %s320_s30, %s15957_s5  ;;  %p15962_p5 = scmp.lt.s32.totalorder %s320_s30, %s320_s30 }
 0x18c   :  { %p15963_p6 = scmp.lt.s32.totalorder %s15957_s5, %s15957_s5 }
 0x18e   :  { %303 = dma.hbm_to_vmem [thread:$0]  %s17661_s22, 16, %s301_s16, [#allocation24]  }
 0x18f   :  { %p15964_p7 = por %p15963_p6, %p15962_p5 }
 0x191   :  { %p15965_p8 = pnand %p15964_p7, %p15958_p4 }
 0x193   :  { %15968 = shalt.err (!%p15965_p8)
}
 0x194   :  { %s17662_s2 = sld [smem:[#allocation98_spill]]  ;;  %s15977_s7 = scalar_lea.vmem %s343_s14, 16 }
 0x195   :  { %p15978_p9 = scmp.ne.s32.totalorder %s343_s14, %s15977_s7  ;;  %s15981_s10 = scalar_lea.vmem %s343_s14, 32 }
 0x196   :  { %p15982_p10 = scmp.lt.s32.totalorder %s343_s14, %s343_s14  ;;  %p15983_p11 = scmp.lt.s32.totalorder %s15981_s10, %s15977_s7 }
 0x198   :  { %p15984_p12 = por %p15983_p11, %p15982_p10 }
 0x19a   :  { %325 = dma.hbm_to_vmem [thread:$0]  %s17662_s2, 2048, %s320_s30, [#allocation27], %s16314_s12, %s16314_s12, %s16315_s1  }
 0x19b   :  { %p15985_p13 = pnand %p15984_p12, %p15978_p9 }
 0x19d   :  { %15988 = shalt.err (!%p15985_p13)
}
 0x19e   :  { %s17663_s11 = sld [smem:[#allocation99_spill]]  ;;  %s16334_s17 = smov [#allocation34]  }
 0x19f   :  { %s363_s27 = sshll.u32 %s16334_s17, 4  ;;  %s16335_s0 = smov [#allocation37]   ;;  %s364_s27 = int_to_ptr.vmem [resolvable:$true] %s363_s27 }
 0x1a0   :  { %s387_s29 = sshll.u32 %s16335_s0, 4  ;;  %s15997_s15 = scalar_lea.vmem %s364_s27, 48  ;;  %s388_s29 = int_to_ptr.vmem [resolvable:$true] %s387_s29 }
 0x1a1   :  { %p15998_p0 = scmp.ne.s32.totalorder %s364_s27, %s15997_s15  ;;  %s16001_s4 = scalar_lea.vmem %s364_s27, 64 }
 0x1a2   :  { %p16002_p1 = scmp.lt.s32.totalorder %s364_s27, %s364_s27  ;;  %p16003_p2 = scmp.lt.s32.totalorder %s16001_s4, %s15997_s15 }
 0x1a4   :  { %345 = dma.hbm_to_vmem [thread:$0]  %s17663_s11, 16, %s343_s14, [#allocation30]  }
 0x1a5   :  { %p16004_p3 = por %p16003_p2, %p16002_p1 }
 0x1a7   :  { %p16005_p4 = pnand %p16004_p3, %p15998_p0 }
 0x1a9   :  { %16008 = shalt.err (!%p16005_p4)
}
 0x1aa   :  { %s17664_s8 = sld [smem:[#allocation100_spill]]  ;;  %s16017_s6 = scalar_lea.vmem %s388_s29, 48 }
 0x1ab   :  { %p16018_p5 = scmp.ne.s32.totalorder %s388_s29, %s16017_s6  ;;  %s16021_s16 = scalar_lea.vmem %s388_s29, 64 }
 0x1ac   :  { %p16022_p6 = scmp.lt.s32.totalorder %s388_s29, %s388_s29  ;;  %p16023_p7 = scmp.lt.s32.totalorder %s16021_s16, %s16017_s6 }
 0x1ae   :  { %p16024_p8 = por %p16023_p7, %p16022_p6 }
 0x1b0   :  { %369 = dma.hbm_to_vmem [thread:$0]  %s17664_s8, 48, %s364_s27, [#allocation33], %s16306_s19, %s16306_s19, %s16307_s23  }
 0x1b1   :  { %p16025_p9 = pnand %p16024_p8, %p16018_p5 }
 0x1b3   :  { %16028 = shalt.err (!%p16025_p9)
}
 0x1b4   :  { %s17665_s21 = sld [smem:[#allocation101_spill]]  ;;  %s16336_s18 = smov [#allocation40]  }
 0x1b5   :  { %s411_s20 = sshll.u32 %s16336_s18, 4  ;;  %s16337_s24 = smov [#allocation43]   ;;  %s412_s20 = int_to_ptr.vmem [resolvable:$true] %s411_s20 }
 0x1b6   :  { %s435_s22 = sshll.u32 %s16337_s24, 4  ;;  %s16037_s26 = scalar_lea.vmem %s412_s20, 192  ;;  %s436_s22 = int_to_ptr.vmem [resolvable:$true] %s435_s22 }
 0x1b7   :  { %p16038_p10 = scmp.ne.s32.totalorder %s412_s20, %s16037_s26  ;;  %p16042_p11 = scmp.lt.s32.totalorder %s412_s20, %s412_s20 }
 0x1b8   :  { %p16043_p12 = scmp.lt.s32.totalorder %s16037_s26, %s16037_s26 }
 0x1ba   :  { %393 = dma.hbm_to_vmem [thread:$0]  %s17665_s21, 48, %s388_s29, [#allocation36], %s16306_s19, %s16306_s19, %s16307_s23  }
 0x1bb   :  { %p16044_p13 = por %p16043_p12, %p16042_p11 }
 0x1bd   :  { %p16045_p0 = pnand %p16044_p13, %p16038_p10 }
 0x1bf   :  { %16048 = shalt.err (!%p16045_p0)
}
 0x1c0   :  { %s17666_s30 = sld [smem:[#allocation102_spill]]  ;;  %s16057_s28 = scalar_lea.vmem %s436_s22, 48 }
 0x1c1   :  { %p16058_p1 = scmp.ne.s32.totalorder %s436_s22, %s16057_s28  ;;  %s16061_s14 = scalar_lea.vmem %s436_s22, 64 }
 0x1c2   :  { %p16062_p2 = scmp.lt.s32.totalorder %s436_s22, %s436_s22  ;;  %p16063_p3 = scmp.lt.s32.totalorder %s16061_s14, %s16057_s28 }
 0x1c4   :  { %p16064_p4 = por %p16063_p3, %p16062_p2 }
 0x1c6   :  { %417 = dma.hbm_to_vmem [thread:$0]  %s17666_s30, 192, %s412_s20, [#allocation39], %s16314_s12, %s16314_s12, %s16315_s1  }
 0x1c7   :  { %p16065_p5 = pnand %p16064_p4, %p16058_p1 }
 0x1c9   :  { %16068 = shalt.err (!%p16065_p5)
}
 0x1ca   :  { %s17667_s5 = sld [smem:[#allocation103_spill]]  ;;  %s16338_s2 = smov [#allocation46]  }
 0x1cb   :  { %s459_s7 = sshll.u32 %s16338_s2, 4  ;;  %s16339_s10 = smov [#allocation49]   ;;  %s460_s7 = int_to_ptr.vmem [resolvable:$true] %s459_s7 }
 0x1cc   :  { %s484_s11 = sshll.u32 %s16339_s10, 4  ;;  %s16077_s17 = scalar_lea.vmem %s460_s7, 48  ;;  %s485_s11 = int_to_ptr.vmem [resolvable:$true] %s484_s11 }
 0x1cd   :  { %p16078_p6 = scmp.ne.s32.totalorder %s460_s7, %s16077_s17  ;;  %s16081_s27 = scalar_lea.vmem %s460_s7, 64 }
 0x1ce   :  { %p16082_p7 = scmp.lt.s32.totalorder %s460_s7, %s460_s7  ;;  %p16083_p8 = scmp.lt.s32.totalorder %s16081_s27, %s16077_s17 }
 0x1d0   :  { %441 = dma.hbm_to_vmem [thread:$0]  %s17667_s5, 48, %s436_s22, [#allocation42], %s16306_s19, %s16306_s19, %s16307_s23  }
 0x1d1   :  { %p16084_p9 = por %p16083_p8, %p16082_p7 }
 0x1d3   :  { %p16085_p10 = pnand %p16084_p9, %p16078_p6 }
 0x1d5   :  { %16088 = shalt.err (!%p16085_p10)
}
 0x1d6   :  { %s17668_s0 = sld [smem:[#allocation104_spill]]  ;;  %s16097_s29 = scalar_lea.vmem %s485_s11, 16 }
 0x1d7   :  { %p16098_p11 = scmp.ne.s32.totalorder %s485_s11, %s16097_s29  ;;  %s16101_s15 = scalar_lea.vmem %s485_s11, 32 }
 0x1d8   :  { %p16102_p12 = scmp.lt.s32.totalorder %s485_s11, %s485_s11  ;;  %p16103_p13 = scmp.lt.s32.totalorder %s16101_s15, %s16097_s29 }
 0x1da   :  { %p16104_p0 = por %p16103_p13, %p16102_p12 }
 0x1dc   :  { %465 = dma.hbm_to_vmem [thread:$0]  %s17668_s0, 48, %s460_s7, [#allocation45], %s16306_s19, %s16306_s19, %s16307_s23  }
 0x1dd   :  { %p16105_p1 = pnand %p16104_p0, %p16098_p11 }
 0x1df   :  { %16108 = shalt.err (!%p16105_p1)
}
 0x1e0   :  { %s17669_s4 = sld [smem:[#allocation107_spill]]  ;;  %s16340_s8 = smov [#allocation52]  }
 0x1e1   :  { %s503_s6 = sshll.u32 %s16340_s8, 4  ;;  %s16341_s16 = smov [#allocation55]   ;;  %s504_s6 = int_to_ptr.vmem [resolvable:$true] %s503_s6 }
 0x1e2   :  { %s525_s21 = sshll.u32 %s16341_s16, 4  ;;  %s16117_s18 = scalar_lea.vmem %s504_s6, 1024  ;;  %s526_s21 = int_to_ptr.vmem [resolvable:$true] %s525_s21 }
 0x1e3   :  { %p16118_p2 = scmp.ne.s32.totalorder %s504_s6, %s16117_s18  ;;  %p16122_p3 = scmp.lt.s32.totalorder %s504_s6, %s504_s6 }
 0x1e4   :  { %p16123_p4 = scmp.lt.s32.totalorder %s16117_s18, %s16117_s18 }
 0x1e6   :  { %487 = dma.hbm_to_vmem [thread:$0]  %s17669_s4, 16, %s485_s11, [#allocation48]  }
 0x1e7   :  { %p16124_p5 = por %p16123_p4, %p16122_p3 }
 0x1e9   :  { %p16125_p6 = pnand %p16124_p5, %p16118_p2 }
 0x1eb   :  { %16128 = shalt.err (!%p16125_p6)
}
 0x1ec   :  { %s17670_s19 = sld [smem:[#allocation109_spill]]  ;;  %s16137_s23 = scalar_lea.vmem %s526_s21, 1024 }
 0x1ed   :  { %p16138_p7 = scmp.ne.s32.totalorder %s526_s21, %s16137_s23  ;;  %p16142_p8 = scmp.lt.s32.totalorder %s526_s21, %s526_s21 }
 0x1ee   :  { %p16143_p9 = scmp.lt.s32.totalorder %s16137_s23, %s16137_s23 }
 0x1f0   :  { %p16144_p10 = por %p16143_p9, %p16142_p8 }
 0x1f2   :  { %509 = dma.hbm_to_vmem [thread:$0]  %s17670_s19, 1024, %s504_s6, [#allocation51], %s16314_s12, %s16314_s12, %s16315_s1  }
 0x1f3   :  { %p16145_p11 = pnand %p16144_p10, %p16138_p7 }
 0x1f5   :  { %16148 = shalt.err (!%p16145_p11)
}
 0x1f6   :  { %s17671_s20 = sld [smem:[#allocation111_spill]]  ;;  %s16342_s24 = smov [#allocation58]  }
 0x1f7   :  { %s556_s22 = sshll.u32 %s16342_s24, 4  ;;  %s557_s22 = int_to_ptr.vmem [resolvable:$true] %s556_s22 }
 0x1f8   :  { %s16157_s26 = scalar_lea.vmem %s557_s22, 16  ;;  %s16161_s30 = scalar_lea.vmem %s557_s22, 32 }
 0x1f9   :  { %p16158_p12 = scmp.ne.s32.totalorder %s557_s22, %s16157_s26  ;;  %p16162_p13 = scmp.lt.s32.totalorder %s557_s22, %s557_s22 }
 0x1fa   :  { %p16163_p0 = scmp.lt.s32.totalorder %s16161_s30, %s16157_s26 }
 0x1fc   :  { %531 = dma.hbm_to_vmem [thread:$0]  %s17671_s20, 1024, %s526_s21, [#allocation54], %s16314_s12, %s16314_s12, %s16315_s1  }
 0x1fd   :  { %p16164_p1 = por %p16163_p0, %p16162_p13 }
 0x1ff   :  { %p16165_p2 = pnand %p16164_p1, %p16158_p12 }
 0x201   :  { %16168 = shalt.err (!%p16165_p2)
}
 0x202   :  { %559 = dma.hbm_to_vmem [thread:$0]  %s16591_s9, 16, %s557_s22, [#allocation57]  }
 0x203   :  { %16209 = dma.done.wait [#allocation3], 32  }
 0x204   :  { %16210 = vsyncadd [#allocation3], 4294967264 }
 0x205   :  { %16211 = dma.done.wait [#allocation6], 528  }
 0x206   :  { %16212 = vsyncadd [#allocation6], 4294966768 }
 0x207   :  { %16213 = dma.done.wait [#allocation9], 80  }
 0x208   :  { %16214 = vsyncadd [#allocation9], 4294967216 }
 0x209   :  { %16215 = dma.done.wait [#allocation12], 528  }
 0x20a   :  { %16216 = vsyncadd [#allocation12], 4294966768 }
 0x20b   :  { %16217 = dma.done.wait [#allocation15], 9232  }
 0x20c   :  { %16218 = vsyncadd [#allocation15], 4294958064 }
 0x20d   :  { %16219 = dma.done.wait [#allocation18], 1072  }
 0x20e   :  { %16220 = vsyncadd [#allocation18], 4294966224 }
 0x20f   :  { %16221 = dma.done.wait [#allocation21], 1040  }
 0x210   :  { %16222 = vsyncadd [#allocation21], 4294966256 }
 0x211   :  { %16223 = dma.done.wait [#allocation24], 32  }
 0x212   :  { %16224 = vsyncadd [#allocation24], 4294967264 }
 0x213   :  { %16225 = dma.done.wait [#allocation27], 2064  }
 0x214   :  { %16226 = vsyncadd [#allocation27], 4294965232 }
 0x215   :  { %16227 = dma.done.wait [#allocation30], 32  }
 0x216   :  { %16228 = vsyncadd [#allocation30], 4294967264 }
 0x217   :  { %16229 = dma.done.wait [#allocation33], 3120  }
 0x218   :  { %16230 = vsyncadd [#allocation33], 4294964176 }
 0x219   :  { %16231 = dma.done.wait [#allocation36], 96  }
 0x21a   :  { %16232 = vsyncadd [#allocation36], 4294967200 }
 0x21b   :  { %16233 = dma.done.wait [#allocation39], 12480  }
 0x21c   :  { %16234 = vsyncadd [#allocation39], 4294954816 }
 0x21d   :  { %16235 = dma.done.wait [#allocation42], 12336  }
 0x21e   :  { %16236 = vsyncadd [#allocation42], 4294954960 }
 0x21f   :  { %16237 = dma.done.wait [#allocation45], 96  }
 0x220   :  { %16238 = vsyncadd [#allocation45], 4294967200 }
 0x221   :  { %16239 = dma.done.wait [#allocation48], 32  }
 0x222   :  { %16240 = vsyncadd [#allocation48], 4294967264 }
 0x223   :  { %16241 = dma.done.wait [#allocation51], 1040  }
 0x224   :  { %16242 = vsyncadd [#allocation51], 4294966256 }
 0x225   :  { %16243 = dma.done.wait [#allocation54], 1040  }
 0x226   :  { %16244 = vsyncadd [#allocation54], 4294966256 }
 0x227   :  { %16245 = dma.done.wait [#allocation57], 2064  }
 0x228   :  { %16246 = vsyncadd [#allocation57], 4294965232  ;;  %s17672_s9 = sld [smem:[#allocation83_spill]]  ;;  %vm682_vm0 = vcmask 23552   ;;  %v673_v0 = vld [vmem:[#allocation2] sm:$0x3]  ;;  %v1078_v56 = vlaneseq }
 0x229   :  { %vm689_vm1 = vcmask 1042432   ;;  %s17673_s12 = sld [smem:[#allocation84_spill]]  ;;  %v674_v2 = vunpack.c.l.bf16 %v673_v0  ;;  %v888_v3 = vld [vmem:[#allocation10] sm:$0x7]  ;;  %vm901_vm2 = vcmask 1045504   ;;  %v16343_v6 = vmov 0.0  }
 0x22a   :  { %v889_v5 = vunpack.c.l.bf16 %v888_v3  ;;  %vm16344_vm3 = vmmov 0   ;;  %vm897_vm4 = vcmask 48128   ;;  %v12900_v8 = vld [vmem:[#allocation7 + $0x18] sm:$0xff]   ;;  %v12903_v10 = vld [vmem:[#allocation13 + $0x18] sm:$0xff]   ;;  %v12899_v13 = vld [vmem:[#allocation7 + $0x10] sm:$0xff]   ;;  %vm805_vm5 = vcmask 523264  }
 0x22b   :  { %14025 = vmatprep.subr.msk.mxu0 %vm689_vm1, %v674_v2  ;;  %v11697_v9 = vunpack.c.h.bf16 %v12900_v8  ;;  %v11696_v11 = vunpack.c.l.bf16 %v12900_v8  ;;  %v11713_v12 = vunpack.c.h.bf16 %v12903_v10  ;;  %v11693_v14 = vunpack.c.h.bf16 %v12899_v13  ;;  %v12902_v16 = vld [vmem:[#allocation13 + $0x10] sm:$0xff]   ;;  %v12898_v19 = vld [vmem:[#allocation7 + $0x8] sm:$0xff]   ;;  %v12901_v22 = vld [vmem:[#allocation13 + $0x8] sm:$0xff]   ;;  %s17676_s1 = sld [smem:[#allocation93_spill]]  ;;  %s16346_s27 = smov [#allocation59]  }
 0x22c   :  { %14026 = vmatpush3.msk.msra.mxu0 %vm689_vm1, %v674_v2  ;;  %v11712_v15 = vunpack.c.l.bf16 %v12903_v10  ;;  %v11692_v17 = vunpack.c.l.bf16 %v12899_v13  ;;  %v11709_v18 = vunpack.c.h.bf16 %v12902_v16  ;;  %v11689_v20 = vunpack.c.h.bf16 %v12898_v19  ;;  %v11683_v25 = vld [vmem:[#allocation7] sm:$0xff]   ;;  %v11699_v28 = vld [vmem:[#allocation13] sm:$0xff]   ;;  %v11462_v32 = vld [vmem:[#allocation5] ss:$0 sm:$0xff]  ;;  %s17677_s28 = sld [smem:[#allocation85_spill]]  ;;  %s11367_s0 = sshll.u32 %s16346_s27, 4  ;;  %s11368_s0 = int_to_ptr.vmem [resolvable:$true] %s11367_s0 }
 0x22d   :  { %14049 = vmatprep.subr.mxu0 %v16343_v6  ;;  %14030 = vmatprep.subr.mxu1 %v11697_v9  ;;  %v11708_v21 = vunpack.c.l.bf16 %v12902_v16  ;;  %v11688_v23 = vunpack.c.l.bf16 %v12898_v19  ;;  %v11705_v24 = vunpack.c.h.bf16 %v12901_v22  ;;  %v11685_v26 = vunpack.c.h.bf16 %v11683_v25  ;;  %v11471_v36 = vld [vmem:[#allocation11] ss:$0 sm:$0xff]  ;;  %v12904_v0 = vld [vmem:[#allocation16 + $0x8] sm:$0xff]   ;;  %v11715_v3 = vld [vmem:[#allocation16] sm:$0xff]   ;;  %s17678_s14 = sld [smem:[#allocation94_spill]]  ;;  %s16347_s29 = smov [#allocation60]  }
 0x22e   :  { %v671_v1 = vld [vmem:[%s17672_s9] sm:$0xff]  ;;  %v672_v4 = vld [vmem:[%s17672_s9 + $0x8] sm:$0xff]  ;;  %14031 = vmatpush3.msra.mxu1 %v11697_v9  ;;  %v11704_v27 = vunpack.c.l.bf16 %v12901_v22  ;;  %v11684_v29 = vunpack.c.l.bf16 %v11683_v25  ;;  %v11701_v30 = vunpack.c.h.bf16 %v11699_v28  ;;  %v11700_v31 = vunpack.c.l.bf16 %v11699_v28  ;;  %s17679_s5 = sld [smem:[#allocation86_spill]]  ;;  %s11377_s15 = sshll.u32 %s16347_s29, 4  ;;  %s11378_s15 = int_to_ptr.vmem [resolvable:$true] %s11377_s15 }
 0x22f   :  { %14027 = vmatprep.mubr.msk.f32.mxu0 %vm682_vm0, %v671_v1  ;;  %v887_v7 = vld [vmem:[%s17673_s12] sm:$0x3]  ;;  %14032 = vmatprep.subr.mxu1 %v11696_v11  ;;  %v16719_v57 = vand.u32 127, %v1078_v56  ;;  %v16722_v59 = vshrl.u32 %v1078_v56, 7  ;;  %vm1095_vm11 = vcmask 15360   ;;  %v11721_v1 = vunpack.c.h.bf16 %v12904_v0  ;;  %s17680_s2 = sld [smem:[#allocation87_spill]]  ;;  %p16174_p4 = scmp.lt.s32.totalorder %s11368_s0, %s11368_s0 }
 0x230   :  { %14028 = vmatmul.mubr.msk.f32.vlgmr.msra.gmra.mxu0 %vm682_vm0, %v672_v4  ;;  %14033 = vmatpush3.msra.mxu1 %v11696_v11  ;;  %v11720_v2 = vunpack.c.l.bf16 %v12904_v0  ;;  %v11717_v4 = vunpack.c.h.bf16 %v11715_v3  ;;  %vm1102_vm13 = vcmask 1041408   ;;  %v12906_v11 = vld [vmem:[#allocation16 + $0x18] sm:$0xff]   ;;  %v11716_v16 = vunpack.c.l.bf16 %v11715_v3  ;;  %v11468_v22 = vld [vmem:[#allocation8] ss:$0 sm:$0xff]  ;;  %s17681_s7 = sld [smem:[#allocation105_spill]]  ;;  %s16169_s4 = scalar_lea.vmem %s11368_s0, 32 }
 0x231   :  { %14050 = vmatpush3.msk.msra.mxu0 %vm901_vm2, %v889_v5  ;;  %14051 = vmatprep.mubr.msk.f32.mxu0 %vm16344_vm3, %v16343_v6  ;;  %v1083_v58 = vmul.u32 8, %v16719_v57  ;;  %v1080_v61 = vadd.s32 8, %v16722_v59  ;;  %v11475_v5 = vld [vmem:[#allocation14] ss:$0 sm:$0xff]  ;;  %v11728_v13 = vunpack.c.l.bf16 %v12906_v11  ;;  %vm1534_vm14 = vcmask 261120   ;;  %s17682_s10 = sld [smem:[#allocation112_spill]]  ;;  %p16170_p3 = scmp.ne.s32.totalorder %s11368_s0, %s16169_s4 }
 0x232   :  { %14054 = vmatprep.subr.mxu0 %v16343_v6  ;;  %14034 = vmatprep.subr.mxu1 %v11693_v14  ;;  %vm1624_vm0 = vcmask 130048   ;;  %s17683_s11 = sld [smem:[#allocation114_spill]]  ;;  %p16175_p5 = scmp.lt.s32.totalorder %s16169_s4, %s16169_s4 }
 0x233   :  { %14035 = vmatpush3.msra.mxu1 %v11693_v14  ;;  %v1086_v60 = vadd.s32 8, %v1083_v58  ;;  %vm1084_vm6 = vcmp.ge.s32.totalorder %v16722_v59, %v1083_v58  ;;  %vm1085_vm9 = vcmp.ge.s32.totalorder %v1080_v61, %v1083_v58  ;;  %v12905_v14 = vld [vmem:[#allocation16 + $0x10] sm:$0xff]   ;;  %s17684_s17 = sld [smem:[#allocation115_spill]] }
 0x234   :  { %14052 = vmatmul.mubr.msk.f32.vlgmr.msra.gmra.mxu0 %vm897_vm4, %v887_v7  ;;  %14036 = vmatprep.subr.mxu1 %v11692_v17  ;;  %p16176_p6 = por %p16175_p5, %p16174_p4 }
 0x235   :  { %14070 = vmatprep.mubr.msk.f32.mxu0 %vm16344_vm3, %v16343_v6  ;;  %14055 = vmatpush3.msra.mxu0 %v11713_v12  ;;  %vm1087_vm7 = vcmp.lt.s32.totalorder %v16722_v59, %v1086_v60  ;;  %vm1088_vm10 = vcmp.lt.s32.totalorder %v1080_v61, %v1086_v60  ;;  %v11729_v12 = vunpack.c.h.bf16 %v12906_v11  ;;  %v16786_v61 = vsub.s32 2, %v16722_v59  ;;  %v11486_v11 = vld [vmem:[%s17677_s28] ss:$0 sm:$0xff] }
 0x236   :  { %14056 = vmatprep.subr.mxu0 %v16343_v6  ;;  %14037 = vmatpush3.msra.mxu1 %v11692_v17  ;;  %vm1089_vm8 = vmand %vm1084_vm6, %vm1087_vm7  ;;  %v11724_v17 = vunpack.c.l.bf16 %v12905_v14  ;;  %p16177_p7 = pnand %p16176_p6, %p16170_p3 }
 0x237   :  { %14057 = vmatpush3.msra.mxu0 %v11712_v15  ;;  %14038 = vmatprep.subr.mxu1 %v11689_v20  ;;  %v16728_v62 = vsel %vm1089_vm8, 1.0, %v16343_v6  ;;  %vm16730_vm12 = vmand %vm1085_vm9, %vm1088_vm10  ;;  %v11725_v15 = vunpack.c.h.bf16 %v12905_v14 }
 0x238   :  { %14058 = vmatprep.subr.mxu0 %v16343_v6  ;;  %14039 = vmatpush3.msra.mxu1 %v11689_v20  ;;  %v16739_v10 = vsel %vm16730_vm12, 1.0, %v16343_v6 }
 0x239   :  { %14059 = vmatpush3.msra.mxu0 %v11709_v18  ;;  %14040 = vmatprep.subr.mxu1 %v11688_v23  ;;  %v12908_v18 = vld [vmem:[#allocation16 + $0x28] sm:$0xff]  }
 0x23a   :  { %14060 = vmatprep.subr.mxu0 %v16343_v6  ;;  %14041 = vmatpush3.msra.mxu1 %v11688_v23  ;;  %v11737_v19 = vunpack.c.h.bf16 %v12908_v18 }
 0x23b   :  { %14061 = vmatpush3.msra.mxu0 %v11708_v21  ;;  %14042 = vmatprep.subr.mxu1 %v11685_v26 }
 0x23c   :  { %14062 = vmatprep.subr.mxu0 %v16343_v6  ;;  %14043 = vmatpush3.msra.mxu1 %v11685_v26 }
 0x23d   :  { %14063 = vmatpush3.msra.mxu0 %v11705_v24  ;;  %14044 = vmatprep.subr.mxu1 %v11684_v29 }
 0x23e   :  { %14064 = vmatprep.subr.mxu0 %v16343_v6  ;;  %14045 = vmatpush3.msra.mxu1 %v11684_v29  ;;  %v11736_v29 = vunpack.c.l.bf16 %v12908_v18 }
 0x23f   :  { %14065 = vmatpush3.msra.mxu0 %v11704_v27 }
 0x240   :  { %14066 = vmatprep.subr.mxu0 %v16343_v6 }
 0x241   :  { %14067 = vmatpush3.msra.mxu0 %v11701_v30  ;;  %v12907_v30 = vld [vmem:[#allocation16 + $0x20] sm:$0xff]  }
 0x242   :  { %14068 = vmatprep.subr.mxu0 %v16343_v6 }
 0x243   :  { %14069 = vmatpush3.msra.mxu0 %v11700_v31  ;;  %v11733_v31 = vunpack.c.h.bf16 %v12907_v30 }
 0x244   :  { %14085 = vmatprep.subr.mxu0 %v11721_v1 }
 0x2f0   :  { %v14029_v33 = vpop.f32.mrf.mxu0 }
 0x2f1   :  { %v765_v34 = vadd.f32 %v14029_v33, %v11462_v32  ;;  %v12910_v33 = vld [vmem:[#allocation16 + $0x38] sm:$0xff]  }
 0x2f2   :  { %v759_v35 = vpop.f32.mrf.mxu0 }
 0x2f3   :  { %v11467_v37 = vmul.f32 -1.442695, %v765_v34  ;;  %v760_v38 = vadd.f32 %v11462_v32, %v759_v35  ;;  %v11732_v32 = vunpack.c.l.bf16 %v12907_v30  ;;  %v11752_v35 = vunpack.c.l.bf16 %v12910_v33 }
 0x2f4   :  { %v971_v39 = vpop.f32.mrf.mxu0 }
 0x2f5   :  { %15279 = vpow2.f32 %v11467_v37  ;;  %v11466_v40 = vmul.f32 -1.442695, %v760_v38  ;;  %v972_v41 = vadd.f32 %v11471_v36, %v971_v39  ;;  %v11747_v36 = vld [vmem:[#allocation16 + $0x30] sm:$0xff]   ;;  %v12914_v39 = vld [vmem:[#allocation16 + $0x58] sm:$0xff]  }
 0x2f6   :  { %v14053_v42 = vpop.f32.mrf.mxu0  ;;  %v11749_v37 = vunpack.c.h.bf16 %v11747_v36 }
 0x2f7   :  { %15281 = vpow2.f32 %v11466_v40  ;;  %v11474_v43 = vmul.f32 -1.442695, %v972_v41  ;;  %v11769_v40 = vunpack.c.h.bf16 %v12914_v39  ;;  %v12913_v42 = vld [vmem:[#allocation16 + $0x50] sm:$0xff]  }
 0x2f9   :  { %15283 = vpow2.f32 %v11474_v43  ;;  %v11765_v43 = vunpack.c.h.bf16 %v12913_v42 }
 0x302   :  { %v15280_v44 = vpop.eup %15279 }
 0x303   :  { %v775_v45 = vadd.f32 1.0, %v15280_v44  ;;  %v11764_v44 = vunpack.c.l.bf16 %v12913_v42 }
 0x304   :  { %v15282_v46 = vpop.eup %15281 }
 0x305   :  { %v774_v47 = vadd.f32 1.0, %v15282_v46  ;;  %15285 = vrcp.f32 %v775_v45  ;;  %v16772_v45 = vsub.s32 1, %v16722_v59 }
 0x306   :  { %v15284_v48 = vpop.eup %15283 }
 0x307   :  { %15287 = vrcp.f32 %v774_v47  ;;  %v978_v49 = vadd.f32 1.0, %v15284_v48  ;;  %v1296_v47 = vld [vmem:[%s17676_s1] sm:$0x7]  ;;  %v16776_v48 = vsub.s32 0, %v16722_v59 }
 0x308   :  { %v1458_v0 = vrot.slane %v1296_v47, %v16786_v61 }
 0x309   :  { %15289 = vrcp.f32 %v978_v49  ;;  %v1379_v49 = vrot.slane %v1296_v47, %v16772_v45 }
 0x312   :  { %v15286_v50 = vpop.eup %15285 }
 0x313   :  { %v781_v54 = vmul.f32 %v15286_v50, %v765_v34  ;;  %v11753_v34 = vunpack.c.h.bf16 %v12910_v33 }
 0x314   :  { %v15288_v51 = vpop.eup %15287 }
 0x315   :  { %v780_v52 = vmul.f32 %v15288_v51, %v760_v38  ;;  %v11748_v38 = vunpack.c.l.bf16 %v11747_v36 }
 0x316   :  { %v15290_v53 = vpop.eup %15289 }
 0x317   :  { %v981_v55 = vmul.f32 %v15290_v53, %v972_v41  ;;  %14046 = vmatprep.mubr.msk.f32.mxu1 %vm805_vm5, %v780_v52  ;;  %v11768_v41 = vunpack.c.l.bf16 %v12914_v39  ;;  %v1300_v53 = vrot.slane %v1296_v47, %v16776_v48  ;;  %v12911_v47 = vld [vmem:[#allocation16 + $0x40] sm:$0xff]  }
 0x318   :  { %14047 = vmatmul.mubr.msk.f32.vlgmr.msra.gmra.mxu1 %vm805_vm5, %v781_v54 }
 0x319   :  { %14071 = vmatmul.mubr.msk.f32.vlgmr.msra.gmra.mxu0 %vm805_vm5, %v981_v55  ;;  %14075 = vmatprep.mubr.msk.f32.mxu1 %vm1095_vm11, %v16728_v62 }
 0x31a   :  { %14086 = vmatpush3.xpose.msra.mxu0 %v11721_v1 }
 0x31b   :  { %14087 = vmatprep.subr.mxu0 %v11720_v2 }
 0x31e   :  { %14088 = vmatpush3.xpose.msra.mxu0 %v11720_v2 }
 0x31f   :  { %14089 = vmatprep.subr.mxu0 %v11717_v4 }
 0x322   :  { %14090 = vmatpush3.xpose.msra.mxu0 %v11717_v4 }
 0x323   :  { %14091 = vmatprep.subr.mxu0 %v11716_v16 }
 0x326   :  { %14092 = vmatpush3.xpose.msra.mxu0 %v11716_v16 }
 0x327   :  { %14107 = vmatprep.subr.mxu0 %v11737_v19 }
 0x3d8   :  { %v14048_v20 = vpop.f32.mrf.mxu1 }
 0x3d9   :  { %v1074_v7 = vpop.f32.mrf.mxu0  ;;  %v884_v25 = vadd.f32 %v14048_v20, %v11468_v22 }
 0x3da   :  { %v1075_v8 = vadd.f32 %v11475_v5, %v1074_v7  ;;  %v878_v21 = vpop.f32.mrf.mxu1  ;;  %v16791_v5 = vld [vmem:[%s17676_s1 + $0x4] sm:$0x7] }
 0x3db   :  { %v14072_v9 = vpop.f32.mrf.mxu0  ;;  %v879_v24 = vadd.f32 %v11468_v22, %v878_v21  ;;  %v16795_v7 = vrot.slane %v16791_v5, %v16776_v48 }
 0x3dc   :  { %14073 = vmatprep.subr.msk.mxu1 %vm1102_vm13, %v1075_v8 }
 0x3dd   :  { %14074 = vmatpush3.msk.msra.mxu1 %vm1102_vm13, %v1075_v8 }
 0x3de   :  { %14076 = vmatmul.mubr.msk.f32.vlgmr.msra.gmra.mxu1 %vm1095_vm11, %v16739_v10  ;;  %14078 = vmatprep.subr.msk.mxu1 %vm1095_vm11, %v16739_v10 }
 0x3df   :  { %14079 = vmatpush3.xpose.msk.msra.mxu1 %vm1095_vm11, %v16739_v10  ;;  %14082 = vmatprep.mubr.msk.f32.mxu1 %vm1095_vm11, %v16728_v62 }
 0x3e0   :  { %14080 = vmatprep.subr.msk.mxu1 %vm1095_vm11, %v16728_v62 }
 0x3e3   :  { %14081 = vmatpush3.xpose.msk.msra.mxu1 %vm1095_vm11, %v16728_v62 }
 0x3e4   :  { %14096 = vmatprep.subr.mxu1 %v11729_v12 }
 0x3e6   :  { %14083 = vmatmul.mubr.msk.f32.vlgmr.msra.gmra.mxu1 %vm1095_vm11, %v16739_v10 }
 0x3e7   :  { %14097 = vmatpush3.xpose.msra.mxu1 %v11729_v12 }
 0x3e8   :  { %14098 = vmatprep.subr.mxu1 %v11728_v13 }
 0x3eb   :  { %14099 = vmatpush3.xpose.msra.mxu1 %v11728_v13 }
 0x3ec   :  { %14100 = vmatprep.subr.mxu1 %v11725_v15 }
 0x3ef   :  { %14101 = vmatpush3.xpose.msra.mxu1 %v11725_v15 }
 0x3f0   :  { %14102 = vmatprep.subr.mxu1 %v11724_v17 }
 0x3f3   :  { %14103 = vmatpush3.xpose.msra.mxu1 %v11724_v17 }
 0x49e   :  { %v14077_v23 = vpop.f32.mrf.mxu1 }
 0x49f   :  { %v16759_v28 = vadd.f32 %v14077_v23, %v884_v25 }
 0x4a0   :  { %v1172_v26 = vpop.f32.mrf.mxu1 }
 0x4a1   :  { %v16757_v27 = vadd.f32 %v1172_v26, %v879_v24 }
 0x4a3   :  { %14093 = vmatprep.mubr.f32.mxu0 %v16757_v27  ;;  %14104 = vmatprep.mubr.f32.mxu1 %v16757_v27 }
 0x4a4   :  { %14094 = vmatmul.mubr.f32.vlgmr.msra.gmra.mxu0 %v16759_v28  ;;  %14105 = vmatmul.mubr.f32.vlgmr.msra.gmra.mxu1 %v16759_v28 }
 0x4a5   :  { %14108 = vmatpush3.xpose.msra.mxu0 %v11737_v19  ;;  %14115 = vmatprep.mubr.f32.mxu0 %v16757_v27 }
 0x4a6   :  { %14109 = vmatprep.subr.mxu0 %v11736_v29  ;;  %v14084_v46 = vpop.f32.mrf.mxu1 }
 0x4a7   :  { %v16803_v13 = vmul.f32 %v14084_v46, %v11486_v11 }
 0x4a8   :  { %v1252_v50 = vpop.f32.mrf.mxu1 }
 0x4a9   :  { %14110 = vmatpush3.xpose.msra.mxu0 %v11736_v29  ;;  %v16801_v12 = vmul.f32 %v11486_v11, %v1252_v50  ;;  %vm1270_vm1 = vcmp.gt.f32.partialorder %v16803_v13, 0.0  ;;  %v11756_v50 = vunpack.c.l.bf16 %v12911_v47 }
 0x4aa   :  { %14111 = vmatprep.subr.mxu0 %v11733_v31 }
 0x4ab   :  { %vm1269_vm15 = vcmp.gt.f32.partialorder %v16801_v12, 0.0 }
 0x4ad   :  { %14112 = vmatpush3.xpose.msra.mxu0 %v11733_v31 }
 0x4ae   :  { %14113 = vmatprep.subr.mxu0 %v11732_v32 }
 0x4b1   :  { %14114 = vmatpush3.xpose.msra.mxu0 %v11732_v32  ;;  %v12912_v32 = vld [vmem:[#allocation16 + $0x48] sm:$0xff]  }
 0x4b2   :  { %14132 = vmatprep.subr.mxu0 %v11753_v34  ;;  %v11761_v33 = vunpack.c.h.bf16 %v12912_v32  ;;  %v11760_v46 = vunpack.c.l.bf16 %v12912_v32 }
 0x4b4   :  { %14116 = vmatmul.mubr.f32.vlgmr.msra.gmra.mxu0 %v16759_v28 }
 0x4b5   :  { %14133 = vmatpush3.xpose.msra.mxu0 %v11753_v34  ;;  %14140 = vmatprep.mubr.f32.mxu0 %v16757_v27  ;;  %v12909_v34 = vld [vmem:[%s17678_s14 + $0x8] sm:$0xff]  }
 0x4b6   :  { %14134 = vmatprep.subr.mxu0 %v11752_v35  ;;  %v11745_v36 = vunpack.c.h.bf16 %v12909_v34 }
 0x4b9   :  { %14135 = vmatpush3.xpose.msra.mxu0 %v11752_v35  ;;  %v11739_v35 = vld [vmem:[%s17678_s14] sm:$0xff]  }
 0x4ba   :  { %14136 = vmatprep.subr.mxu0 %v11749_v37 }
 0x4bd   :  { %14137 = vmatpush3.xpose.msra.mxu0 %v11749_v37  ;;  %v11744_v37 = vunpack.c.l.bf16 %v12909_v34 }
 0x4be   :  { %14138 = vmatprep.subr.mxu0 %v11748_v38 }
 0x4c1   :  { %14139 = vmatpush3.xpose.msra.mxu0 %v11748_v38  ;;  %v11741_v38 = vunpack.c.h.bf16 %v11739_v35 }
 0x4c2   :  { %14154 = vmatprep.subr.mxu0 %v11769_v40 }
 0x4c4   :  { %14141 = vmatmul.mubr.f32.vlgmr.msra.gmra.mxu0 %v16759_v28 }
 0x4c5   :  { %14155 = vmatpush3.xpose.msra.mxu0 %v11769_v40  ;;  %14162 = vmatprep.mubr.f32.mxu0 %v16757_v27 }
 0x4c6   :  { %14156 = vmatprep.subr.mxu0 %v11768_v41 }
 0x4c9   :  { %14157 = vmatpush3.xpose.msra.mxu0 %v11768_v41 }
 0x4ca   :  { %14158 = vmatprep.subr.mxu0 %v11765_v43 }
 0x4cd   :  { %14159 = vmatpush3.xpose.msra.mxu0 %v11765_v43 }
 0x4ce   :  { %14160 = vmatprep.subr.mxu0 %v11764_v44 }
 0x4d1   :  { %14161 = vmatpush3.xpose.msra.mxu0 %v11764_v44 }
 0x4d2   :  { %14190 = vmatprep.subr.mxu0 %v11745_v36 }
 0x4d4   :  { %14163 = vmatmul.mubr.f32.vlgmr.msra.gmra.mxu0 %v16759_v28 }
 0x4d5   :  { %14191 = vmatpush3.msra.mxu0 %v11745_v36 }
 0x4d6   :  { %14192 = vmatprep.subr.mxu0 %v11744_v37 }
 0x4d7   :  { %14193 = vmatpush3.msra.mxu0 %v11744_v37 }
 0x4d8   :  { %14194 = vmatprep.subr.mxu0 %v11741_v38 }
 0x4d9   :  { %14195 = vmatpush3.msra.mxu0 %v11741_v38 }
 0x564   :  { %v14095_v51 = vpop.f32.mrf.mxu0  ;;  %v14106_v52 = vpop.f32.mrf.mxu1 }
 0x565   :  { %v1452_v54 = vadd.f32 %v14106_v52, %v1379_v49  ;;  %v1373_v63 = vadd.f32 %v14095_v51, %v1300_v53 }
 0x566   :  { %v1367_v55 = vpop.f32.mrf.mxu0  ;;  %v1446_v56 = vpop.f32.mrf.mxu1 }
 0x567   :  { %v1368_v58 = vadd.f32 %v1367_v55, %v1300_v53  ;;  %v1447_v60 = vadd.f32 %v1446_v56, %v1379_v49  ;;  %14118 = vmatprep.subr.msk.mxu1 %vm1534_vm14, %v1452_v54  ;;  %v11757_v49 = vunpack.c.h.bf16 %v12911_v47  ;;  %v11740_v53 = vunpack.c.l.bf16 %v11739_v35 }
 0x568   :  { %14119 = vmatpush3.xpose.msk.msra.mxu1 %vm1534_vm14, %v1452_v54  ;;  %v12919_v54 = vld [vmem:[#allocation16 + $0x78] sm:$0xff]  }
 0x569   :  { %14120 = vmatprep.subr.msk.mxu1 %vm1534_vm14, %v1447_v60  ;;  %14122 = vmatprep.mubr.msk.f32.mxu1 %vm1534_vm14, %v1368_v58  ;;  %v11793_v55 = vunpack.c.h.bf16 %v12919_v54 }
 0x56a   :  { %14196 = vmatprep.subr.mxu0 %v11740_v53 }
 0x56b   :  { %14197 = vmatpush3.msra.mxu0 %v11740_v53 }
 0x56c   :  { %14121 = vmatpush3.xpose.msk.msra.mxu1 %vm1534_vm14, %v1447_v60  ;;  %14212 = vmatprep.subr.mxu0 %v11793_v55  ;;  %v11792_v60 = vunpack.c.l.bf16 %v12919_v54 }
 0x56f   :  { %14123 = vmatmul.mubr.msk.f32.vlgmr.msra.gmra.mxu1 %vm1534_vm14, %v1373_v63  ;;  %v12918_v63 = vld [vmem:[#allocation16 + $0x70] sm:$0xff]  }
 0x574   :  { %v14117_v1 = vpop.f32.mrf.mxu0 }
 0x575   :  { %v1531_v2 = vadd.f32 %v14117_v1, %v1458_v0  ;;  %v11788_v1 = vunpack.c.l.bf16 %v12918_v63 }
 0x576   :  { %v1525_v3 = vpop.f32.mrf.mxu0 }
 0x577   :  { %v1526_v4 = vadd.f32 %v1525_v3, %v1458_v0  ;;  %14125 = vmatprep.subr.mxu1 %v1531_v2  ;;  %v11789_v0 = vunpack.c.h.bf16 %v12918_v63 }
 0x578   :  { %14126 = vmatpush3.msra.mxu1 %v1531_v2  ;;  %v1845_v2 = vrot.slane %v16791_v5, %v16772_v45 }
 0x579   :  { %14127 = vmatprep.subr.mxu1 %v1526_v4 }
 0x57a   :  { %14128 = vmatpush3.msra.mxu1 %v1526_v4 }
 0x57b   :  { %14143 = vmatprep.subr.mxu1 %v11761_v33 }
 0x584   :  { %v14142_v8 = vpop.f32.mrf.mxu0 }
 0x585   :  { %v16798_v9 = vadd.f32 %v14142_v8, %v16795_v7  ;;  %v1924_v8 = vrot.slane %v16791_v5, %v16786_v61 }
 0x586   :  { %v1833_v51 = vpop.f32.mrf.mxu0 }
 0x587   :  { %v1834_v52 = vadd.f32 %v1833_v51, %v16795_v7  ;;  %v12915_v51 = vld [vmem:[%s17678_s14 + $0x10] sm:$0xff]  }
 0x588   :  { %v11773_v54 = vunpack.c.h.bf16 %v12915_v51 }
 0x62f   :  { %v14124_v14 = vpop.f32.mrf.mxu1 }
 0x630   :  { %v1623_v18 = vsel %vm1270_vm1, %v14124_v14, -1e+30  ;;  %v14164_v14 = vpop.f32.mrf.mxu0 }
 0x631   :  { %v1613_v15 = vpop.f32.mrf.mxu1  ;;  %v1628_v19 = vsel %vm1624_vm0, %v1623_v18, -inf }
 0x632   :  { %v1622_v16 = vsel %vm1269_vm15, %v1613_v15, -1e+30  ;;  %v1997_v15 = vadd.f32 %v14164_v14, %v1924_v8 }
 0x633   :  { %v1625_v17 = vsel %vm1624_vm0, %v1622_v16, -inf }
 0x634   :  { %1626 = vmax.xlane.f32.xlu0 %v1625_v17 }
 0x638   :  { %1629 = vmax.xlane.f32.xlu0 %v1628_v19 }
 0x6bd   :  { %v1627_v20 = vpop.xlane.xlu0 %1626 }
 0x6be   :  { %v1631_v21 = vsub.f32 %v1622_v16, %v1627_v20  ;;  %v1991_v16 = vpop.f32.mrf.mxu0 }
 0x6bf   :  { %v1992_v17 = vadd.f32 %v1991_v16, %v1924_v8  ;;  %v12924_v16 = vld [vmem:[#allocation16 + $0x98] sm:$0xff]  }
 0x6c0   :  { %v1633_v22 = vmul.f32 1.442695, %v1631_v21 }
 0x6c1   :  { %v1630_v23 = vpop.xlane.xlu0 %1629 }
 0x6c2   :  { %15291 = vpow2.f32 %v1633_v22  ;;  %v1632_v24 = vsub.f32 %v1623_v18, %v1630_v23  ;;  %v16840_v18 = vld [vmem:[%s17676_s1 + $0x8] sm:$0x7] }
 0x6c3   :  { %v2472_v19 = vrot.slane %v16840_v18, %v16772_v45 }
 0x6c4   :  { %v1635_v25 = vmul.f32 1.442695, %v1632_v24 }
 0x6c6   :  { %15293 = vpow2.f32 %v1635_v25 }
 0x6cf   :  { %v15292_v26 = vpop.eup %15291 }
 0x6d0   :  { %v1637_v29 = vsel %vm1624_vm0, %v15292_v26, 0.0 }
 0x6d1   :  { %1638 = vadd.xlane.f32.xlu1 %v1637_v29 }
 0x6d3   :  { %v15294_v30 = vpop.eup %15293 }
 0x6d4   :  { %v1640_v31 = vsel %vm1624_vm0, %v15294_v30, 0.0 }
 0x6d5   :  { %1641 = vadd.xlane.f32.xlu1 %v1640_v31 }
 0x75a   :  { %v1639_v39 = vpop.xlane.xlu1 %1638 }
 0x75b   :  { %15295 = vrcp.f32 %v1639_v39 }
 0x75e   :  { %v1642_v40 = vpop.xlane.xlu1 %1641 }
 0x75f   :  { %15297 = vrcp.f32 %v1642_v40 }
 0x768   :  { %v15296_v41 = vpop.eup %15295 }
 0x769   :  { %v1644_v42 = vmul.f32 %v15296_v41, %v15292_v26 }
 0x76b   :  { %14129 = vmatprep.mubr.msk.f32.mxu1 %vm1624_vm0, %v1644_v42  ;;  %v12916_v42 = vld [vmem:[%s17678_s14 + $0x18] sm:$0xff]  }
 0x76c   :  { %v15298_v43 = vpop.eup %15297  ;;  %v11776_v53 = vunpack.c.l.bf16 %v12916_v42 }
 0x76d   :  { %v1646_v44 = vmul.f32 %v15298_v43, %v15294_v30  ;;  %v11777_v43 = vunpack.c.h.bf16 %v12916_v42 }
 0x76f   :  { %14130 = vmatmul.mubr.msk.f32.vlgmr.msra.gmra.mxu1 %vm1624_vm0, %v1646_v44 }
 0x770   :  { %14144 = vmatpush3.xpose.msra.mxu1 %v11761_v33  ;;  %14151 = vmatprep.mubr.f32.mxu1 %v16757_v27 }
 0x771   :  { %14145 = vmatprep.subr.mxu1 %v11760_v46 }
 0x774   :  { %14146 = vmatpush3.xpose.msra.mxu1 %v11760_v46 }
 0x775   :  { %14147 = vmatprep.subr.mxu1 %v11757_v49 }
 0x778   :  { %14148 = vmatpush3.xpose.msra.mxu1 %v11757_v49 }
 0x779   :  { %14149 = vmatprep.subr.mxu1 %v11756_v50 }
 0x77c   :  { %14150 = vmatpush3.xpose.msra.mxu1 %v11756_v50 }
 0x77f   :  { %14152 = vmatmul.mubr.f32.vlgmr.msra.gmra.mxu1 %v16759_v28 }
 0x780   :  { %14169 = vmatprep.mubr.msk.f32.mxu1 %vm1534_vm14, %v1834_v52 }
 0x82f   :  { %v14131_v56 = vpop.f32.mrf.mxu1 }
 0x831   :  { %v1719_v58 = vpop.f32.mrf.mxu1 }
 0x832   :  { %14198 = vmatprep.mubr.msk.f32.mxu0 %vm1534_vm14, %v1719_v58 }
 0x833   :  { %14199 = vmatmul.mubr.msk.f32.vlgmr.msra.gmra.mxu0 %vm1534_vm14, %v14131_v56  ;;  %v12917_v56 = vld [vmem:[#allocation16 + $0x68] sm:$0xff]  }
 0x834   :  { %14213 = vmatpush3.xpose.msra.mxu0 %v11793_v55  ;;  %14220 = vmatprep.mubr.f32.mxu0 %v16757_v27  ;;  %v11772_v55 = vunpack.c.l.bf16 %v12915_v51  ;;  %v11785_v58 = vunpack.c.h.bf16 %v12917_v56 }
 0x835   :  { %14214 = vmatprep.subr.mxu0 %v11792_v60 }
 0x838   :  { %14215 = vmatpush3.xpose.msra.mxu0 %v11792_v60 }
 0x839   :  { %14216 = vmatprep.subr.mxu0 %v11789_v0 }
 0x83c   :  { %14217 = vmatpush3.xpose.msra.mxu0 %v11789_v0  ;;  %v11784_v0 = vunpack.c.l.bf16 %v12917_v56 }
 0x83d   :  { %14218 = vmatprep.subr.mxu0 %v11788_v1 }
 0x83f   :  { %v14153_v3 = vpop.f32.mrf.mxu1 }
 0x840   :  { %v1918_v4 = vadd.f32 %v14153_v3, %v1845_v2  ;;  %14219 = vmatpush3.xpose.msra.mxu0 %v11788_v1  ;;  %v11779_v1 = vld [vmem:[#allocation16 + $0x60] sm:$0xff]  }
 0x841   :  { %v1912_v7 = vpop.f32.mrf.mxu1  ;;  %v11780_v3 = vunpack.c.l.bf16 %v11779_v1 }
 0x842   :  { %v1913_v11 = vadd.f32 %v1912_v7, %v1845_v2  ;;  %14165 = vmatprep.subr.msk.mxu1 %vm1534_vm14, %v1918_v4  ;;  %v11781_v2 = vunpack.c.h.bf16 %v11779_v1 }
 0x843   :  { %14166 = vmatpush3.xpose.msk.msra.mxu1 %vm1534_vm14, %v1918_v4  ;;  %14221 = vmatmul.mubr.f32.vlgmr.msra.gmra.mxu0 %v16759_v28  ;;  %v12921_v4 = vld [vmem:[#allocation16 + $0x88] sm:$0xff]  }
 0x844   :  { %14167 = vmatprep.subr.msk.mxu1 %vm1534_vm14, %v1913_v11  ;;  %v11801_v7 = vunpack.c.h.bf16 %v12921_v4  ;;  %v11800_v8 = vunpack.c.l.bf16 %v12921_v4  ;;  %v12923_v4 = vld [vmem:[%s17678_s14 + $0x28] sm:$0xff]  }
 0x847   :  { %14168 = vmatpush3.xpose.msk.msra.mxu1 %vm1534_vm14, %v1913_v11  ;;  %v12920_v11 = vld [vmem:[#allocation16 + $0x80] sm:$0xff]  }
 0x848   :  { %14172 = vmatprep.subr.mxu1 %v1997_v15  ;;  %v11797_v14 = vunpack.c.h.bf16 %v12920_v11 }
 0x84a   :  { %14170 = vmatmul.mubr.msk.f32.vlgmr.msra.gmra.mxu1 %vm1534_vm14, %v16798_v9 }
 0x84b   :  { %14173 = vmatpush3.msra.mxu1 %v1997_v15  ;;  %v11796_v15 = vunpack.c.l.bf16 %v12920_v11 }
 0x84c   :  { %14174 = vmatprep.subr.mxu1 %v1992_v17 }
 0x84d   :  { %14175 = vmatpush3.msra.mxu1 %v1992_v17  ;;  %v11817_v17 = vunpack.c.h.bf16 %v12924_v16 }
 0x84e   :  { %14179 = vmatprep.subr.mxu1 %v11777_v43 }
 0x8f3   :  { %v16837_v5 = vpop.f32.mrf.mxu0 }
 0x8f5   :  { %v16844_v20 = vpop.f32.mrf.mxu0 }
 0x903   :  { %v14222_v21 = vpop.f32.mrf.mxu0 }
 0x904   :  { %v2545_v22 = vadd.f32 %v14222_v21, %v2472_v19  ;;  %v11811_v21 = vld [vmem:[#allocation16 + $0x90] sm:$0xff]  }
 0x905   :  { %v2539_v23 = vpop.f32.mrf.mxu0 }
 0x906   :  { %v2540_v24 = vadd.f32 %v2539_v23, %v2472_v19  ;;  %14234 = vmatprep.subr.msk.mxu0 %vm1534_vm14, %v2545_v22  ;;  %v11816_v19 = vunpack.c.l.bf16 %v12924_v16  ;;  %v11812_v23 = vunpack.c.l.bf16 %v11811_v21 }
 0x907   :  { %14235 = vmatpush3.xpose.msk.msra.mxu0 %vm1534_vm14, %v2545_v22  ;;  %v11813_v22 = vunpack.c.h.bf16 %v11811_v21  ;;  %v11808_v21 = vunpack.c.l.bf16 %v12923_v4 }
 0x908   :  { %14236 = vmatprep.subr.msk.mxu0 %vm1534_vm14, %v2540_v24 }
 0x90a   :  { %v14171_v9 = vpop.f32.mrf.mxu1 }
 0x90b   :  { %v2088_v25 = vsel %vm1270_vm1, %v14171_v9, -1e+30  ;;  %14237 = vmatpush3.xpose.msk.msra.mxu0 %vm1534_vm14, %v2540_v24  ;;  %v12928_v24 = vld [vmem:[#allocation16 + $0xb8] sm:$0xff]  }
 0x90c   :  { %v2078_v26 = vpop.f32.mrf.mxu1  ;;  %v2092_v29 = vsel %vm1624_vm0, %v2088_v25, -inf  ;;  %v11833_v9 = vunpack.c.h.bf16 %v12928_v24 }
 0x90d   :  { %v2087_v30 = vsel %vm1269_vm15, %v2078_v26, -1e+30  ;;  %2093 = vmax.xlane.f32.xlu1 %v2092_v29  ;;  %v12927_v26 = vld [vmem:[#allocation16 + $0xb0] sm:$0xff]  }
 0x90e   :  { %v2089_v31 = vsel %vm1624_vm0, %v2087_v30, -inf  ;;  %v11829_v29 = vunpack.c.h.bf16 %v12927_v26 }
 0x90f   :  { %2090 = vmax.xlane.f32.xlu0 %v2089_v31 }
 0x996   :  { %v2094_v32 = vpop.xlane.xlu1 %2093 }
 0x997   :  { %v2096_v33 = vsub.f32 %v2088_v25, %v2094_v32  ;;  %v11832_v25 = vunpack.c.l.bf16 %v12928_v24  ;;  %v12926_v24 = vld [vmem:[#allocation16 + $0xa8] sm:$0xff]  }
 0x998   :  { %v2091_v34 = vpop.xlane.xlu0 %2090 }
 0x999   :  { %v2099_v35 = vmul.f32 1.442695, %v2096_v33  ;;  %v2095_v36 = vsub.f32 %v2087_v30, %v2091_v34  ;;  %v11828_v30 = vunpack.c.l.bf16 %v12927_v26  ;;  %v2393_v33 = vrot.slane %v16840_v18, %v16776_v48 }
 0x99b   :  { %15299 = vpow2.f32 %v2099_v35  ;;  %v2097_v37 = vmul.f32 1.442695, %v2095_v36 }
 0x99d   :  { %15301 = vpow2.f32 %v2097_v37 }
 0x9a8   :  { %v15300_v38 = vpop.eup %15299 }
 0x9a9   :  { %v2104_v39 = vsel %vm1624_vm0, %v15300_v38, 0.0 }
 0x9aa   :  { %v15302_v40 = vpop.eup %15301  ;;  %2105 = vadd.xlane.f32.xlu1 %v2104_v39 }
 0x9ab   :  { %v2101_v41 = vsel %vm1624_vm0, %v15302_v40, 0.0 }
 0x9ac   :  { %2102 = vadd.xlane.f32.xlu0 %v2101_v41 }
 0xa33   :  { %v2106_v44 = vpop.xlane.xlu1 %2105 }
 0xa34   :  { %15303 = vrcp.f32 %v2106_v44 }
 0xa35   :  { %v2103_v46 = vpop.xlane.xlu0 %2102 }
 0xa36   :  { %15305 = vrcp.f32 %v2103_v46 }
 0xa41   :  { %v15304_v47 = vpop.eup %15303 }
 0xa42   :  { %v2110_v52 = vmul.f32 %v15304_v47, %v15300_v38  ;;  %v2551_v38 = vrot.slane %v16840_v18, %v16786_v61 }
 0xa43   :  { %v15306_v49 = vpop.eup %15305 }
 0xa44   :  { %v2108_v50 = vmul.f32 %v15306_v49, %v15302_v40 }
 0xa46   :  { %14176 = vmatprep.mubr.msk.f32.mxu1 %vm1624_vm0, %v2108_v50 }
 0xa47   :  { %14177 = vmatmul.mubr.msk.f32.vlgmr.msra.gmra.mxu1 %vm1624_vm0, %v2110_v52 }
 0xa48   :  { %14180 = vmatpush3.msra.mxu1 %v11777_v43  ;;  %v16883_v43 = vld [vmem:[%s17676_s1 + $0xc] sm:$0x7] }
 0xa49   :  { %14181 = vmatprep.subr.mxu1 %v11776_v53  ;;  %v16887_v44 = vrot.slane %v16883_v43, %v16776_v48 }
 0xa4a   :  { %14182 = vmatpush3.msra.mxu1 %v11776_v53 }
 0xa4b   :  { %14183 = vmatprep.subr.mxu1 %v11773_v54 }
 0xa4c   :  { %14184 = vmatpush3.msra.mxu1 %v11773_v54 }
 0xa4d   :  { %14185 = vmatprep.subr.mxu1 %v11772_v55 }
 0xa4e   :  { %14186 = vmatpush3.msra.mxu1 %v11772_v55 }
 0xa4f   :  { %14201 = vmatprep.subr.mxu1 %v11785_v58 }
 0xb07   :  { %v14178_v60 = vpop.f32.mrf.mxu1 }
 0xb09   :  { %v2183_v63 = vpop.f32.mrf.mxu1 }
 0xb0a   :  { %14187 = vmatprep.mubr.msk.f32.mxu1 %vm1534_vm14, %v2183_v63 }
 0xb0b   :  { %14188 = vmatmul.mubr.msk.f32.vlgmr.msra.gmra.mxu1 %vm1534_vm14, %v14178_v60 }
 0xb0c   :  { %14202 = vmatpush3.xpose.msra.mxu1 %v11785_v58  ;;  %14209 = vmatprep.mubr.f32.mxu1 %v16757_v27 }
 0xb0d   :  { %14203 = vmatprep.subr.mxu1 %v11784_v0 }
 0xb10   :  { %14204 = vmatpush3.xpose.msra.mxu1 %v11784_v0 }
 0xb11   :  { %14205 = vmatprep.subr.mxu1 %v11781_v2 }
 0xb14   :  { %14206 = vmatpush3.xpose.msra.mxu1 %v11781_v2 }
 0xb15   :  { %14207 = vmatprep.subr.mxu1 %v11780_v3 }
 0xb18   :  { %14208 = vmatpush3.xpose.msra.mxu1 %v11780_v3 }
 0xb19   :  { %14223 = vmatprep.subr.mxu1 %v11801_v7 }
 0xb1b   :  { %14210 = vmatmul.mubr.f32.vlgmr.msra.gmra.mxu1 %v16759_v28 }
 0xb1c   :  { %14224 = vmatpush3.xpose.msra.mxu1 %v11801_v7  ;;  %14231 = vmatprep.mubr.f32.mxu1 %v16757_v27  ;;  %v11809_v7 = vunpack.c.h.bf16 %v12923_v4 }
 0xb1d   :  { %14225 = vmatprep.subr.mxu1 %v11800_v8 }
 0xb20   :  { %14226 = vmatpush3.xpose.msra.mxu1 %v11800_v8 }
 0xb21   :  { %14227 = vmatprep.subr.mxu1 %v11797_v14 }
 0xb24   :  { %14228 = vmatpush3.xpose.msra.mxu1 %v11797_v14 }
 0xb25   :  { %14229 = vmatprep.subr.mxu1 %v11796_v15 }
 0xb28   :  { %14230 = vmatpush3.xpose.msra.mxu1 %v11796_v15 }
 0xb29   :  { %14259 = vmatprep.subr.mxu1 %v11817_v17 }
 0xb2b   :  { %14232 = vmatmul.mubr.f32.vlgmr.msra.gmra.mxu1 %v16759_v28 }
 0xb2c   :  { %14260 = vmatpush3.xpose.msra.mxu1 %v11817_v17  ;;  %14267 = vmatprep.mubr.f32.mxu1 %v16757_v27  ;;  %v12922_v17 = vld [vmem:[%s17678_s14 + $0x20] sm:$0xff]  }
 0xb2d   :  { %14261 = vmatprep.subr.mxu1 %v11816_v19 }
 0xb30   :  { %14262 = vmatpush3.xpose.msra.mxu1 %v11816_v19 }
 0xb31   :  { %14263 = vmatprep.subr.mxu1 %v11813_v22 }
 0xb34   :  { %14264 = vmatpush3.xpose.msra.mxu1 %v11813_v22  ;;  %v11805_v22 = vunpack.c.h.bf16 %v12922_v17 }
 0xb35   :  { %14265 = vmatprep.subr.mxu1 %v11812_v23 }
 0xb38   :  { %14266 = vmatpush3.xpose.msra.mxu1 %v11812_v23  ;;  %v11804_v23 = vunpack.c.l.bf16 %v12922_v17 }
 0xb39   :  { %14281 = vmatprep.subr.mxu1 %v11833_v9 }
 0xb3b   :  { %14268 = vmatmul.mubr.f32.vlgmr.msra.gmra.mxu1 %v16759_v28 }
 0xb3c   :  { %14282 = vmatpush3.xpose.msra.mxu1 %v11833_v9  ;;  %14289 = vmatprep.mubr.f32.mxu1 %v16757_v27  ;;  %v11825_v9 = vunpack.c.h.bf16 %v12926_v24 }
 0xb3d   :  { %14283 = vmatprep.subr.mxu1 %v11832_v25 }
 0xb40   :  { %14284 = vmatpush3.xpose.msra.mxu1 %v11832_v25 }
 0xb41   :  { %14285 = vmatprep.subr.mxu1 %v11829_v29 }
 0xb44   :  { %14286 = vmatpush3.xpose.msra.mxu1 %v11829_v29  ;;  %v11824_v29 = vunpack.c.l.bf16 %v12926_v24 }
 0xb45   :  { %14287 = vmatprep.subr.mxu1 %v11828_v30 }
 0xb48   :  { %14288 = vmatpush3.xpose.msra.mxu1 %v11828_v30  ;;  %v12925_v30 = vld [vmem:[#allocation16 + $0xa0] sm:$0xff]  }
 0xb4b   :  { %14290 = vmatmul.mubr.f32.vlgmr.msra.gmra.mxu1 %v16759_v28 }
 0xbcb   :  { %v16872_v31 = vpop.f32.mrf.mxu1 }
 0xbcd   :  { %v16874_v32 = vpop.f32.mrf.mxu1 }
 0xbdb   :  { %v14211_v34 = vpop.f32.mrf.mxu1 }
 0xbdc   :  { %v2466_v37 = vadd.f32 %v14211_v34, %v2393_v33  ;;  %v11820_v34 = vunpack.c.l.bf16 %v12925_v30 }
 0xbdd   :  { %v2460_v35 = vpop.f32.mrf.mxu1 }
 0xbde   :  { %v2461_v36 = vadd.f32 %v2460_v35, %v2393_v33  ;;  %v11821_v33 = vunpack.c.h.bf16 %v12925_v30 }
 0xbe0   :  { %14238 = vmatprep.mubr.msk.f32.mxu0 %vm1534_vm14, %v2461_v36 }
 0xbe1   :  { %14239 = vmatmul.mubr.msk.f32.vlgmr.msra.gmra.mxu0 %vm1534_vm14, %v2466_v37  ;;  %v2360_v37 = vadd.f32 %v16837_v5, %v16872_v31 }
 0xbeb   :  { %v14233_v39 = vpop.f32.mrf.mxu1 }
 0xbec   :  { %v2624_v40 = vadd.f32 %v14233_v39, %v2551_v38  ;;  %v2355_v39 = vadd.f32 %v16844_v20, %v16874_v32 }
 0xbed   :  { %v2618_v41 = vpop.f32.mrf.mxu1 }
 0xbee   :  { %v2619_v42 = vadd.f32 %v2618_v41, %v2551_v38  ;;  %14241 = vmatprep.subr.mxu0 %v2624_v40 }
 0xbef   :  { %14242 = vmatpush3.msra.mxu0 %v2624_v40 }
 0xbf0   :  { %14243 = vmatprep.subr.mxu0 %v2619_v42 }
 0xbf1   :  { %14244 = vmatpush3.msra.mxu0 %v2619_v42 }
 0xbf2   :  { %14248 = vmatprep.subr.mxu0 %v11809_v7 }
 0xbfb   :  { %v14269_v46 = vpop.f32.mrf.mxu1 }
 0xbfc   :  { %v16890_v47 = vadd.f32 %v14269_v46, %v16887_v44  ;;  %v3020_v46 = vrot.slane %v16883_v43, %v16772_v45 }
 0xbfd   :  { %v3008_v35 = vpop.f32.mrf.mxu1 }
 0xbfe   :  { %v3009_v36 = vadd.f32 %v3008_v35, %v16887_v44 }
 0xc0b   :  { %v14291_v5 = vpop.f32.mrf.mxu1 }
 0xc0d   :  { %v3166_v31 = vpop.f32.mrf.mxu1 }
 0xca1   :  { %v14240_v49 = vpop.f32.mrf.mxu0 }
 0xca2   :  { %v2715_v18 = vsel %vm1270_vm1, %v14240_v49, -1e+30 }
 0xca3   :  { %v2705_v50 = vpop.f32.mrf.mxu0  ;;  %v2719_v51 = vsel %vm1624_vm0, %v2715_v18, -inf }
 0xca4   :  { %v2714_v52 = vsel %vm1269_vm15, %v2705_v50, -1e+30  ;;  %2720 = vmax.xlane.f32.xlu1 %v2719_v51  ;;  %v3099_v50 = vrot.slane %v16883_v43, %v16786_v61 }
 0xca5   :  { %v2716_v53 = vsel %vm1624_vm0, %v2714_v52, -inf }
 0xca6   :  { %2717 = vmax.xlane.f32.xlu0 %v2716_v53  ;;  %v3172_v20 = vadd.f32 %v14291_v5, %v3099_v50  ;;  %v3167_v32 = vadd.f32 %v3166_v31, %v3099_v50 }
 0xd2d   :  { %v2721_v54 = vpop.xlane.xlu1 %2720 }
 0xd2e   :  { %v2723_v55 = vsub.f32 %v2715_v18, %v2721_v54 }
 0xd2f   :  { %v2718_v56 = vpop.xlane.xlu0 %2717 }
 0xd30   :  { %v2726_v58 = vmul.f32 1.442695, %v2723_v55  ;;  %v2722_v60 = vsub.f32 %v2714_v52, %v2718_v56 }
 0xd32   :  { %15307 = vpow2.f32 %v2726_v58  ;;  %v2724_v63 = vmul.f32 1.442695, %v2722_v60 }
 0xd34   :  { %15309 = vpow2.f32 %v2724_v63 }
 0xd3f   :  { %v15308_v0 = vpop.eup %15307 }
 0xd40   :  { %v2731_v1 = vsel %vm1624_vm0, %v15308_v0, 0.0 }
 0xd41   :  { %v15310_v2 = vpop.eup %15309  ;;  %2732 = vadd.xlane.f32.xlu1 %v2731_v1 }
 0xd42   :  { %v2728_v3 = vsel %vm1624_vm0, %v15310_v2, 0.0 }
 0xd43   :  { %2729 = vadd.xlane.f32.xlu0 %v2728_v3 }
 0xdca   :  { %v2733_v8 = vpop.xlane.xlu1 %2732 }
 0xdcb   :  { %15311 = vrcp.f32 %v2733_v8  ;;  %v12930_v8 = vld [vmem:[%s17678_s14 + $0x38] sm:$0xff]  }
 0xdcc   :  { %v2730_v11 = vpop.xlane.xlu0 %2729 }
 0xdcd   :  { %15313 = vrcp.f32 %v2730_v11  ;;  %v11841_v11 = vunpack.c.h.bf16 %v12930_v8 }
 0xdcf   :  { %14306 = vmatprep.subr.mxu1 %v11841_v11 }
 0xdd0   :  { %14307 = vmatpush3.msra.mxu1 %v11841_v11 }
 0xdd8   :  { %v15312_v14 = vpop.eup %15311 }
 0xdd9   :  { %v2737_v19 = vmul.f32 %v15312_v14, %v15308_v0  ;;  %v11840_v14 = vunpack.c.l.bf16 %v12930_v8 }
 0xdda   :  { %v15314_v15 = vpop.eup %15313 }
 0xddb   :  { %v2735_v16 = vmul.f32 %v15314_v15, %v15310_v2  ;;  %14308 = vmatprep.subr.mxu1 %v11840_v14 }
 0xddc   :  { %14309 = vmatpush3.msra.mxu1 %v11840_v14 }
 0xddd   :  { %14245 = vmatprep.mubr.msk.f32.mxu0 %vm1624_vm0, %v2735_v16 }
 0xdde   :  { %14246 = vmatmul.mubr.msk.f32.vlgmr.msra.gmra.mxu0 %vm1624_vm0, %v2737_v19 }
 0xddf   :  { %14249 = vmatpush3.msra.mxu0 %v11809_v7 }
 0xde0   :  { %14250 = vmatprep.subr.mxu0 %v11808_v21 }
 0xde1   :  { %14251 = vmatpush3.msra.mxu0 %v11808_v21 }
 0xde2   :  { %14252 = vmatprep.subr.mxu0 %v11805_v22 }
 0xde3   :  { %14253 = vmatpush3.msra.mxu0 %v11805_v22 }
 0xde4   :  { %14254 = vmatprep.subr.mxu0 %v11804_v23 }
 0xde5   :  { %14255 = vmatpush3.msra.mxu0 %v11804_v23  ;;  %v12929_v23 = vld [vmem:[%s17678_s14 + $0x30] sm:$0xff]  }
 0xde6   :  { %14270 = vmatprep.subr.mxu0 %v11825_v9  ;;  %v11837_v24 = vunpack.c.h.bf16 %v12929_v23 }
 0xde8   :  { %14310 = vmatprep.subr.mxu1 %v11837_v24 }
 0xde9   :  { %14311 = vmatpush3.msra.mxu1 %v11837_v24 }
 0xe9e   :  { %v14247_v25 = vpop.f32.mrf.mxu0 }
 0xea0   :  { %v2810_v26 = vpop.f32.mrf.mxu0 }
 0xea1   :  { %14256 = vmatprep.mubr.msk.f32.mxu0 %vm1534_vm14, %v2810_v26  ;;  %v12933_v26 = vld [vmem:[#allocation16 + $0xd8] sm:$0xff]  }
 0xea2   :  { %14257 = vmatmul.mubr.msk.f32.vlgmr.msra.gmra.mxu0 %vm1534_vm14, %v14247_v25  ;;  %v12931_v25 = vld [vmem:[#allocation16 + $0xc8] sm:$0xff]   ;;  %v11857_v30 = vunpack.c.h.bf16 %v12933_v26 }
 0xea3   :  { %14271 = vmatpush3.xpose.msra.mxu0 %v11825_v9  ;;  %14278 = vmatprep.mubr.f32.mxu0 %v16757_v27  ;;  %v11836_v9 = vunpack.c.l.bf16 %v12929_v23 }
 0xea4   :  { %14272 = vmatprep.subr.mxu0 %v11824_v29 }
 0xea5   :  { %14312 = vmatprep.subr.mxu1 %v11836_v9 }
 0xea6   :  { %14313 = vmatpush3.msra.mxu1 %v11836_v9 }
 0xea7   :  { %14273 = vmatpush3.xpose.msra.mxu0 %v11824_v29  ;;  %v11849_v29 = vunpack.c.h.bf16 %v12931_v25  ;;  %14328 = vmatprep.subr.mxu1 %v11857_v30 }
 0xea8   :  { %14274 = vmatprep.subr.mxu0 %v11821_v33 }
 0xeab   :  { %14275 = vmatpush3.xpose.msra.mxu0 %v11821_v33  ;;  %v11848_v33 = vunpack.c.l.bf16 %v12931_v25 }
 0xeac   :  { %14276 = vmatprep.subr.mxu0 %v11820_v34 }
 0xeaf   :  { %14277 = vmatpush3.xpose.msra.mxu0 %v11820_v34 }
 0xeb2   :  { %14279 = vmatmul.mubr.f32.vlgmr.msra.gmra.mxu0 %v16759_v28 }
 0xeb3   :  { %14296 = vmatprep.mubr.msk.f32.mxu0 %vm1534_vm14, %v3009_v36  ;;  %v11856_v36 = vunpack.c.l.bf16 %v12933_v26 }
 0xf62   :  { %v14258_v38 = vpop.f32.mrf.mxu0 }
 0xf63   :  { %v16914_v40 = vadd.f32 %v14258_v38, %v2360_v37  ;;  %v11843_v37 = vld [vmem:[#allocation16 + $0xc0] sm:$0xff]  }
 0xf64   :  { %v2900_v41 = vpop.f32.mrf.mxu0  ;;  %v11845_v38 = vunpack.c.h.bf16 %v11843_v37 }
 0xf65   :  { %v16916_v42 = vadd.f32 %v2900_v41, %v2355_v39  ;;  %v12932_v39 = vld [vmem:[#allocation16 + $0xd0] sm:$0xff]  }
 0xf66   :  { %v11853_v41 = vunpack.c.h.bf16 %v12932_v39 }
 0xf72   :  { %v14280_v44 = vpop.f32.mrf.mxu0 }
 0xf73   :  { %v3093_v49 = vadd.f32 %v14280_v44, %v3020_v46  ;;  %v11852_v44 = vunpack.c.l.bf16 %v12932_v39 }
 0xf74   :  { %v3087_v18 = vpop.f32.mrf.mxu0 }
 0xf75   :  { %v3088_v51 = vadd.f32 %v3087_v18, %v3020_v46  ;;  %14292 = vmatprep.subr.msk.mxu0 %vm1534_vm14, %v3093_v49  ;;  %v11844_v46 = vunpack.c.l.bf16 %v11843_v37 }
 0xf76   :  { %14293 = vmatpush3.xpose.msk.msra.mxu0 %vm1534_vm14, %v3093_v49  ;;  %v12935_v49 = vld [vmem:[#allocation16 + $0xe8] sm:$0xff]  }
 0xf77   :  { %14294 = vmatprep.subr.msk.mxu0 %vm1534_vm14, %v3088_v51  ;;  %v11865_v18 = vunpack.c.h.bf16 %v12935_v49 }
 0xf7a   :  { %14295 = vmatpush3.xpose.msk.msra.mxu0 %vm1534_vm14, %v3088_v51 }
 0xf7b   :  { %14299 = vmatprep.subr.mxu0 %v3172_v20 }
 0xf7d   :  { %14297 = vmatmul.mubr.msk.f32.vlgmr.msra.gmra.mxu0 %vm1534_vm14, %v16890_v47 }
 0xf7e   :  { %14300 = vmatpush3.msra.mxu0 %v3172_v20 }
 0xf7f   :  { %14301 = vmatprep.subr.mxu0 %v3167_v32 }
 0xf80   :  { %14302 = vmatpush3.msra.mxu0 %v3167_v32  ;;  %v11534_v32 = vld [vmem:[#allocation17] ss:$0 sm:$0xff] }
 0xf81   :  { %14317 = vmatprep.subr.mxu0 %v11849_v29 }
0x103d   :  { %v14298_v43 = vpop.f32.mrf.mxu0 }
0x103e   :  { %v3263_v52 = vsel %vm1270_vm1, %v14298_v43, -1e+30 }
0x103f   :  { %v3253_v53 = vpop.f32.mrf.mxu0  ;;  %v3267_v54 = vsel %vm1624_vm0, %v3263_v52, -inf }
0x1040   :  { %v3262_v55 = vsel %vm1269_vm15, %v3253_v53, -1e+30  ;;  %3268 = vmax.xlane.f32.xlu1 %v3267_v54  ;;  %v11864_v54 = vunpack.c.l.bf16 %v12935_v49 }
0x1041   :  { %v3264_v56 = vsel %vm1624_vm0, %v3262_v55, -inf }
0x1042   :  { %3265 = vmax.xlane.f32.xlu0 %v3264_v56 }
0x10c9   :  { %v3269_v58 = vpop.xlane.xlu1 %3268 }
0x10ca   :  { %v3271_v47 = vsub.f32 %v3263_v52, %v3269_v58  ;;  %v11875_v58 = vld [vmem:[#allocation16 + $0xf0] sm:$0xff]  }
0x10cb   :  { %v3266_v60 = vpop.xlane.xlu0 %3265 }
0x10cc   :  { %v3274_v63 = vmul.f32 1.442695, %v3271_v47  ;;  %v3270_v0 = vsub.f32 %v3262_v55, %v3266_v60  ;;  %v12934_v55 = vld [vmem:[#allocation16 + $0xe0] sm:$0xff]   ;;  %v11877_v47 = vunpack.c.h.bf16 %v11875_v58  ;;  %v11876_v60 = vunpack.c.l.bf16 %v11875_v58 }
0x10ce   :  { %15315 = vpow2.f32 %v3274_v63  ;;  %v3272_v1 = vmul.f32 1.442695, %v3270_v0  ;;  %v12942_v63 = vld [vmem:[#allocation16 + $0x118] sm:$0xff]  }
0x10cf   :  { %v11897_v0 = vunpack.c.h.bf16 %v12942_v63 }
0x10d0   :  { %15317 = vpow2.f32 %v3272_v1  ;;  %v11896_v1 = vunpack.c.l.bf16 %v12942_v63 }
0x10db   :  { %v15316_v2 = vpop.eup %15315 }
0x10dc   :  { %v3279_v3 = vsel %vm1624_vm0, %v15316_v2, 0.0 }
0x10dd   :  { %v15318_v4 = vpop.eup %15317  ;;  %3280 = vadd.xlane.f32.xlu1 %v3279_v3 }
0x10de   :  { %v3276_v7 = vsel %vm1624_vm0, %v15318_v4, 0.0 }
0x10df   :  { %3277 = vadd.xlane.f32.xlu0 %v3276_v7  ;;  %v11535_v7 = vld [vmem:[%s17676_s1 + $0x10] sm:$0x7] }
0x10e0   :  { %v3580_v8 = vrot.slane %v11535_v7, %v16772_v45  ;;  %v3659_v24 = vrot.slane %v11535_v7, %v16786_v61 }
0x1166   :  { %v3281_v15 = vpop.xlane.xlu1 %3280 }
0x1167   :  { %15319 = vrcp.f32 %v3281_v15  ;;  %v3501_v15 = vrot.slane %v11535_v7, %v16776_v48 }
0x1168   :  { %v3278_v16 = vpop.xlane.xlu0 %3277 }
0x1169   :  { %15321 = vrcp.f32 %v3278_v16 }
0x1174   :  { %v15320_v17 = vpop.eup %15319 }
0x1175   :  { %v3285_v22 = vmul.f32 %v15320_v17, %v15316_v2  ;;  %v12941_v2 = vld [vmem:[#allocation16 + $0x110] sm:$0xff]  }
0x1176   :  { %v15322_v19 = vpop.eup %15321  ;;  %v11893_v3 = vunpack.c.h.bf16 %v12941_v2 }
0x1177   :  { %v3283_v21 = vmul.f32 %v15322_v19, %v15318_v4  ;;  %v11892_v4 = vunpack.c.l.bf16 %v12941_v2 }
0x1179   :  { %14303 = vmatprep.mubr.msk.f32.mxu0 %vm1624_vm0, %v3283_v21 }
0x117a   :  { %14304 = vmatmul.mubr.msk.f32.vlgmr.msra.gmra.mxu0 %vm1624_vm0, %v3285_v22 }
0x117b   :  { %14318 = vmatpush3.xpose.msra.mxu0 %v11849_v29 }
0x117c   :  { %14319 = vmatprep.subr.mxu0 %v11848_v33 }
0x117f   :  { %14320 = vmatpush3.xpose.msra.mxu0 %v11848_v33 }
0x1180   :  { %14321 = vmatprep.subr.mxu0 %v11845_v38 }
0x1183   :  { %14322 = vmatpush3.xpose.msra.mxu0 %v11845_v38 }
0x1184   :  { %14323 = vmatprep.subr.mxu0 %v11844_v46 }
0x1187   :  { %14324 = vmatpush3.xpose.msra.mxu0 %v11844_v46 }
0x1188   :  { %14339 = vmatprep.subr.mxu0 %v11865_v18 }
0x123a   :  { %v14305_v34 = vpop.f32.mrf.mxu0 }
0x123c   :  { %v3358_v35 = vpop.f32.mrf.mxu0 }
0x123d   :  { %14314 = vmatprep.mubr.msk.f32.mxu1 %vm1534_vm14, %v3358_v35 }
0x123e   :  { %14315 = vmatmul.mubr.msk.f32.vlgmr.msra.gmra.mxu1 %vm1534_vm14, %v14305_v34 }
0x123f   :  { %14329 = vmatpush3.xpose.msra.mxu1 %v11857_v30  ;;  %v16971_v30 = vld [vmem:[%s17676_s1 + $0x14] sm:$0x7] }
0x1240   :  { %14330 = vmatprep.subr.mxu1 %v11856_v36  ;;  %v3966_v33 = vrot.slane %v16971_v30, %v16776_v48 }
0x1243   :  { %14331 = vmatpush3.xpose.msra.mxu1 %v11856_v36 }
0x1244   :  { %14332 = vmatprep.subr.mxu1 %v11853_v41 }
0x1247   :  { %14333 = vmatpush3.xpose.msra.mxu1 %v11853_v41 }
0x1248   :  { %14334 = vmatprep.subr.mxu1 %v11852_v44 }
0x124b   :  { %14335 = vmatpush3.xpose.msra.mxu1 %v11852_v44 }
0x12fe   :  { %v14316_v50 = vpop.f32.mrf.mxu1 }
0x12ff   :  { %v3458_v51 = vadd.f32 %v14316_v50, %v16914_v40  ;;  %v12938_v40 = vld [vmem:[#allocation16 + $0xf8] sm:$0xff]  }
0x1300   :  { %v3448_v5 = vpop.f32.mrf.mxu1  ;;  %v11880_v56 = vunpack.c.l.bf16 %v12938_v40 }
0x1301   :  { %v3457_v20 = vadd.f32 %v3448_v5, %v16916_v42  ;;  %v3460_v31 = vadd.f32 %v3458_v51, %v16759_v28  ;;  %v11861_v28 = vunpack.c.h.bf16 %v12934_v55  ;;  %v11881_v42 = vunpack.c.h.bf16 %v12938_v40 }
0x1303   :  { %v3459_v43 = vadd.f32 %v3457_v20, %v16757_v27  ;;  %v16948_v53 = vadd.f32 %v11534_v32, %v3460_v31  ;;  %v11860_v27 = vunpack.c.l.bf16 %v12934_v55 }
0x1305   :  { %v16946_v52 = vadd.f32 %v11534_v32, %v3459_v43 }
0x1307   :  { %14325 = vmatprep.mubr.f32.mxu0 %v16946_v52  ;;  %14336 = vmatprep.mubr.f32.mxu1 %v16946_v52 }
0x1308   :  { %14326 = vmatmul.mubr.f32.vlgmr.msra.gmra.mxu0 %v16948_v53  ;;  %14337 = vmatmul.mubr.f32.vlgmr.msra.gmra.mxu1 %v16948_v53 }
0x1309   :  { %14340 = vmatpush3.xpose.msra.mxu0 %v11865_v18  ;;  %14347 = vmatprep.mubr.f32.mxu0 %v16946_v52 }
0x130a   :  { %14341 = vmatprep.subr.mxu0 %v11864_v54 }
0x130d   :  { %14342 = vmatpush3.xpose.msra.mxu0 %v11864_v54  ;;  %v12940_v54 = vld [vmem:[#allocation16 + $0x108] sm:$0xff]  }
0x130e   :  { %14343 = vmatprep.subr.mxu0 %v11861_v28  ;;  %v11889_v55 = vunpack.c.h.bf16 %v12940_v54  ;;  %v11888_v2 = vunpack.c.l.bf16 %v12940_v54 }
0x1311   :  { %14344 = vmatpush3.xpose.msra.mxu0 %v11861_v28  ;;  %v12937_v28 = vld [vmem:[%s17678_s14 + $0x48] sm:$0xff]  }
0x1312   :  { %14345 = vmatprep.subr.mxu0 %v11860_v27  ;;  %v11873_v40 = vunpack.c.h.bf16 %v12937_v28 }
0x1315   :  { %14346 = vmatpush3.xpose.msra.mxu0 %v11860_v27  ;;  %v12936_v27 = vld [vmem:[%s17678_s14 + $0x40] sm:$0xff]  }
0x1316   :  { %14364 = vmatprep.subr.mxu0 %v11881_v42 }
0x1318   :  { %14348 = vmatmul.mubr.f32.vlgmr.msra.gmra.mxu0 %v16948_v53 }
0x1319   :  { %14365 = vmatpush3.xpose.msra.mxu0 %v11881_v42  ;;  %14372 = vmatprep.mubr.f32.mxu0 %v16946_v52  ;;  %v11872_v42 = vunpack.c.l.bf16 %v12937_v28 }
0x131a   :  { %14366 = vmatprep.subr.mxu0 %v11880_v56 }
0x131d   :  { %14367 = vmatpush3.xpose.msra.mxu0 %v11880_v56  ;;  %v11869_v56 = vunpack.c.h.bf16 %v12936_v27 }
0x131e   :  { %14368 = vmatprep.subr.mxu0 %v11877_v47 }
0x1321   :  { %14369 = vmatpush3.xpose.msra.mxu0 %v11877_v47 }
0x1322   :  { %14370 = vmatprep.subr.mxu0 %v11876_v60 }
0x1325   :  { %14371 = vmatpush3.xpose.msra.mxu0 %v11876_v60 }
0x1326   :  { %14386 = vmatprep.subr.mxu0 %v11897_v0 }
0x1328   :  { %14373 = vmatmul.mubr.f32.vlgmr.msra.gmra.mxu0 %v16948_v53 }
0x1329   :  { %14387 = vmatpush3.xpose.msra.mxu0 %v11897_v0  ;;  %14394 = vmatprep.mubr.f32.mxu0 %v16946_v52 }
0x132a   :  { %14388 = vmatprep.subr.mxu0 %v11896_v1 }
0x132d   :  { %14389 = vmatpush3.xpose.msra.mxu0 %v11896_v1 }
0x132e   :  { %14390 = vmatprep.subr.mxu0 %v11893_v3 }
0x1331   :  { %14391 = vmatpush3.xpose.msra.mxu0 %v11893_v3  ;;  %v12939_v3 = vld [vmem:[#allocation16 + $0x100] sm:$0xff]  }
0x1332   :  { %14392 = vmatprep.subr.mxu0 %v11892_v4  ;;  %v11884_v7 = vunpack.c.l.bf16 %v12939_v3 }
0x1335   :  { %14393 = vmatpush3.xpose.msra.mxu0 %v11892_v4  ;;  %v11885_v4 = vunpack.c.h.bf16 %v12939_v3 }
0x1336   :  { %14422 = vmatprep.subr.mxu0 %v11873_v40 }
0x1338   :  { %14395 = vmatmul.mubr.f32.vlgmr.msra.gmra.mxu0 %v16948_v53 }
0x1339   :  { %14423 = vmatpush3.msra.mxu0 %v11873_v40 }
0x133a   :  { %14424 = vmatprep.subr.mxu0 %v11872_v42 }
0x133b   :  { %14425 = vmatpush3.msra.mxu0 %v11872_v42 }
0x133c   :  { %14426 = vmatprep.subr.mxu0 %v11869_v56 }
0x133d   :  { %14427 = vmatpush3.msra.mxu0 %v11869_v56 }
0x13c8   :  { %v14327_v11 = vpop.f32.mrf.mxu0  ;;  %v14338_v14 = vpop.f32.mrf.mxu1 }
0x13c9   :  { %v3653_v16 = vadd.f32 %v14338_v14, %v3580_v8  ;;  %v3574_v23 = vadd.f32 %v14327_v11, %v3501_v15  ;;  %v11868_v14 = vunpack.c.l.bf16 %v12936_v27 }
0x13ca   :  { %v3568_v17 = vpop.f32.mrf.mxu0  ;;  %v3647_v19 = vpop.f32.mrf.mxu1 }
0x13cb   :  { %v3569_v21 = vadd.f32 %v3568_v17, %v3501_v15  ;;  %v3648_v22 = vadd.f32 %v3647_v19, %v3580_v8  ;;  %14350 = vmatprep.subr.msk.mxu1 %vm1534_vm14, %v3653_v16  ;;  %v12947_v15 = vld [vmem:[#allocation16 + $0x138] sm:$0xff]   ;;  %14428 = vmatprep.subr.mxu0 %v11868_v14 }
0x13cc   :  { %14351 = vmatpush3.xpose.msk.msra.mxu1 %vm1534_vm14, %v3653_v16  ;;  %v11921_v16 = vunpack.c.h.bf16 %v12947_v15  ;;  %14429 = vmatpush3.msra.mxu0 %v11868_v14 }
0x13cd   :  { %14352 = vmatprep.subr.msk.mxu1 %vm1534_vm14, %v3648_v22  ;;  %14354 = vmatprep.mubr.msk.f32.mxu1 %vm1534_vm14, %v3569_v21  ;;  %v11920_v21 = vunpack.c.l.bf16 %v12947_v15 }
0x13ce   :  { %14444 = vmatprep.subr.mxu0 %v11921_v16 }
0x13d0   :  { %14353 = vmatpush3.xpose.msk.msra.mxu1 %vm1534_vm14, %v3648_v22  ;;  %v12946_v22 = vld [vmem:[#allocation16 + $0x130] sm:$0xff]  }
0x13d3   :  { %14355 = vmatmul.mubr.msk.f32.vlgmr.msra.gmra.mxu1 %vm1534_vm14, %v3574_v23  ;;  %v11917_v23 = vunpack.c.h.bf16 %v12946_v22 }
0x13d8   :  { %v14349_v9 = vpop.f32.mrf.mxu0 }
0x13d9   :  { %v3732_v25 = vadd.f32 %v14349_v9, %v3659_v24  ;;  %v4045_v9 = vrot.slane %v16971_v30, %v16772_v45 }
0x13da   :  { %v3726_v26 = vpop.f32.mrf.mxu0 }
0x13db   :  { %v3727_v29 = vadd.f32 %v3726_v26, %v3659_v24  ;;  %14357 = vmatprep.subr.mxu1 %v3732_v25  ;;  %v11916_v24 = vunpack.c.l.bf16 %v12946_v22 }
0x13dc   :  { %14358 = vmatpush3.msra.mxu1 %v3732_v25 }
0x13dd   :  { %14359 = vmatprep.subr.mxu1 %v3727_v29 }
0x13de   :  { %14360 = vmatpush3.msra.mxu1 %v3727_v29 }
0x13df   :  { %14375 = vmatprep.subr.mxu1 %v11889_v55 }
0x13e8   :  { %v14374_v34 = vpop.f32.mrf.mxu0 }
0x13e9   :  { %v16975_v35 = vadd.f32 %v14374_v34, %v3966_v33 }
0x13ea   :  { %v4033_v8 = vpop.f32.mrf.mxu0 }
0x13eb   :  { %v4034_v11 = vadd.f32 %v4033_v8, %v3966_v33  ;;  %v4124_v33 = vrot.slane %v16971_v30, %v16786_v61  ;;  %v12943_v8 = vld [vmem:[%s17678_s14 + $0x50] sm:$0xff]  }
0x13ec   :  { %v11901_v15 = vunpack.c.h.bf16 %v12943_v8 }
0x1493   :  { %v14356_v36 = vpop.f32.mrf.mxu1 }
0x1494   :  { %v3823_v37 = vsel %vm1270_vm1, %v14356_v36, -1e+30  ;;  %v14396_v36 = vpop.f32.mrf.mxu0 }
0x1495   :  { %v3813_v38 = vpop.f32.mrf.mxu1  ;;  %v3827_v39 = vsel %vm1624_vm0, %v3823_v37, -inf }
0x1496   :  { %v3822_v41 = vsel %vm1269_vm15, %v3813_v38, -1e+30  ;;  %3828 = vmax.xlane.f32.xlu1 %v3827_v39  ;;  %v4191_v38 = vpop.f32.mrf.mxu0 }
0x1497   :  { %v3824_v46 = vsel %vm1624_vm0, %v3822_v41, -inf  ;;  %v4192_v39 = vadd.f32 %v4191_v38, %v4124_v33  ;;  %v12952_v38 = vld [vmem:[#allocation16 + $0x158] sm:$0xff]  }
0x1498   :  { %3825 = vmax.xlane.f32.xlu0 %v3824_v46 }
0x151f   :  { %v3829_v44 = vpop.xlane.xlu1 %3828 }
0x1520   :  { %v3831_v49 = vsub.f32 %v3823_v37, %v3829_v44  ;;  %v4197_v37 = vadd.f32 %v14396_v36, %v4124_v33 }
0x1521   :  { %v3826_v18 = vpop.xlane.xlu0 %3825 }
0x1522   :  { %v3834_v50 = vmul.f32 1.442695, %v3831_v49  ;;  %v3830_v51 = vsub.f32 %v3822_v41, %v3826_v18  ;;  %v17009_v41 = vld [vmem:[%s17676_s1 + $0x18] sm:$0x7] }
0x1523   :  { %v4672_v46 = vrot.slane %v17009_v41, %v16772_v45 }
0x1524   :  { %15323 = vpow2.f32 %v3834_v50  ;;  %v3832_v5 = vmul.f32 1.442695, %v3830_v51 }
0x1526   :  { %15325 = vpow2.f32 %v3832_v5 }
0x1531   :  { %v15324_v20 = vpop.eup %15323 }
0x1532   :  { %v3839_v31 = vsel %vm1624_vm0, %v15324_v20, 0.0 }
0x1533   :  { %v15326_v32 = vpop.eup %15325  ;;  %3840 = vadd.xlane.f32.xlu1 %v3839_v31 }
0x1534   :  { %v3836_v43 = vsel %vm1624_vm0, %v15326_v32, 0.0 }
0x1535   :  { %3837 = vadd.xlane.f32.xlu0 %v3836_v43 }
0x15bc   :  { %v3841_v58 = vpop.xlane.xlu1 %3840 }
0x15bd   :  { %15327 = vrcp.f32 %v3841_v58 }
0x15be   :  { %v3838_v47 = vpop.xlane.xlu0 %3837 }
0x15bf   :  { %15329 = vrcp.f32 %v3838_v47 }
0x15ca   :  { %v15328_v60 = vpop.eup %15327 }
0x15cb   :  { %v3845_v1 = vmul.f32 %v15328_v60, %v15324_v20 }
0x15cc   :  { %v15330_v63 = vpop.eup %15329 }
0x15cd   :  { %v3843_v0 = vmul.f32 %v15330_v63, %v15326_v32  ;;  %v12944_v63 = vld [vmem:[%s17678_s14 + $0x58] sm:$0xff]  }
0x15ce   :  { %v11904_v14 = vunpack.c.l.bf16 %v12944_v63 }
0x15cf   :  { %14361 = vmatprep.mubr.msk.f32.mxu1 %vm1624_vm0, %v3843_v0  ;;  %v11905_v0 = vunpack.c.h.bf16 %v12944_v63 }
0x15d0   :  { %14362 = vmatmul.mubr.msk.f32.vlgmr.msra.gmra.mxu1 %vm1624_vm0, %v3845_v1 }
0x15d1   :  { %14376 = vmatpush3.xpose.msra.mxu1 %v11889_v55  ;;  %14383 = vmatprep.mubr.f32.mxu1 %v16946_v52 }
0x15d2   :  { %14377 = vmatprep.subr.mxu1 %v11888_v2 }
0x15d5   :  { %14378 = vmatpush3.xpose.msra.mxu1 %v11888_v2 }
0x15d6   :  { %14379 = vmatprep.subr.mxu1 %v11885_v4 }
0x15d9   :  { %14380 = vmatpush3.xpose.msra.mxu1 %v11885_v4 }
0x15da   :  { %14381 = vmatprep.subr.mxu1 %v11884_v7 }
0x15dd   :  { %14382 = vmatpush3.xpose.msra.mxu1 %v11884_v7 }
0x15e0   :  { %14384 = vmatmul.mubr.f32.vlgmr.msra.gmra.mxu1 %v16948_v53 }
0x15e1   :  { %14401 = vmatprep.mubr.msk.f32.mxu1 %vm1534_vm14, %v4034_v11 }
0x1690   :  { %v14363_v17 = vpop.f32.mrf.mxu1 }
0x1692   :  { %v3918_v19 = vpop.f32.mrf.mxu1 }
0x1693   :  { %14430 = vmatprep.mubr.msk.f32.mxu0 %vm1534_vm14, %v3918_v19 }
0x1694   :  { %14431 = vmatmul.mubr.msk.f32.vlgmr.msra.gmra.mxu0 %vm1534_vm14, %v14363_v17  ;;  %v12945_v17 = vld [vmem:[#allocation16 + $0x128] sm:$0xff]  }
0x1695   :  { %14445 = vmatpush3.xpose.msra.mxu0 %v11921_v16  ;;  %14452 = vmatprep.mubr.f32.mxu0 %v16946_v52  ;;  %v11900_v16 = vunpack.c.l.bf16 %v12943_v8  ;;  %v11913_v19 = vunpack.c.h.bf16 %v12945_v17 }
0x1696   :  { %14446 = vmatprep.subr.mxu0 %v11920_v21 }
0x1699   :  { %14447 = vmatpush3.xpose.msra.mxu0 %v11920_v21 }
0x169a   :  { %14448 = vmatprep.subr.mxu0 %v11917_v23 }
0x169d   :  { %14449 = vmatpush3.xpose.msra.mxu0 %v11917_v23  ;;  %v11912_v23 = vunpack.c.l.bf16 %v12945_v17 }
0x169e   :  { %14450 = vmatprep.subr.mxu0 %v11916_v24 }
0x16a0   :  { %v14385_v25 = vpop.f32.mrf.mxu1 }
0x16a1   :  { %v4118_v26 = vadd.f32 %v14385_v25, %v4045_v9  ;;  %14451 = vmatpush3.xpose.msra.mxu0 %v11916_v24  ;;  %v11907_v24 = vld [vmem:[#allocation16 + $0x120] sm:$0xff]  }
0x16a2   :  { %v4112_v29 = vpop.f32.mrf.mxu1  ;;  %v11908_v25 = vunpack.c.l.bf16 %v11907_v24 }
0x16a3   :  { %v4113_v34 = vadd.f32 %v4112_v29, %v4045_v9  ;;  %14397 = vmatprep.subr.msk.mxu1 %vm1534_vm14, %v4118_v26  ;;  %v11909_v9 = vunpack.c.h.bf16 %v11907_v24 }
0x16a4   :  { %14398 = vmatpush3.xpose.msk.msra.mxu1 %vm1534_vm14, %v4118_v26  ;;  %14453 = vmatmul.mubr.f32.vlgmr.msra.gmra.mxu0 %v16948_v53  ;;  %v12949_v26 = vld [vmem:[#allocation16 + $0x148] sm:$0xff]  }
0x16a5   :  { %14399 = vmatprep.subr.msk.mxu1 %vm1534_vm14, %v4113_v34  ;;  %v11929_v29 = vunpack.c.h.bf16 %v12949_v26  ;;  %v11928_v33 = vunpack.c.l.bf16 %v12949_v26  ;;  %v12951_v26 = vld [vmem:[%s17678_s14 + $0x68] sm:$0xff]  }
0x16a8   :  { %14400 = vmatpush3.xpose.msk.msra.mxu1 %vm1534_vm14, %v4113_v34  ;;  %v12948_v34 = vld [vmem:[#allocation16 + $0x140] sm:$0xff]  }
0x16a9   :  { %14404 = vmatprep.subr.mxu1 %v4197_v37  ;;  %v11925_v36 = vunpack.c.h.bf16 %v12948_v34 }
0x16ab   :  { %14402 = vmatmul.mubr.msk.f32.vlgmr.msra.gmra.mxu1 %vm1534_vm14, %v16975_v35 }
0x16ac   :  { %14405 = vmatpush3.msra.mxu1 %v4197_v37  ;;  %v11924_v37 = vunpack.c.l.bf16 %v12948_v34 }
0x16ad   :  { %14406 = vmatprep.subr.mxu1 %v4192_v39 }
0x16ae   :  { %14407 = vmatpush3.msra.mxu1 %v4192_v39  ;;  %v11945_v39 = vunpack.c.h.bf16 %v12952_v38 }
0x16af   :  { %14411 = vmatprep.subr.mxu1 %v11905_v0 }
0x1754   :  { %v17006_v30 = vpop.f32.mrf.mxu0 }
0x1756   :  { %v17013_v44 = vpop.f32.mrf.mxu0 }
0x1764   :  { %v14454_v49 = vpop.f32.mrf.mxu0 }
0x1765   :  { %v4745_v18 = vadd.f32 %v14454_v49, %v4672_v46  ;;  %v11939_v49 = vld [vmem:[#allocation16 + $0x150] sm:$0xff]  }
0x1766   :  { %v4739_v50 = vpop.f32.mrf.mxu0 }
0x1767   :  { %v4740_v51 = vadd.f32 %v4739_v50, %v4672_v46  ;;  %14466 = vmatprep.subr.msk.mxu0 %vm1534_vm14, %v4745_v18  ;;  %v11944_v46 = vunpack.c.l.bf16 %v12952_v38  ;;  %v11940_v50 = vunpack.c.l.bf16 %v11939_v49 }
0x1768   :  { %14467 = vmatpush3.xpose.msk.msra.mxu0 %vm1534_vm14, %v4745_v18  ;;  %v11941_v18 = vunpack.c.h.bf16 %v11939_v49  ;;  %v11936_v49 = vunpack.c.l.bf16 %v12951_v26 }
0x1769   :  { %14468 = vmatprep.subr.msk.mxu0 %vm1534_vm14, %v4740_v51 }
0x176b   :  { %v14403_v35 = vpop.f32.mrf.mxu1 }
0x176c   :  { %v4288_v5 = vsel %vm1270_vm1, %v14403_v35, -1e+30  ;;  %14469 = vmatpush3.xpose.msk.msra.mxu0 %vm1534_vm14, %v4740_v51  ;;  %v12956_v51 = vld [vmem:[#allocation16 + $0x178] sm:$0xff]  }
0x176d   :  { %v4278_v20 = vpop.f32.mrf.mxu1  ;;  %v4292_v31 = vsel %vm1624_vm0, %v4288_v5, -inf  ;;  %v11961_v35 = vunpack.c.h.bf16 %v12956_v51 }
0x176e   :  { %v4287_v32 = vsel %vm1269_vm15, %v4278_v20, -1e+30  ;;  %4293 = vmax.xlane.f32.xlu1 %v4292_v31  ;;  %v12955_v20 = vld [vmem:[#allocation16 + $0x170] sm:$0xff]  }
0x176f   :  { %v4289_v43 = vsel %vm1624_vm0, %v4287_v32, -inf  ;;  %v11957_v31 = vunpack.c.h.bf16 %v12955_v20 }
0x1770   :  { %4290 = vmax.xlane.f32.xlu0 %v4289_v43 }
0x17f7   :  { %v4294_v54 = vpop.xlane.xlu1 %4293 }
0x17f8   :  { %v4296_v55 = vsub.f32 %v4288_v5, %v4294_v54  ;;  %v11960_v5 = vunpack.c.l.bf16 %v12956_v51  ;;  %v12954_v51 = vld [vmem:[#allocation16 + $0x168] sm:$0xff]  }
0x17f9   :  { %v4291_v28 = vpop.xlane.xlu0 %4290 }
0x17fa   :  { %v4299_v27 = vmul.f32 1.442695, %v4296_v55  ;;  %v4295_v40 = vsub.f32 %v4287_v32, %v4291_v28  ;;  %v11956_v32 = vunpack.c.l.bf16 %v12955_v20  ;;  %v4593_v55 = vrot.slane %v17009_v41, %v16776_v48 }
0x17fc   :  { %15331 = vpow2.f32 %v4299_v27  ;;  %v4297_v42 = vmul.f32 1.442695, %v4295_v40 }
0x17fe   :  { %15333 = vpow2.f32 %v4297_v42 }
0x1809   :  { %v15332_v56 = vpop.eup %15331 }
0x180a   :  { %v4304_v58 = vsel %vm1624_vm0, %v15332_v56, 0.0 }
0x180b   :  { %v15334_v47 = vpop.eup %15333  ;;  %4305 = vadd.xlane.f32.xlu1 %v4304_v58 }
0x180c   :  { %v4301_v60 = vsel %vm1624_vm0, %v15334_v47, 0.0 }
0x180d   :  { %4302 = vadd.xlane.f32.xlu0 %v4301_v60 }
0x1894   :  { %v4306_v1 = vpop.xlane.xlu1 %4305 }
0x1895   :  { %15335 = vrcp.f32 %v4306_v1 }
0x1896   :  { %v4303_v2 = vpop.xlane.xlu0 %4302 }
0x1897   :  { %15337 = vrcp.f32 %v4303_v2 }
0x18a2   :  { %v15336_v3 = vpop.eup %15335 }
0x18a3   :  { %v4310_v11 = vmul.f32 %v15336_v3, %v15332_v56  ;;  %v4751_v56 = vrot.slane %v17009_v41, %v16786_v61 }
0x18a4   :  { %v15338_v4 = vpop.eup %15337 }
0x18a5   :  { %v4308_v7 = vmul.f32 %v15338_v4, %v15334_v47 }
0x18a7   :  { %14408 = vmatprep.mubr.msk.f32.mxu1 %vm1624_vm0, %v4308_v7 }
0x18a8   :  { %14409 = vmatmul.mubr.msk.f32.vlgmr.msra.gmra.mxu1 %vm1624_vm0, %v4310_v11 }
0x18a9   :  { %14412 = vmatpush3.msra.mxu1 %v11905_v0  ;;  %v17052_v0 = vld [vmem:[%s17676_s1 + $0x1c] sm:$0x7] }
0x18aa   :  { %14413 = vmatprep.subr.mxu1 %v11904_v14  ;;  %v17056_v1 = vrot.slane %v17052_v0, %v16776_v48 }
0x18ab   :  { %14414 = vmatpush3.msra.mxu1 %v11904_v14 }
0x18ac   :  { %14415 = vmatprep.subr.mxu1 %v11901_v15 }
0x18ad   :  { %14416 = vmatpush3.msra.mxu1 %v11901_v15 }
0x18ae   :  { %14417 = vmatprep.subr.mxu1 %v11900_v16 }
0x18af   :  { %14418 = vmatpush3.msra.mxu1 %v11900_v16 }
0x18b0   :  { %14433 = vmatprep.subr.mxu1 %v11913_v19 }
0x1968   :  { %v14410_v21 = vpop.f32.mrf.mxu1 }
0x196a   :  { %v4383_v22 = vpop.f32.mrf.mxu1 }
0x196b   :  { %14419 = vmatprep.mubr.msk.f32.mxu1 %vm1534_vm14, %v4383_v22 }
0x196c   :  { %14420 = vmatmul.mubr.msk.f32.vlgmr.msra.gmra.mxu1 %vm1534_vm14, %v14410_v21 }
0x196d   :  { %14434 = vmatpush3.xpose.msra.mxu1 %v11913_v19  ;;  %14441 = vmatprep.mubr.f32.mxu1 %v16946_v52 }
0x196e   :  { %14435 = vmatprep.subr.mxu1 %v11912_v23 }
0x1971   :  { %14436 = vmatpush3.xpose.msra.mxu1 %v11912_v23 }
0x1972   :  { %14437 = vmatprep.subr.mxu1 %v11909_v9 }
0x1975   :  { %14438 = vmatpush3.xpose.msra.mxu1 %v11909_v9 }
0x1976   :  { %14439 = vmatprep.subr.mxu1 %v11908_v25 }
0x1979   :  { %14440 = vmatpush3.xpose.msra.mxu1 %v11908_v25 }
0x197a   :  { %14455 = vmatprep.subr.mxu1 %v11929_v29 }
0x197c   :  { %14442 = vmatmul.mubr.f32.vlgmr.msra.gmra.mxu1 %v16948_v53 }
0x197d   :  { %14456 = vmatpush3.xpose.msra.mxu1 %v11929_v29  ;;  %14463 = vmatprep.mubr.f32.mxu1 %v16946_v52  ;;  %v11937_v29 = vunpack.c.h.bf16 %v12951_v26 }
0x197e   :  { %14457 = vmatprep.subr.mxu1 %v11928_v33 }
0x1981   :  { %14458 = vmatpush3.xpose.msra.mxu1 %v11928_v33 }
0x1982   :  { %14459 = vmatprep.subr.mxu1 %v11925_v36 }
0x1985   :  { %14460 = vmatpush3.xpose.msra.mxu1 %v11925_v36 }
0x1986   :  { %14461 = vmatprep.subr.mxu1 %v11924_v37 }
0x1989   :  { %14462 = vmatpush3.xpose.msra.mxu1 %v11924_v37 }
0x198a   :  { %14491 = vmatprep.subr.mxu1 %v11945_v39 }
0x198c   :  { %14464 = vmatmul.mubr.f32.vlgmr.msra.gmra.mxu1 %v16948_v53 }
0x198d   :  { %14492 = vmatpush3.xpose.msra.mxu1 %v11945_v39  ;;  %14499 = vmatprep.mubr.f32.mxu1 %v16946_v52  ;;  %v12950_v39 = vld [vmem:[%s17678_s14 + $0x60] sm:$0xff]  }
0x198e   :  { %14493 = vmatprep.subr.mxu1 %v11944_v46 }
0x1991   :  { %14494 = vmatpush3.xpose.msra.mxu1 %v11944_v46 }
0x1992   :  { %14495 = vmatprep.subr.mxu1 %v11941_v18 }
0x1995   :  { %14496 = vmatpush3.xpose.msra.mxu1 %v11941_v18  ;;  %v11933_v18 = vunpack.c.h.bf16 %v12950_v39 }
0x1996   :  { %14497 = vmatprep.subr.mxu1 %v11940_v50 }
0x1999   :  { %14498 = vmatpush3.xpose.msra.mxu1 %v11940_v50  ;;  %v11932_v50 = vunpack.c.l.bf16 %v12950_v39 }
0x199a   :  { %14513 = vmatprep.subr.mxu1 %v11961_v35 }
0x199c   :  { %14500 = vmatmul.mubr.f32.vlgmr.msra.gmra.mxu1 %v16948_v53 }
0x199d   :  { %14514 = vmatpush3.xpose.msra.mxu1 %v11961_v35  ;;  %14521 = vmatprep.mubr.f32.mxu1 %v16946_v52  ;;  %v11953_v35 = vunpack.c.h.bf16 %v12954_v51 }
0x199e   :  { %14515 = vmatprep.subr.mxu1 %v11960_v5 }
0x19a1   :  { %14516 = vmatpush3.xpose.msra.mxu1 %v11960_v5 }
0x19a2   :  { %14517 = vmatprep.subr.mxu1 %v11957_v31 }
0x19a5   :  { %14518 = vmatpush3.xpose.msra.mxu1 %v11957_v31  ;;  %v11952_v31 = vunpack.c.l.bf16 %v12954_v51 }
0x19a6   :  { %14519 = vmatprep.subr.mxu1 %v11956_v32 }
0x19a9   :  { %14520 = vmatpush3.xpose.msra.mxu1 %v11956_v32  ;;  %v12953_v32 = vld [vmem:[#allocation16 + $0x160] sm:$0xff]  }
0x19ac   :  { %14522 = vmatmul.mubr.f32.vlgmr.msra.gmra.mxu1 %v16948_v53 }
0x1a2c   :  { %v17041_v43 = vpop.f32.mrf.mxu1 }
0x1a2e   :  { %v17043_v54 = vpop.f32.mrf.mxu1 }
0x1a3c   :  { %v14443_v28 = vpop.f32.mrf.mxu1 }
0x1a3d   :  { %v4666_v42 = vadd.f32 %v14443_v28, %v4593_v55  ;;  %v11948_v28 = vunpack.c.l.bf16 %v12953_v32 }
0x1a3e   :  { %v4660_v27 = vpop.f32.mrf.mxu1 }
0x1a3f   :  { %v4661_v40 = vadd.f32 %v4660_v27, %v4593_v55  ;;  %v11949_v55 = vunpack.c.h.bf16 %v12953_v32 }
0x1a41   :  { %14470 = vmatprep.mubr.msk.f32.mxu0 %vm1534_vm14, %v4661_v40 }
0x1a42   :  { %14471 = vmatmul.mubr.msk.f32.vlgmr.msra.gmra.mxu0 %vm1534_vm14, %v4666_v42  ;;  %v4560_v42 = vadd.f32 %v17006_v30, %v17041_v43 }
0x1a4c   :  { %v14465_v58 = vpop.f32.mrf.mxu1 }
0x1a4d   :  { %v4824_v47 = vadd.f32 %v14465_v58, %v4751_v56  ;;  %v4555_v58 = vadd.f32 %v17013_v44, %v17043_v54 }
0x1a4e   :  { %v4818_v60 = vpop.f32.mrf.mxu1 }
0x1a4f   :  { %v4819_v63 = vadd.f32 %v4818_v60, %v4751_v56  ;;  %14473 = vmatprep.subr.mxu0 %v4824_v47 }
0x1a50   :  { %14474 = vmatpush3.msra.mxu0 %v4824_v47 }
0x1a51   :  { %14475 = vmatprep.subr.mxu0 %v4819_v63 }
0x1a52   :  { %14476 = vmatpush3.msra.mxu0 %v4819_v63 }
0x1a53   :  { %14480 = vmatprep.subr.mxu0 %v11937_v29 }
0x1a5c   :  { %v14501_v2 = vpop.f32.mrf.mxu1 }
0x1a5d   :  { %v17059_v3 = vadd.f32 %v14501_v2, %v17056_v1  ;;  %v5220_v2 = vrot.slane %v17052_v0, %v16772_v45 }
0x1a5e   :  { %v5208_v27 = vpop.f32.mrf.mxu1 }
0x1a5f   :  { %v5209_v40 = vadd.f32 %v5208_v27, %v17056_v1 }
0x1a6c   :  { %v14523_v30 = vpop.f32.mrf.mxu1 }
0x1a6e   :  { %v5366_v43 = vpop.f32.mrf.mxu1 }
0x1b02   :  { %v14472_v4 = vpop.f32.mrf.mxu0 }
0x1b03   :  { %v4915_v41 = vsel %vm1270_vm1, %v14472_v4, -1e+30 }
0x1b04   :  { %v4905_v7 = vpop.f32.mrf.mxu0  ;;  %v4919_v8 = vsel %vm1624_vm0, %v4915_v41, -inf }
0x1b05   :  { %v4914_v11 = vsel %vm1269_vm15, %v4905_v7, -1e+30  ;;  %4920 = vmax.xlane.f32.xlu1 %v4919_v8  ;;  %v5299_v7 = vrot.slane %v17052_v0, %v16786_v61 }
0x1b06   :  { %v4916_v14 = vsel %vm1624_vm0, %v4914_v11, -inf }
0x1b07   :  { %4917 = vmax.xlane.f32.xlu0 %v4916_v14  ;;  %v5372_v44 = vadd.f32 %v14523_v30, %v5299_v7  ;;  %v5367_v54 = vadd.f32 %v5366_v43, %v5299_v7 }
0x1b8e   :  { %v4921_v15 = vpop.xlane.xlu1 %4920 }
0x1b8f   :  { %v4923_v16 = vsub.f32 %v4915_v41, %v4921_v15 }
0x1b90   :  { %v4918_v17 = vpop.xlane.xlu0 %4917 }
0x1b91   :  { %v4926_v19 = vmul.f32 1.442695, %v4923_v16  ;;  %v4922_v21 = vsub.f32 %v4914_v11, %v4918_v17 }
0x1b93   :  { %15339 = vpow2.f32 %v4926_v19  ;;  %v4924_v22 = vmul.f32 1.442695, %v4922_v21 }
0x1b95   :  { %15341 = vpow2.f32 %v4924_v22 }
0x1ba0   :  { %v15340_v23 = vpop.eup %15339 }
0x1ba1   :  { %v4931_v24 = vsel %vm1624_vm0, %v15340_v23, 0.0 }
0x1ba2   :  { %v15342_v9 = vpop.eup %15341  ;;  %4932 = vadd.xlane.f32.xlu1 %v4931_v24 }
0x1ba3   :  { %v4928_v25 = vsel %vm1624_vm0, %v15342_v9, 0.0 }
0x1ba4   :  { %4929 = vadd.xlane.f32.xlu0 %v4928_v25 }
0x1c2b   :  { %v4933_v33 = vpop.xlane.xlu1 %4932 }
0x1c2c   :  { %15343 = vrcp.f32 %v4933_v33  ;;  %v12958_v33 = vld [vmem:[%s17678_s14 + $0x78] sm:$0xff]  }
0x1c2d   :  { %v4930_v34 = vpop.xlane.xlu0 %4929 }
0x1c2e   :  { %15345 = vrcp.f32 %v4930_v34  ;;  %v11969_v34 = vunpack.c.h.bf16 %v12958_v33 }
0x1c30   :  { %14538 = vmatprep.subr.mxu1 %v11969_v34 }
0x1c31   :  { %14539 = vmatpush3.msra.mxu1 %v11969_v34 }
0x1c39   :  { %v15344_v36 = vpop.eup %15343 }
0x1c3a   :  { %v4937_v46 = vmul.f32 %v15344_v36, %v15340_v23  ;;  %v11968_v36 = vunpack.c.l.bf16 %v12958_v33 }
0x1c3b   :  { %v15346_v37 = vpop.eup %15345 }
0x1c3c   :  { %v4935_v38 = vmul.f32 %v15346_v37, %v15342_v9  ;;  %14540 = vmatprep.subr.mxu1 %v11968_v36 }
0x1c3d   :  { %14541 = vmatpush3.msra.mxu1 %v11968_v36 }
0x1c3e   :  { %14477 = vmatprep.mubr.msk.f32.mxu0 %vm1624_vm0, %v4935_v38 }
0x1c3f   :  { %14478 = vmatmul.mubr.msk.f32.vlgmr.msra.gmra.mxu0 %vm1624_vm0, %v4937_v46 }
0x1c40   :  { %14481 = vmatpush3.msra.mxu0 %v11937_v29 }
0x1c41   :  { %14482 = vmatprep.subr.mxu0 %v11936_v49 }
0x1c42   :  { %14483 = vmatpush3.msra.mxu0 %v11936_v49 }
0x1c43   :  { %14484 = vmatprep.subr.mxu0 %v11933_v18 }
0x1c44   :  { %14485 = vmatpush3.msra.mxu0 %v11933_v18 }
0x1c45   :  { %14486 = vmatprep.subr.mxu0 %v11932_v50 }
0x1c46   :  { %14487 = vmatpush3.msra.mxu0 %v11932_v50  ;;  %v12957_v50 = vld [vmem:[%s17678_s14 + $0x70] sm:$0xff]  }
0x1c47   :  { %14502 = vmatprep.subr.mxu0 %v11953_v35  ;;  %v11965_v51 = vunpack.c.h.bf16 %v12957_v50 }
0x1c49   :  { %14542 = vmatprep.subr.mxu1 %v11965_v51 }
0x1c4a   :  { %14543 = vmatpush3.msra.mxu1 %v11965_v51 }
0x1cff   :  { %v14479_v5 = vpop.f32.mrf.mxu0 }
0x1d01   :  { %v5010_v20 = vpop.f32.mrf.mxu0 }
0x1d02   :  { %14488 = vmatprep.mubr.msk.f32.mxu0 %vm1534_vm14, %v5010_v20  ;;  %v12961_v20 = vld [vmem:[#allocation16 + $0x198] sm:$0xff]  }
0x1d03   :  { %14489 = vmatmul.mubr.msk.f32.vlgmr.msra.gmra.mxu0 %vm1534_vm14, %v14479_v5  ;;  %v12959_v5 = vld [vmem:[#allocation16 + $0x188] sm:$0xff]   ;;  %v11985_v32 = vunpack.c.h.bf16 %v12961_v20 }
0x1d04   :  { %14503 = vmatpush3.xpose.msra.mxu0 %v11953_v35  ;;  %14510 = vmatprep.mubr.f32.mxu0 %v16946_v52  ;;  %v11964_v35 = vunpack.c.l.bf16 %v12957_v50 }
0x1d05   :  { %14504 = vmatprep.subr.mxu0 %v11952_v31 }
0x1d06   :  { %14544 = vmatprep.subr.mxu1 %v11964_v35 }
0x1d07   :  { %14545 = vmatpush3.msra.mxu1 %v11964_v35 }
0x1d08   :  { %14505 = vmatpush3.xpose.msra.mxu0 %v11952_v31  ;;  %v11977_v31 = vunpack.c.h.bf16 %v12959_v5  ;;  %14560 = vmatprep.subr.mxu1 %v11985_v32 }
0x1d09   :  { %14506 = vmatprep.subr.mxu0 %v11949_v55 }
0x1d0c   :  { %14507 = vmatpush3.xpose.msra.mxu0 %v11949_v55  ;;  %v11976_v55 = vunpack.c.l.bf16 %v12959_v5 }
0x1d0d   :  { %14508 = vmatprep.subr.mxu0 %v11948_v28 }
0x1d10   :  { %14509 = vmatpush3.xpose.msra.mxu0 %v11948_v28 }
0x1d13   :  { %14511 = vmatmul.mubr.f32.vlgmr.msra.gmra.mxu0 %v16948_v53 }
0x1d14   :  { %14528 = vmatprep.mubr.msk.f32.mxu0 %vm1534_vm14, %v5209_v40  ;;  %v11984_v40 = vunpack.c.l.bf16 %v12961_v20 }
0x1dc3   :  { %v14490_v56 = vpop.f32.mrf.mxu0 }
0x1dc4   :  { %v17083_v47 = vadd.f32 %v14490_v56, %v4560_v42  ;;  %v11971_v42 = vld [vmem:[#allocation16 + $0x180] sm:$0xff]  }
0x1dc5   :  { %v5100_v60 = vpop.f32.mrf.mxu0  ;;  %v11973_v56 = vunpack.c.h.bf16 %v11971_v42 }
0x1dc6   :  { %v17085_v63 = vadd.f32 %v5100_v60, %v4555_v58  ;;  %v12960_v58 = vld [vmem:[#allocation16 + $0x190] sm:$0xff]  }
0x1dc7   :  { %v11981_v60 = vunpack.c.h.bf16 %v12960_v58 }
0x1dd3   :  { %v14512_v1 = vpop.f32.mrf.mxu0 }
0x1dd4   :  { %v5293_v4 = vadd.f32 %v14512_v1, %v5220_v2  ;;  %v11980_v1 = vunpack.c.l.bf16 %v12960_v58 }
0x1dd5   :  { %v5287_v41 = vpop.f32.mrf.mxu0 }
0x1dd6   :  { %v5288_v8 = vadd.f32 %v5287_v41, %v5220_v2  ;;  %14524 = vmatprep.subr.msk.mxu0 %vm1534_vm14, %v5293_v4  ;;  %v11972_v2 = vunpack.c.l.bf16 %v11971_v42 }
0x1dd7   :  { %14525 = vmatpush3.xpose.msk.msra.mxu0 %vm1534_vm14, %v5293_v4  ;;  %v12963_v4 = vld [vmem:[#allocation16 + $0x1a8] sm:$0xff]  }
0x1dd8   :  { %14526 = vmatprep.subr.msk.mxu0 %vm1534_vm14, %v5288_v8  ;;  %v11993_v41 = vunpack.c.h.bf16 %v12963_v4 }
0x1ddb   :  { %14527 = vmatpush3.xpose.msk.msra.mxu0 %vm1534_vm14, %v5288_v8 }
0x1ddc   :  { %14531 = vmatprep.subr.mxu0 %v5372_v44 }
0x1dde   :  { %14529 = vmatmul.mubr.msk.f32.vlgmr.msra.gmra.mxu0 %vm1534_vm14, %v17059_v3 }
0x1ddf   :  { %14532 = vmatpush3.msra.mxu0 %v5372_v44 }
0x1de0   :  { %14533 = vmatprep.subr.mxu0 %v5367_v54 }
0x1de1   :  { %14534 = vmatpush3.msra.mxu0 %v5367_v54  ;;  %v11587_v54 = vld [vmem:[#allocation17 + $0x1] ss:$0 sm:$0xff] }
0x1de2   :  { %14549 = vmatprep.subr.mxu0 %v11977_v31 }
0x1e9e   :  { %v14530_v0 = vpop.f32.mrf.mxu0 }
0x1e9f   :  { %v5463_v11 = vsel %vm1270_vm1, %v14530_v0, -1e+30 }
0x1ea0   :  { %v5453_v14 = vpop.f32.mrf.mxu0  ;;  %v5467_v15 = vsel %vm1624_vm0, %v5463_v11, -inf }
0x1ea1   :  { %v5462_v16 = vsel %vm1269_vm15, %v5453_v14, -1e+30  ;;  %5468 = vmax.xlane.f32.xlu1 %v5467_v15  ;;  %v11992_v15 = vunpack.c.l.bf16 %v12963_v4 }
0x1ea2   :  { %v5464_v17 = vsel %vm1624_vm0, %v5462_v16, -inf }
0x1ea3   :  { %5465 = vmax.xlane.f32.xlu0 %v5464_v17 }
0x1f2a   :  { %v5469_v19 = vpop.xlane.xlu1 %5468 }
0x1f2b   :  { %v5471_v3 = vsub.f32 %v5463_v11, %v5469_v19  ;;  %v12003_v19 = vld [vmem:[#allocation16 + $0x1b0] sm:$0xff]  }
0x1f2c   :  { %v5466_v21 = vpop.xlane.xlu0 %5465 }
0x1f2d   :  { %v5474_v22 = vmul.f32 1.442695, %v5471_v3  ;;  %v5470_v23 = vsub.f32 %v5462_v16, %v5466_v21  ;;  %v12962_v16 = vld [vmem:[#allocation16 + $0x1a0] sm:$0xff]   ;;  %v12005_v3 = vunpack.c.h.bf16 %v12003_v19  ;;  %v12004_v21 = vunpack.c.l.bf16 %v12003_v19 }
0x1f2f   :  { %15347 = vpow2.f32 %v5474_v22  ;;  %v5472_v24 = vmul.f32 1.442695, %v5470_v23  ;;  %v12970_v22 = vld [vmem:[#allocation16 + $0x1d8] sm:$0xff]  }
0x1f30   :  { %v12025_v23 = vunpack.c.h.bf16 %v12970_v22 }
0x1f31   :  { %15349 = vpow2.f32 %v5472_v24  ;;  %v12024_v24 = vunpack.c.l.bf16 %v12970_v22 }
0x1f3c   :  { %v15348_v9 = vpop.eup %15347 }
0x1f3d   :  { %v5479_v25 = vsel %vm1624_vm0, %v15348_v9, 0.0 }
0x1f3e   :  { %v15350_v26 = vpop.eup %15349  ;;  %5480 = vadd.xlane.f32.xlu1 %v5479_v25 }
0x1f3f   :  { %v5476_v29 = vsel %vm1624_vm0, %v15350_v26, 0.0 }
0x1f40   :  { %5477 = vadd.xlane.f32.xlu0 %v5476_v29  ;;  %v11588_v29 = vld [vmem:[%s17676_s1 + $0x20] sm:$0x7] }
0x1f41   :  { %v5780_v33 = vrot.slane %v11588_v29, %v16772_v45  ;;  %v5859_v51 = vrot.slane %v11588_v29, %v16786_v61 }
0x1fc7   :  { %v5481_v37 = vpop.xlane.xlu1 %5480 }
0x1fc8   :  { %15351 = vrcp.f32 %v5481_v37  ;;  %v5701_v37 = vrot.slane %v11588_v29, %v16776_v48 }
0x1fc9   :  { %v5478_v38 = vpop.xlane.xlu0 %5477 }
0x1fca   :  { %15353 = vrcp.f32 %v5478_v38 }
0x1fd5   :  { %v15352_v39 = vpop.eup %15351 }
0x1fd6   :  { %v5485_v18 = vmul.f32 %v15352_v39, %v15348_v9  ;;  %v12969_v9 = vld [vmem:[#allocation16 + $0x1d0] sm:$0xff]  }
0x1fd7   :  { %v15354_v46 = vpop.eup %15353  ;;  %v12021_v25 = vunpack.c.h.bf16 %v12969_v9 }
0x1fd8   :  { %v5483_v49 = vmul.f32 %v15354_v46, %v15350_v26  ;;  %v12020_v26 = vunpack.c.l.bf16 %v12969_v9 }
0x1fda   :  { %14535 = vmatprep.mubr.msk.f32.mxu0 %vm1624_vm0, %v5483_v49 }
0x1fdb   :  { %14536 = vmatmul.mubr.msk.f32.vlgmr.msra.gmra.mxu0 %vm1624_vm0, %v5485_v18 }
0x1fdc   :  { %14550 = vmatpush3.xpose.msra.mxu0 %v11977_v31 }
0x1fdd   :  { %14551 = vmatprep.subr.mxu0 %v11976_v55 }
0x1fe0   :  { %14552 = vmatpush3.xpose.msra.mxu0 %v11976_v55 }
0x1fe1   :  { %14553 = vmatprep.subr.mxu0 %v11973_v56 }
0x1fe4   :  { %14554 = vmatpush3.xpose.msra.mxu0 %v11973_v56 }
0x1fe5   :  { %14555 = vmatprep.subr.mxu0 %v11972_v2 }
0x1fe8   :  { %14556 = vmatpush3.xpose.msra.mxu0 %v11972_v2 }
0x1fe9   :  { %14571 = vmatprep.subr.mxu0 %v11993_v41 }
0x209b   :  { %v14537_v28 = vpop.f32.mrf.mxu0 }
0x209d   :  { %v5558_v27 = vpop.f32.mrf.mxu0 }
0x209e   :  { %14546 = vmatprep.mubr.msk.f32.mxu1 %vm1534_vm14, %v5558_v27 }
0x209f   :  { %14547 = vmatmul.mubr.msk.f32.vlgmr.msra.gmra.mxu1 %vm1534_vm14, %v14537_v28 }
0x20a0   :  { %14561 = vmatpush3.xpose.msra.mxu1 %v11985_v32  ;;  %v17140_v32 = vld [vmem:[%s17676_s1 + $0x24] sm:$0x7] }
0x20a1   :  { %14562 = vmatprep.subr.mxu1 %v11984_v40  ;;  %v6166_v55 = vrot.slane %v17140_v32, %v16776_v48 }
0x20a4   :  { %14563 = vmatpush3.xpose.msra.mxu1 %v11984_v40 }
0x20a5   :  { %14564 = vmatprep.subr.mxu1 %v11981_v60 }
0x20a8   :  { %14565 = vmatpush3.xpose.msra.mxu1 %v11981_v60 }
0x20a9   :  { %14566 = vmatprep.subr.mxu1 %v11980_v1 }
0x20ac   :  { %14567 = vmatpush3.xpose.msra.mxu1 %v11980_v1 }
0x215f   :  { %v14548_v7 = vpop.f32.mrf.mxu1 }
0x2160   :  { %v5658_v8 = vadd.f32 %v14548_v7, %v17083_v47  ;;  %v12966_v47 = vld [vmem:[#allocation16 + $0x1b8] sm:$0xff]  }
0x2161   :  { %v5648_v30 = vpop.f32.mrf.mxu1  ;;  %v12008_v17 = vunpack.c.l.bf16 %v12966_v47 }
0x2162   :  { %v5657_v44 = vadd.f32 %v5648_v30, %v17085_v63  ;;  %v5660_v43 = vadd.f32 %v5658_v8, %v16948_v53  ;;  %v11989_v53 = vunpack.c.h.bf16 %v12962_v16  ;;  %v12009_v63 = vunpack.c.h.bf16 %v12966_v47 }
0x2164   :  { %v5659_v0 = vadd.f32 %v5657_v44, %v16946_v52  ;;  %v17117_v14 = vadd.f32 %v11587_v54, %v5660_v43  ;;  %v11988_v52 = vunpack.c.l.bf16 %v12962_v16 }
0x2166   :  { %v17115_v11 = vadd.f32 %v11587_v54, %v5659_v0 }
0x2168   :  { %14557 = vmatprep.mubr.f32.mxu0 %v17115_v11  ;;  %14568 = vmatprep.mubr.f32.mxu1 %v17115_v11 }
0x2169   :  { %14558 = vmatmul.mubr.f32.vlgmr.msra.gmra.mxu0 %v17117_v14  ;;  %14569 = vmatmul.mubr.f32.vlgmr.msra.gmra.mxu1 %v17117_v14 }
0x216a   :  { %14572 = vmatpush3.xpose.msra.mxu0 %v11993_v41  ;;  %14579 = vmatprep.mubr.f32.mxu0 %v17115_v11 }
0x216b   :  { %14573 = vmatprep.subr.mxu0 %v11992_v15 }
0x216e   :  { %14574 = vmatpush3.xpose.msra.mxu0 %v11992_v15  ;;  %v12968_v15 = vld [vmem:[#allocation16 + $0x1c8] sm:$0xff]  }
0x216f   :  { %14575 = vmatprep.subr.mxu0 %v11989_v53  ;;  %v12017_v16 = vunpack.c.h.bf16 %v12968_v15  ;;  %v12016_v9 = vunpack.c.l.bf16 %v12968_v15 }
0x2172   :  { %14576 = vmatpush3.xpose.msra.mxu0 %v11989_v53  ;;  %v12965_v53 = vld [vmem:[%s17678_s14 + $0x88] sm:$0xff]  }
0x2173   :  { %14577 = vmatprep.subr.mxu0 %v11988_v52  ;;  %v12001_v47 = vunpack.c.h.bf16 %v12965_v53 }
0x2176   :  { %14578 = vmatpush3.xpose.msra.mxu0 %v11988_v52  ;;  %v12964_v52 = vld [vmem:[%s17678_s14 + $0x80] sm:$0xff]  }
0x2177   :  { %14596 = vmatprep.subr.mxu0 %v12009_v63 }
0x2179   :  { %14580 = vmatmul.mubr.f32.vlgmr.msra.gmra.mxu0 %v17117_v14 }
0x217a   :  { %14597 = vmatpush3.xpose.msra.mxu0 %v12009_v63  ;;  %14604 = vmatprep.mubr.f32.mxu0 %v17115_v11  ;;  %v12000_v63 = vunpack.c.l.bf16 %v12965_v53 }
0x217b   :  { %14598 = vmatprep.subr.mxu0 %v12008_v17 }
0x217e   :  { %14599 = vmatpush3.xpose.msra.mxu0 %v12008_v17  ;;  %v11997_v17 = vunpack.c.h.bf16 %v12964_v52 }
0x217f   :  { %14600 = vmatprep.subr.mxu0 %v12005_v3 }
0x2182   :  { %14601 = vmatpush3.xpose.msra.mxu0 %v12005_v3 }
0x2183   :  { %14602 = vmatprep.subr.mxu0 %v12004_v21 }
0x2186   :  { %14603 = vmatpush3.xpose.msra.mxu0 %v12004_v21 }
0x2187   :  { %14618 = vmatprep.subr.mxu0 %v12025_v23 }
0x2189   :  { %14605 = vmatmul.mubr.f32.vlgmr.msra.gmra.mxu0 %v17117_v14 }
0x218a   :  { %14619 = vmatpush3.xpose.msra.mxu0 %v12025_v23  ;;  %14626 = vmatprep.mubr.f32.mxu0 %v17115_v11 }
0x218b   :  { %14620 = vmatprep.subr.mxu0 %v12024_v24 }
0x218e   :  { %14621 = vmatpush3.xpose.msra.mxu0 %v12024_v24 }
0x218f   :  { %14622 = vmatprep.subr.mxu0 %v12021_v25 }
0x2192   :  { %14623 = vmatpush3.xpose.msra.mxu0 %v12021_v25  ;;  %v12967_v25 = vld [vmem:[#allocation16 + $0x1c0] sm:$0xff]  }
0x2193   :  { %14624 = vmatprep.subr.mxu0 %v12020_v26  ;;  %v12012_v29 = vunpack.c.l.bf16 %v12967_v25 }
0x2196   :  { %14625 = vmatpush3.xpose.msra.mxu0 %v12020_v26  ;;  %v12013_v26 = vunpack.c.h.bf16 %v12967_v25 }
0x2197   :  { %14654 = vmatprep.subr.mxu0 %v12001_v47 }
0x2199   :  { %14627 = vmatmul.mubr.f32.vlgmr.msra.gmra.mxu0 %v17117_v14 }
0x219a   :  { %14655 = vmatpush3.msra.mxu0 %v12001_v47 }
0x219b   :  { %14656 = vmatprep.subr.mxu0 %v12000_v63 }
0x219c   :  { %14657 = vmatpush3.msra.mxu0 %v12000_v63 }
0x219d   :  { %14658 = vmatprep.subr.mxu0 %v11997_v17 }
0x219e   :  { %14659 = vmatpush3.msra.mxu0 %v11997_v17 }
0x2229   :  { %v14559_v34 = vpop.f32.mrf.mxu0  ;;  %v14570_v36 = vpop.f32.mrf.mxu1 }
0x222a   :  { %v5853_v38 = vadd.f32 %v14570_v36, %v5780_v33  ;;  %v5774_v50 = vadd.f32 %v14559_v34, %v5701_v37  ;;  %v11996_v36 = vunpack.c.l.bf16 %v12964_v52 }
0x222b   :  { %v5768_v39 = vpop.f32.mrf.mxu0  ;;  %v5847_v46 = vpop.f32.mrf.mxu1 }
0x222c   :  { %v5769_v49 = vadd.f32 %v5768_v39, %v5701_v37  ;;  %v5848_v18 = vadd.f32 %v5847_v46, %v5780_v33  ;;  %14582 = vmatprep.subr.msk.mxu1 %vm1534_vm14, %v5853_v38  ;;  %v12975_v37 = vld [vmem:[#allocation16 + $0x1f8] sm:$0xff]   ;;  %14660 = vmatprep.subr.mxu0 %v11996_v36 }
0x222d   :  { %14583 = vmatpush3.xpose.msk.msra.mxu1 %vm1534_vm14, %v5853_v38  ;;  %v12049_v38 = vunpack.c.h.bf16 %v12975_v37  ;;  %14661 = vmatpush3.msra.mxu0 %v11996_v36 }
0x222e   :  { %14584 = vmatprep.subr.msk.mxu1 %vm1534_vm14, %v5848_v18  ;;  %14586 = vmatprep.mubr.msk.f32.mxu1 %vm1534_vm14, %v5769_v49  ;;  %v12048_v49 = vunpack.c.l.bf16 %v12975_v37 }
0x222f   :  { %14676 = vmatprep.subr.mxu0 %v12049_v38 }
0x2231   :  { %14585 = vmatpush3.xpose.msk.msra.mxu1 %vm1534_vm14, %v5848_v18  ;;  %v12974_v18 = vld [vmem:[#allocation16 + $0x1f0] sm:$0xff]  }
0x2234   :  { %14587 = vmatmul.mubr.msk.f32.vlgmr.msra.gmra.mxu1 %vm1534_vm14, %v5774_v50  ;;  %v12045_v50 = vunpack.c.h.bf16 %v12974_v18 }
0x2239   :  { %v14581_v35 = vpop.f32.mrf.mxu0 }
0x223a   :  { %v5932_v5 = vadd.f32 %v14581_v35, %v5859_v51  ;;  %v6245_v35 = vrot.slane %v17140_v32, %v16772_v45 }
0x223b   :  { %v5926_v20 = vpop.f32.mrf.mxu0 }
0x223c   :  { %v5927_v31 = vadd.f32 %v5926_v20, %v5859_v51  ;;  %14589 = vmatprep.subr.mxu1 %v5932_v5  ;;  %v12044_v51 = vunpack.c.l.bf16 %v12974_v18 }
0x223d   :  { %14590 = vmatpush3.msra.mxu1 %v5932_v5 }
0x223e   :  { %14591 = vmatprep.subr.mxu1 %v5927_v31 }
0x223f   :  { %14592 = vmatpush3.msra.mxu1 %v5927_v31 }
0x2240   :  { %14607 = vmatprep.subr.mxu1 %v12017_v16 }
0x2249   :  { %v14606_v28 = vpop.f32.mrf.mxu0 }
0x224a   :  { %v17144_v27 = vadd.f32 %v14606_v28, %v6166_v55 }
0x224b   :  { %v6233_v33 = vpop.f32.mrf.mxu0 }
0x224c   :  { %v6234_v34 = vadd.f32 %v6233_v33, %v6166_v55  ;;  %v6324_v55 = vrot.slane %v17140_v32, %v16786_v61  ;;  %v12971_v33 = vld [vmem:[%s17678_s14 + $0x90] sm:$0xff]  }
0x224d   :  { %v12029_v37 = vunpack.c.h.bf16 %v12971_v33 }
0x22f4   :  { %v14588_v40 = vpop.f32.mrf.mxu1 }
0x22f5   :  { %v6023_v42 = vsel %vm1270_vm1, %v14588_v40, -1e+30  ;;  %v14628_v40 = vpop.f32.mrf.mxu0 }
0x22f6   :  { %v6013_v56 = vpop.f32.mrf.mxu1  ;;  %v6027_v58 = vsel %vm1624_vm0, %v6023_v42, -inf }
0x22f7   :  { %v6022_v60 = vsel %vm1269_vm15, %v6013_v56, -1e+30  ;;  %6028 = vmax.xlane.f32.xlu1 %v6027_v58  ;;  %v6391_v56 = vpop.f32.mrf.mxu0 }
0x22f8   :  { %v6024_v2 = vsel %vm1624_vm0, %v6022_v60, -inf  ;;  %v6392_v58 = vadd.f32 %v6391_v56, %v6324_v55  ;;  %v12980_v56 = vld [vmem:[#allocation16 + $0x218] sm:$0xff]  }
0x22f9   :  { %6025 = vmax.xlane.f32.xlu0 %v6024_v2 }
0x2380   :  { %v6029_v1 = vpop.xlane.xlu1 %6028 }
0x2381   :  { %v6031_v4 = vsub.f32 %v6023_v42, %v6029_v1  ;;  %v6397_v42 = vadd.f32 %v14628_v40, %v6324_v55 }
0x2382   :  { %v6026_v41 = vpop.xlane.xlu0 %6025 }
0x2383   :  { %v6034_v7 = vmul.f32 1.442695, %v6031_v4  ;;  %v6030_v8 = vsub.f32 %v6022_v60, %v6026_v41  ;;  %v17178_v60 = vld [vmem:[%s17676_s1 + $0x28] sm:$0x7] }
0x2384   :  { %v6872_v2 = vrot.slane %v17178_v60, %v16772_v45 }
0x2385   :  { %15355 = vpow2.f32 %v6034_v7  ;;  %v6032_v30 = vmul.f32 1.442695, %v6030_v8 }
0x2387   :  { %15357 = vpow2.f32 %v6032_v30 }
0x2392   :  { %v15356_v44 = vpop.eup %15355 }
0x2393   :  { %v6039_v43 = vsel %vm1624_vm0, %v15356_v44, 0.0 }
0x2394   :  { %v15358_v54 = vpop.eup %15357  ;;  %6040 = vadd.xlane.f32.xlu1 %v6039_v43 }
0x2395   :  { %v6036_v0 = vsel %vm1624_vm0, %v15358_v54, 0.0 }
0x2396   :  { %6037 = vadd.xlane.f32.xlu0 %v6036_v0 }
0x241d   :  { %v6041_v19 = vpop.xlane.xlu1 %6040 }
0x241e   :  { %15359 = vrcp.f32 %v6041_v19 }
0x241f   :  { %v6038_v3 = vpop.xlane.xlu0 %6037 }
0x2420   :  { %15361 = vrcp.f32 %v6038_v3 }
0x242b   :  { %v15360_v21 = vpop.eup %15359 }
0x242c   :  { %v6045_v24 = vmul.f32 %v15360_v21, %v15356_v44 }
0x242d   :  { %v15362_v22 = vpop.eup %15361 }
0x242e   :  { %v6043_v23 = vmul.f32 %v15362_v22, %v15358_v54  ;;  %v12972_v22 = vld [vmem:[%s17678_s14 + $0x98] sm:$0xff]  }
0x242f   :  { %v12032_v36 = vunpack.c.l.bf16 %v12972_v22 }
0x2430   :  { %14593 = vmatprep.mubr.msk.f32.mxu1 %vm1624_vm0, %v6043_v23  ;;  %v12033_v23 = vunpack.c.h.bf16 %v12972_v22 }
0x2431   :  { %14594 = vmatmul.mubr.msk.f32.vlgmr.msra.gmra.mxu1 %vm1624_vm0, %v6045_v24 }
0x2432   :  { %14608 = vmatpush3.xpose.msra.mxu1 %v12017_v16  ;;  %14615 = vmatprep.mubr.f32.mxu1 %v17115_v11 }
0x2433   :  { %14609 = vmatprep.subr.mxu1 %v12016_v9 }
0x2436   :  { %14610 = vmatpush3.xpose.msra.mxu1 %v12016_v9 }
0x2437   :  { %14611 = vmatprep.subr.mxu1 %v12013_v26 }
0x243a   :  { %14612 = vmatpush3.xpose.msra.mxu1 %v12013_v26 }
0x243b   :  { %14613 = vmatprep.subr.mxu1 %v12012_v29 }
0x243e   :  { %14614 = vmatpush3.xpose.msra.mxu1 %v12012_v29 }
0x2441   :  { %14616 = vmatmul.mubr.f32.vlgmr.msra.gmra.mxu1 %v17117_v14 }
0x2442   :  { %14633 = vmatprep.mubr.msk.f32.mxu1 %vm1534_vm14, %v6234_v34 }
0x24f1   :  { %v14595_v39 = vpop.f32.mrf.mxu1 }
0x24f3   :  { %v6118_v46 = vpop.f32.mrf.mxu1 }
0x24f4   :  { %14662 = vmatprep.mubr.msk.f32.mxu0 %vm1534_vm14, %v6118_v46 }
0x24f5   :  { %14663 = vmatmul.mubr.msk.f32.vlgmr.msra.gmra.mxu0 %vm1534_vm14, %v14595_v39  ;;  %v12973_v39 = vld [vmem:[#allocation16 + $0x1e8] sm:$0xff]  }
0x24f6   :  { %14677 = vmatpush3.xpose.msra.mxu0 %v12049_v38  ;;  %14684 = vmatprep.mubr.f32.mxu0 %v17115_v11  ;;  %v12028_v38 = vunpack.c.l.bf16 %v12971_v33  ;;  %v12041_v46 = vunpack.c.h.bf16 %v12973_v39 }
0x24f7   :  { %14678 = vmatprep.subr.mxu0 %v12048_v49 }
0x24fa   :  { %14679 = vmatpush3.xpose.msra.mxu0 %v12048_v49 }
0x24fb   :  { %14680 = vmatprep.subr.mxu0 %v12045_v50 }
0x24fe   :  { %14681 = vmatpush3.xpose.msra.mxu0 %v12045_v50  ;;  %v12040_v50 = vunpack.c.l.bf16 %v12973_v39 }
0x24ff   :  { %14682 = vmatprep.subr.mxu0 %v12044_v51 }
0x2501   :  { %v14617_v5 = vpop.f32.mrf.mxu1 }
0x2502   :  { %v6318_v20 = vadd.f32 %v14617_v5, %v6245_v35  ;;  %14683 = vmatpush3.xpose.msra.mxu0 %v12044_v51  ;;  %v12035_v51 = vld [vmem:[#allocation16 + $0x1e0] sm:$0xff]  }
0x2503   :  { %v6312_v31 = vpop.f32.mrf.mxu1  ;;  %v12036_v5 = vunpack.c.l.bf16 %v12035_v51 }
0x2504   :  { %v6313_v28 = vadd.f32 %v6312_v31, %v6245_v35  ;;  %14629 = vmatprep.subr.msk.mxu1 %vm1534_vm14, %v6318_v20  ;;  %v12037_v35 = vunpack.c.h.bf16 %v12035_v51 }
0x2505   :  { %14630 = vmatpush3.xpose.msk.msra.mxu1 %vm1534_vm14, %v6318_v20  ;;  %14685 = vmatmul.mubr.f32.vlgmr.msra.gmra.mxu0 %v17117_v14  ;;  %v12977_v20 = vld [vmem:[#allocation16 + $0x208] sm:$0xff]  }
0x2506   :  { %14631 = vmatprep.subr.msk.mxu1 %vm1534_vm14, %v6313_v28  ;;  %v12057_v31 = vunpack.c.h.bf16 %v12977_v20  ;;  %v12056_v55 = vunpack.c.l.bf16 %v12977_v20  ;;  %v12979_v20 = vld [vmem:[%s17678_s14 + $0xa8] sm:$0xff]  }
0x2509   :  { %14632 = vmatpush3.xpose.msk.msra.mxu1 %vm1534_vm14, %v6313_v28  ;;  %v12976_v28 = vld [vmem:[#allocation16 + $0x200] sm:$0xff]  }
0x250a   :  { %14636 = vmatprep.subr.mxu1 %v6397_v42  ;;  %v12053_v40 = vunpack.c.h.bf16 %v12976_v28 }
0x250c   :  { %14634 = vmatmul.mubr.msk.f32.vlgmr.msra.gmra.mxu1 %vm1534_vm14, %v17144_v27 }
0x250d   :  { %14637 = vmatpush3.msra.mxu1 %v6397_v42  ;;  %v12052_v42 = vunpack.c.l.bf16 %v12976_v28 }
0x250e   :  { %14638 = vmatprep.subr.mxu1 %v6392_v58 }
0x250f   :  { %14639 = vmatpush3.msra.mxu1 %v6392_v58  ;;  %v12073_v58 = vunpack.c.h.bf16 %v12980_v56 }
0x2510   :  { %14643 = vmatprep.subr.mxu1 %v12033_v23 }
0x25b5   :  { %v17175_v32 = vpop.f32.mrf.mxu0 }
0x25b7   :  { %v17182_v1 = vpop.f32.mrf.mxu0 }
0x25c5   :  { %v14686_v4 = vpop.f32.mrf.mxu0 }
0x25c6   :  { %v6945_v41 = vadd.f32 %v14686_v4, %v6872_v2  ;;  %v12067_v4 = vld [vmem:[#allocation16 + $0x210] sm:$0xff]  }
0x25c7   :  { %v6939_v7 = vpop.f32.mrf.mxu0 }
0x25c8   :  { %v6940_v8 = vadd.f32 %v6939_v7, %v6872_v2  ;;  %14698 = vmatprep.subr.msk.mxu0 %vm1534_vm14, %v6945_v41  ;;  %v12072_v2 = vunpack.c.l.bf16 %v12980_v56  ;;  %v12068_v7 = vunpack.c.l.bf16 %v12067_v4 }
0x25c9   :  { %14699 = vmatpush3.xpose.msk.msra.mxu0 %vm1534_vm14, %v6945_v41  ;;  %v12069_v41 = vunpack.c.h.bf16 %v12067_v4  ;;  %v12064_v4 = vunpack.c.l.bf16 %v12979_v20 }
0x25ca   :  { %14700 = vmatprep.subr.msk.mxu0 %vm1534_vm14, %v6940_v8 }
0x25cc   :  { %v14635_v27 = vpop.f32.mrf.mxu1 }
0x25cd   :  { %v6488_v30 = vsel %vm1270_vm1, %v14635_v27, -1e+30  ;;  %14701 = vmatpush3.xpose.msk.msra.mxu0 %vm1534_vm14, %v6940_v8  ;;  %v12984_v8 = vld [vmem:[#allocation16 + $0x238] sm:$0xff]  }
0x25ce   :  { %v6478_v44 = vpop.f32.mrf.mxu1  ;;  %v6492_v43 = vsel %vm1624_vm0, %v6488_v30, -inf  ;;  %v12089_v27 = vunpack.c.h.bf16 %v12984_v8 }
0x25cf   :  { %v6487_v54 = vsel %vm1269_vm15, %v6478_v44, -1e+30  ;;  %6493 = vmax.xlane.f32.xlu1 %v6492_v43  ;;  %v12983_v44 = vld [vmem:[#allocation16 + $0x230] sm:$0xff]  }
0x25d0   :  { %v6489_v0 = vsel %vm1624_vm0, %v6487_v54, -inf  ;;  %v12085_v43 = vunpack.c.h.bf16 %v12983_v44 }
0x25d1   :  { %6490 = vmax.xlane.f32.xlu0 %v6489_v0 }
0x2658   :  { %v6494_v15 = vpop.xlane.xlu1 %6493 }
0x2659   :  { %v6496_v16 = vsub.f32 %v6488_v30, %v6494_v15  ;;  %v12088_v30 = vunpack.c.l.bf16 %v12984_v8  ;;  %v12982_v8 = vld [vmem:[#allocation16 + $0x228] sm:$0xff]  }
0x265a   :  { %v6491_v53 = vpop.xlane.xlu0 %6490 }
0x265b   :  { %v6499_v52 = vmul.f32 1.442695, %v6496_v16  ;;  %v6495_v47 = vsub.f32 %v6487_v54, %v6491_v53  ;;  %v12084_v54 = vunpack.c.l.bf16 %v12983_v44  ;;  %v6793_v16 = vrot.slane %v17178_v60, %v16776_v48 }
0x265d   :  { %15363 = vpow2.f32 %v6499_v52  ;;  %v6497_v63 = vmul.f32 1.442695, %v6495_v47 }
0x265f   :  { %15365 = vpow2.f32 %v6497_v63 }
0x266a   :  { %v15364_v17 = vpop.eup %15363 }
0x266b   :  { %v6504_v19 = vsel %vm1624_vm0, %v15364_v17, 0.0 }
0x266c   :  { %v15366_v3 = vpop.eup %15365  ;;  %6505 = vadd.xlane.f32.xlu1 %v6504_v19 }
0x266d   :  { %v6501_v21 = vsel %vm1624_vm0, %v15366_v3, 0.0 }
0x266e   :  { %6502 = vadd.xlane.f32.xlu0 %v6501_v21 }
0x26f5   :  { %v6506_v24 = vpop.xlane.xlu1 %6505 }
0x26f6   :  { %15367 = vrcp.f32 %v6506_v24 }
0x26f7   :  { %v6503_v9 = vpop.xlane.xlu0 %6502 }
0x26f8   :  { %15369 = vrcp.f32 %v6503_v9 }
0x2703   :  { %v15368_v25 = vpop.eup %15367 }
0x2704   :  { %v6510_v34 = vmul.f32 %v15368_v25, %v15364_v17  ;;  %v6951_v17 = vrot.slane %v17178_v60, %v16786_v61 }
0x2705   :  { %v15370_v26 = vpop.eup %15369 }
0x2706   :  { %v6508_v29 = vmul.f32 %v15370_v26, %v15366_v3 }
0x2708   :  { %14640 = vmatprep.mubr.msk.f32.mxu1 %vm1624_vm0, %v6508_v29 }
0x2709   :  { %14641 = vmatmul.mubr.msk.f32.vlgmr.msra.gmra.mxu1 %vm1624_vm0, %v6510_v34 }
0x270a   :  { %14644 = vmatpush3.msra.mxu1 %v12033_v23  ;;  %v17221_v23 = vld [vmem:[%s17676_s1 + $0x2c] sm:$0x7] }
0x270b   :  { %14645 = vmatprep.subr.mxu1 %v12032_v36  ;;  %v17225_v24 = vrot.slane %v17221_v23, %v16776_v48 }
0x270c   :  { %14646 = vmatpush3.msra.mxu1 %v12032_v36 }
0x270d   :  { %14647 = vmatprep.subr.mxu1 %v12029_v37 }
0x270e   :  { %14648 = vmatpush3.msra.mxu1 %v12029_v37 }
0x270f   :  { %14649 = vmatprep.subr.mxu1 %v12028_v38 }
0x2710   :  { %14650 = vmatpush3.msra.mxu1 %v12028_v38 }
0x2711   :  { %14665 = vmatprep.subr.mxu1 %v12041_v46 }
0x27c9   :  { %v14642_v49 = vpop.f32.mrf.mxu1 }
0x27cb   :  { %v6583_v18 = vpop.f32.mrf.mxu1 }
0x27cc   :  { %14651 = vmatprep.mubr.msk.f32.mxu1 %vm1534_vm14, %v6583_v18 }
0x27cd   :  { %14652 = vmatmul.mubr.msk.f32.vlgmr.msra.gmra.mxu1 %vm1534_vm14, %v14642_v49 }
0x27ce   :  { %14666 = vmatpush3.xpose.msra.mxu1 %v12041_v46  ;;  %14673 = vmatprep.mubr.f32.mxu1 %v17115_v11 }
0x27cf   :  { %14667 = vmatprep.subr.mxu1 %v12040_v50 }
0x27d2   :  { %14668 = vmatpush3.xpose.msra.mxu1 %v12040_v50 }
0x27d3   :  { %14669 = vmatprep.subr.mxu1 %v12037_v35 }
0x27d6   :  { %14670 = vmatpush3.xpose.msra.mxu1 %v12037_v35 }
0x27d7   :  { %14671 = vmatprep.subr.mxu1 %v12036_v5 }
0x27da   :  { %14672 = vmatpush3.xpose.msra.mxu1 %v12036_v5 }
0x27db   :  { %14687 = vmatprep.subr.mxu1 %v12057_v31 }
0x27dd   :  { %14674 = vmatmul.mubr.f32.vlgmr.msra.gmra.mxu1 %v17117_v14 }
0x27de   :  { %14688 = vmatpush3.xpose.msra.mxu1 %v12057_v31  ;;  %14695 = vmatprep.mubr.f32.mxu1 %v17115_v11  ;;  %v12065_v31 = vunpack.c.h.bf16 %v12979_v20  ;;  %v12986_v20 = vld [vmem:[%s17678_s14 + $0xb8] sm:$0xff]  }
0x27df   :  { %14689 = vmatprep.subr.mxu1 %v12056_v55 }
0x27e2   :  { %14690 = vmatpush3.xpose.msra.mxu1 %v12056_v55 }
0x27e3   :  { %14691 = vmatprep.subr.mxu1 %v12053_v40 }
0x27e6   :  { %14692 = vmatpush3.xpose.msra.mxu1 %v12053_v40 }
0x27e7   :  { %14693 = vmatprep.subr.mxu1 %v12052_v42 }
0x27ea   :  { %14694 = vmatpush3.xpose.msra.mxu1 %v12052_v42 }
0x27eb   :  { %14723 = vmatprep.subr.mxu1 %v12073_v58 }
0x27ed   :  { %14696 = vmatmul.mubr.f32.vlgmr.msra.gmra.mxu1 %v17117_v14 }
0x27ee   :  { %14724 = vmatpush3.xpose.msra.mxu1 %v12073_v58  ;;  %14731 = vmatprep.mubr.f32.mxu1 %v17115_v11  ;;  %v12978_v58 = vld [vmem:[%s17678_s14 + $0xa0] sm:$0xff]  }
0x27ef   :  { %14725 = vmatprep.subr.mxu1 %v12072_v2 }
0x27f2   :  { %14726 = vmatpush3.xpose.msra.mxu1 %v12072_v2 }
0x27f3   :  { %14727 = vmatprep.subr.mxu1 %v12069_v41 }
0x27f6   :  { %14728 = vmatpush3.xpose.msra.mxu1 %v12069_v41  ;;  %v12061_v41 = vunpack.c.h.bf16 %v12978_v58 }
0x27f7   :  { %14729 = vmatprep.subr.mxu1 %v12068_v7 }
0x27fa   :  { %14730 = vmatpush3.xpose.msra.mxu1 %v12068_v7  ;;  %v12060_v7 = vunpack.c.l.bf16 %v12978_v58 }
0x27fb   :  { %14745 = vmatprep.subr.mxu1 %v12089_v27 }
0x27fd   :  { %14732 = vmatmul.mubr.f32.vlgmr.msra.gmra.mxu1 %v17117_v14 }
0x27fe   :  { %14746 = vmatpush3.xpose.msra.mxu1 %v12089_v27  ;;  %14753 = vmatprep.mubr.f32.mxu1 %v17115_v11  ;;  %v12081_v27 = vunpack.c.h.bf16 %v12982_v8 }
0x27ff   :  { %14747 = vmatprep.subr.mxu1 %v12088_v30 }
0x2802   :  { %14748 = vmatpush3.xpose.msra.mxu1 %v12088_v30 }
0x2803   :  { %14749 = vmatprep.subr.mxu1 %v12085_v43 }
0x2806   :  { %14750 = vmatpush3.xpose.msra.mxu1 %v12085_v43  ;;  %v12080_v43 = vunpack.c.l.bf16 %v12982_v8 }
0x2807   :  { %14751 = vmatprep.subr.mxu1 %v12084_v54 }
0x280a   :  { %14752 = vmatpush3.xpose.msra.mxu1 %v12084_v54  ;;  %v12981_v54 = vld [vmem:[#allocation16 + $0x220] sm:$0xff]  }
0x280d   :  { %14754 = vmatmul.mubr.f32.vlgmr.msra.gmra.mxu1 %v17117_v14 }
0x288d   :  { %v17210_v0 = vpop.f32.mrf.mxu1 }
0x288f   :  { %v17212_v15 = vpop.f32.mrf.mxu1 }
0x289d   :  { %v14675_v53 = vpop.f32.mrf.mxu1 }
0x289e   :  { %v6866_v63 = vadd.f32 %v14675_v53, %v6793_v16  ;;  %v12076_v53 = vunpack.c.l.bf16 %v12981_v54 }
0x289f   :  { %v6860_v52 = vpop.f32.mrf.mxu1 }
0x28a0   :  { %v6861_v47 = vadd.f32 %v6860_v52, %v6793_v16  ;;  %v12077_v16 = vunpack.c.h.bf16 %v12981_v54 }
0x28a2   :  { %14702 = vmatprep.mubr.msk.f32.mxu0 %vm1534_vm14, %v6861_v47 }
0x28a3   :  { %14703 = vmatmul.mubr.msk.f32.vlgmr.msra.gmra.mxu0 %vm1534_vm14, %v6866_v63  ;;  %v6760_v63 = vadd.f32 %v17175_v32, %v17210_v0 }
0x28ad   :  { %v14697_v19 = vpop.f32.mrf.mxu1 }
0x28ae   :  { %v7024_v3 = vadd.f32 %v14697_v19, %v6951_v17  ;;  %v6755_v19 = vadd.f32 %v17182_v1, %v17212_v15 }
0x28af   :  { %v7018_v21 = vpop.f32.mrf.mxu1 }
0x28b0   :  { %v7019_v22 = vadd.f32 %v7018_v21, %v6951_v17  ;;  %14705 = vmatprep.subr.mxu0 %v7024_v3 }
0x28b1   :  { %14706 = vmatpush3.msra.mxu0 %v7024_v3 }
0x28b2   :  { %14707 = vmatprep.subr.mxu0 %v7019_v22 }
0x28b3   :  { %14708 = vmatpush3.msra.mxu0 %v7019_v22 }
0x28b4   :  { %14712 = vmatprep.subr.mxu0 %v12065_v31 }
0x28bd   :  { %v14733_v9 = vpop.f32.mrf.mxu1 }
0x28be   :  { %v17228_v25 = vadd.f32 %v14733_v9, %v17225_v24  ;;  %v7420_v9 = vrot.slane %v17221_v23, %v16772_v45 }
0x28bf   :  { %v7408_v52 = vpop.f32.mrf.mxu1 }
0x28c0   :  { %v7409_v47 = vadd.f32 %v7408_v52, %v17225_v24  ;;  %v12992_v52 = vld [vmem:[#allocation19 + $0x30] sm:$0xff]  }
0x28cd   :  { %v14755_v32 = vpop.f32.mrf.mxu1 }
0x28cf   :  { %v7566_v0 = vpop.f32.mrf.mxu1 }
0x2963   :  { %v14704_v26 = vpop.f32.mrf.mxu0 }
0x2964   :  { %v7115_v60 = vsel %vm1270_vm1, %v14704_v26, -1e+30 }
0x2965   :  { %v7105_v29 = vpop.f32.mrf.mxu0  ;;  %v7119_v33 = vsel %vm1624_vm0, %v7115_v60, -inf }
0x2966   :  { %v7114_v34 = vsel %vm1269_vm15, %v7105_v29, -1e+30  ;;  %7120 = vmax.xlane.f32.xlu1 %v7119_v33  ;;  %v7499_v29 = vrot.slane %v17221_v23, %v16786_v61 }
0x2967   :  { %v7116_v36 = vsel %vm1624_vm0, %v7114_v34, -inf }
0x2968   :  { %7117 = vmax.xlane.f32.xlu0 %v7116_v36  ;;  %v7572_v1 = vadd.f32 %v14755_v32, %v7499_v29  ;;  %v7567_v15 = vadd.f32 %v7566_v0, %v7499_v29  ;;  %v12989_v29 = vld [vmem:[#allocation19 + $0x18] sm:$0xff]  }
0x2969   :  { %v12113_v32 = vunpack.c.h.bf16 %v12989_v29  ;;  %v12112_v0 = vunpack.c.l.bf16 %v12989_v29 }
0x29ef   :  { %v7121_v37 = vpop.xlane.xlu1 %7120 }
0x29f0   :  { %v7123_v38 = vsub.f32 %v7115_v60, %v7121_v37 }
0x29f1   :  { %v7118_v39 = vpop.xlane.xlu0 %7117 }
0x29f2   :  { %v7126_v46 = vmul.f32 1.442695, %v7123_v38  ;;  %v7122_v49 = vsub.f32 %v7114_v34, %v7118_v39 }
0x29f4   :  { %15371 = vpow2.f32 %v7126_v46  ;;  %v7124_v18 = vmul.f32 1.442695, %v7122_v49 }
0x29f6   :  { %15373 = vpow2.f32 %v7124_v18 }
0x2a01   :  { %v15372_v50 = vpop.eup %15371 }
0x2a02   :  { %v7131_v51 = vsel %vm1624_vm0, %v15372_v50, 0.0 }
0x2a03   :  { %v15374_v35 = vpop.eup %15373  ;;  %7132 = vadd.xlane.f32.xlu1 %v7131_v51 }
0x2a04   :  { %v7128_v5 = vsel %vm1624_vm0, %v15374_v35, 0.0 }
0x2a05   :  { %7129 = vadd.xlane.f32.xlu0 %v7128_v5 }
0x2a8c   :  { %v7133_v55 = vpop.xlane.xlu1 %7132 }
0x2a8d   :  { %15375 = vrcp.f32 %v7133_v55  ;;  %v12096_v55 = vunpack.c.l.bf16 %v12986_v20 }
0x2a8e   :  { %v7130_v28 = vpop.xlane.xlu0 %7129 }
0x2a8f   :  { %15377 = vrcp.f32 %v7130_v28 }
0x2a9a   :  { %v15376_v40 = vpop.eup %15375 }
0x2a9b   :  { %v7137_v2 = vmul.f32 %v15376_v40, %v15372_v50 }
0x2a9c   :  { %v15378_v42 = vpop.eup %15377 }
0x2a9d   :  { %v7135_v56 = vmul.f32 %v15378_v42, %v15374_v35 }
0x2a9f   :  { %14709 = vmatprep.mubr.msk.f32.mxu0 %vm1624_vm0, %v7135_v56 }
0x2aa0   :  { %14710 = vmatmul.mubr.msk.f32.vlgmr.msra.gmra.mxu0 %vm1624_vm0, %v7137_v2 }
0x2aa1   :  { %14713 = vmatpush3.msra.mxu0 %v12065_v31  ;;  %v12097_v31 = vunpack.c.h.bf16 %v12986_v20 }
0x2aa2   :  { %14714 = vmatprep.subr.mxu0 %v12064_v4 }
0x2aa3   :  { %14715 = vmatpush3.msra.mxu0 %v12064_v4  ;;  %14770 = vmatprep.subr.mxu1 %v12097_v31  ;;  %v1185_v4 = vld [vmem:[%s17679_s5 + $0x8] sm:$0xff] }
0x2aa4   :  { %14716 = vmatprep.subr.mxu0 %v12061_v41  ;;  %14771 = vmatpush3.msra.mxu1 %v12097_v31 }
0x2aa5   :  { %14717 = vmatpush3.msra.mxu0 %v12061_v41  ;;  %14772 = vmatprep.subr.mxu1 %v12096_v55  ;;  %v12985_v41 = vld [vmem:[%s17678_s14 + $0xb0] sm:$0xff]  }
0x2aa6   :  { %14718 = vmatprep.subr.mxu0 %v12060_v7  ;;  %14773 = vmatpush3.msra.mxu1 %v12096_v55  ;;  %v12092_v8 = vunpack.c.l.bf16 %v12985_v41 }
0x2aa7   :  { %14719 = vmatpush3.msra.mxu0 %v12060_v7  ;;  %v12093_v7 = vunpack.c.h.bf16 %v12985_v41  ;;  %v13006_v41 = vld [vmem:[#allocation28 + $0x30] sm:$0xff]  }
0x2aa8   :  { %14734 = vmatprep.subr.mxu0 %v12081_v27 }
0x2aa9   :  { %14774 = vmatprep.subr.mxu1 %v12093_v7 }
0x2aaa   :  { %14775 = vmatpush3.msra.mxu1 %v12093_v7 }
0x2aab   :  { %14776 = vmatprep.subr.mxu1 %v12092_v8 }
0x2aac   :  { %14777 = vmatpush3.msra.mxu1 %v12092_v8 }
0x2aad   :  { %14795 = vmatprep.subr.mxu1 %v16343_v6 }
0x2b60   :  { %v14711_v30 = vpop.f32.mrf.mxu0 }
0x2b62   :  { %v7210_v44 = vpop.f32.mrf.mxu0 }
0x2b63   :  { %14720 = vmatprep.mubr.msk.f32.mxu0 %vm1534_vm14, %v7210_v44 }
0x2b64   :  { %14721 = vmatmul.mubr.msk.f32.vlgmr.msra.gmra.mxu0 %vm1534_vm14, %v14711_v30 }
0x2b65   :  { %14735 = vmatpush3.xpose.msra.mxu0 %v12081_v27  ;;  %14742 = vmatprep.mubr.f32.mxu0 %v17115_v11  ;;  %v16345_v27 = vmov 0  }
0x2b66   :  { %14736 = vmatprep.subr.mxu0 %v12080_v43  ;;  %15277 = vset.pattern.permute.xlu1 %v16345_v27 }
0x2b69   :  { %14737 = vmatpush3.xpose.msra.mxu0 %v12080_v43 }
0x2b6a   :  { %14738 = vmatprep.subr.mxu0 %v12077_v16 }
0x2b6d   :  { %14739 = vmatpush3.xpose.msra.mxu0 %v12077_v16 }
0x2b6e   :  { %14740 = vmatprep.subr.mxu0 %v12076_v53 }
0x2b71   :  { %14741 = vmatpush3.xpose.msra.mxu0 %v12076_v53  ;;  %v12993_v53 = vld [vmem:[#allocation19 + $0x38] sm:$0xff]  }
0x2b74   :  { %14743 = vmatmul.mubr.f32.vlgmr.msra.gmra.mxu0 %v17117_v14 }
0x2b75   :  { %14760 = vmatprep.mubr.msk.f32.mxu0 %vm1534_vm14, %v7409_v47  ;;  %v12129_v47 = vunpack.c.h.bf16 %v12993_v53 }
0x2c24   :  { %v14722_v17 = vpop.f32.mrf.mxu0 }
0x2c25   :  { %v17252_v3 = vadd.f32 %v14722_v17, %v6760_v63  ;;  %v12128_v63 = vunpack.c.l.bf16 %v12993_v53  ;;  %v12125_v17 = vunpack.c.h.bf16 %v12992_v52 }
0x2c26   :  { %v7300_v21 = vpop.f32.mrf.mxu0 }
0x2c27   :  { %v17254_v22 = vadd.f32 %v7300_v21, %v6755_v19  ;;  %v12991_v19 = vld [vmem:[#allocation19 + $0x28] sm:$0xff]   ;;  %v12124_v21 = vunpack.c.l.bf16 %v12992_v52 }
0x2c34   :  { %v14744_v24 = vpop.f32.mrf.mxu0 }
0x2c35   :  { %v7493_v26 = vadd.f32 %v14744_v24, %v7420_v9  ;;  %v12990_v24 = vld [vmem:[#allocation19 + $0x20] sm:$0xff]  }
0x2c36   :  { %v7487_v60 = vpop.f32.mrf.mxu0 }
0x2c37   :  { %v7488_v33 = vadd.f32 %v7487_v60, %v7420_v9  ;;  %14756 = vmatprep.subr.msk.mxu0 %vm1534_vm14, %v7493_v26  ;;  %v12121_v9 = vunpack.c.h.bf16 %v12991_v19  ;;  %v12117_v60 = vunpack.c.h.bf16 %v12990_v24 }
0x2c38   :  { %14757 = vmatpush3.xpose.msk.msra.mxu0 %vm1534_vm14, %v7493_v26  ;;  %v12120_v26 = vunpack.c.l.bf16 %v12991_v19 }
0x2c39   :  { %14758 = vmatprep.subr.msk.mxu0 %vm1534_vm14, %v7488_v33 }
0x2c3c   :  { %14759 = vmatpush3.xpose.msk.msra.mxu0 %vm1534_vm14, %v7488_v33  ;;  %v12116_v33 = vunpack.c.l.bf16 %v12990_v24  ;;  %v13011_v24 = vld [vmem:[#allocation28 + $0x58] sm:$0xff]  }
0x2c3d   :  { %14763 = vmatprep.subr.mxu0 %v7572_v1 }
0x2c3f   :  { %14761 = vmatmul.mubr.msk.f32.vlgmr.msra.gmra.mxu0 %vm1534_vm14, %v17228_v25 }
0x2c40   :  { %14764 = vmatpush3.msra.mxu0 %v7572_v1  ;;  %v12988_v1 = vld [vmem:[#allocation19 + $0x10] sm:$0xff]  }
0x2c41   :  { %14765 = vmatprep.subr.mxu0 %v7567_v15 }
0x2c42   :  { %14766 = vmatpush3.msra.mxu0 %v7567_v15  ;;  %v12109_v15 = vunpack.c.h.bf16 %v12988_v1 }
0x2c43   :  { %14781 = vmatprep.subr.mxu0 %v16343_v6 }
0x2cff   :  { %v14762_v23 = vpop.f32.mrf.mxu0 }
0x2d00   :  { %v7663_v34 = vsel %vm1270_vm1, %v14762_v23, -1e+30  ;;  %v12987_v23 = vld [vmem:[#allocation19 + $0x8] sm:$0xff]  }
0x2d01   :  { %v7653_v36 = vpop.f32.mrf.mxu0  ;;  %v7667_v37 = vsel %vm1624_vm0, %v7663_v34, -inf }
0x2d02   :  { %v7662_v38 = vsel %vm1269_vm15, %v7653_v36, -1e+30  ;;  %7668 = vmax.xlane.f32.xlu1 %v7667_v37  ;;  %v12105_v36 = vunpack.c.h.bf16 %v12987_v23  ;;  %v12099_v37 = vld [vmem:[#allocation19] sm:$0xff]  }
0x2d03   :  { %v7664_v39 = vsel %vm1624_vm0, %v7662_v38, -inf }
0x2d04   :  { %7665 = vmax.xlane.f32.xlu0 %v7664_v39  ;;  %v12101_v39 = vunpack.c.h.bf16 %v12099_v37 }
0x2d8b   :  { %v7669_v25 = vpop.xlane.xlu1 %7668 }
0x2d8c   :  { %v7671_v46 = vsub.f32 %v7663_v34, %v7669_v25  ;;  %v12108_v34 = vunpack.c.l.bf16 %v12988_v1  ;;  %v13010_v1 = vld [vmem:[#allocation28 + $0x50] sm:$0xff]  }
0x2d8d   :  { %v7666_v49 = vpop.xlane.xlu0 %7665 }
0x2d8e   :  { %v7674_v18 = vmul.f32 1.442695, %v7671_v46  ;;  %v7670_v50 = vsub.f32 %v7662_v38, %v7666_v49  ;;  %v12104_v38 = vunpack.c.l.bf16 %v12987_v23 }
0x2d90   :  { %15379 = vpow2.f32 %v7674_v18  ;;  %v7672_v51 = vmul.f32 1.442695, %v7670_v50  ;;  %v11640_v18 = vld [vmem:[#allocation17 + $0x2] ss:$0 sm:$0xff] }
0x2d92   :  { %15381 = vpow2.f32 %v7672_v51 }
0x2d9d   :  { %v15380_v13 = vpop.eup %15379 }
0x2d9e   :  { %v7679_v35 = vsel %vm1624_vm0, %v15380_v13, 0.0 }
0x2d9f   :  { %v15382_v5 = vpop.eup %15381  ;;  %7680 = vadd.xlane.f32.xlu1 %v7679_v35 }
0x2da0   :  { %v7676_v12 = vsel %vm1624_vm0, %v15382_v5, 0.0 }
0x2da1   :  { %7677 = vadd.xlane.f32.xlu0 %v7676_v12 }
0x2db0   :  { %7981 = vperm.xlu1 %15277, %v1185_v4  }
0x2dce   :  { %7869 = vxpose.xlu0.b32.start [1/2] (short) (narrow) %v16728_v62, 8  ;;  %v1184_v62 = vld [vmem:[%s17679_s5] sm:$0xff] }
0x2dcf   :  { %7976 = vperm.xlu1 %15277, %v1184_v62  }
0x2dd2   :  { %7870 = vxpose.xlu0.b32.end [2/2] (short) (narrow) %v16739_v10, 8 }
0x2dfb   :  { %15278 = vset.pattern.permute.xlu0 %v16345_v27 }
0x2e28   :  { %v7681_v28 = vpop.xlane.xlu1 %7680 }
0x2e29   :  { %15383 = vrcp.f32 %v7681_v28  ;;  %v13007_v28 = vld [vmem:[#allocation28 + $0x38] sm:$0xff]  }
0x2e2a   :  { %v7678_v40 = vpop.xlane.xlu0 %7677  ;;  %v12192_v8 = vunpack.c.l.bf16 %v13007_v28 }
0x2e2b   :  { %15385 = vrcp.f32 %v7678_v40  ;;  %v17324_v40 = vld.sshfl [vmem:[%s17680_s2] sm:$0x33 pattern:$0x76325410] }
0x2e2c   :  { %v7982_v49 = vpop.permute.xlu1 %7981 }
0x2e36   :  { %v15384_v42 = vpop.eup %15383 }
0x2e37   :  { %v7685_v2 = vmul.f32 %v15384_v42, %v15380_v13 }
0x2e38   :  { %v15386_v56 = vpop.eup %15385 }
0x2e39   :  { %v7683_v58 = vmul.f32 %v15386_v56, %v15382_v5 }
0x2e3b   :  { %14767 = vmatprep.mubr.msk.f32.mxu0 %vm1624_vm0, %v7683_v58  ;;  %v12193_v58 = vunpack.c.h.bf16 %v13007_v28  ;;  %v12998_v28 = vld [vmem:[#allocation22 + $0x28] sm:$0xff]  }
0x2e3c   :  { %14768 = vmatmul.mubr.msk.f32.vlgmr.msra.gmra.mxu0 %vm1624_vm0, %v7685_v2  ;;  %v13014_v2 = vld [vmem:[#allocation28 + $0x70] sm:$0xff]  }
0x2e3d   :  { %14782 = vmatpush3.msra.mxu0 %v1185_v4  ;;  %14785 = vmatprep.mubr.msk.f32.mxu0 %vm16344_vm3, %v16343_v6  ;;  %v8400_v4 = vcombine.high %v17324_v40, %v17324_v40  ;;  %v12221_v27 = vunpack.c.h.bf16 %v13014_v2 }
0x2e3e   :  { %14783 = vmatprep.subr.mxu0 %v16343_v6 }
0x2e3f   :  { %14784 = vmatpush3.msra.mxu0 %v1184_v62 }
0x2e40   :  { %14788 = vmatprep.subr.mxu0 %v16343_v6 }
0x2e4a   :  { %v17286_v10 = vpop.trf.xlu0  ;;  %v7977_v31 = vpop.permute.xlu1 %7976 }
0x2e4b   :  { %14786 = vmatmul.mubr.msk.f32.vlgmr.msra.gmra.mxu0 %vm1624_vm0, %v17286_v10 }
0x2e4c   :  { %14792 = vmatprep.mubr.msk.f32.mxu0 %vm16344_vm3, %v16343_v6 }
0x2efc   :  { %v14769_v30 = vpop.f32.mrf.mxu0 }
0x2efe   :  { %v7758_v44 = vpop.f32.mrf.mxu0 }
0x2eff   :  { %14778 = vmatprep.mubr.msk.f32.mxu1 %vm1534_vm14, %v7758_v44  ;;  %v13013_v44 = vld [vmem:[#allocation28 + $0x68] sm:$0xff]  }
0x2f00   :  { %14779 = vmatmul.mubr.msk.f32.vlgmr.msra.gmra.mxu1 %vm1534_vm14, %v14769_v30  ;;  %v12189_v30 = vunpack.c.h.bf16 %v13006_v41  ;;  %v12217_v53 = vunpack.c.h.bf16 %v13013_v44 }
0x2f01   :  { %14827 = vmatprep.mubr.msk.f32.mxu1 %vm16344_vm3, %v16343_v6  ;;  %14796 = vmatpush3.msra.mxu1 %v12129_v47  ;;  %v13012_v47 = vld [vmem:[#allocation28 + $0x60] sm:$0xff]  }
0x2f02   :  { %14797 = vmatprep.subr.mxu1 %v16343_v6 }
0x2f03   :  { %14798 = vmatpush3.msra.mxu1 %v12128_v63  ;;  %v12216_v63 = vunpack.c.l.bf16 %v13013_v44 }
0x2f04   :  { %14799 = vmatprep.subr.mxu1 %v16343_v6 }
0x2f05   :  { %14800 = vmatpush3.msra.mxu1 %v12125_v17  ;;  %v13004_v17 = vld [vmem:[#allocation28 + $0x20] sm:$0xff]  }
0x2f06   :  { %14801 = vmatprep.subr.mxu1 %v16343_v6  ;;  %v12180_v29 = vunpack.c.l.bf16 %v13004_v17 }
0x2f07   :  { %14802 = vmatpush3.msra.mxu1 %v12124_v21  ;;  %v12213_v21 = vunpack.c.h.bf16 %v13012_v47 }
0x2f08   :  { %14803 = vmatprep.subr.mxu1 %v16343_v6 }
0x2f09   :  { %14804 = vmatpush3.msra.mxu1 %v12121_v9  ;;  %v12181_v9 = vunpack.c.h.bf16 %v13004_v17 }
0x2f0a   :  { %14805 = vmatprep.subr.mxu1 %v16343_v6 }
0x2f0b   :  { %v7970_v43 = vpop.f32.mrf.mxu0  ;;  %14806 = vmatpush3.msra.mxu1 %v12120_v26  ;;  %v12212_v26 = vunpack.c.l.bf16 %v13012_v47 }
0x2f0c   :  { %v8056_v54 = vmax.f32 %v7970_v43, 1.0  ;;  %14807 = vmatprep.subr.mxu1 %v16343_v6  ;;  %v12220_v43 = vunpack.c.l.bf16 %v13014_v2 }
0x2f0d   :  { %v14787_v16 = vpop.f32.mrf.mxu0  ;;  %14808 = vmatpush3.msra.mxu1 %v12117_v60  ;;  %v13003_v60 = vld [vmem:[#allocation28 + $0x18] sm:$0xff]  }
0x2f0e   :  { %8059 = vperm.xlu1 %15277, %v8056_v54   ;;  %14809 = vmatprep.subr.mxu1 %v16343_v6  ;;  %v13005_v54 = vld [vmem:[#allocation28 + $0x28] sm:$0xff]   ;;  %v12188_v16 = vunpack.c.l.bf16 %v13006_v41  ;;  %v12176_v23 = vunpack.c.l.bf16 %v13003_v60 }
0x2f0f   :  { %14810 = vmatpush3.msra.mxu1 %v12116_v33  ;;  %v12185_v52 = vunpack.c.h.bf16 %v13005_v54  ;;  %v12184_v19 = vunpack.c.l.bf16 %v13005_v54  ;;  %v12209_v33 = vunpack.c.h.bf16 %v13011_v24  ;;  %v12995_v41 = vld [vmem:[#allocation22 + $0x10] sm:$0xff]  }
0x2f10   :  { %14811 = vmatprep.subr.mxu1 %v16343_v6 }
0x2f11   :  { %14812 = vmatpush3.msra.mxu1 %v12113_v32  ;;  %v12177_v32 = vunpack.c.h.bf16 %v13003_v60  ;;  %v11648_v60 = vld [vmem:[#allocation29] ss:$0 sm:$0xff] }
0x2f12   :  { %14813 = vmatprep.subr.mxu1 %v16343_v6 }
0x2f13   :  { %14814 = vmatpush3.msra.mxu1 %v12112_v0  ;;  %v12208_v0 = vunpack.c.l.bf16 %v13011_v24 }
0x2f14   :  { %14815 = vmatprep.subr.mxu1 %v16343_v6 }
0x2f15   :  { %14816 = vmatpush3.msra.mxu1 %v12109_v15  ;;  %v13002_v15 = vld [vmem:[#allocation28 + $0x10] sm:$0xff]  }
0x2f16   :  { %14817 = vmatprep.subr.mxu1 %v16343_v6 }
0x2f17   :  { %14818 = vmatpush3.msra.mxu1 %v12108_v34  ;;  %v12205_v34 = vunpack.c.h.bf16 %v13010_v1 }
0x2f18   :  { %14819 = vmatprep.subr.mxu1 %v16343_v6 }
0x2f19   :  { %14820 = vmatpush3.msra.mxu1 %v12105_v36  ;;  %v12173_v36 = vunpack.c.h.bf16 %v13002_v15 }
0x2f1a   :  { %14821 = vmatprep.subr.mxu1 %v16343_v6 }
0x2f1b   :  { %14822 = vmatpush3.msra.mxu1 %v12104_v38  ;;  %v12204_v38 = vunpack.c.l.bf16 %v13010_v1 }
0x2f1c   :  { %14823 = vmatprep.subr.mxu1 %v16343_v6 }
0x2f1d   :  { %14824 = vmatpush3.msra.mxu1 %v12101_v39  ;;  %v13001_v39 = vld [vmem:[#allocation28 + $0x8] sm:$0xff]  }
0x2f1e   :  { %14825 = vmatprep.subr.mxu1 %v16343_v6 }
0x2fc0   :  { %v14780_v25 = vpop.f32.mrf.mxu1 }
0x2fc1   :  { %v7858_v46 = vadd.f32 %v14780_v25, %v17252_v3  ;;  %v13015_v3 = vld [vmem:[#allocation28 + $0x78] sm:$0xff]   ;;  %v12172_v25 = vunpack.c.l.bf16 %v13002_v15 }
0x2fc2   :  { %v7848_v50 = vpop.f32.mrf.mxu1 }
0x2fc3   :  { %v7860_v51 = vadd.f32 %v7858_v46, %v17117_v14  ;;  %v7857_v13 = vadd.f32 %v7848_v50, %v17254_v22  ;;  %v12100_v14 = vunpack.c.l.bf16 %v12099_v37  ;;  %v8060_v22 = vpop.permute.xlu1 %8059  ;;  %v13009_v37 = vld [vmem:[#allocation28 + $0x48] sm:$0xff]  }
0x2fc4   :  { %15387 = vrcp.f32 %v8060_v22  ;;  %v12201_v46 = vunpack.c.h.bf16 %v13009_v37  ;;  %v12200_v50 = vunpack.c.l.bf16 %v13009_v37  ;;  %v13020_v37 = vld [vmem:[#allocation32 + $0x28] sm:$0xff]  }
0x2fc5   :  { %v7868_v35 = vadd.f32 %v11640_v18, %v7860_v51  ;;  %v7859_v5 = vadd.f32 %v7857_v13, %v17115_v11  ;;  %v12225_v11 = vunpack.c.h.bf16 %v13015_v3  ;;  %14826 = vmatpush3.msra.mxu1 %v12100_v14  ;;  %v12163_v51 = vld [vmem:[#allocation28] sm:$0xff]   ;;  %v12168_v13 = vunpack.c.l.bf16 %v13001_v39 }
0x2fc7   :  { %v7985_v12 = vmul.f32 %v7982_v49, %v7868_v35  ;;  %v7867_v20 = vadd.f32 %v11640_v18, %v7859_v5  ;;  %13627 = vmatprep.subr.mxu1 %v12225_v11  ;;  %v12169_v49 = vunpack.c.h.bf16 %v13001_v39  ;;  %v13008_v18 = vld [vmem:[#allocation28 + $0x40] sm:$0xff]   ;;  %v12165_v5 = vunpack.c.h.bf16 %v12163_v51 }
0x2fc8   :  { %v12197_v35 = vunpack.c.h.bf16 %v13008_v18  ;;  %v12249_v39 = vunpack.c.h.bf16 %v13020_v37 }
0x2fc9   :  { %v7984_v55 = vmul.f32 %v7977_v31, %v7867_v20  ;;  %14789 = vmatpush3.msra.mxu0 %v7985_v12  ;;  %v12196_v12 = vunpack.c.l.bf16 %v13008_v18  ;;  %v12164_v20 = vunpack.c.l.bf16 %v12163_v51  ;;  %v13000_v31 = vld [vmem:[#allocation22 + $0x38] sm:$0xff]   ;;  %v13018_v18 = vld [vmem:[#allocation32 + $0x18] sm:$0xff]  }
0x2fca   :  { %14790 = vmatprep.subr.mxu0 %v16343_v6  ;;  %v12160_v14 = vunpack.c.l.bf16 %v13000_v31  ;;  %v12241_v51 = vunpack.c.h.bf16 %v13018_v18 }
0x2fcb   :  { %14791 = vmatpush3.msra.mxu0 %v7984_v55  ;;  %v12161_v55 = vunpack.c.h.bf16 %v13000_v31  ;;  %v13016_v31 = vld [vmem:[#allocation32 + $0x8] sm:$0xff]  }
0x2fcc   :  { %14793 = vmatmul.mubr.msk.f32.vlgmr.msra.gmra.mxu0 %vm1624_vm0, %v17286_v10  ;;  %14830 = vmatprep.subr.mxu0 %v16343_v6  ;;  %v12224_v10 = vunpack.c.l.bf16 %v13015_v3  ;;  %v12999_v3 = vld [vmem:[#allocation22 + $0x30] sm:$0xff]  }
0x2fcd   :  { %14862 = vmatprep.mubr.msk.f32.mxu0 %vm16344_vm3, %v16343_v6  ;;  %14831 = vmatpush3.msra.mxu0 %v12161_v55  ;;  %v12157_v11 = vunpack.c.h.bf16 %v12999_v3  ;;  %v12156_v22 = vunpack.c.l.bf16 %v12999_v3  ;;  %v12227_v3 = vld [vmem:[#allocation32] sm:$0xff]  }
0x2fce   :  { %14832 = vmatprep.subr.mxu0 %v16343_v6 }
0x2fcf   :  { %14833 = vmatpush3.msra.mxu0 %v12160_v14  ;;  %v12233_v14 = vunpack.c.h.bf16 %v13016_v31 }
0x2fd0   :  { %14834 = vmatprep.subr.mxu0 %v16343_v6 }
0x2fd1   :  { %v15388_v42 = vpop.eup %15387  ;;  %14835 = vmatpush3.msra.mxu0 %v12157_v11  ;;  %v12232_v11 = vunpack.c.l.bf16 %v13016_v31 }
0x2fd2   :  { %14836 = vmatprep.subr.mxu0 %v16343_v6 }
0x2fd3   :  { %14837 = vmatpush3.msra.mxu0 %v12156_v22  ;;  %v12229_v22 = vunpack.c.h.bf16 %v12227_v3 }
0x2fd4   :  { %14838 = vmatprep.subr.mxu0 %v16343_v6 }
0x308c   :  { %v8052_v56 = vpop.f32.mrf.mxu0 }
0x308d   :  { %v8063_v62 = vmul.f32 %v15388_v42, %v8052_v56  ;;  %v12152_v42 = vunpack.c.l.bf16 %v12998_v28  ;;  %v12997_v56 = vld [vmem:[#allocation22 + $0x20] sm:$0xff]  }
0x308e   :  { %v14794_v7 = vpop.f32.mrf.mxu0  ;;  %v12148_v2 = vunpack.c.l.bf16 %v12997_v56 }
0x308f   :  { %14828 = vmatmul.mubr.f32.vlgmr.msra.gmra.mxu1 %v8063_v62  ;;  %v12141_v7 = vunpack.c.h.bf16 %v12995_v41 }
0x3090   :  { %13628 = vmatpush3.msra.mxu1 %v12193_v58  ;;  %8467 = vmatprep.mubr.f32.mxu1 %v8400_v4  ;;  %v12149_v58 = vunpack.c.h.bf16 %v12997_v56  ;;  %v12996_v4 = vld [vmem:[#allocation22 + $0x18] sm:$0xff]  }
0x3091   :  { %13629 = vmatprep.subr.mxu1 %v12224_v10  ;;  %v12145_v62 = vunpack.c.h.bf16 %v12996_v4  ;;  %v12144_v10 = vunpack.c.l.bf16 %v12996_v4 }
0x3092   :  { %13630 = vmatpush3.msra.mxu1 %v12192_v8  ;;  %v12140_v8 = vunpack.c.l.bf16 %v12995_v41 }
0x3093   :  { %13631 = vmatprep.subr.mxu1 %v12221_v27  ;;  %v12994_v27 = vld [vmem:[#allocation22 + $0x8] sm:$0xff]  }
0x3094   :  { %13632 = vmatpush3.msra.mxu1 %v12189_v30  ;;  %v12137_v30 = vunpack.c.h.bf16 %v12994_v27  ;;  %v12136_v44 = vunpack.c.l.bf16 %v12994_v27 }
0x3095   :  { %13633 = vmatprep.subr.mxu1 %v12220_v43  ;;  %v12131_v43 = vld [vmem:[#allocation22] sm:$0xff]  }
0x3096   :  { %13634 = vmatpush3.msra.mxu1 %v12188_v16  ;;  %v12133_v54 = vunpack.c.h.bf16 %v12131_v43  ;;  %v12132_v16 = vunpack.c.l.bf16 %v12131_v43  ;;  %v8655_v43 = vld [vmem:[#allocation38 + $0xe0] sm:$0xff] }
0x3097   :  { %13635 = vmatprep.subr.mxu1 %v12217_v53  ;;  %v11643_v53 = vld [vmem:[#allocation20] ss:$0 sm:$0xff] }
0x3098   :  { %13636 = vmatpush3.msra.mxu1 %v12185_v52 }
0x3099   :  { %13637 = vmatprep.subr.mxu1 %v12216_v63 }
0x309a   :  { %13638 = vmatpush3.msra.mxu1 %v12184_v19 }
0x309b   :  { %13639 = vmatprep.subr.mxu1 %v12213_v21 }
0x309c   :  { %13640 = vmatpush3.msra.mxu1 %v12181_v9  ;;  %v13022_v9 = vld [vmem:[#allocation32 + $0x38] sm:$0xff]  }
0x309d   :  { %13641 = vmatprep.subr.mxu1 %v12212_v26  ;;  %v12256_v15 = vunpack.c.l.bf16 %v13022_v9 }
0x309e   :  { %13642 = vmatpush3.msra.mxu1 %v12180_v29 }
0x309f   :  { %13643 = vmatprep.subr.mxu1 %v12209_v33  ;;  %v12257_v33 = vunpack.c.h.bf16 %v13022_v9 }
0x30a0   :  { %13644 = vmatpush3.msra.mxu1 %v12177_v32 }
0x30a1   :  { %13645 = vmatprep.subr.mxu1 %v12208_v0  ;;  %v13021_v0 = vld [vmem:[#allocation32 + $0x30] sm:$0xff]  }
0x30a2   :  { %13646 = vmatpush3.msra.mxu1 %v12176_v23 }
0x30a3   :  { %13647 = vmatprep.subr.mxu1 %v12205_v34  ;;  %v12253_v34 = vunpack.c.h.bf16 %v13021_v0 }
0x30a4   :  { %13648 = vmatpush3.msra.mxu1 %v12173_v36 }
0x30a5   :  { %13649 = vmatprep.subr.mxu1 %v12204_v38  ;;  %v12252_v38 = vunpack.c.l.bf16 %v13021_v0 }
0x30a6   :  { %13650 = vmatpush3.msra.mxu1 %v12172_v25  ;;  %v13019_v25 = vld [vmem:[#allocation32 + $0x20] sm:$0xff]  }
0x30a7   :  { %13651 = vmatprep.subr.mxu1 %v12201_v46  ;;  %v12248_v46 = vunpack.c.l.bf16 %v13020_v37 }
0x30a8   :  { %13652 = vmatpush3.msra.mxu1 %v12169_v49  ;;  %v12245_v49 = vunpack.c.h.bf16 %v13019_v25 }
0x30a9   :  { %13653 = vmatprep.subr.mxu1 %v12200_v50  ;;  %v12244_v50 = vunpack.c.l.bf16 %v13019_v25 }
0x30aa   :  { %13654 = vmatpush3.msra.mxu1 %v12168_v13  ;;  %v13017_v13 = vld [vmem:[#allocation32 + $0x10] sm:$0xff]  }
0x30ab   :  { %13655 = vmatprep.subr.mxu1 %v12197_v35  ;;  %v12240_v35 = vunpack.c.l.bf16 %v13018_v18  ;;  %v12236_v55 = vunpack.c.l.bf16 %v13017_v13 }
0x30ac   :  { %13656 = vmatpush3.msra.mxu1 %v12165_v5 }
0x30ad   :  { %13657 = vmatprep.subr.mxu1 %v12196_v12  ;;  %v12237_v12 = vunpack.c.h.bf16 %v13017_v13 }
0x30ae   :  { %13658 = vmatpush3.msra.mxu1 %v12164_v20 }
0x30af   :  { %8468 = vmatmul.mubr.f32.vlgmr.msra.gmra.mxu1 %v17324_v40  ;;  %v12153_v40 = vunpack.c.h.bf16 %v12998_v28  ;;  %v12228_v28 = vunpack.c.l.bf16 %v12227_v3  ;;  %v8646_v3 = vld [vmem:[#allocation38 + $0x98] sm:$0xff] }
0x30b0   :  { %8809 = vmatprep.mubr.f32.mxu1 %v16343_v6 }
0x30b1   :  { %14839 = vmatpush3.msra.mxu0 %v12153_v40 }
0x30b2   :  { %14840 = vmatprep.subr.mxu0 %v16343_v6 }
0x30b3   :  { %14841 = vmatpush3.msra.mxu0 %v12152_v42  ;;  %v11651_v42 = vld [vmem:[#allocation31] ss:$0 sm:$0xff] }
0x30b4   :  { %14842 = vmatprep.subr.mxu0 %v16343_v6 }
0x30b5   :  { %14843 = vmatpush3.msra.mxu0 %v12149_v58 }
0x30b6   :  { %14844 = vmatprep.subr.mxu0 %v16343_v6 }
0x30b7   :  { %14845 = vmatpush3.msra.mxu0 %v12148_v2 }
0x30b8   :  { %14846 = vmatprep.subr.mxu0 %v16343_v6 }
0x30b9   :  { %14847 = vmatpush3.msra.mxu0 %v12145_v62  ;;  %v11652_v62 = vld [vmem:[#allocation34] ss:$0 sm:$0xff] }
0x30ba   :  { %14848 = vmatprep.subr.mxu0 %v16343_v6 }
0x30bb   :  { %14849 = vmatpush3.msra.mxu0 %v12144_v10 }
0x30bc   :  { %14850 = vmatprep.subr.mxu0 %v16343_v6 }
0x30bd   :  { %14851 = vmatpush3.msra.mxu0 %v12141_v7 }
0x30be   :  { %14852 = vmatprep.subr.mxu0 %v16343_v6 }
0x30bf   :  { %14853 = vmatpush3.msra.mxu0 %v12140_v8 }
0x30c0   :  { %14854 = vmatprep.subr.mxu0 %v16343_v6 }
0x30c1   :  { %14855 = vmatpush3.msra.mxu0 %v12137_v30  ;;  %v8657_v30 = vld [vmem:[#allocation38 + $0xf0] sm:$0xff] }
0x30c2   :  { %14856 = vmatprep.subr.mxu0 %v16343_v6 }
0x30c3   :  { %14857 = vmatpush3.msra.mxu0 %v12136_v44  ;;  %v8658_v44 = vld [vmem:[#allocation38 + $0xf8] sm:$0xff] }
0x30c4   :  { %14858 = vmatprep.subr.mxu0 %v16343_v6 }
0x30c5   :  { %14859 = vmatpush3.msra.mxu0 %v12133_v54  ;;  %v8719_v54 = vunpack.c.l.bf16 %v8657_v30 }
0x30c6   :  { %14860 = vmatprep.subr.mxu0 %v16343_v6 }
0x30c7   :  { %14861 = vmatpush3.msra.mxu0 %v12132_v16  ;;  %v8720_v16 = vunpack.c.h.bf16 %v8657_v30 }
0x30c8   :  { %14865 = vmatprep.subr.mxu0 %v16343_v6 }
0x30c9   :  { %8745 = vmatprep.subr.mxu1 %v8720_v16  ;;  %v8637_v16 = vld [vmem:[#allocation38 + $0x50] sm:$0xff] }
0x30ca   :  { %8746 = vmatpush1.msra.mxu1 %v8719_v54  ;;  %v8640_v54 = vld [vmem:[#allocation38 + $0x68] sm:$0xff] }
0x314f   :  { %v8169_v52 = vpop.f32.mrf.mxu1 }
0x3150   :  { %v8170_v47 = vadd.f32 %v11643_v53, %v8169_v52  ;;  %v8721_v53 = vunpack.c.l.bf16 %v8658_v44  ;;  %v8722_v52 = vunpack.c.h.bf16 %v8658_v44 }
0x3151   :  { %v14829_v63 = vpop.f32.mrf.mxu1 }
0x3152   :  { %v11644_v17 = vmul.f32 -1.442695, %v8170_v47  ;;  %v8653_v63 = vld [vmem:[#allocation38 + $0xd0] sm:$0xff] }
0x3154   :  { %15389 = vpow2.f32 %v11644_v17  ;;  %v8654_v17 = vld [vmem:[#allocation38 + $0xd8] sm:$0xff] }
0x3161   :  { %v15390_v19 = vpop.eup %15389 }
0x3162   :  { %v8176_v21 = vadd.f32 1.0, %v15390_v19  ;;  %v8715_v19 = vunpack.c.l.bf16 %v8655_v43 }
0x3164   :  { %15391 = vrcp.f32 %v8176_v21  ;;  %v8716_v21 = vunpack.c.h.bf16 %v8655_v43 }
0x3166   :  { %8747 = vmatprep.subr.mxu1 %v8716_v21  ;;  %v8636_v21 = vld [vmem:[#allocation38 + $0x48] sm:$0xff] }
0x3167   :  { %8748 = vmatpush1.msra.mxu1 %v8715_v19  ;;  %v8635_v19 = vld [vmem:[#allocation38 + $0x40] sm:$0xff] }
0x316f   :  { %v13659_v24 = vpop.f32.mrf.mxu1 }
0x3171   :  { %v15392_v26 = vpop.eup %15391  ;;  %v13660_v29 = vpop.f32.mrf.mxu1 }
0x3172   :  { %v8179_v32 = vmul.f32 %v15392_v26, %v8170_v47  ;;  %v13661_v1 = vadd.f32 %v13660_v29, %v13659_v24  ;;  %v8656_v47 = vld [vmem:[#allocation38 + $0xe8] sm:$0xff]  ;;  %v8651_v26 = vld [vmem:[#allocation38 + $0xc0] sm:$0xff]  ;;  %v8712_v29 = vunpack.c.h.bf16 %v8653_v63 }
0x3173   :  { %v8717_v9 = vunpack.c.l.bf16 %v8656_v47  ;;  %v8718_v24 = vunpack.c.h.bf16 %v8656_v47  ;;  %v8708_v0 = vunpack.c.h.bf16 %v8651_v26  ;;  %v8686_v47 = vunpack.c.h.bf16 %v8640_v54 }
0x3174   :  { %v8470_v23 = vadd.f32 %v13661_v1, %v11648_v60  ;;  %14863 = vmatmul.mubr.f32.vlgmr.msra.gmra.mxu0 %v8179_v32  ;;  %v8652_v60 = vld [vmem:[#allocation38 + $0xc8] sm:$0xff]  ;;  %v8711_v32 = vunpack.c.l.bf16 %v8653_v63  ;;  %v8713_v1 = vunpack.c.l.bf16 %v8654_v17  ;;  %8749 = vmatprep.subr.mxu1 %v8712_v29  ;;  %v8633_v29 = vld [vmem:[#allocation38 + $0x30] sm:$0xff] }
0x3175   :  { %14866 = vmatpush3.msra.mxu0 %v12257_v33  ;;  %14897 = vmatprep.mubr.msk.f32.mxu0 %vm16344_vm3, %v16343_v6  ;;  %v8714_v33 = vunpack.c.h.bf16 %v8654_v17  ;;  %v8685_v17 = vunpack.c.l.bf16 %v8640_v54 }
0x3176   :  { %v11650_v36 = vmul.f32 -1.442695, %v8470_v23  ;;  %14867 = vmatprep.subr.mxu0 %v16343_v6  ;;  %8750 = vmatpush1.msra.mxu1 %v8711_v32  ;;  %v8676_v32 = vunpack.c.h.bf16 %v8635_v19 }
0x3177   :  { %14868 = vmatpush3.msra.mxu0 %v12256_v15  ;;  %v8710_v15 = vunpack.c.h.bf16 %v8652_v60  ;;  %8751 = vmatprep.subr.mxu1 %v8708_v0  ;;  %v8675_v0 = vunpack.c.l.bf16 %v8635_v19  ;;  %v13044_v19 = vld [vmem:[#allocation41 + $0xb0] sm:$0xff]  }
0x3178   :  { %15393 = vpow2.f32 %v11650_v36  ;;  %14869 = vmatprep.subr.mxu0 %v16343_v6 }
0x3179   :  { %14870 = vmatpush3.msra.mxu0 %v12253_v34  ;;  %v8709_v34 = vunpack.c.l.bf16 %v8652_v60 }
0x317a   :  { %14871 = vmatprep.subr.mxu0 %v16343_v6 }
0x317b   :  { %14872 = vmatpush3.msra.mxu0 %v12252_v38 }
0x317c   :  { %14873 = vmatprep.subr.mxu0 %v16343_v6 }
0x317d   :  { %14874 = vmatpush3.msra.mxu0 %v12249_v39 }
0x317e   :  { %14875 = vmatprep.subr.mxu0 %v16343_v6 }
0x317f   :  { %14876 = vmatpush3.msra.mxu0 %v12248_v46  ;;  %v8649_v46 = vld [vmem:[#allocation38 + $0xb0] sm:$0xff] }
0x3180   :  { %14877 = vmatprep.subr.mxu0 %v16343_v6  ;;  %v8704_v18 = vunpack.c.h.bf16 %v8649_v46 }
0x3181   :  { %14878 = vmatpush3.msra.mxu0 %v12245_v49  ;;  %v8650_v49 = vld [vmem:[#allocation38 + $0xb8] sm:$0xff] }
0x3182   :  { %14879 = vmatprep.subr.mxu0 %v16343_v6  ;;  %v8705_v13 = vunpack.c.l.bf16 %v8650_v49 }
0x3183   :  { %14880 = vmatpush3.msra.mxu0 %v12244_v50  ;;  %v8706_v50 = vunpack.c.h.bf16 %v8650_v49  ;;  %v8630_v49 = vld [vmem:[#allocation38 + $0x18] sm:$0xff] }
0x3184   :  { %14881 = vmatprep.subr.mxu0 %v16343_v6 }
0x3185   :  { %v15394_v5 = vpop.eup %15393  ;;  %14882 = vmatpush3.msra.mxu0 %v12241_v51  ;;  %v8703_v51 = vunpack.c.l.bf16 %v8649_v46  ;;  %v8629_v46 = vld [vmem:[#allocation38 + $0x10] sm:$0xff] }
0x3186   :  { %v8476_v20 = vadd.f32 1.0, %v15394_v5  ;;  %14883 = vmatprep.subr.mxu0 %v16343_v6  ;;  %v8648_v5 = vld [vmem:[#allocation38 + $0xa8] sm:$0xff] }
0x3187   :  { %14884 = vmatpush3.msra.mxu0 %v12240_v35  ;;  %v8647_v35 = vld [vmem:[#allocation38 + $0xa0] sm:$0xff] }
0x3188   :  { %15395 = vrcp.f32 %v8476_v20  ;;  %14885 = vmatprep.subr.mxu0 %v16343_v6  ;;  %v8702_v20 = vunpack.c.h.bf16 %v8648_v5  ;;  %v8699_v31 = vunpack.c.l.bf16 %v8647_v35 }
0x3189   :  { %14886 = vmatpush3.msra.mxu0 %v12237_v12  ;;  %v8700_v12 = vunpack.c.h.bf16 %v8647_v35  ;;  %v8627_v35 = vld [vmem:[#allocation38] sm:$0xff] }
0x318a   :  { %14887 = vmatprep.subr.mxu0 %v16343_v6 }
0x318b   :  { %14888 = vmatpush3.msra.mxu0 %v12236_v55  ;;  %v8701_v55 = vunpack.c.l.bf16 %v8648_v5  ;;  %v8628_v5 = vld [vmem:[#allocation38 + $0x8] sm:$0xff] }
0x318c   :  { %14889 = vmatprep.subr.mxu0 %v16343_v6 }
0x318d   :  { %14890 = vmatpush3.msra.mxu0 %v12233_v14  ;;  %v8645_v14 = vld [vmem:[#allocation38 + $0x90] sm:$0xff] }
0x318e   :  { %14891 = vmatprep.subr.mxu0 %v16343_v6 }
0x318f   :  { %14892 = vmatpush3.msra.mxu0 %v12232_v11  ;;  %v8696_v11 = vunpack.c.h.bf16 %v8645_v14 }
0x3190   :  { %14893 = vmatprep.subr.mxu0 %v16343_v6 }
0x3191   :  { %14894 = vmatpush3.msra.mxu0 %v12229_v22  ;;  %v8698_v22 = vunpack.c.h.bf16 %v8646_v3 }
0x3192   :  { %14895 = vmatprep.subr.mxu0 %v16343_v6 }
0x3193   :  { %14896 = vmatpush3.msra.mxu0 %v12228_v28  ;;  %v8695_v28 = vunpack.c.l.bf16 %v8645_v14  ;;  %v8660_v14 = vunpack.c.h.bf16 %v8627_v35 }
0x3194   :  { %8816 = vmatprep.subr.mxu0 %v8722_v52 }
0x3195   :  { %v15396_v40 = vpop.eup %15395 }
0x3196   :  { %v8479_v56 = vmul.f32 %v15396_v40, %v8470_v23  ;;  %v8707_v23 = vunpack.c.l.bf16 %v8651_v26  ;;  %v8697_v40 = vunpack.c.l.bf16 %v8646_v3  ;;  %v8679_v26 = vunpack.c.l.bf16 %v8637_v16 }
0x3197   :  { %v8662_v3 = vunpack.c.h.bf16 %v8628_v5 }
0x3198   :  { %v8487_v58 = vadd.f32 %v11651_v42, %v8479_v56  ;;  %8752 = vmatpush1.msra.mxu1 %v8707_v23  ;;  %v8643_v42 = vld [vmem:[#allocation38 + $0x80] sm:$0xff]  ;;  %v8644_v56 = vld [vmem:[#allocation38 + $0x88] sm:$0xff] }
0x3199   :  { %8753 = vmatprep.subr.mxu1 %v8704_v18  ;;  %v8631_v23 = vld [vmem:[#allocation38 + $0x20] sm:$0xff] }
0x319a   :  { %14898 = vmatmul.mubr.f32.vlgmr.msra.gmra.mxu0 %v8487_v58  ;;  %8754 = vmatpush1.msra.mxu1 %v8703_v51  ;;  %v8668_v18 = vunpack.c.h.bf16 %v8631_v23  ;;  %v8667_v51 = vunpack.c.l.bf16 %v8631_v23 }
0x319b   :  { %8880 = vmatprep.mubr.f32.mxu0 %v16343_v6  ;;  %8817 = vmatpush1.msra.mxu0 %v8721_v53  ;;  %v8638_v53 = vld [vmem:[#allocation38 + $0x58] sm:$0xff] }
0x319c   :  { %8818 = vmatprep.subr.mxu0 %v8718_v24  ;;  %8755 = vmatprep.subr.mxu1 %v8700_v12  ;;  %v8682_v24 = vunpack.c.h.bf16 %v8638_v53  ;;  %v8681_v60 = vunpack.c.l.bf16 %v8638_v53  ;;  %v8664_v12 = vunpack.c.h.bf16 %v8629_v46  ;;  %v13052_v53 = vld [vmem:[#allocation41 + $0xf0] sm:$0xff]  }
0x319d   :  { %8819 = vmatpush1.msra.mxu0 %v8717_v9  ;;  %8756 = vmatpush1.msra.mxu1 %v8699_v31  ;;  %v8680_v9 = vunpack.c.h.bf16 %v8637_v16  ;;  %v8663_v31 = vunpack.c.l.bf16 %v8629_v46  ;;  %v13036_v16 = vld [vmem:[#allocation41 + $0x70] sm:$0xff]   ;;  %v13034_v46 = vld [vmem:[#allocation41 + $0x60] sm:$0xff]  }
0x319e   :  { %8820 = vmatprep.subr.mxu0 %v8714_v33  ;;  %8757 = vmatprep.subr.mxu1 %v8696_v11  ;;  %v8634_v33 = vld [vmem:[#allocation38 + $0x38] sm:$0xff]  ;;  %v8659_v11 = vunpack.c.l.bf16 %v8627_v35 }
0x319f   :  { %8821 = vmatpush1.msra.mxu0 %v8713_v1  ;;  %8758 = vmatpush1.msra.mxu1 %v8695_v28  ;;  %v8678_v1 = vunpack.c.h.bf16 %v8636_v21  ;;  %v13037_v28 = vld [vmem:[#allocation41 + $0x78] sm:$0xff]  }
0x31a0   :  { %8822 = vmatprep.subr.mxu0 %v8710_v15  ;;  %v8677_v15 = vunpack.c.l.bf16 %v8636_v21 }
0x31a1   :  { %8823 = vmatpush1.msra.mxu0 %v8709_v34  ;;  %v8632_v34 = vld [vmem:[#allocation38 + $0x28] sm:$0xff] }
0x31a2   :  { %8824 = vmatprep.subr.mxu0 %v8706_v50  ;;  %v8670_v50 = vunpack.c.h.bf16 %v8632_v34 }
0x31a3   :  { %8825 = vmatpush1.msra.mxu0 %v8705_v13  ;;  %v8669_v13 = vunpack.c.l.bf16 %v8632_v34  ;;  %v12348_v34 = vunpack.c.l.bf16 %v13044_v19 }
0x31a4   :  { %8826 = vmatprep.subr.mxu0 %v8702_v20  ;;  %v8666_v20 = vunpack.c.h.bf16 %v8630_v49 }
0x31a5   :  { %8827 = vmatpush1.msra.mxu0 %v8701_v55  ;;  %v8665_v55 = vunpack.c.l.bf16 %v8630_v49  ;;  %v13050_v49 = vld [vmem:[#allocation41 + $0xe0] sm:$0xff]  }
0x31a6   :  { %8828 = vmatprep.subr.mxu0 %v8698_v22  ;;  %v8661_v22 = vunpack.c.l.bf16 %v8628_v5 }
0x31a7   :  { %8829 = vmatpush1.msra.mxu0 %v8697_v40  ;;  %v13053_v40 = vld [vmem:[#allocation41 + $0xf8] sm:$0xff]  }
0x3234   :  { %v17364_v2 = vpop.f32.mrf.mxu0 }
0x3236   :  { %v14864_v4 = vpop.f32.mrf.mxu0 }
0x3237   :  { %v8692_v4 = vunpack.c.h.bf16 %v8643_v42 }
0x3239   :  { %8759 = vmatprep.subr.mxu1 %v8692_v4 }
0x325a   :  { %v8593_v10 = vpop.f32.mrf.mxu0 }
0x325b   :  { %v8594_v41 = vadd.f32 %v11652_v62, %v8593_v10  ;;  %v8693_v62 = vunpack.c.l.bf16 %v8644_v56  ;;  %v8694_v10 = vunpack.c.h.bf16 %v8644_v56  ;;  %v12385_v56 = vunpack.c.h.bf16 %v13053_v40 }
0x325c   :  { %v14899_v7 = vpop.f32.mrf.mxu0 }
0x325d   :  { %v8597_v8 = vadd.f32 %v8594_v41, %v8487_v58  ;;  %v8691_v58 = vunpack.c.l.bf16 %v8643_v42  ;;  %v8641_v41 = vld [vmem:[#allocation38 + $0x70] sm:$0xff]  ;;  %v8642_v7 = vld [vmem:[#allocation38 + $0x78] sm:$0xff]  ;;  %8830 = vmatprep.subr.mxu0 %v8694_v10  ;;  %v12321_v42 = vunpack.c.h.bf16 %v13037_v28 }
0x325e   :  { %v8688_v30 = vunpack.c.h.bf16 %v8641_v41  ;;  %v8689_v44 = vunpack.c.l.bf16 %v8642_v7  ;;  %v8690_v43 = vunpack.c.h.bf16 %v8642_v7  ;;  %8831 = vmatpush1.msra.mxu0 %v8693_v62 }
0x325f   :  { %v8600_v27 = vsel %vm1102_vm13, %v8597_v8, 0.0  ;;  %8760 = vmatpush1.msra.mxu1 %v8691_v58 }
0x3260   :  { %8601 = vadd.xlane.f32.xlu1 %v8600_v27  ;;  %v8687_v27 = vunpack.c.l.bf16 %v8641_v41  ;;  %8761 = vmatprep.subr.mxu1 %v8688_v30  ;;  %v11653_v41 = vld [vmem:[#allocation35] ss:$0 sm:$0xff]  ;;  %v11654_v30 = vld [vmem:[#allocation37] ss:$0 sm:$0xff] }
0x3261   :  { %8832 = vmatprep.subr.mxu0 %v8690_v43 }
0x3262   :  { %8762 = vmatpush1.msra.mxu1 %v8687_v27  ;;  %8833 = vmatpush1.msra.mxu0 %v8689_v44  ;;  %v13045_v27 = vld [vmem:[#allocation41 + $0xb8] sm:$0xff]  }
0x3263   :  { %8834 = vmatprep.subr.mxu0 %v8686_v47  ;;  %v12353_v54 = vunpack.c.h.bf16 %v13045_v27  ;;  %v12320_v47 = vunpack.c.l.bf16 %v13037_v28  ;;  %v13025_v28 = vld [vmem:[#allocation41 + $0x18] sm:$0xff]  }
0x3264   :  { %8835 = vmatpush1.msra.mxu0 %v8685_v17  ;;  %v13028_v17 = vld [vmem:[#allocation41 + $0x30] sm:$0xff]  }
0x3265   :  { %8836 = vmatprep.subr.mxu0 %v8682_v24  ;;  %v12381_v24 = vunpack.c.h.bf16 %v13052_v53  ;;  %v12284_v23 = vunpack.c.l.bf16 %v13028_v17 }
0x3266   :  { %8837 = vmatpush1.msra.mxu0 %v8681_v60  ;;  %v12349_v60 = vunpack.c.h.bf16 %v13044_v19 }
0x3267   :  { %8838 = vmatprep.subr.mxu0 %v8678_v1  ;;  %v12380_v1 = vunpack.c.l.bf16 %v13052_v53 }
0x3268   :  { %8839 = vmatpush1.msra.mxu0 %v8677_v15  ;;  %v13043_v15 = vld [vmem:[#allocation41 + $0xa8] sm:$0xff]  }
0x3269   :  { %v12344_v5 = vunpack.c.l.bf16 %v13043_v15 }
0x32e9   :  { %v8602_v36 = vpop.xlane.xlu1 %8601 }
0x32ea   :  { %v8603_v37 = vmul.f32 0.0078125, %v8602_v36  ;;  %v8672_v36 = vunpack.c.h.bf16 %v8633_v29 }
0x32ec   :  { %v17367_v38 = vsub.f32 %v8597_v8, %v8603_v37  ;;  %v8639_v8 = vld [vmem:[#allocation38 + $0x60] sm:$0xff]  ;;  %v8674_v37 = vunpack.c.h.bf16 %v8634_v33 }
0x32ed   :  { %v8684_v52 = vunpack.c.h.bf16 %v8639_v8  ;;  %v8683_v63 = vunpack.c.l.bf16 %v8639_v8  ;;  %v13029_v8 = vld [vmem:[#allocation41 + $0x38] sm:$0xff]  }
0x32ee   :  { %v8605_v39 = vmul.f32 %v17367_v38, %v17367_v38  ;;  %8840 = vmatprep.subr.mxu0 %v8674_v37  ;;  %v12289_v43 = vunpack.c.h.bf16 %v13029_v8  ;;  %v12288_v21 = vunpack.c.l.bf16 %v13029_v8 }
0x32ef   :  { %8763 = vmatprep.subr.mxu1 %v8684_v52 }
0x32f0   :  { %v8606_v25 = vsel %vm1102_vm13, %v8605_v39, 0.0  ;;  %8764 = vmatpush1.msra.mxu1 %v8683_v63  ;;  %v8671_v39 = vunpack.c.l.bf16 %v8633_v29  ;;  %v12384_v63 = vunpack.c.l.bf16 %v13053_v40  ;;  %v13035_v29 = vld [vmem:[#allocation41 + $0x68] sm:$0xff]   ;;  %v13041_v40 = vld [vmem:[#allocation41 + $0x98] sm:$0xff]  }
0x32f1   :  { %8607 = vadd.xlane.f32.xlu0 %v8606_v25  ;;  %8765 = vmatprep.subr.mxu1 %v8680_v9  ;;  %v8673_v25 = vunpack.c.l.bf16 %v8634_v33  ;;  %v12352_v9 = vunpack.c.l.bf16 %v13045_v27  ;;  %v13051_v33 = vld [vmem:[#allocation41 + $0xe8] sm:$0xff]  }
0x32f2   :  { %8766 = vmatpush1.msra.mxu1 %v8679_v26  ;;  %v12285_v26 = vunpack.c.h.bf16 %v13028_v17  ;;  %v12377_v37 = vunpack.c.h.bf16 %v13051_v33 }
0x32f3   :  { %8767 = vmatprep.subr.mxu1 %v8676_v32  ;;  %8841 = vmatpush1.msra.mxu0 %v8673_v25  ;;  %v12316_v32 = vunpack.c.l.bf16 %v13036_v16  ;;  %v12345_v25 = vunpack.c.h.bf16 %v13043_v15 }
0x32f4   :  { %8768 = vmatpush1.msra.mxu1 %v8675_v0  ;;  %8842 = vmatprep.subr.mxu0 %v8670_v50  ;;  %v13027_v0 = vld [vmem:[#allocation41 + $0x28] sm:$0xff]   ;;  %v12376_v50 = vunpack.c.l.bf16 %v13051_v33 }
0x32f5   :  { %8769 = vmatprep.subr.mxu1 %v8672_v36  ;;  %8843 = vmatpush1.msra.mxu0 %v8669_v13  ;;  %v12313_v36 = vunpack.c.h.bf16 %v13035_v29  ;;  %v13042_v13 = vld [vmem:[#allocation41 + $0xa0] sm:$0xff]   ;;  %v12280_v35 = vunpack.c.l.bf16 %v13027_v0  ;;  %v13039_v33 = vld [vmem:[#allocation41 + $0x88] sm:$0xff]  }
0x32f6   :  { %8770 = vmatpush1.msra.mxu1 %v8671_v39  ;;  %8844 = vmatprep.subr.mxu0 %v8666_v20  ;;  %v12281_v39 = vunpack.c.h.bf16 %v13027_v0  ;;  %v12373_v20 = vunpack.c.h.bf16 %v13050_v49 }
0x32f7   :  { %8771 = vmatprep.subr.mxu1 %v8668_v18  ;;  %8845 = vmatpush1.msra.mxu0 %v8665_v55  ;;  %v12312_v18 = vunpack.c.l.bf16 %v13035_v29  ;;  %v12341_v55 = vunpack.c.h.bf16 %v13042_v13  ;;  %v13023_v29 = vld [vmem:[#allocation41 + $0x8] sm:$0xff]  }
0x32f8   :  { %8772 = vmatpush1.msra.mxu1 %v8667_v51  ;;  %8846 = vmatprep.subr.mxu0 %v8662_v3  ;;  %v13026_v51 = vld [vmem:[#allocation41 + $0x20] sm:$0xff]   ;;  %v13049_v3 = vld [vmem:[#allocation41 + $0xd8] sm:$0xff]  }
0x32f9   :  { %8773 = vmatprep.subr.mxu1 %v8664_v12  ;;  %8847 = vmatpush1.msra.mxu0 %v8661_v22  ;;  %v12309_v12 = vunpack.c.h.bf16 %v13034_v46  ;;  %v12372_v22 = vunpack.c.l.bf16 %v13050_v49  ;;  %v12368_v27 = vunpack.c.l.bf16 %v13049_v3  ;;  %v13038_v49 = vld [vmem:[#allocation41 + $0x80] sm:$0xff]  }
0x32fa   :  { %8774 = vmatpush1.msra.mxu1 %v8663_v31  ;;  %13714 = vmatprep.subr.mxu0 %v12385_v56  ;;  %v12277_v31 = vunpack.c.h.bf16 %v13026_v51  ;;  %v12340_v56 = vunpack.c.l.bf16 %v13042_v13 }
0x32fb   :  { %8775 = vmatprep.subr.mxu1 %v8660_v14  ;;  %v13033_v14 = vld [vmem:[#allocation41 + $0x58] sm:$0xff]  }
0x32fc   :  { %8776 = vmatpush1.msra.mxu1 %v8659_v11  ;;  %v12308_v11 = vunpack.c.l.bf16 %v13034_v46  ;;  %v12304_v8 = vunpack.c.l.bf16 %v13033_v14  ;;  %v12259_v46 = vld [vmem:[#allocation41] sm:$0xff]  }
0x32fd   :  { %13679 = vmatprep.subr.mxu1 %v12321_v42  ;;  %v12276_v42 = vunpack.c.l.bf16 %v13026_v51 }
0x337a   :  { %v8608_v58 = vpop.xlane.xlu0 %8607 }
0x337b   :  { %v8609_v4 = vmul.f32 0.0078125, %v8608_v58  ;;  %v12305_v58 = vunpack.c.h.bf16 %v13033_v14 }
0x337d   :  { %v8610_v62 = vadd.f32 1e-05, %v8609_v4  ;;  %v12369_v4 = vunpack.c.h.bf16 %v13049_v3 }
0x337f   :  { %15397 = vrsqrt.f32 %v8610_v62  ;;  %v12273_v62 = vunpack.c.h.bf16 %v13025_v28 }
0x338c   :  { %v15398_v10 = vpop.eup %15397 }
0x338d   :  { %v8612_v7 = vmul.f32 %v15398_v10, %v17367_v38  ;;  %v12317_v38 = vunpack.c.h.bf16 %v13036_v16  ;;  %v12337_v10 = vunpack.c.h.bf16 %v13041_v40 }
0x338f   :  { %v8619_v44 = vmul.f32 %v11653_v41, %v8612_v7  ;;  %v13032_v41 = vld [vmem:[#allocation41 + $0x50] sm:$0xff]  }
0x3390   :  { %v13048_v7 = vld [vmem:[#allocation41 + $0xd0] sm:$0xff]   ;;  %v12301_v16 = vunpack.c.h.bf16 %v13032_v41  ;;  %v12300_v17 = vunpack.c.l.bf16 %v13032_v41 }
0x3391   :  { %v17373_v52 = vadd.f32 %v11654_v30, %v8619_v44  ;;  %v13024_v30 = vld [vmem:[#allocation41 + $0x10] sm:$0xff]   ;;  %v12365_v53 = vunpack.c.h.bf16 %v13048_v7  ;;  %v12364_v19 = vunpack.c.l.bf16 %v13048_v7 }
0x3392   :  { %v13040_v44 = vld [vmem:[#allocation41 + $0x90] sm:$0xff]  }
0x3393   :  { %8810 = vmatmul.mubr.f32.vlgmr.msra.gmra.mxu1 %v17373_v52  ;;  %8881 = vmatmul.mubr.f32.vlgmr.msra.gmra.mxu0 %v17373_v52 }
0x3394   :  { %13680 = vmatpush3.msra.mxu1 %v12289_v43  ;;  %13715 = vmatpush3.msra.mxu0 %v12353_v54  ;;  %v12272_v43 = vunpack.c.l.bf16 %v13025_v28  ;;  %v12336_v54 = vunpack.c.l.bf16 %v13041_v40 }
0x3395   :  { %13681 = vmatprep.subr.mxu1 %v12320_v47  ;;  %13716 = vmatprep.subr.mxu0 %v12384_v63  ;;  %v12269_v47 = vunpack.c.h.bf16 %v13024_v30  ;;  %v12333_v63 = vunpack.c.h.bf16 %v13040_v44 }
0x3396   :  { %13682 = vmatpush3.msra.mxu1 %v12288_v21  ;;  %13717 = vmatpush3.msra.mxu0 %v12352_v9  ;;  %v12268_v21 = vunpack.c.l.bf16 %v13024_v30  ;;  %v12332_v9 = vunpack.c.l.bf16 %v13040_v44 }
0x3397   :  { %13683 = vmatprep.subr.mxu1 %v12317_v38  ;;  %13718 = vmatprep.subr.mxu0 %v12381_v24  ;;  %v13031_v38 = vld [vmem:[#allocation41 + $0x48] sm:$0xff]  }
0x3398   :  { %13684 = vmatpush3.msra.mxu1 %v12285_v26  ;;  %13719 = vmatpush3.msra.mxu0 %v12349_v60  ;;  %v13047_v24 = vld [vmem:[#allocation41 + $0xc8] sm:$0xff]   ;;  %v12297_v26 = vunpack.c.h.bf16 %v13031_v38  ;;  %v12296_v0 = vunpack.c.l.bf16 %v13031_v38 }
0x3399   :  { %13685 = vmatprep.subr.mxu1 %v12316_v32  ;;  %13720 = vmatprep.subr.mxu0 %v12380_v1  ;;  %v12361_v60 = vunpack.c.h.bf16 %v13047_v24  ;;  %v12265_v32 = vunpack.c.h.bf16 %v13023_v29  ;;  %v12329_v1 = vunpack.c.h.bf16 %v13039_v33  ;;  %v12360_v15 = vunpack.c.l.bf16 %v13047_v24 }
0x339a   :  { %13686 = vmatpush3.msra.mxu1 %v12284_v23  ;;  %13721 = vmatpush3.msra.mxu0 %v12348_v34  ;;  %v12264_v23 = vunpack.c.l.bf16 %v13023_v29  ;;  %v12328_v34 = vunpack.c.l.bf16 %v13039_v33 }
0x339b   :  { %13687 = vmatprep.subr.mxu1 %v12313_v36  ;;  %13722 = vmatprep.subr.mxu0 %v12377_v37  ;;  %v13030_v36 = vld [vmem:[#allocation41 + $0x40] sm:$0xff]  }
0x339c   :  { %13688 = vmatpush3.msra.mxu1 %v12281_v39  ;;  %13723 = vmatpush3.msra.mxu0 %v12345_v25  ;;  %v13046_v37 = vld [vmem:[#allocation41 + $0xc0] sm:$0xff]   ;;  %v12293_v39 = vunpack.c.h.bf16 %v13030_v36  ;;  %v12292_v51 = vunpack.c.l.bf16 %v13030_v36 }
0x339d   :  { %13689 = vmatprep.subr.mxu1 %v12312_v18  ;;  %13724 = vmatprep.subr.mxu0 %v12376_v50  ;;  %v12357_v25 = vunpack.c.h.bf16 %v13046_v37  ;;  %v12261_v18 = vunpack.c.h.bf16 %v12259_v46  ;;  %v12325_v50 = vunpack.c.h.bf16 %v13038_v49  ;;  %v12356_v13 = vunpack.c.l.bf16 %v13046_v37  ;;  %v13056_v36 = vld [vmem:[#allocation32 + $0x58] sm:$0xff]  }
0x339e   :  { %13690 = vmatpush3.msra.mxu1 %v12280_v35  ;;  %13725 = vmatpush3.msra.mxu0 %v12344_v5  ;;  %v12260_v35 = vunpack.c.l.bf16 %v12259_v46  ;;  %v12324_v5 = vunpack.c.l.bf16 %v13038_v49  ;;  %v12401_v37 = vunpack.c.h.bf16 %v13056_v36  ;;  %v13054_v49 = vld [vmem:[#allocation32 + $0x48] sm:$0xff]  }
0x339f   :  { %13691 = vmatprep.subr.mxu1 %v12309_v12  ;;  %13726 = vmatprep.subr.mxu0 %v12373_v20  ;;  %v8723_v12 = vld [vmem:[#allocation40] sm:$0xf]  ;;  %v17379_v20 = vsub.s32 3, %v16722_v59 }
0x33a0   :  { %13692 = vmatpush3.msra.mxu1 %v12277_v31  ;;  %13727 = vmatpush3.msra.mxu0 %v12341_v55  ;;  %v8728_v31 = vrot.slane %v8723_v12, %v16776_v48  ;;  %v8736_v55 = vrot.slane %v8723_v12, %v16786_v61  ;;  %v8732_v14 = vrot.slane %v8723_v12, %v16772_v45 }
0x33a1   :  { %13693 = vmatprep.subr.mxu1 %v12308_v11  ;;  %13728 = vmatprep.subr.mxu0 %v12372_v22  ;;  %v8740_v3 = vrot.slane %v8723_v12, %v17379_v20 }
0x33a2   :  { %13694 = vmatpush3.msra.mxu1 %v12276_v42  ;;  %13729 = vmatpush3.msra.mxu0 %v12340_v56 }
0x33a3   :  { %13695 = vmatprep.subr.mxu1 %v12305_v58  ;;  %13730 = vmatprep.subr.mxu0 %v12369_v4 }
0x33a4   :  { %13696 = vmatpush3.msra.mxu1 %v12273_v62  ;;  %13731 = vmatpush3.msra.mxu0 %v12337_v10 }
0x33a5   :  { %13697 = vmatprep.subr.mxu1 %v12304_v8  ;;  %13732 = vmatprep.subr.mxu0 %v12368_v27  ;;  %v11655_v27 = vld [vmem:[#allocation43] ss:$0 sm:$0xff] }
0x33a6   :  { %13698 = vmatpush3.msra.mxu1 %v12272_v43  ;;  %13733 = vmatpush3.msra.mxu0 %v12336_v54 }
0x33a7   :  { %13699 = vmatprep.subr.mxu1 %v12301_v16  ;;  %13734 = vmatprep.subr.mxu0 %v12365_v53 }
0x33a8   :  { %13700 = vmatpush3.msra.mxu1 %v12269_v47  ;;  %13735 = vmatpush3.msra.mxu0 %v12333_v63 }
0x33a9   :  { %13701 = vmatprep.subr.mxu1 %v12300_v17  ;;  %13736 = vmatprep.subr.mxu0 %v12364_v19  ;;  %v13060_v17 = vld [vmem:[#allocation32 + $0x78] sm:$0xff]   ;;  %v13059_v19 = vld [vmem:[#allocation32 + $0x70] sm:$0xff]  }
0x33aa   :  { %13702 = vmatpush3.msra.mxu1 %v12268_v21  ;;  %13737 = vmatpush3.msra.mxu0 %v12332_v9  ;;  %v12417_v21 = vunpack.c.h.bf16 %v13060_v17  ;;  %v12416_v9 = vunpack.c.l.bf16 %v13060_v17  ;;  %v12413_v38 = vunpack.c.h.bf16 %v13059_v19  ;;  %v12412_v24 = vunpack.c.l.bf16 %v13059_v19  ;;  %v9364_v19 = vld [vmem:[#allocation38 + $0x1c0] sm:$0xff] }
0x33ab   :  { %13703 = vmatprep.subr.mxu1 %v12297_v26  ;;  %13738 = vmatprep.subr.mxu0 %v12361_v60 }
0x33ac   :  { %13704 = vmatpush3.msra.mxu1 %v12265_v32  ;;  %13739 = vmatpush3.msra.mxu0 %v12329_v1  ;;  %v13058_v32 = vld [vmem:[#allocation32 + $0x68] sm:$0xff]  }
0x33ad   :  { %13705 = vmatprep.subr.mxu1 %v12296_v0  ;;  %13740 = vmatprep.subr.mxu0 %v12360_v15  ;;  %v12409_v1 = vunpack.c.h.bf16 %v13058_v32  ;;  %v12408_v0 = vunpack.c.l.bf16 %v13058_v32  ;;  %v13057_v15 = vld [vmem:[#allocation32 + $0x60] sm:$0xff]  }
0x33ae   :  { %13706 = vmatpush3.msra.mxu1 %v12264_v23  ;;  %13741 = vmatpush3.msra.mxu0 %v12328_v34  ;;  %v12405_v23 = vunpack.c.h.bf16 %v13057_v15  ;;  %v12404_v34 = vunpack.c.l.bf16 %v13057_v15 }
0x33af   :  { %13707 = vmatprep.subr.mxu1 %v12293_v39  ;;  %13742 = vmatprep.subr.mxu0 %v12357_v25  ;;  %v13055_v39 = vld [vmem:[#allocation32 + $0x50] sm:$0xff]   ;;  %v12400_v25 = vunpack.c.l.bf16 %v13056_v36  ;;  %v9363_v36 = vld [vmem:[#allocation38 + $0x1b8] sm:$0xff] }
0x33b0   :  { %13708 = vmatpush3.msra.mxu1 %v12261_v18  ;;  %13743 = vmatpush3.msra.mxu0 %v12325_v50  ;;  %v12397_v46 = vunpack.c.h.bf16 %v13055_v39  ;;  %v12396_v18 = vunpack.c.l.bf16 %v13055_v39  ;;  %v12393_v50 = vunpack.c.h.bf16 %v13054_v49  ;;  %v9419_v39 = vunpack.c.h.bf16 %v9363_v36 }
0x33b1   :  { %13709 = vmatprep.subr.mxu1 %v12292_v51  ;;  %13744 = vmatprep.subr.mxu0 %v12356_v13  ;;  %v12387_v51 = vld [vmem:[#allocation32 + $0x40] sm:$0xff]   ;;  %v12392_v13 = vunpack.c.l.bf16 %v13054_v49  ;;  %v9360_v49 = vld [vmem:[#allocation38 + $0x1a0] sm:$0xff] }
0x33b2   :  { %13710 = vmatpush3.msra.mxu1 %v12260_v35  ;;  %13745 = vmatpush3.msra.mxu0 %v12324_v5  ;;  %v12389_v35 = vunpack.c.h.bf16 %v12387_v51  ;;  %v12388_v5 = vunpack.c.l.bf16 %v12387_v51 }
0x33b3   :  { %14900 = vmatprep.subr.mxu1 %v16343_v6 }
0x3453   :  { %v8811_v11 = vpop.f32.mrf.mxu1  ;;  %v8882_v22 = vpop.f32.mrf.mxu0 }
0x3454   :  { %v8812_v28 = vadd.f32 %v8811_v11, %v8728_v31  ;;  %v8883_v40 = vadd.f32 %v8882_v22, %v8736_v55  ;;  %v11657_v22 = vld [vmem:[#allocation46] ss:$0 sm:$0xff] }
0x3455   :  { %v8813_v42 = vpop.f32.mrf.mxu1  ;;  %v8884_v56 = vpop.f32.mrf.mxu0 }
0x3456   :  { %v8814_v58 = vadd.f32 %v8813_v42, %v8732_v14  ;;  %v8885_v4 = vadd.f32 %v8884_v56, %v8740_v3  ;;  %v8887_v59 = vmax.f32 %v8812_v28, 0.0  ;;  %v8889_v41 = vmax.f32 %v8883_v40, 0.0  ;;  %v11656_v3 = vld [vmem:[#allocation44] ss:$0 sm:$0xff]  ;;  %v11658_v42 = vld [vmem:[#allocation34 + $0x1] ss:$0 sm:$0xff] }
0x3458   :  { %v8888_v62 = vmax.f32 %v8814_v58, 0.0  ;;  %v8890_v10 = vmax.f32 %v8885_v4, 0.0 }
0x345a   :  { %9090 = vmatprep.mubr.f32.mxu1 %v8888_v62  ;;  %9160 = vmatprep.mubr.f32.mxu0 %v8890_v10 }
0x345b   :  { %9091 = vmatmul.mubr.f32.vlgmr.msra.gmra.mxu1 %v8887_v59  ;;  %9161 = vmatmul.mubr.f32.vlgmr.msra.gmra.mxu0 %v8889_v41  ;;  %v9370_v59 = vld [vmem:[#allocation38 + $0x1f0] sm:$0xff]  ;;  %v9371_v41 = vld [vmem:[#allocation38 + $0x1f8] sm:$0xff] }
0x345c   :  { %14932 = vmatprep.mubr.msk.f32.mxu1 %vm16344_vm3, %v16343_v6  ;;  %9523 = vmatprep.mubr.f32.mxu0 %v16343_v6 }
0x345d   :  { %14901 = vmatpush3.msra.mxu1 %v12417_v21  ;;  %v9365_v21 = vld [vmem:[#allocation38 + $0x1c8] sm:$0xff] }
0x345e   :  { %14902 = vmatprep.subr.mxu1 %v16343_v6 }
0x345f   :  { %14903 = vmatpush3.msra.mxu1 %v12416_v9 }
0x3460   :  { %14904 = vmatprep.subr.mxu1 %v16343_v6 }
0x3461   :  { %14905 = vmatpush3.msra.mxu1 %v12413_v38 }
0x3462   :  { %14906 = vmatprep.subr.mxu1 %v16343_v6 }
0x3463   :  { %14907 = vmatpush3.msra.mxu1 %v12412_v24 }
0x3464   :  { %14908 = vmatprep.subr.mxu1 %v16343_v6 }
0x3465   :  { %14909 = vmatpush3.msra.mxu1 %v12409_v1 }
0x3466   :  { %14910 = vmatprep.subr.mxu1 %v16343_v6 }
0x3467   :  { %14911 = vmatpush3.msra.mxu1 %v12408_v0 }
0x3468   :  { %14912 = vmatprep.subr.mxu1 %v16343_v6 }
0x3469   :  { %14913 = vmatpush3.msra.mxu1 %v12405_v23 }
0x346a   :  { %14914 = vmatprep.subr.mxu1 %v16343_v6 }
0x346b   :  { %14915 = vmatpush3.msra.mxu1 %v12404_v34  ;;  %v9362_v34 = vld [vmem:[#allocation38 + $0x1b0] sm:$0xff] }
0x346c   :  { %14916 = vmatprep.subr.mxu1 %v16343_v6 }
0x346d   :  { %14917 = vmatpush3.msra.mxu1 %v12401_v37  ;;  %v9417_v37 = vunpack.c.h.bf16 %v9362_v34 }
0x346e   :  { %14918 = vmatprep.subr.mxu1 %v16343_v6 }
0x346f   :  { %14919 = vmatpush3.msra.mxu1 %v12400_v25  ;;  %v9416_v25 = vunpack.c.l.bf16 %v9362_v34  ;;  %v9342_v34 = vld [vmem:[#allocation38 + $0x110] sm:$0xff] }
0x3470   :  { %14920 = vmatprep.subr.mxu1 %v16343_v6 }
0x3471   :  { %14921 = vmatpush3.msra.mxu1 %v12397_v46  ;;  %v9418_v46 = vunpack.c.l.bf16 %v9363_v36  ;;  %v9343_v36 = vld [vmem:[#allocation38 + $0x118] sm:$0xff] }
0x3472   :  { %14922 = vmatprep.subr.mxu1 %v16343_v6 }
0x3473   :  { %14923 = vmatpush3.msra.mxu1 %v12396_v18  ;;  %v9361_v18 = vld [vmem:[#allocation38 + $0x1a8] sm:$0xff] }
0x3474   :  { %14924 = vmatprep.subr.mxu1 %v16343_v6  ;;  %v9415_v51 = vunpack.c.h.bf16 %v9361_v18 }
0x3475   :  { %14925 = vmatpush3.msra.mxu1 %v12393_v50  ;;  %v9413_v50 = vunpack.c.h.bf16 %v9360_v49 }
0x3476   :  { %14926 = vmatprep.subr.mxu1 %v16343_v6 }
0x3477   :  { %14927 = vmatpush3.msra.mxu1 %v12392_v13  ;;  %v9412_v13 = vunpack.c.l.bf16 %v9360_v49  ;;  %v9340_v49 = vld [vmem:[#allocation38 + $0x100] sm:$0xff] }
0x3478   :  { %14928 = vmatprep.subr.mxu1 %v16343_v6 }
0x3479   :  { %14929 = vmatpush3.msra.mxu1 %v12389_v35  ;;  %v9414_v35 = vunpack.c.l.bf16 %v9361_v18  ;;  %v9341_v18 = vld [vmem:[#allocation38 + $0x108] sm:$0xff] }
0x347a   :  { %14930 = vmatprep.subr.mxu1 %v16343_v6 }
0x347b   :  { %14931 = vmatpush3.msra.mxu1 %v12388_v5  ;;  %v9358_v5 = vld [vmem:[#allocation38 + $0x190] sm:$0xff] }
0x351b   :  { %v13711_v7 = vpop.f32.mrf.mxu1  ;;  %v13746_v8 = vpop.f32.mrf.mxu0 }
0x351d   :  { %v13712_v30 = vpop.f32.mrf.mxu1  ;;  %v13747_v44 = vpop.f32.mrf.mxu0 }
0x351e   :  { %v13713_v43 = vadd.f32 %v13712_v30, %v13711_v7  ;;  %v13748_v16 = vadd.f32 %v13747_v44, %v13746_v8  ;;  %v9368_v7 = vld [vmem:[#allocation38 + $0x1e0] sm:$0xff]  ;;  %v9432_v8 = vunpack.c.l.bf16 %v9370_v59  ;;  %v9434_v30 = vunpack.c.l.bf16 %v9371_v41 }
0x351f   :  { %v9435_v44 = vunpack.c.h.bf16 %v9371_v41 }
0x3520   :  { %v9093_v54 = vadd.f32 %v13713_v43, %v11655_v27  ;;  %v9433_v27 = vunpack.c.h.bf16 %v9370_v59  ;;  %v9369_v43 = vld [vmem:[#allocation38 + $0x1e8] sm:$0xff] }
0x3521   :  { %v9431_v17 = vunpack.c.h.bf16 %v9369_v43  ;;  %9530 = vmatprep.subr.mxu1 %v9435_v44 }
0x3522   :  { %v9163_v53 = vadd.f32 %v13748_v16, %v9093_v54  ;;  %v9366_v54 = vld [vmem:[#allocation38 + $0x1d0] sm:$0xff]  ;;  %v9367_v16 = vld [vmem:[#allocation38 + $0x1d8] sm:$0xff]  ;;  %9459 = vmatprep.subr.mxu0 %v9433_v27 }
0x3523   :  { %v9425_v9 = vunpack.c.h.bf16 %v9366_v54  ;;  %v9427_v38 = vunpack.c.h.bf16 %v9367_v16  ;;  %9460 = vmatpush1.msra.mxu0 %v9432_v8  ;;  %v9424_v24 = vunpack.c.l.bf16 %v9366_v54  ;;  %v9353_v8 = vld [vmem:[#allocation38 + $0x168] sm:$0xff]  ;;  %v9350_v27 = vld [vmem:[#allocation38 + $0x150] sm:$0xff] }
0x3524   :  { %v9166_v47 = vadd.f32 %v9163_v53, %v17373_v52  ;;  %v9428_v53 = vunpack.c.l.bf16 %v9368_v7 }
0x3526   :  { %v9169_v63 = vsel %vm1102_vm13, %v9166_v47, 0.0 }
0x3527   :  { %9170 = vadd.xlane.f32.xlu1 %v9169_v63  ;;  %v9430_v63 = vunpack.c.l.bf16 %v9369_v43  ;;  %v9399_v43 = vunpack.c.h.bf16 %v9353_v8 }
0x35b0   :  { %v9171_v52 = vpop.xlane.xlu1 %9170 }
0x35b1   :  { %v9172_v26 = vmul.f32 0.0078125, %v9171_v52  ;;  %v9426_v52 = vunpack.c.l.bf16 %v9367_v16  ;;  %v9398_v16 = vunpack.c.l.bf16 %v9353_v8 }
0x35b3   :  { %v9173_v60 = vsub.f32 %v9166_v47, %v9172_v26  ;;  %v9429_v47 = vunpack.c.h.bf16 %v9368_v7  ;;  %v9421_v26 = vunpack.c.h.bf16 %v9364_v19 }
0x35b5   :  { %v9174_v29 = vmul.f32 %v9173_v60, %v9173_v60  ;;  %9461 = vmatprep.subr.mxu0 %v9429_v47  ;;  %v9349_v47 = vld [vmem:[#allocation38 + $0x148] sm:$0xff] }
0x35b6   :  { %9462 = vmatpush1.msra.mxu0 %v9428_v53  ;;  %v9348_v53 = vld [vmem:[#allocation38 + $0x140] sm:$0xff] }
0x35b7   :  { %v9175_v33 = vsel %vm1102_vm13, %v9174_v29, 0.0  ;;  %v9420_v29 = vunpack.c.l.bf16 %v9364_v19  ;;  %9463 = vmatprep.subr.mxu0 %v9425_v9  ;;  %v9392_v19 = vunpack.c.l.bf16 %v9350_v27  ;;  %v9346_v9 = vld [vmem:[#allocation38 + $0x130] sm:$0xff] }
0x35b8   :  { %9176 = vadd.xlane.f32.xlu1 %v9175_v33  ;;  %v9422_v33 = vunpack.c.l.bf16 %v9365_v21  ;;  %9464 = vmatpush1.msra.mxu0 %v9424_v24  ;;  %v9389_v24 = vunpack.c.h.bf16 %v9348_v53 }
0x35b9   :  { %9465 = vmatprep.subr.mxu0 %v9421_v26  ;;  %v9388_v26 = vunpack.c.l.bf16 %v9348_v53  ;;  %v13082_v53 = vld [vmem:[#allocation41 + $0x1b0] sm:$0xff]  }
0x35ba   :  { %9466 = vmatpush1.msra.mxu0 %v9420_v29  ;;  %v9344_v29 = vld [vmem:[#allocation38 + $0x120] sm:$0xff] }
0x35bb   :  { %9467 = vmatprep.subr.mxu0 %v9417_v37  ;;  %v9381_v37 = vunpack.c.h.bf16 %v9344_v29 }
0x35bc   :  { %9468 = vmatpush1.msra.mxu0 %v9416_v25  ;;  %v9380_v25 = vunpack.c.l.bf16 %v9344_v29 }
0x35bd   :  { %9469 = vmatprep.subr.mxu0 %v9413_v50  ;;  %v9377_v50 = vunpack.c.h.bf16 %v9342_v34 }
0x35be   :  { %9470 = vmatpush1.msra.mxu0 %v9412_v13  ;;  %v9376_v13 = vunpack.c.l.bf16 %v9342_v34  ;;  %v13072_v34 = vld [vmem:[#allocation41 + $0x160] sm:$0xff]  }
0x3641   :  { %v9177_v12 = vpop.xlane.xlu1 %9176 }
0x3642   :  { %v9178_v31 = vmul.f32 0.0078125, %v9177_v12  ;;  %v9359_v12 = vld [vmem:[#allocation38 + $0x198] sm:$0xff] }
0x3644   :  { %v9179_v55 = vadd.f32 1e-05, %v9178_v31  ;;  %v9409_v31 = vunpack.c.h.bf16 %v9358_v5 }
0x3646   :  { %15399 = vrsqrt.f32 %v9179_v55  ;;  %v9411_v55 = vunpack.c.h.bf16 %v9359_v12  ;;  %9471 = vmatprep.subr.mxu0 %v9409_v31  ;;  %v9372_v31 = vunpack.c.l.bf16 %v9340_v49 }
0x3653   :  { %v15400_v14 = vpop.eup %15399 }
0x3654   :  { %v9181_v11 = vmul.f32 %v15400_v14, %v9173_v60  ;;  %v9423_v60 = vunpack.c.h.bf16 %v9365_v21  ;;  %v9408_v14 = vunpack.c.l.bf16 %v9358_v5  ;;  %v9373_v5 = vunpack.c.h.bf16 %v9340_v49 }
0x3656   :  { %v9188_v28 = vmul.f32 %v11656_v3, %v9181_v11  ;;  %v9410_v3 = vunpack.c.l.bf16 %v9359_v12  ;;  %v9356_v11 = vld [vmem:[#allocation38 + $0x180] sm:$0xff]  ;;  %9472 = vmatpush1.msra.mxu0 %v9408_v14  ;;  %v9375_v12 = vunpack.c.h.bf16 %v9341_v18 }
0x3657   :  { %v13075_v14 = vld [vmem:[#allocation41 + $0x178] sm:$0xff]  }
0x3658   :  { %v9195_v40 = vadd.f32 %v11657_v22, %v9188_v28  ;;  %v9357_v22 = vld [vmem:[#allocation38 + $0x188] sm:$0xff]  ;;  %v9404_v28 = vunpack.c.l.bf16 %v9356_v11 }
0x365a   :  { %14933 = vmatmul.mubr.f32.vlgmr.msra.gmra.mxu1 %v9195_v40 }
0x365b   :  { %9594 = vmatprep.mubr.f32.mxu1 %v16343_v6  ;;  %9531 = vmatpush1.msra.mxu1 %v9434_v30  ;;  %v9351_v30 = vld [vmem:[#allocation38 + $0x158] sm:$0xff] }
0x365c   :  { %9532 = vmatprep.subr.mxu1 %v9431_v17  ;;  %v9395_v17 = vunpack.c.h.bf16 %v9351_v30  ;;  %v9394_v21 = vunpack.c.l.bf16 %v9351_v30  ;;  %v13090_v30 = vld [vmem:[#allocation41 + $0x1f0] sm:$0xff]  }
0x365d   :  { %9533 = vmatpush1.msra.mxu1 %v9430_v63  ;;  %v9393_v63 = vunpack.c.h.bf16 %v9350_v27  ;;  %v13074_v27 = vld [vmem:[#allocation41 + $0x170] sm:$0xff]  }
0x365e   :  { %9534 = vmatprep.subr.mxu1 %v9427_v38  ;;  %v9347_v38 = vld [vmem:[#allocation38 + $0x138] sm:$0xff] }
0x365f   :  { %9535 = vmatpush1.msra.mxu1 %v9426_v52  ;;  %v9391_v52 = vunpack.c.h.bf16 %v9349_v47 }
0x3660   :  { %9536 = vmatprep.subr.mxu1 %v9423_v60  ;;  %v9390_v60 = vunpack.c.l.bf16 %v9349_v47 }
0x3661   :  { %9537 = vmatpush1.msra.mxu1 %v9422_v33  ;;  %v9345_v33 = vld [vmem:[#allocation38 + $0x128] sm:$0xff] }
0x3662   :  { %9538 = vmatprep.subr.mxu1 %v9419_v39  ;;  %v9383_v39 = vunpack.c.h.bf16 %v9345_v33 }
0x3663   :  { %9539 = vmatpush1.msra.mxu1 %v9418_v46  ;;  %v9382_v46 = vunpack.c.l.bf16 %v9345_v33  ;;  %v12508_v33 = vunpack.c.l.bf16 %v13082_v53 }
0x3664   :  { %9540 = vmatprep.subr.mxu1 %v9415_v51  ;;  %v9379_v51 = vunpack.c.h.bf16 %v9343_v36 }
0x3665   :  { %9541 = vmatpush1.msra.mxu1 %v9414_v35  ;;  %v9378_v35 = vunpack.c.l.bf16 %v9343_v36  ;;  %v13088_v36 = vld [vmem:[#allocation41 + $0x1e0] sm:$0xff]  }
0x3666   :  { %9542 = vmatprep.subr.mxu1 %v9411_v55  ;;  %v9374_v55 = vunpack.c.l.bf16 %v9341_v18 }
0x3667   :  { %9543 = vmatpush1.msra.mxu1 %v9410_v3  ;;  %v13091_v3 = vld [vmem:[#allocation41 + $0x1f8] sm:$0xff]  }
0x371a   :  { %v9303_v56 = vpop.f32.mrf.mxu1 }
0x371b   :  { %v9304_v58 = vadd.f32 %v11658_v42, %v9303_v56  ;;  %v9406_v42 = vunpack.c.l.bf16 %v9357_v22  ;;  %v9407_v56 = vunpack.c.h.bf16 %v9357_v22  ;;  %v12545_v22 = vunpack.c.h.bf16 %v13091_v3 }
0x371c   :  { %v14934_v4 = vpop.f32.mrf.mxu1 }
0x371d   :  { %v9307_v62 = vadd.f32 %v9304_v58, %v9195_v40  ;;  %v9405_v40 = vunpack.c.h.bf16 %v9356_v11  ;;  %v9354_v58 = vld [vmem:[#allocation38 + $0x170] sm:$0xff]  ;;  %v9355_v4 = vld [vmem:[#allocation38 + $0x178] sm:$0xff]  ;;  %9544 = vmatprep.subr.mxu1 %v9407_v56  ;;  %v12481_v11 = vunpack.c.h.bf16 %v13075_v14 }
0x371e   :  { %v9401_v59 = vunpack.c.h.bf16 %v9354_v58  ;;  %v9402_v41 = vunpack.c.l.bf16 %v9355_v4  ;;  %v9403_v7 = vunpack.c.h.bf16 %v9355_v4  ;;  %9545 = vmatpush1.msra.mxu1 %v9406_v42 }
0x371f   :  { %v9312_v10 = vsel %vm1102_vm13, %v9307_v62, 0.0  ;;  %9473 = vmatprep.subr.mxu0 %v9405_v40 }
0x3720   :  { %9313 = vadd.xlane.f32.xlu1 %v9312_v10  ;;  %v9400_v10 = vunpack.c.l.bf16 %v9354_v58  ;;  %9474 = vmatpush1.msra.mxu0 %v9404_v28  ;;  %v11659_v58 = vld [vmem:[#allocation35 + $0x1] ss:$0 sm:$0xff] }
0x3721   :  { %9475 = vmatprep.subr.mxu0 %v9401_v59  ;;  %9546 = vmatprep.subr.mxu1 %v9403_v7  ;;  %v11660_v59 = vld [vmem:[#allocation37 + $0x1] ss:$0 sm:$0xff] }
0x3722   :  { %9476 = vmatpush1.msra.mxu0 %v9400_v10  ;;  %9547 = vmatpush1.msra.mxu1 %v9402_v41  ;;  %v13083_v10 = vld [vmem:[#allocation41 + $0x1b8] sm:$0xff]  }
0x3723   :  { %9548 = vmatprep.subr.mxu1 %v9399_v43  ;;  %v12513_v8 = vunpack.c.h.bf16 %v13083_v10  ;;  %v12480_v43 = vunpack.c.l.bf16 %v13075_v14  ;;  %v13063_v14 = vld [vmem:[#allocation41 + $0x118] sm:$0xff]  }
0x3724   :  { %9549 = vmatpush1.msra.mxu1 %v9398_v16  ;;  %v13066_v16 = vld [vmem:[#allocation41 + $0x130] sm:$0xff]  }
0x3725   :  { %9550 = vmatprep.subr.mxu1 %v9395_v17  ;;  %v12541_v17 = vunpack.c.h.bf16 %v13090_v30  ;;  %v12444_v29 = vunpack.c.l.bf16 %v13066_v16 }
0x3726   :  { %9551 = vmatpush1.msra.mxu1 %v9394_v21  ;;  %v12509_v21 = vunpack.c.h.bf16 %v13082_v53 }
0x3727   :  { %9552 = vmatprep.subr.mxu1 %v9391_v52  ;;  %v12540_v52 = vunpack.c.l.bf16 %v13090_v30 }
0x3728   :  { %9553 = vmatpush1.msra.mxu1 %v9390_v60  ;;  %v13081_v60 = vld [vmem:[#allocation41 + $0x1a8] sm:$0xff]  }
0x3729   :  { %v12504_v18 = vunpack.c.l.bf16 %v13081_v60 }
0x37a9   :  { %v9314_v32 = vpop.xlane.xlu1 %9313 }
0x37aa   :  { %v9315_v1 = vmul.f32 0.0078125, %v9314_v32  ;;  %v9385_v32 = vunpack.c.h.bf16 %v9346_v9 }
0x37ac   :  { %v17408_v0 = vsub.f32 %v9307_v62, %v9315_v1  ;;  %v9352_v62 = vld [vmem:[#allocation38 + $0x160] sm:$0xff]  ;;  %v9387_v1 = vunpack.c.h.bf16 %v9347_v38 }
0x37ad   :  { %v9397_v44 = vunpack.c.h.bf16 %v9352_v62  ;;  %v9396_v54 = vunpack.c.l.bf16 %v9352_v62  ;;  %v13067_v62 = vld [vmem:[#allocation41 + $0x138] sm:$0xff]  }
0x37ae   :  { %v9317_v15 = vmul.f32 %v17408_v0, %v17408_v0  ;;  %9554 = vmatprep.subr.mxu1 %v9387_v1  ;;  %v12449_v7 = vunpack.c.h.bf16 %v13067_v62  ;;  %v12448_v47 = vunpack.c.l.bf16 %v13067_v62 }
0x37af   :  { %9477 = vmatprep.subr.mxu0 %v9397_v44 }
0x37b0   :  { %v9318_v23 = vsel %vm1102_vm13, %v9317_v15, 0.0  ;;  %9478 = vmatpush1.msra.mxu0 %v9396_v54  ;;  %v9384_v15 = vunpack.c.l.bf16 %v9346_v9  ;;  %v12544_v54 = vunpack.c.l.bf16 %v13091_v3  ;;  %v13073_v9 = vld [vmem:[#allocation41 + $0x168] sm:$0xff]   ;;  %v13079_v3 = vld [vmem:[#allocation41 + $0x198] sm:$0xff]  }
0x37b1   :  { %9319 = vadd.xlane.f32.xlu1 %v9318_v23  ;;  %9479 = vmatprep.subr.mxu0 %v9393_v63  ;;  %v9386_v23 = vunpack.c.l.bf16 %v9347_v38  ;;  %v12512_v63 = vunpack.c.l.bf16 %v13083_v10  ;;  %v13089_v38 = vld [vmem:[#allocation41 + $0x1e8] sm:$0xff]  }
0x37b2   :  { %9480 = vmatpush1.msra.mxu0 %v9392_v19  ;;  %v12445_v19 = vunpack.c.h.bf16 %v13066_v16  ;;  %v12537_v1 = vunpack.c.h.bf16 %v13089_v38 }
0x37b3   :  { %9481 = vmatprep.subr.mxu0 %v9389_v24  ;;  %9555 = vmatpush1.msra.mxu1 %v9386_v23  ;;  %v12476_v24 = vunpack.c.l.bf16 %v13074_v27  ;;  %v12505_v23 = vunpack.c.h.bf16 %v13081_v60 }
0x37b4   :  { %9482 = vmatpush1.msra.mxu0 %v9388_v26  ;;  %9556 = vmatprep.subr.mxu1 %v9383_v39  ;;  %v13065_v26 = vld [vmem:[#allocation41 + $0x128] sm:$0xff]   ;;  %v12536_v39 = vunpack.c.l.bf16 %v13089_v38 }
0x37b5   :  { %9483 = vmatprep.subr.mxu0 %v9385_v32  ;;  %9557 = vmatpush1.msra.mxu1 %v9382_v46  ;;  %v12473_v32 = vunpack.c.h.bf16 %v13073_v9  ;;  %v13080_v46 = vld [vmem:[#allocation41 + $0x1a0] sm:$0xff]   ;;  %v12440_v49 = vunpack.c.l.bf16 %v13065_v26  ;;  %v13077_v38 = vld [vmem:[#allocation41 + $0x188] sm:$0xff]  }
0x37b6   :  { %9484 = vmatpush1.msra.mxu0 %v9384_v15  ;;  %9558 = vmatprep.subr.mxu1 %v9379_v51  ;;  %v12441_v15 = vunpack.c.h.bf16 %v13065_v26  ;;  %v12533_v51 = vunpack.c.h.bf16 %v13088_v36 }
0x37b7   :  { %9485 = vmatprep.subr.mxu0 %v9381_v37  ;;  %9559 = vmatpush1.msra.mxu1 %v9378_v35  ;;  %v12472_v37 = vunpack.c.l.bf16 %v13073_v9  ;;  %v12501_v35 = vunpack.c.h.bf16 %v13080_v46  ;;  %v13061_v9 = vld [vmem:[#allocation41 + $0x108] sm:$0xff]  }
0x37b8   :  { %9486 = vmatpush1.msra.mxu0 %v9380_v25  ;;  %9560 = vmatprep.subr.mxu1 %v9375_v12  ;;  %v13064_v25 = vld [vmem:[#allocation41 + $0x120] sm:$0xff]   ;;  %v13087_v12 = vld [vmem:[#allocation41 + $0x1d8] sm:$0xff]  }
0x37b9   :  { %9487 = vmatprep.subr.mxu0 %v9377_v50  ;;  %9561 = vmatpush1.msra.mxu1 %v9374_v55  ;;  %v12469_v50 = vunpack.c.h.bf16 %v13072_v34  ;;  %v12532_v55 = vunpack.c.l.bf16 %v13088_v36  ;;  %v12528_v10 = vunpack.c.l.bf16 %v13087_v12  ;;  %v13076_v36 = vld [vmem:[#allocation41 + $0x180] sm:$0xff]  }
0x37ba   :  { %9488 = vmatpush1.msra.mxu0 %v9376_v13  ;;  %13801 = vmatprep.subr.mxu1 %v12545_v22  ;;  %v12437_v13 = vunpack.c.h.bf16 %v13064_v25  ;;  %v12500_v22 = vunpack.c.l.bf16 %v13080_v46 }
0x37bb   :  { %9489 = vmatprep.subr.mxu0 %v9373_v5  ;;  %v13071_v5 = vld [vmem:[#allocation41 + $0x158] sm:$0xff]  }
0x37bc   :  { %9490 = vmatpush1.msra.mxu0 %v9372_v31  ;;  %v12468_v31 = vunpack.c.l.bf16 %v13072_v34  ;;  %v12464_v62 = vunpack.c.l.bf16 %v13071_v5  ;;  %v12419_v34 = vld [vmem:[#allocation41 + $0x100] sm:$0xff]  }
0x37bd   :  { %13766 = vmatprep.subr.mxu0 %v12481_v11  ;;  %v12436_v11 = vunpack.c.l.bf16 %v13064_v25 }
0x383a   :  { %v9320_v28 = vpop.xlane.xlu1 %9319 }
0x383b   :  { %v9321_v40 = vmul.f32 0.0078125, %v9320_v28  ;;  %v12465_v28 = vunpack.c.h.bf16 %v13071_v5 }
0x383d   :  { %v9322_v42 = vadd.f32 1e-05, %v9321_v40  ;;  %v12529_v40 = vunpack.c.h.bf16 %v13087_v12 }
0x383f   :  { %15401 = vrsqrt.f32 %v9322_v42  ;;  %v12433_v42 = vunpack.c.h.bf16 %v13063_v14 }
0x384c   :  { %v15402_v56 = vpop.eup %15401 }
0x384d   :  { %v9324_v4 = vmul.f32 %v15402_v56, %v17408_v0  ;;  %v12477_v0 = vunpack.c.h.bf16 %v13074_v27  ;;  %v12497_v56 = vunpack.c.h.bf16 %v13079_v3 }
0x384f   :  { %v9331_v41 = vmul.f32 %v11659_v58, %v9324_v4  ;;  %v13070_v58 = vld [vmem:[#allocation41 + $0x150] sm:$0xff]  }
0x3850   :  { %v13086_v4 = vld [vmem:[#allocation41 + $0x1d0] sm:$0xff]   ;;  %v12461_v27 = vunpack.c.h.bf16 %v13070_v58  ;;  %v12460_v16 = vunpack.c.l.bf16 %v13070_v58 }
0x3851   :  { %v17414_v44 = vadd.f32 %v11660_v59, %v9331_v41  ;;  %v13062_v59 = vld [vmem:[#allocation41 + $0x110] sm:$0xff]   ;;  %v12525_v30 = vunpack.c.h.bf16 %v13086_v4  ;;  %v12524_v53 = vunpack.c.l.bf16 %v13086_v4 }
0x3852   :  { %v13078_v41 = vld [vmem:[#allocation41 + $0x190] sm:$0xff]  }
0x3853   :  { %9524 = vmatmul.mubr.f32.vlgmr.msra.gmra.mxu0 %v17414_v44  ;;  %9595 = vmatmul.mubr.f32.vlgmr.msra.gmra.mxu1 %v17414_v44 }
0x3854   :  { %13767 = vmatpush3.msra.mxu0 %v12449_v7  ;;  %13802 = vmatpush3.msra.mxu1 %v12513_v8  ;;  %v12432_v7 = vunpack.c.l.bf16 %v13063_v14  ;;  %v12496_v8 = vunpack.c.l.bf16 %v13079_v3 }
0x3855   :  { %13768 = vmatprep.subr.mxu0 %v12480_v43  ;;  %13803 = vmatprep.subr.mxu1 %v12544_v54  ;;  %v12429_v43 = vunpack.c.h.bf16 %v13062_v59  ;;  %v12493_v54 = vunpack.c.h.bf16 %v13078_v41 }
0x3856   :  { %13769 = vmatpush3.msra.mxu0 %v12448_v47  ;;  %13804 = vmatpush3.msra.mxu1 %v12512_v63  ;;  %v12428_v47 = vunpack.c.l.bf16 %v13062_v59  ;;  %v12492_v63 = vunpack.c.l.bf16 %v13078_v41 }
0x3857   :  { %13770 = vmatprep.subr.mxu0 %v12477_v0  ;;  %13805 = vmatprep.subr.mxu1 %v12541_v17  ;;  %v13069_v0 = vld [vmem:[#allocation41 + $0x148] sm:$0xff]  }
0x3858   :  { %13771 = vmatpush3.msra.mxu0 %v12445_v19  ;;  %13806 = vmatpush3.msra.mxu1 %v12509_v21  ;;  %v13085_v17 = vld [vmem:[#allocation41 + $0x1c8] sm:$0xff]   ;;  %v12457_v19 = vunpack.c.h.bf16 %v13069_v0  ;;  %v12456_v26 = vunpack.c.l.bf16 %v13069_v0 }
0x3859   :  { %13772 = vmatprep.subr.mxu0 %v12476_v24  ;;  %13807 = vmatprep.subr.mxu1 %v12540_v52  ;;  %v12521_v21 = vunpack.c.h.bf16 %v13085_v17  ;;  %v12425_v24 = vunpack.c.h.bf16 %v13061_v9  ;;  %v12489_v52 = vunpack.c.h.bf16 %v13077_v38  ;;  %v12520_v60 = vunpack.c.l.bf16 %v13085_v17 }
0x385a   :  { %13773 = vmatpush3.msra.mxu0 %v12444_v29  ;;  %13808 = vmatpush3.msra.mxu1 %v12508_v33  ;;  %v12424_v29 = vunpack.c.l.bf16 %v13061_v9  ;;  %v12488_v33 = vunpack.c.l.bf16 %v13077_v38 }
0x385b   :  { %13774 = vmatprep.subr.mxu0 %v12473_v32  ;;  %13809 = vmatprep.subr.mxu1 %v12537_v1  ;;  %v13068_v32 = vld [vmem:[#allocation41 + $0x140] sm:$0xff]  }
0x385c   :  { %13775 = vmatpush3.msra.mxu0 %v12441_v15  ;;  %13810 = vmatpush3.msra.mxu1 %v12505_v23  ;;  %v13084_v1 = vld [vmem:[#allocation41 + $0x1c0] sm:$0xff]   ;;  %v12453_v15 = vunpack.c.h.bf16 %v13068_v32  ;;  %v12452_v25 = vunpack.c.l.bf16 %v13068_v32 }
0x385d   :  { %13776 = vmatprep.subr.mxu0 %v12472_v37  ;;  %13811 = vmatprep.subr.mxu1 %v12536_v39  ;;  %v12517_v23 = vunpack.c.h.bf16 %v13084_v1  ;;  %v12421_v37 = vunpack.c.h.bf16 %v12419_v34  ;;  %v12485_v39 = vunpack.c.h.bf16 %v13076_v36  ;;  %v12516_v46 = vunpack.c.l.bf16 %v13084_v1  ;;  %v13094_v32 = vld [vmem:[#allocation32 + $0x98] sm:$0xff]  }
0x385e   :  { %13777 = vmatpush3.msra.mxu0 %v12440_v49  ;;  %13812 = vmatpush3.msra.mxu1 %v12504_v18  ;;  %v12420_v49 = vunpack.c.l.bf16 %v12419_v34  ;;  %v12484_v18 = vunpack.c.l.bf16 %v13076_v36  ;;  %v12561_v1 = vunpack.c.h.bf16 %v13094_v32  ;;  %v13092_v36 = vld [vmem:[#allocation32 + $0x88] sm:$0xff]  }
0x385f   :  { %13778 = vmatprep.subr.mxu0 %v12469_v50  ;;  %13813 = vmatprep.subr.mxu1 %v12533_v51  ;;  %v9437_v50 = vld [vmem:[#allocation40 + $0x4] sm:$0xf] }
0x3860   :  { %13779 = vmatpush3.msra.mxu0 %v12437_v13  ;;  %13814 = vmatpush3.msra.mxu1 %v12501_v35  ;;  %v9442_v51 = vrot.slane %v9437_v50, %v16776_v48  ;;  %v9450_v13 = vrot.slane %v9437_v50, %v16786_v61  ;;  %v9446_v35 = vrot.slane %v9437_v50, %v16772_v45 }
0x3861   :  { %13780 = vmatprep.subr.mxu0 %v12468_v31  ;;  %13815 = vmatprep.subr.mxu1 %v12532_v55  ;;  %v9454_v5 = vrot.slane %v9437_v50, %v17379_v20 }
0x3862   :  { %13781 = vmatpush3.msra.mxu0 %v12436_v11  ;;  %13816 = vmatpush3.msra.mxu1 %v12500_v22 }
0x3863   :  { %13782 = vmatprep.subr.mxu0 %v12465_v28  ;;  %13817 = vmatprep.subr.mxu1 %v12529_v40 }
0x3864   :  { %13783 = vmatpush3.msra.mxu0 %v12433_v42  ;;  %13818 = vmatpush3.msra.mxu1 %v12497_v56 }
0x3865   :  { %13784 = vmatprep.subr.mxu0 %v12464_v62  ;;  %13819 = vmatprep.subr.mxu1 %v12528_v10  ;;  %v11661_v10 = vld [vmem:[#allocation43 + $0x1] ss:$0 sm:$0xff] }
0x3866   :  { %13785 = vmatpush3.msra.mxu0 %v12432_v7  ;;  %13820 = vmatpush3.msra.mxu1 %v12496_v8 }
0x3867   :  { %13786 = vmatprep.subr.mxu0 %v12461_v27  ;;  %13821 = vmatprep.subr.mxu1 %v12525_v30 }
0x3868   :  { %13787 = vmatpush3.msra.mxu0 %v12429_v43  ;;  %13822 = vmatpush3.msra.mxu1 %v12493_v54 }
0x3869   :  { %13788 = vmatprep.subr.mxu0 %v12460_v16  ;;  %13823 = vmatprep.subr.mxu1 %v12524_v53  ;;  %v13098_v16 = vld [vmem:[#allocation32 + $0xb8] sm:$0xff]   ;;  %v13097_v53 = vld [vmem:[#allocation32 + $0xb0] sm:$0xff]  }
0x386a   :  { %13789 = vmatpush3.msra.mxu0 %v12428_v47  ;;  %13824 = vmatpush3.msra.mxu1 %v12492_v63  ;;  %v12577_v47 = vunpack.c.h.bf16 %v13098_v16  ;;  %v12576_v63 = vunpack.c.l.bf16 %v13098_v16  ;;  %v12573_v0 = vunpack.c.h.bf16 %v13097_v53  ;;  %v12572_v17 = vunpack.c.l.bf16 %v13097_v53  ;;  %v10082_v53 = vld [vmem:[#allocation38 + $0x2c0] sm:$0xff] }
0x386b   :  { %13790 = vmatprep.subr.mxu0 %v12457_v19  ;;  %13825 = vmatprep.subr.mxu1 %v12521_v21 }
0x386c   :  { %13791 = vmatpush3.msra.mxu0 %v12425_v24  ;;  %13826 = vmatpush3.msra.mxu1 %v12489_v52  ;;  %v13096_v24 = vld [vmem:[#allocation32 + $0xa8] sm:$0xff]  }
0x386d   :  { %13792 = vmatprep.subr.mxu0 %v12456_v26  ;;  %13827 = vmatprep.subr.mxu1 %v12520_v60  ;;  %v12569_v52 = vunpack.c.h.bf16 %v13096_v24  ;;  %v12568_v26 = vunpack.c.l.bf16 %v13096_v24  ;;  %v13095_v60 = vld [vmem:[#allocation32 + $0xa0] sm:$0xff]  }
0x386e   :  { %13793 = vmatpush3.msra.mxu0 %v12424_v29  ;;  %13828 = vmatpush3.msra.mxu1 %v12488_v33  ;;  %v12565_v29 = vunpack.c.h.bf16 %v13095_v60  ;;  %v12564_v33 = vunpack.c.l.bf16 %v13095_v60 }
0x386f   :  { %13794 = vmatprep.subr.mxu0 %v12453_v15  ;;  %13829 = vmatprep.subr.mxu1 %v12517_v23  ;;  %v13093_v15 = vld [vmem:[#allocation32 + $0x90] sm:$0xff]   ;;  %v12560_v23 = vunpack.c.l.bf16 %v13094_v32  ;;  %v10081_v32 = vld [vmem:[#allocation38 + $0x2b8] sm:$0xff] }
0x3870   :  { %13795 = vmatpush3.msra.mxu0 %v12421_v37  ;;  %13830 = vmatpush3.msra.mxu1 %v12485_v39  ;;  %v12557_v34 = vunpack.c.h.bf16 %v13093_v15  ;;  %v12556_v37 = vunpack.c.l.bf16 %v13093_v15  ;;  %v12553_v39 = vunpack.c.h.bf16 %v13092_v36  ;;  %v10137_v15 = vunpack.c.h.bf16 %v10081_v32 }
0x3871   :  { %13796 = vmatprep.subr.mxu0 %v12452_v25  ;;  %13831 = vmatprep.subr.mxu1 %v12516_v46  ;;  %v12547_v25 = vld [vmem:[#allocation32 + $0x80] sm:$0xff]   ;;  %v12552_v46 = vunpack.c.l.bf16 %v13092_v36  ;;  %v10078_v36 = vld [vmem:[#allocation38 + $0x2a0] sm:$0xff] }
0x3872   :  { %13797 = vmatpush3.msra.mxu0 %v12420_v49  ;;  %13832 = vmatpush3.msra.mxu1 %v12484_v18  ;;  %v12549_v49 = vunpack.c.h.bf16 %v12547_v25  ;;  %v12548_v18 = vunpack.c.l.bf16 %v12547_v25 }
0x3873   :  { %14935 = vmatprep.subr.mxu0 %v16343_v6 }
0x3913   :  { %v9525_v12 = vpop.f32.mrf.mxu0  ;;  %v9596_v31 = vpop.f32.mrf.mxu1 }
0x3914   :  { %v9526_v55 = vadd.f32 %v9525_v12, %v9442_v51  ;;  %v9597_v14 = vadd.f32 %v9596_v31, %v9450_v13  ;;  %v11663_v31 = vld [vmem:[#allocation46 + $0x1] ss:$0 sm:$0xff] }
0x3915   :  { %v9527_v3 = vpop.f32.mrf.mxu0  ;;  %v9598_v11 = vpop.f32.mrf.mxu1 }
0x3916   :  { %v9528_v22 = vadd.f32 %v9527_v3, %v9446_v35  ;;  %v9599_v28 = vadd.f32 %v9598_v11, %v9454_v5  ;;  %v9601_v56 = vmax.f32 %v9526_v55, 0.0  ;;  %v9603_v58 = vmax.f32 %v9597_v14, 0.0  ;;  %v11662_v5 = vld [vmem:[#allocation44 + $0x1] ss:$0 sm:$0xff]  ;;  %v11664_v3 = vld [vmem:[#allocation34 + $0x2] ss:$0 sm:$0xff] }
0x3918   :  { %v9602_v40 = vmax.f32 %v9528_v22, 0.0  ;;  %v9604_v42 = vmax.f32 %v9599_v28, 0.0 }
0x391a   :  { %9806 = vmatprep.mubr.f32.mxu0 %v9602_v40  ;;  %9876 = vmatprep.mubr.f32.mxu1 %v9604_v42 }
0x391b   :  { %9807 = vmatmul.mubr.f32.vlgmr.msra.gmra.mxu0 %v9601_v56  ;;  %9877 = vmatmul.mubr.f32.vlgmr.msra.gmra.mxu1 %v9603_v58  ;;  %v10088_v56 = vld [vmem:[#allocation38 + $0x2f0] sm:$0xff]  ;;  %v10089_v58 = vld [vmem:[#allocation38 + $0x2f8] sm:$0xff] }
0x391c   :  { %14967 = vmatprep.mubr.msk.f32.mxu0 %vm16344_vm3, %v16343_v6  ;;  %10241 = vmatprep.mubr.f32.mxu1 %v16343_v6 }
0x391d   :  { %14936 = vmatpush3.msra.mxu0 %v12577_v47  ;;  %v10083_v47 = vld [vmem:[#allocation38 + $0x2c8] sm:$0xff] }
0x391e   :  { %14937 = vmatprep.subr.mxu0 %v16343_v6 }
0x391f   :  { %14938 = vmatpush3.msra.mxu0 %v12576_v63 }
0x3920   :  { %14939 = vmatprep.subr.mxu0 %v16343_v6 }
0x3921   :  { %14940 = vmatpush3.msra.mxu0 %v12573_v0 }
0x3922   :  { %14941 = vmatprep.subr.mxu0 %v16343_v6 }
0x3923   :  { %14942 = vmatpush3.msra.mxu0 %v12572_v17 }
0x3924   :  { %14943 = vmatprep.subr.mxu0 %v16343_v6 }
0x3925   :  { %14944 = vmatpush3.msra.mxu0 %v12569_v52 }
0x3926   :  { %14945 = vmatprep.subr.mxu0 %v16343_v6 }
0x3927   :  { %14946 = vmatpush3.msra.mxu0 %v12568_v26 }
0x3928   :  { %14947 = vmatprep.subr.mxu0 %v16343_v6 }
0x3929   :  { %14948 = vmatpush3.msra.mxu0 %v12565_v29 }
0x392a   :  { %14949 = vmatprep.subr.mxu0 %v16343_v6 }
0x392b   :  { %14950 = vmatpush3.msra.mxu0 %v12564_v33  ;;  %v10080_v33 = vld [vmem:[#allocation38 + $0x2b0] sm:$0xff] }
0x392c   :  { %14951 = vmatprep.subr.mxu0 %v16343_v6 }
0x392d   :  { %14952 = vmatpush3.msra.mxu0 %v12561_v1  ;;  %v10135_v1 = vunpack.c.h.bf16 %v10080_v33 }
0x392e   :  { %14953 = vmatprep.subr.mxu0 %v16343_v6 }
0x392f   :  { %14954 = vmatpush3.msra.mxu0 %v12560_v23  ;;  %v10134_v23 = vunpack.c.l.bf16 %v10080_v33  ;;  %v10060_v33 = vld [vmem:[#allocation38 + $0x210] sm:$0xff] }
0x3930   :  { %14955 = vmatprep.subr.mxu0 %v16343_v6 }
0x3931   :  { %14956 = vmatpush3.msra.mxu0 %v12557_v34  ;;  %v10136_v34 = vunpack.c.l.bf16 %v10081_v32  ;;  %v10061_v32 = vld [vmem:[#allocation38 + $0x218] sm:$0xff] }
0x3932   :  { %14957 = vmatprep.subr.mxu0 %v16343_v6 }
0x3933   :  { %14958 = vmatpush3.msra.mxu0 %v12556_v37  ;;  %v10079_v37 = vld [vmem:[#allocation38 + $0x2a8] sm:$0xff] }
0x3934   :  { %14959 = vmatprep.subr.mxu0 %v16343_v6  ;;  %v10133_v25 = vunpack.c.h.bf16 %v10079_v37 }
0x3935   :  { %14960 = vmatpush3.msra.mxu0 %v12553_v39  ;;  %v10131_v39 = vunpack.c.h.bf16 %v10078_v36 }
0x3936   :  { %14961 = vmatprep.subr.mxu0 %v16343_v6 }
0x3937   :  { %14962 = vmatpush3.msra.mxu0 %v12552_v46  ;;  %v10130_v46 = vunpack.c.l.bf16 %v10078_v36  ;;  %v10058_v36 = vld [vmem:[#allocation38 + $0x200] sm:$0xff] }
0x3938   :  { %14963 = vmatprep.subr.mxu0 %v16343_v6 }
0x3939   :  { %14964 = vmatpush3.msra.mxu0 %v12549_v49  ;;  %v10132_v49 = vunpack.c.l.bf16 %v10079_v37  ;;  %v10059_v37 = vld [vmem:[#allocation38 + $0x208] sm:$0xff] }
0x393a   :  { %14965 = vmatprep.subr.mxu0 %v16343_v6 }
0x393b   :  { %14966 = vmatpush3.msra.mxu0 %v12548_v18  ;;  %v10076_v18 = vld [vmem:[#allocation38 + $0x290] sm:$0xff] }
0x39db   :  { %v13798_v4 = vpop.f32.mrf.mxu0  ;;  %v13833_v62 = vpop.f32.mrf.mxu1 }
0x39dd   :  { %v13799_v59 = vpop.f32.mrf.mxu0  ;;  %v13834_v41 = vpop.f32.mrf.mxu1 }
0x39de   :  { %v13800_v7 = vadd.f32 %v13799_v59, %v13798_v4  ;;  %v13835_v27 = vadd.f32 %v13834_v41, %v13833_v62  ;;  %v10086_v4 = vld [vmem:[#allocation38 + $0x2e0] sm:$0xff]  ;;  %v10150_v62 = vunpack.c.l.bf16 %v10088_v56  ;;  %v10152_v59 = vunpack.c.l.bf16 %v10089_v58 }
0x39df   :  { %v10153_v41 = vunpack.c.h.bf16 %v10089_v58 }
0x39e0   :  { %v9809_v8 = vadd.f32 %v13800_v7, %v11661_v10  ;;  %v10151_v10 = vunpack.c.h.bf16 %v10088_v56  ;;  %v10087_v7 = vld [vmem:[#allocation38 + $0x2e8] sm:$0xff] }
0x39e1   :  { %v10149_v16 = vunpack.c.h.bf16 %v10087_v7  ;;  %10248 = vmatprep.subr.mxu0 %v10153_v41 }
0x39e2   :  { %v9879_v30 = vadd.f32 %v13835_v27, %v9809_v8  ;;  %v10084_v8 = vld [vmem:[#allocation38 + $0x2d0] sm:$0xff]  ;;  %v10085_v27 = vld [vmem:[#allocation38 + $0x2d8] sm:$0xff]  ;;  %10177 = vmatprep.subr.mxu1 %v10151_v10 }
0x39e3   :  { %v10143_v63 = vunpack.c.h.bf16 %v10084_v8  ;;  %v10145_v0 = vunpack.c.h.bf16 %v10085_v27  ;;  %10178 = vmatpush1.msra.mxu1 %v10150_v62  ;;  %v10142_v17 = vunpack.c.l.bf16 %v10084_v8  ;;  %v10071_v62 = vld [vmem:[#allocation38 + $0x268] sm:$0xff]  ;;  %v10068_v10 = vld [vmem:[#allocation38 + $0x250] sm:$0xff] }
0x39e4   :  { %v9882_v43 = vadd.f32 %v9879_v30, %v17414_v44  ;;  %v10146_v30 = vunpack.c.l.bf16 %v10086_v4 }
0x39e6   :  { %v9887_v54 = vsel %vm1102_vm13, %v9882_v43, 0.0 }
0x39e7   :  { %9888 = vadd.xlane.f32.xlu1 %v9887_v54  ;;  %v10148_v54 = vunpack.c.l.bf16 %v10087_v7  ;;  %v10117_v7 = vunpack.c.h.bf16 %v10071_v62 }
0x3a70   :  { %v9889_v44 = vpop.xlane.xlu1 %9888 }
0x3a71   :  { %v9890_v19 = vmul.f32 0.0078125, %v9889_v44  ;;  %v10144_v44 = vunpack.c.l.bf16 %v10085_v27  ;;  %v10116_v27 = vunpack.c.l.bf16 %v10071_v62 }
0x3a73   :  { %v9891_v21 = vsub.f32 %v9882_v43, %v9890_v19  ;;  %v10147_v43 = vunpack.c.h.bf16 %v10086_v4  ;;  %v10139_v19 = vunpack.c.h.bf16 %v10082_v53 }
0x3a75   :  { %v9892_v9 = vmul.f32 %v9891_v21, %v9891_v21  ;;  %10179 = vmatprep.subr.mxu1 %v10147_v43  ;;  %v10067_v43 = vld [vmem:[#allocation38 + $0x248] sm:$0xff] }
0x3a76   :  { %10180 = vmatpush1.msra.mxu1 %v10146_v30  ;;  %v10066_v30 = vld [vmem:[#allocation38 + $0x240] sm:$0xff] }
0x3a77   :  { %v9893_v38 = vsel %vm1102_vm13, %v9892_v9, 0.0  ;;  %v10138_v9 = vunpack.c.l.bf16 %v10082_v53  ;;  %10181 = vmatprep.subr.mxu1 %v10143_v63  ;;  %v10110_v53 = vunpack.c.l.bf16 %v10068_v10  ;;  %v10064_v63 = vld [vmem:[#allocation38 + $0x230] sm:$0xff] }
0x3a78   :  { %9894 = vadd.xlane.f32.xlu1 %v9893_v38  ;;  %v10140_v38 = vunpack.c.l.bf16 %v10083_v47  ;;  %10182 = vmatpush1.msra.mxu1 %v10142_v17  ;;  %v10107_v17 = vunpack.c.h.bf16 %v10066_v30 }
0x3a79   :  { %10183 = vmatprep.subr.mxu1 %v10139_v19  ;;  %v10106_v19 = vunpack.c.l.bf16 %v10066_v30  ;;  %v13120_v30 = vld [vmem:[#allocation41 + $0x2b0] sm:$0xff]  }
0x3a7a   :  { %10184 = vmatpush1.msra.mxu1 %v10138_v9  ;;  %v10062_v9 = vld [vmem:[#allocation38 + $0x220] sm:$0xff] }
0x3a7b   :  { %10185 = vmatprep.subr.mxu1 %v10135_v1  ;;  %v10099_v1 = vunpack.c.h.bf16 %v10062_v9 }
0x3a7c   :  { %10186 = vmatpush1.msra.mxu1 %v10134_v23  ;;  %v10098_v23 = vunpack.c.l.bf16 %v10062_v9 }
0x3a7d   :  { %10187 = vmatprep.subr.mxu1 %v10131_v39  ;;  %v10095_v39 = vunpack.c.h.bf16 %v10060_v33 }
0x3a7e   :  { %10188 = vmatpush1.msra.mxu1 %v10130_v46  ;;  %v10094_v46 = vunpack.c.l.bf16 %v10060_v33  ;;  %v13110_v33 = vld [vmem:[#allocation41 + $0x260] sm:$0xff]  }
0x3b01   :  { %v9895_v50 = vpop.xlane.xlu1 %9894 }
0x3b02   :  { %v9896_v51 = vmul.f32 0.0078125, %v9895_v50  ;;  %v10077_v50 = vld [vmem:[#allocation38 + $0x298] sm:$0xff] }
0x3b04   :  { %v9897_v13 = vadd.f32 1e-05, %v9896_v51  ;;  %v10127_v51 = vunpack.c.h.bf16 %v10076_v18 }
0x3b06   :  { %15403 = vrsqrt.f32 %v9897_v13  ;;  %v10129_v13 = vunpack.c.h.bf16 %v10077_v50  ;;  %10189 = vmatprep.subr.mxu1 %v10127_v51  ;;  %v10090_v51 = vunpack.c.l.bf16 %v10058_v36 }
0x3b13   :  { %v15404_v35 = vpop.eup %15403 }
0x3b14   :  { %v9899_v12 = vmul.f32 %v15404_v35, %v9891_v21  ;;  %v10141_v21 = vunpack.c.h.bf16 %v10083_v47  ;;  %v10126_v35 = vunpack.c.l.bf16 %v10076_v18  ;;  %v10091_v18 = vunpack.c.h.bf16 %v10058_v36 }
0x3b16   :  { %v9906_v55 = vmul.f32 %v11662_v5, %v9899_v12  ;;  %v10128_v5 = vunpack.c.l.bf16 %v10077_v50  ;;  %v10074_v12 = vld [vmem:[#allocation38 + $0x280] sm:$0xff]  ;;  %10190 = vmatpush1.msra.mxu1 %v10126_v35  ;;  %v10093_v50 = vunpack.c.h.bf16 %v10059_v37 }
0x3b17   :  { %v13113_v35 = vld [vmem:[#allocation41 + $0x278] sm:$0xff]  }
0x3b18   :  { %v9913_v14 = vadd.f32 %v11663_v31, %v9906_v55  ;;  %v10075_v31 = vld [vmem:[#allocation38 + $0x288] sm:$0xff]  ;;  %v10122_v55 = vunpack.c.l.bf16 %v10074_v12 }
0x3b1a   :  { %14968 = vmatmul.mubr.f32.vlgmr.msra.gmra.mxu0 %v9913_v14 }
0x3b1b   :  { %10312 = vmatprep.mubr.f32.mxu0 %v16343_v6  ;;  %10249 = vmatpush1.msra.mxu0 %v10152_v59  ;;  %v10069_v59 = vld [vmem:[#allocation38 + $0x258] sm:$0xff] }
0x3b1c   :  { %10250 = vmatprep.subr.mxu0 %v10149_v16  ;;  %v10113_v16 = vunpack.c.h.bf16 %v10069_v59  ;;  %v10112_v47 = vunpack.c.l.bf16 %v10069_v59  ;;  %v13128_v59 = vld [vmem:[#allocation41 + $0x2f0] sm:$0xff]  }
0x3b1d   :  { %10251 = vmatpush1.msra.mxu0 %v10148_v54  ;;  %v10111_v54 = vunpack.c.h.bf16 %v10068_v10  ;;  %v13112_v10 = vld [vmem:[#allocation41 + $0x270] sm:$0xff]  }
0x3b1e   :  { %10252 = vmatprep.subr.mxu0 %v10145_v0  ;;  %v10065_v0 = vld [vmem:[#allocation38 + $0x238] sm:$0xff] }
0x3b1f   :  { %10253 = vmatpush1.msra.mxu0 %v10144_v44  ;;  %v10109_v44 = vunpack.c.h.bf16 %v10067_v43 }
0x3b20   :  { %10254 = vmatprep.subr.mxu0 %v10141_v21  ;;  %v10108_v21 = vunpack.c.l.bf16 %v10067_v43 }
0x3b21   :  { %10255 = vmatpush1.msra.mxu0 %v10140_v38  ;;  %v10063_v38 = vld [vmem:[#allocation38 + $0x228] sm:$0xff] }
0x3b22   :  { %10256 = vmatprep.subr.mxu0 %v10137_v15  ;;  %v10101_v15 = vunpack.c.h.bf16 %v10063_v38 }
0x3b23   :  { %10257 = vmatpush1.msra.mxu0 %v10136_v34  ;;  %v10100_v34 = vunpack.c.l.bf16 %v10063_v38  ;;  %v12668_v38 = vunpack.c.l.bf16 %v13120_v30 }
0x3b24   :  { %10258 = vmatprep.subr.mxu0 %v10133_v25  ;;  %v10097_v25 = vunpack.c.h.bf16 %v10061_v32 }
0x3b25   :  { %10259 = vmatpush1.msra.mxu0 %v10132_v49  ;;  %v10096_v49 = vunpack.c.l.bf16 %v10061_v32  ;;  %v13126_v32 = vld [vmem:[#allocation41 + $0x2e0] sm:$0xff]  }
0x3b26   :  { %10260 = vmatprep.subr.mxu0 %v10129_v13  ;;  %v10092_v13 = vunpack.c.l.bf16 %v10059_v37 }
0x3b27   :  { %10261 = vmatpush1.msra.mxu0 %v10128_v5  ;;  %v13129_v5 = vld [vmem:[#allocation41 + $0x2f8] sm:$0xff]  }
0x3bda   :  { %v10021_v11 = vpop.f32.mrf.mxu0 }
0x3bdb   :  { %v10022_v22 = vadd.f32 %v11664_v3, %v10021_v11  ;;  %v10124_v3 = vunpack.c.l.bf16 %v10075_v31  ;;  %v10125_v11 = vunpack.c.h.bf16 %v10075_v31  ;;  %v12705_v31 = vunpack.c.h.bf16 %v13129_v5 }
0x3bdc   :  { %v14969_v28 = vpop.f32.mrf.mxu0 }
0x3bdd   :  { %v10025_v40 = vadd.f32 %v10022_v22, %v9913_v14  ;;  %v10123_v14 = vunpack.c.h.bf16 %v10074_v12  ;;  %v10072_v22 = vld [vmem:[#allocation38 + $0x270] sm:$0xff]  ;;  %v10073_v28 = vld [vmem:[#allocation38 + $0x278] sm:$0xff]  ;;  %10262 = vmatprep.subr.mxu0 %v10125_v11  ;;  %v12641_v12 = vunpack.c.h.bf16 %v13113_v35 }
0x3bde   :  { %v10119_v56 = vunpack.c.h.bf16 %v10072_v22  ;;  %v10120_v58 = vunpack.c.l.bf16 %v10073_v28  ;;  %v10121_v4 = vunpack.c.h.bf16 %v10073_v28  ;;  %10263 = vmatpush1.msra.mxu0 %v10124_v3 }
0x3bdf   :  { %v10030_v42 = vsel %vm1102_vm13, %v10025_v40, 0.0  ;;  %10191 = vmatprep.subr.mxu1 %v10123_v14 }
0x3be0   :  { %10031 = vadd.xlane.f32.xlu1 %v10030_v42  ;;  %v10118_v42 = vunpack.c.l.bf16 %v10072_v22  ;;  %10192 = vmatpush1.msra.mxu1 %v10122_v55  ;;  %v11665_v22 = vld [vmem:[#allocation35 + $0x2] ss:$0 sm:$0xff] }
0x3be1   :  { %10193 = vmatprep.subr.mxu1 %v10119_v56  ;;  %10264 = vmatprep.subr.mxu0 %v10121_v4  ;;  %v11666_v56 = vld [vmem:[#allocation37 + $0x2] ss:$0 sm:$0xff] }
0x3be2   :  { %10194 = vmatpush1.msra.mxu1 %v10118_v42  ;;  %10265 = vmatpush1.msra.mxu0 %v10120_v58  ;;  %v13121_v42 = vld [vmem:[#allocation41 + $0x2b8] sm:$0xff]  }
0x3be3   :  { %10266 = vmatprep.subr.mxu0 %v10117_v7  ;;  %v12673_v62 = vunpack.c.h.bf16 %v13121_v42  ;;  %v12640_v7 = vunpack.c.l.bf16 %v13113_v35  ;;  %v13101_v35 = vld [vmem:[#allocation41 + $0x218] sm:$0xff]  }
0x3be4   :  { %10267 = vmatpush1.msra.mxu0 %v10116_v27  ;;  %v13104_v27 = vld [vmem:[#allocation41 + $0x230] sm:$0xff]  }
0x3be5   :  { %10268 = vmatprep.subr.mxu0 %v10113_v16  ;;  %v12701_v16 = vunpack.c.h.bf16 %v13128_v59  ;;  %v12604_v9 = vunpack.c.l.bf16 %v13104_v27 }
0x3be6   :  { %10269 = vmatpush1.msra.mxu0 %v10112_v47  ;;  %v12669_v47 = vunpack.c.h.bf16 %v13120_v30 }
0x3be7   :  { %10270 = vmatprep.subr.mxu0 %v10109_v44  ;;  %v12700_v44 = vunpack.c.l.bf16 %v13128_v59 }
0x3be8   :  { %10271 = vmatpush1.msra.mxu0 %v10108_v21  ;;  %v13119_v21 = vld [vmem:[#allocation41 + $0x2a8] sm:$0xff]  }
0x3be9   :  { %v12664_v37 = vunpack.c.l.bf16 %v13119_v21 }
0x3c69   :  { %v10032_v24 = vpop.xlane.xlu1 %10031 }
0x3c6a   :  { %v10033_v52 = vmul.f32 0.0078125, %v10032_v24  ;;  %v10103_v24 = vunpack.c.h.bf16 %v10064_v63 }
0x3c6c   :  { %v17446_v26 = vsub.f32 %v10025_v40, %v10033_v52  ;;  %v10070_v40 = vld [vmem:[#allocation38 + $0x260] sm:$0xff]  ;;  %v10105_v52 = vunpack.c.h.bf16 %v10065_v0 }
0x3c6d   :  { %v10115_v41 = vunpack.c.h.bf16 %v10070_v40  ;;  %v10114_v8 = vunpack.c.l.bf16 %v10070_v40  ;;  %v13105_v40 = vld [vmem:[#allocation41 + $0x238] sm:$0xff]  }
0x3c6e   :  { %v10035_v60 = vmul.f32 %v17446_v26, %v17446_v26  ;;  %10272 = vmatprep.subr.mxu0 %v10105_v52  ;;  %v12609_v4 = vunpack.c.h.bf16 %v13105_v40  ;;  %v12608_v43 = vunpack.c.l.bf16 %v13105_v40 }
0x3c6f   :  { %10195 = vmatprep.subr.mxu1 %v10115_v41 }
0x3c70   :  { %v10036_v29 = vsel %vm1102_vm13, %v10035_v60, 0.0  ;;  %10196 = vmatpush1.msra.mxu1 %v10114_v8  ;;  %v10102_v60 = vunpack.c.l.bf16 %v10064_v63  ;;  %v12704_v8 = vunpack.c.l.bf16 %v13129_v5  ;;  %v13111_v63 = vld [vmem:[#allocation41 + $0x268] sm:$0xff]   ;;  %v13117_v5 = vld [vmem:[#allocation41 + $0x298] sm:$0xff]  }
0x3c71   :  { %10037 = vadd.xlane.f32.xlu1 %v10036_v29  ;;  %10197 = vmatprep.subr.mxu1 %v10111_v54  ;;  %v10104_v29 = vunpack.c.l.bf16 %v10065_v0  ;;  %v12672_v54 = vunpack.c.l.bf16 %v13121_v42  ;;  %v13127_v0 = vld [vmem:[#allocation41 + $0x2e8] sm:$0xff]  }
0x3c72   :  { %10198 = vmatpush1.msra.mxu1 %v10110_v53  ;;  %v12605_v53 = vunpack.c.h.bf16 %v13104_v27  ;;  %v12697_v52 = vunpack.c.h.bf16 %v13127_v0 }
0x3c73   :  { %10199 = vmatprep.subr.mxu1 %v10107_v17  ;;  %10273 = vmatpush1.msra.mxu0 %v10104_v29  ;;  %v12636_v17 = vunpack.c.l.bf16 %v13112_v10  ;;  %v12665_v29 = vunpack.c.h.bf16 %v13119_v21 }
0x3c74   :  { %10200 = vmatpush1.msra.mxu1 %v10106_v19  ;;  %10274 = vmatprep.subr.mxu0 %v10101_v15  ;;  %v13103_v19 = vld [vmem:[#allocation41 + $0x228] sm:$0xff]   ;;  %v12696_v15 = vunpack.c.l.bf16 %v13127_v0 }
0x3c75   :  { %10201 = vmatprep.subr.mxu1 %v10103_v24  ;;  %10275 = vmatpush1.msra.mxu0 %v10100_v34  ;;  %v12633_v24 = vunpack.c.h.bf16 %v13111_v63  ;;  %v13118_v34 = vld [vmem:[#allocation41 + $0x2a0] sm:$0xff]   ;;  %v12600_v36 = vunpack.c.l.bf16 %v13103_v19  ;;  %v13115_v0 = vld [vmem:[#allocation41 + $0x288] sm:$0xff]  }
0x3c76   :  { %10202 = vmatpush1.msra.mxu1 %v10102_v60  ;;  %10276 = vmatprep.subr.mxu0 %v10097_v25  ;;  %v12601_v60 = vunpack.c.h.bf16 %v13103_v19  ;;  %v12693_v25 = vunpack.c.h.bf16 %v13126_v32 }
0x3c77   :  { %10203 = vmatprep.subr.mxu1 %v10099_v1  ;;  %10277 = vmatpush1.msra.mxu0 %v10096_v49  ;;  %v12632_v1 = vunpack.c.l.bf16 %v13111_v63  ;;  %v12661_v49 = vunpack.c.h.bf16 %v13118_v34  ;;  %v13099_v63 = vld [vmem:[#allocation41 + $0x208] sm:$0xff]  }
0x3c78   :  { %10204 = vmatpush1.msra.mxu1 %v10098_v23  ;;  %10278 = vmatprep.subr.mxu0 %v10093_v50  ;;  %v13102_v23 = vld [vmem:[#allocation41 + $0x220] sm:$0xff]   ;;  %v13125_v50 = vld [vmem:[#allocation41 + $0x2d8] sm:$0xff]  }
0x3c79   :  { %10205 = vmatprep.subr.mxu1 %v10095_v39  ;;  %10279 = vmatpush1.msra.mxu0 %v10092_v13  ;;  %v12629_v39 = vunpack.c.h.bf16 %v13110_v33  ;;  %v12692_v13 = vunpack.c.l.bf16 %v13126_v32  ;;  %v12688_v42 = vunpack.c.l.bf16 %v13125_v50  ;;  %v13114_v32 = vld [vmem:[#allocation41 + $0x280] sm:$0xff]  }
0x3c7a   :  { %10206 = vmatpush1.msra.mxu1 %v10094_v46  ;;  %13888 = vmatprep.subr.mxu0 %v12705_v31  ;;  %v12597_v46 = vunpack.c.h.bf16 %v13102_v23  ;;  %v12660_v31 = vunpack.c.l.bf16 %v13118_v34 }
0x3c7b   :  { %10207 = vmatprep.subr.mxu1 %v10091_v18  ;;  %v13109_v18 = vld [vmem:[#allocation41 + $0x258] sm:$0xff]  }
0x3c7c   :  { %10208 = vmatpush1.msra.mxu1 %v10090_v51  ;;  %v12628_v51 = vunpack.c.l.bf16 %v13110_v33  ;;  %v12624_v40 = vunpack.c.l.bf16 %v13109_v18  ;;  %v12579_v33 = vld [vmem:[#allocation41 + $0x200] sm:$0xff]  }
0x3c7d   :  { %13853 = vmatprep.subr.mxu1 %v12641_v12  ;;  %v12596_v12 = vunpack.c.l.bf16 %v13102_v23 }
0x3cfa   :  { %v10038_v55 = vpop.xlane.xlu1 %10037 }
0x3cfb   :  { %v10039_v14 = vmul.f32 0.0078125, %v10038_v55  ;;  %v12625_v55 = vunpack.c.h.bf16 %v13109_v18 }
0x3cfd   :  { %v10040_v3 = vadd.f32 1e-05, %v10039_v14  ;;  %v12689_v14 = vunpack.c.h.bf16 %v13125_v50 }
0x3cff   :  { %15405 = vrsqrt.f32 %v10040_v3  ;;  %v12593_v3 = vunpack.c.h.bf16 %v13101_v35 }
0x3d0c   :  { %v15406_v11 = vpop.eup %15405 }
0x3d0d   :  { %v10042_v28 = vmul.f32 %v15406_v11, %v17446_v26  ;;  %v12637_v26 = vunpack.c.h.bf16 %v13112_v10  ;;  %v12657_v11 = vunpack.c.h.bf16 %v13117_v5 }
0x3d0f   :  { %v10049_v58 = vmul.f32 %v11665_v22, %v10042_v28  ;;  %v13108_v22 = vld [vmem:[#allocation41 + $0x250] sm:$0xff]  }
0x3d10   :  { %v13124_v28 = vld [vmem:[#allocation41 + $0x2d0] sm:$0xff]   ;;  %v12621_v10 = vunpack.c.h.bf16 %v13108_v22  ;;  %v12620_v27 = vunpack.c.l.bf16 %v13108_v22 }
0x3d11   :  { %v17452_v41 = vadd.f32 %v11666_v56, %v10049_v58  ;;  %v13100_v56 = vld [vmem:[#allocation41 + $0x210] sm:$0xff]   ;;  %v12685_v59 = vunpack.c.h.bf16 %v13124_v28  ;;  %v12684_v30 = vunpack.c.l.bf16 %v13124_v28 }
0x3d12   :  { %v13116_v58 = vld [vmem:[#allocation41 + $0x290] sm:$0xff]  }
0x3d13   :  { %10242 = vmatmul.mubr.f32.vlgmr.msra.gmra.mxu1 %v17452_v41  ;;  %10313 = vmatmul.mubr.f32.vlgmr.msra.gmra.mxu0 %v17452_v41 }
0x3d14   :  { %13854 = vmatpush3.msra.mxu1 %v12609_v4  ;;  %13889 = vmatpush3.msra.mxu0 %v12673_v62  ;;  %v12592_v4 = vunpack.c.l.bf16 %v13101_v35  ;;  %v12656_v62 = vunpack.c.l.bf16 %v13117_v5 }
0x3d15   :  { %13855 = vmatprep.subr.mxu1 %v12640_v7  ;;  %13890 = vmatprep.subr.mxu0 %v12704_v8  ;;  %v12589_v7 = vunpack.c.h.bf16 %v13100_v56  ;;  %v12653_v8 = vunpack.c.h.bf16 %v13116_v58 }
0x3d16   :  { %13856 = vmatpush3.msra.mxu1 %v12608_v43  ;;  %13891 = vmatpush3.msra.mxu0 %v12672_v54  ;;  %v12588_v43 = vunpack.c.l.bf16 %v13100_v56  ;;  %v12652_v54 = vunpack.c.l.bf16 %v13116_v58 }
0x3d17   :  { %13857 = vmatprep.subr.mxu1 %v12637_v26  ;;  %13892 = vmatprep.subr.mxu0 %v12701_v16  ;;  %v13107_v26 = vld [vmem:[#allocation41 + $0x248] sm:$0xff]  }
0x3d18   :  { %13858 = vmatpush3.msra.mxu1 %v12605_v53  ;;  %13893 = vmatpush3.msra.mxu0 %v12669_v47  ;;  %v13123_v16 = vld [vmem:[#allocation41 + $0x2c8] sm:$0xff]   ;;  %v12617_v53 = vunpack.c.h.bf16 %v13107_v26  ;;  %v12616_v19 = vunpack.c.l.bf16 %v13107_v26 }
0x3d19   :  { %13859 = vmatprep.subr.mxu1 %v12636_v17  ;;  %13894 = vmatprep.subr.mxu0 %v12700_v44  ;;  %v12681_v47 = vunpack.c.h.bf16 %v13123_v16  ;;  %v12585_v17 = vunpack.c.h.bf16 %v13099_v63  ;;  %v12649_v44 = vunpack.c.h.bf16 %v13115_v0  ;;  %v12680_v21 = vunpack.c.l.bf16 %v13123_v16 }
0x3d1a   :  { %13860 = vmatpush3.msra.mxu1 %v12604_v9  ;;  %13895 = vmatpush3.msra.mxu0 %v12668_v38  ;;  %v12584_v9 = vunpack.c.l.bf16 %v13099_v63  ;;  %v12648_v38 = vunpack.c.l.bf16 %v13115_v0  ;;  %v13133_v0 = vld [vmem:[%s17681_s7 + $0x20] sm:$0xff]  }
0x3d1b   :  { %13861 = vmatprep.subr.mxu1 %v12633_v24  ;;  %13896 = vmatprep.subr.mxu0 %v12697_v52  ;;  %v13106_v24 = vld [vmem:[#allocation41 + $0x240] sm:$0xff]  }
0x3d1c   :  { %13862 = vmatpush3.msra.mxu1 %v12601_v60  ;;  %13897 = vmatpush3.msra.mxu0 %v12665_v29  ;;  %v13122_v52 = vld [vmem:[#allocation41 + $0x2c0] sm:$0xff]   ;;  %v12613_v60 = vunpack.c.h.bf16 %v13106_v24  ;;  %v12612_v23 = vunpack.c.l.bf16 %v13106_v24 }
0x3d1d   :  { %13863 = vmatprep.subr.mxu1 %v12632_v1  ;;  %13898 = vmatprep.subr.mxu0 %v12696_v15  ;;  %v12677_v29 = vunpack.c.h.bf16 %v13122_v52  ;;  %v12581_v1 = vunpack.c.h.bf16 %v12579_v33  ;;  %v12645_v15 = vunpack.c.h.bf16 %v13114_v32  ;;  %v12676_v34 = vunpack.c.l.bf16 %v13122_v52  ;;  %v13130_v52 = vld [vmem:[%s17681_s7 + $0x8] sm:$0xff]  }
0x3d1e   :  { %13864 = vmatpush3.msra.mxu1 %v12600_v36  ;;  %13899 = vmatpush3.msra.mxu0 %v12664_v37  ;;  %v12580_v36 = vunpack.c.l.bf16 %v12579_v33  ;;  %v12644_v37 = vunpack.c.l.bf16 %v13114_v32  ;;  %v12707_v33 = vld [vmem:[%s17681_s7] sm:$0xff]   ;;  %v12712_v32 = vunpack.c.l.bf16 %v13130_v52 }
0x3d1f   :  { %13865 = vmatprep.subr.mxu1 %v12629_v39  ;;  %13900 = vmatprep.subr.mxu0 %v12693_v25  ;;  %v10155_v39 = vld [vmem:[#allocation40 + $0x8] sm:$0xf] }
0x3d20   :  { %13866 = vmatpush3.msra.mxu1 %v12597_v46  ;;  %13901 = vmatpush3.msra.mxu0 %v12661_v49  ;;  %v10160_v25 = vrot.slane %v10155_v39, %v16776_v48  ;;  %v10168_v46 = vrot.slane %v10155_v39, %v16786_v61  ;;  %v10164_v49 = vrot.slane %v10155_v39, %v16772_v45  ;;  %v11667_v61 = vld [vmem:[#allocation43 + $0x2] ss:$0 sm:$0xff] }
0x3d21   :  { %13867 = vmatprep.subr.mxu1 %v12628_v51  ;;  %13902 = vmatprep.subr.mxu0 %v12692_v13  ;;  %v10172_v18 = vrot.slane %v10155_v39, %v17379_v20  ;;  %v11668_v39 = vld [vmem:[#allocation44 + $0x2] ss:$0 sm:$0xff] }
0x3d22   :  { %13868 = vmatpush3.msra.mxu1 %v12596_v12  ;;  %13903 = vmatpush3.msra.mxu0 %v12660_v31 }
0x3d23   :  { %13869 = vmatprep.subr.mxu1 %v12625_v55  ;;  %13904 = vmatprep.subr.mxu0 %v12689_v14 }
0x3d24   :  { %13870 = vmatpush3.msra.mxu1 %v12593_v3  ;;  %13905 = vmatpush3.msra.mxu0 %v12657_v11 }
0x3d25   :  { %13871 = vmatprep.subr.mxu1 %v12624_v40  ;;  %13906 = vmatprep.subr.mxu0 %v12688_v42 }
0x3d26   :  { %13872 = vmatpush3.msra.mxu1 %v12592_v4  ;;  %13907 = vmatpush3.msra.mxu0 %v12656_v62 }
0x3d27   :  { %13873 = vmatprep.subr.mxu1 %v12621_v10  ;;  %13908 = vmatprep.subr.mxu0 %v12685_v59  ;;  %v13136_v10 = vld [vmem:[%s17681_s7 + $0x38] sm:$0xff]   ;;  %v13135_v59 = vld [vmem:[%s17681_s7 + $0x30] sm:$0xff]  }
0x3d28   :  { %13874 = vmatpush3.msra.mxu1 %v12589_v7  ;;  %13909 = vmatpush3.msra.mxu0 %v12653_v8  ;;  %v12737_v7 = vunpack.c.h.bf16 %v13136_v10  ;;  %v12736_v8 = vunpack.c.l.bf16 %v13136_v10  ;;  %v13141_v10 = vld [vmem:[#allocation52 + $0x28] sm:$0xff]  }
0x3d29   :  { %13875 = vmatprep.subr.mxu1 %v12620_v27  ;;  %13910 = vmatprep.subr.mxu0 %v12684_v30  ;;  %v12733_v27 = vunpack.c.h.bf16 %v13135_v59  ;;  %v12732_v30 = vunpack.c.l.bf16 %v13135_v59  ;;  %v12761_v59 = vunpack.c.h.bf16 %v13141_v10 }
0x3d2a   :  { %13876 = vmatpush3.msra.mxu1 %v12588_v43  ;;  %13911 = vmatpush3.msra.mxu0 %v12652_v54 }
0x3d2b   :  { %13877 = vmatprep.subr.mxu1 %v12617_v53  ;;  %13912 = vmatprep.subr.mxu0 %v12681_v47  ;;  %v13134_v53 = vld [vmem:[%s17681_s7 + $0x28] sm:$0xff]  }
0x3d2c   :  { %13878 = vmatpush3.msra.mxu1 %v12585_v17  ;;  %13913 = vmatpush3.msra.mxu0 %v12649_v44  ;;  %v12729_v47 = vunpack.c.h.bf16 %v13134_v53  ;;  %v12728_v63 = vunpack.c.l.bf16 %v13134_v53  ;;  %v12725_v17 = vunpack.c.h.bf16 %v13133_v0  ;;  %v12724_v44 = vunpack.c.l.bf16 %v13133_v0  ;;  %v13137_v53 = vld [vmem:[#allocation52 + $0x8] sm:$0xff]   ;;  %v12739_v0 = vld [vmem:[#allocation52] sm:$0xff]  }
0x3d2d   :  { %13879 = vmatprep.subr.mxu1 %v12616_v19  ;;  %13914 = vmatprep.subr.mxu0 %v12680_v21  ;;  %v13132_v19 = vld [vmem:[%s17681_s7 + $0x18] sm:$0xff]  }
0x3d2e   :  { %13880 = vmatpush3.msra.mxu1 %v12584_v9  ;;  %13915 = vmatpush3.msra.mxu0 %v12648_v38  ;;  %v12721_v21 = vunpack.c.h.bf16 %v13132_v19  ;;  %v13131_v9 = vld [vmem:[%s17681_s7 + $0x10] sm:$0xff]   ;;  %v12720_v38 = vunpack.c.l.bf16 %v13132_v19  ;;  %v12740_v19 = vunpack.c.l.bf16 %v12739_v0 }
0x3d2f   :  { %13881 = vmatprep.subr.mxu1 %v12613_v60  ;;  %13916 = vmatprep.subr.mxu0 %v12677_v29  ;;  %v12717_v24 = vunpack.c.h.bf16 %v13131_v9  ;;  %v12716_v60 = vunpack.c.l.bf16 %v13131_v9  ;;  %v12713_v29 = vunpack.c.h.bf16 %v13130_v52  ;;  %v13149_v9 = vld [vmem:[#allocation55 + $0x30] sm:$0xff]  }
0x3d30   :  { %13882 = vmatpush3.msra.mxu1 %v12581_v1  ;;  %13917 = vmatpush3.msra.mxu0 %v12645_v15  ;;  %v12709_v1 = vunpack.c.h.bf16 %v12707_v33  ;;  %v12708_v15 = vunpack.c.l.bf16 %v12707_v33  ;;  %v12797_v52 = vunpack.c.h.bf16 %v13149_v9 }
0x3d31   :  { %13883 = vmatprep.subr.mxu1 %v12612_v23  ;;  %13918 = vmatprep.subr.mxu0 %v12676_v34 }
0x3d32   :  { %13884 = vmatpush3.msra.mxu1 %v12580_v36  ;;  %13919 = vmatpush3.msra.mxu0 %v12644_v37 }
0x3d33   :  { %14970 = vmatprep.subr.mxu1 %v16343_v6  ;;  %15005 = vmatprep.subr.mxu0 %v16343_v6 }
0x3dd3   :  { %v10243_v50 = vpop.f32.mrf.mxu1  ;;  %v10314_v51 = vpop.f32.mrf.mxu0 }
0x3dd4   :  { %v10244_v13 = vadd.f32 %v10243_v50, %v10160_v25  ;;  %v10315_v35 = vadd.f32 %v10314_v51, %v10168_v46  ;;  %v11669_v46 = vld [vmem:[#allocation46 + $0x2] ss:$0 sm:$0xff]  ;;  %v11670_v50 = vld [vmem:[#allocation47] ss:$0 sm:$0xff]  ;;  %v11645_v51 = vld [vmem:[#allocation23] ss:$0 sm:$0xff] }
0x3dd5   :  { %v10245_v5 = vpop.f32.mrf.mxu1  ;;  %v10316_v12 = vpop.f32.mrf.mxu0 }
0x3dd6   :  { %v10246_v31 = vadd.f32 %v10245_v5, %v10164_v49  ;;  %v10317_v55 = vadd.f32 %v10316_v12, %v10172_v18  ;;  %v10319_v11 = vmax.f32 %v10244_v13, 0.0  ;;  %v10321_v22 = vmax.f32 %v10315_v35, 0.0 }
0x3dd7   :  { %v8286_v12 = vadd.f32 %v11645_v51, %v17364_v2 }
0x3dd8   :  { %v10320_v14 = vmax.f32 %v10246_v31, 0.0  ;;  %v10322_v3 = vmax.f32 %v10317_v55, 0.0 }
0x3dd9   :  { %v8291_v55 = vsel %vm1102_vm13, %v8286_v12, 0.0 }
0x3dda   :  { %10524 = vmatprep.mubr.f32.mxu1 %v10320_v14  ;;  %10594 = vmatprep.mubr.f32.mxu0 %v10322_v3  ;;  %v13143_v14 = vld [vmem:[#allocation52 + $0x38] sm:$0xff]   ;;  %v13142_v3 = vld [vmem:[#allocation52 + $0x30] sm:$0xff]  }
0x3ddb   :  { %10525 = vmatmul.mubr.f32.vlgmr.msra.gmra.mxu1 %v10319_v11  ;;  %10595 = vmatmul.mubr.f32.vlgmr.msra.gmra.mxu0 %v10321_v22  ;;  %v12769_v11 = vunpack.c.h.bf16 %v13143_v14  ;;  %v12768_v22 = vunpack.c.l.bf16 %v13143_v14  ;;  %v11671_v14 = vld [vmem:[#allocation49] ss:$0 sm:$0xff] }
0x3ddc   :  { %15002 = vmatprep.mubr.msk.f32.mxu1 %vm16344_vm3, %v16343_v6  ;;  %15037 = vmatprep.mubr.msk.f32.mxu0 %vm16344_vm3, %v16343_v6 }
0x3ddd   :  { %14971 = vmatpush3.msra.mxu1 %v12737_v7  ;;  %15006 = vmatpush3.msra.mxu0 %v12769_v11  ;;  %v12760_v7 = vunpack.c.l.bf16 %v13141_v10  ;;  %v11672_v11 = vld [vmem:[#allocation50] ss:$0 sm:$0xff] }
0x3dde   :  { %14972 = vmatprep.subr.mxu1 %v16343_v6  ;;  %15007 = vmatprep.subr.mxu0 %v16343_v6 }
0x3ddf   :  { %14973 = vmatpush3.msra.mxu1 %v12736_v8  ;;  %15008 = vmatpush3.msra.mxu0 %v12768_v22  ;;  %v13140_v8 = vld [vmem:[#allocation52 + $0x20] sm:$0xff]  }
0x3de0   :  { %14974 = vmatprep.subr.mxu1 %v16343_v6  ;;  %15009 = vmatprep.subr.mxu0 %v16343_v6 }
0x3de1   :  { %14975 = vmatpush3.msra.mxu1 %v12733_v27  ;;  %v12757_v27 = vunpack.c.h.bf16 %v13140_v8 }
0x3de2   :  { %14976 = vmatprep.subr.mxu1 %v16343_v6 }
0x3de3   :  { %14977 = vmatpush3.msra.mxu1 %v12732_v30  ;;  %v12756_v30 = vunpack.c.l.bf16 %v13140_v8 }
0x3de4   :  { %14978 = vmatprep.subr.mxu1 %v16343_v6 }
0x3de5   :  { %14979 = vmatpush3.msra.mxu1 %v12729_v47 }
0x3de6   :  { %14980 = vmatprep.subr.mxu1 %v16343_v6 }
0x3de7   :  { %14981 = vmatpush3.msra.mxu1 %v12728_v63  ;;  %v12745_v63 = vunpack.c.h.bf16 %v13137_v53 }
0x3de8   :  { %14982 = vmatprep.subr.mxu1 %v16343_v6 }
0x3de9   :  { %14983 = vmatpush3.msra.mxu1 %v12725_v17  ;;  %v12744_v17 = vunpack.c.l.bf16 %v13137_v53  ;;  %v13154_v53 = vld [vmem:[#allocation56 + $0x20] sm:$0xff]  }
0x3dea   :  { %14984 = vmatprep.subr.mxu1 %v16343_v6 }
0x3deb   :  { %14985 = vmatpush3.msra.mxu1 %v12724_v44  ;;  %v12741_v44 = vunpack.c.h.bf16 %v12739_v0  ;;  %v13153_v0 = vld [vmem:[#allocation56 + $0x18] sm:$0xff]  }
0x3dec   :  { %14986 = vmatprep.subr.mxu1 %v16343_v6 }
0x3ded   :  { %14987 = vmatpush3.msra.mxu1 %v12721_v21  ;;  %v13150_v21 = vld [vmem:[#allocation55 + $0x38] sm:$0xff]  }
0x3dee   :  { %14988 = vmatprep.subr.mxu1 %v16343_v6 }
0x3def   :  { %14989 = vmatpush3.msra.mxu1 %v12720_v38  ;;  %v12801_v38 = vunpack.c.h.bf16 %v13150_v21 }
0x3df0   :  { %14990 = vmatprep.subr.mxu1 %v16343_v6 }
0x3df1   :  { %14991 = vmatpush3.msra.mxu1 %v12717_v24  ;;  %v12800_v24 = vunpack.c.l.bf16 %v13150_v21 }
0x3df2   :  { %14992 = vmatprep.subr.mxu1 %v16343_v6 }
0x3df3   :  { %14993 = vmatpush3.msra.mxu1 %v12716_v60  ;;  %v13148_v60 = vld [vmem:[#allocation55 + $0x28] sm:$0xff]  }
0x3df4   :  { %14994 = vmatprep.subr.mxu1 %v16343_v6  ;;  %v12793_v33 = vunpack.c.h.bf16 %v13148_v60 }
0x3df5   :  { %14995 = vmatpush3.msra.mxu1 %v12713_v29  ;;  %v12796_v29 = vunpack.c.l.bf16 %v13149_v9 }
0x3df6   :  { %14996 = vmatprep.subr.mxu1 %v16343_v6 }
0x3df7   :  { %14997 = vmatpush3.msra.mxu1 %v12712_v32  ;;  %v13147_v32 = vld [vmem:[#allocation55 + $0x20] sm:$0xff]  }
0x3df8   :  { %14998 = vmatprep.subr.mxu1 %v16343_v6 }
0x3df9   :  { %14999 = vmatpush3.msra.mxu1 %v12709_v1  ;;  %v12792_v1 = vunpack.c.l.bf16 %v13148_v60  ;;  %v12803_v60 = vld [vmem:[#allocation56] sm:$0xff]  }
0x3dfa   :  { %15000 = vmatprep.subr.mxu1 %v16343_v6 }
0x3dfb   :  { %15001 = vmatpush3.msra.mxu1 %v12708_v15  ;;  %v12789_v15 = vunpack.c.h.bf16 %v13147_v32 }
0x3dfc   :  { %15040 = vmatprep.subr.mxu1 %v16343_v6 }
0x3e9b   :  { %v13885_v45 = vpop.f32.mrf.mxu1  ;;  %v13920_v48 = vpop.f32.mrf.mxu0 }
0x3e9d   :  { %v13886_v20 = vpop.f32.mrf.mxu1  ;;  %v13921_v28 = vpop.f32.mrf.mxu0 }
0x3e9e   :  { %v13887_v40 = vadd.f32 %v13886_v20, %v13885_v45  ;;  %v13922_v56 = vadd.f32 %v13921_v28, %v13920_v48  ;;  %v12765_v45 = vunpack.c.h.bf16 %v13142_v3  ;;  %v12764_v48 = vunpack.c.l.bf16 %v13142_v3 }
0x3ea0   :  { %v10527_v42 = vadd.f32 %v13887_v40, %v11667_v61  ;;  %15010 = vmatpush3.msra.mxu0 %v12765_v45 }
0x3ea1   :  { %15011 = vmatprep.subr.mxu0 %v16343_v6 }
0x3ea2   :  { %v10597_v58 = vadd.f32 %v13922_v56, %v10527_v42  ;;  %15012 = vmatpush3.msra.mxu0 %v12764_v48  ;;  %v11646_v48 = vld [vmem:[#allocation25] ss:$0 sm:$0xff] }
0x3ea3   :  { %15013 = vmatprep.subr.mxu0 %v16343_v6 }
0x3ea4   :  { %v10600_v4 = vadd.f32 %v10597_v58, %v17452_v41  ;;  %15014 = vmatpush3.msra.mxu0 %v12761_v59 }
0x3ea5   :  { %15015 = vmatprep.subr.mxu0 %v16343_v6 }
0x3ea6   :  { %v10605_v62 = vsel %vm1102_vm13, %v10600_v4, 0.0  ;;  %15016 = vmatpush3.msra.mxu0 %v12760_v7  ;;  %v13157_v7 = vld [vmem:[#allocation56 + $0x38] sm:$0xff]  }
0x3ea7   :  { %10606 = vadd.xlane.f32.xlu1 %v10605_v62  ;;  %15017 = vmatprep.subr.mxu0 %v16343_v6  ;;  %v12833_v8 = vunpack.c.h.bf16 %v13157_v7 }
0x3ea8   :  { %15018 = vmatpush3.msra.mxu0 %v12757_v27  ;;  %v12832_v27 = vunpack.c.l.bf16 %v13157_v7 }
0x3ea9   :  { %15019 = vmatprep.subr.mxu0 %v16343_v6 }
0x3eaa   :  { %15020 = vmatpush3.msra.mxu0 %v12756_v30  ;;  %v13156_v30 = vld [vmem:[#allocation56 + $0x30] sm:$0xff]  }
0x3eab   :  { %15021 = vmatprep.subr.mxu0 %v16343_v6 }
0x3f30   :  { %v10607_v41 = vpop.xlane.xlu1 %10606 }
0x3f31   :  { %v10608_v43 = vmul.f32 0.0078125, %v10607_v41  ;;  %v13139_v41 = vld [vmem:[#allocation52 + $0x18] sm:$0xff]  }
0x3f33   :  { %v10609_v54 = vsub.f32 %v10600_v4, %v10608_v43  ;;  %v12753_v43 = vunpack.c.h.bf16 %v13139_v41 }
0x3f35   :  { %v10610_v26 = vmul.f32 %v10609_v54, %v10609_v54  ;;  %15022 = vmatpush3.msra.mxu0 %v12753_v43  ;;  %v12828_v43 = vunpack.c.l.bf16 %v13156_v30 }
0x3f36   :  { %15023 = vmatprep.subr.mxu0 %v16343_v6 }
0x3f37   :  { %v10611_v16 = vsel %vm1102_vm13, %v10610_v26, 0.0  ;;  %v13138_v26 = vld [vmem:[#allocation52 + $0x10] sm:$0xff]  }
0x3f38   :  { %10612 = vadd.xlane.f32.xlu0 %v10611_v16  ;;  %v12749_v16 = vunpack.c.h.bf16 %v13138_v26  ;;  %v12748_v47 = vunpack.c.l.bf16 %v13138_v26 }
0x3fc1   :  { %v10613_v23 = vpop.xlane.xlu0 %10612 }
0x3fc2   :  { %v10614_v34 = vmul.f32 0.0078125, %v10613_v23  ;;  %v13146_v23 = vld [vmem:[#allocation55 + $0x18] sm:$0xff]  }
0x3fc4   :  { %v10615_v36 = vadd.f32 1e-05, %v10614_v34  ;;  %v12788_v34 = vunpack.c.l.bf16 %v13147_v32  ;;  %v11674_v32 = vld [vmem:[%s17682_s10] ss:$0 sm:$0xff] }
0x3fc6   :  { %15407 = vrsqrt.f32 %v10615_v36  ;;  %v12785_v36 = vunpack.c.h.bf16 %v13146_v23 }
0x3fd3   :  { %v15408_v37 = vpop.eup %15407 }
0x3fd4   :  { %v10617_v25 = vmul.f32 %v15408_v37, %v10609_v54  ;;  %v12752_v54 = vunpack.c.l.bf16 %v13139_v41  ;;  %v13145_v37 = vld [vmem:[#allocation55 + $0x10] sm:$0xff]   ;;  %v12829_v41 = vunpack.c.h.bf16 %v13156_v30 }
0x3fd6   :  { %v10624_v49 = vmul.f32 %v11668_v39, %v10617_v25  ;;  %15024 = vmatpush3.msra.mxu0 %v12752_v54  ;;  %v12784_v39 = vunpack.c.l.bf16 %v13146_v23  ;;  %v12781_v25 = vunpack.c.h.bf16 %v13145_v37  ;;  %v13155_v54 = vld [vmem:[#allocation56 + $0x28] sm:$0xff]  }
0x3fd7   :  { %15025 = vmatprep.subr.mxu0 %v16343_v6  ;;  %v12825_v26 = vunpack.c.h.bf16 %v13155_v54 }
0x3fd8   :  { %v10631_v18 = vadd.f32 %v11669_v46, %v10624_v49  ;;  %15026 = vmatpush3.msra.mxu0 %v12749_v16  ;;  %v13144_v46 = vld [vmem:[#allocation55 + $0x8] sm:$0xff]   ;;  %v12780_v49 = vunpack.c.l.bf16 %v13145_v37  ;;  %v12824_v16 = vunpack.c.l.bf16 %v13155_v54 }
0x3fd9   :  { %15027 = vmatprep.subr.mxu0 %v16343_v6 }
0x3fda   :  { %15003 = vmatmul.mubr.f32.vlgmr.msra.gmra.mxu1 %v10631_v18  ;;  %15028 = vmatpush3.msra.mxu0 %v12748_v47  ;;  %v12777_v18 = vunpack.c.h.bf16 %v13144_v46  ;;  %v12821_v47 = vunpack.c.h.bf16 %v13154_v53 }
0x3fdb   :  { %15072 = vmatprep.mubr.msk.f32.mxu1 %vm16344_vm3, %v16343_v6  ;;  %15029 = vmatprep.subr.mxu0 %v16343_v6 }
0x3fdc   :  { %15030 = vmatpush3.msra.mxu0 %v12745_v63  ;;  %15041 = vmatpush3.msra.mxu1 %v12801_v38  ;;  %v12820_v63 = vunpack.c.l.bf16 %v13154_v53  ;;  %v13151_v38 = vld [vmem:[#allocation56 + $0x8] sm:$0xff]  }
0x3fdd   :  { %15031 = vmatprep.subr.mxu0 %v16343_v6  ;;  %15042 = vmatprep.subr.mxu1 %v16343_v6 }
0x3fde   :  { %15032 = vmatpush3.msra.mxu0 %v12744_v17  ;;  %15043 = vmatpush3.msra.mxu1 %v12800_v24  ;;  %v12817_v17 = vunpack.c.h.bf16 %v13153_v0  ;;  %v12809_v24 = vunpack.c.h.bf16 %v13151_v38 }
0x3fdf   :  { %15033 = vmatprep.subr.mxu0 %v16343_v6  ;;  %15044 = vmatprep.subr.mxu1 %v16343_v6 }
0x3fe0   :  { %15034 = vmatpush3.msra.mxu0 %v12741_v44  ;;  %15045 = vmatpush3.msra.mxu1 %v12797_v52  ;;  %v12816_v44 = vunpack.c.l.bf16 %v13153_v0  ;;  %v12808_v52 = vunpack.c.l.bf16 %v13151_v38 }
0x3fe1   :  { %15035 = vmatprep.subr.mxu0 %v16343_v6  ;;  %15046 = vmatprep.subr.mxu1 %v16343_v6 }
0x3fe2   :  { %15036 = vmatpush3.msra.mxu0 %v12740_v19  ;;  %15047 = vmatpush3.msra.mxu1 %v12796_v29  ;;  %v13152_v19 = vld [vmem:[#allocation56 + $0x10] sm:$0xff]   ;;  %v12805_v29 = vunpack.c.h.bf16 %v12803_v60 }
0x3fe3   :  { %15075 = vmatprep.subr.mxu0 %v16343_v6  ;;  %15048 = vmatprep.subr.mxu1 %v16343_v6  ;;  %v12813_v21 = vunpack.c.h.bf16 %v13152_v19  ;;  %v12812_v9 = vunpack.c.l.bf16 %v13152_v19 }
0x3fe4   :  { %15049 = vmatpush3.msra.mxu1 %v12793_v33  ;;  %v12804_v33 = vunpack.c.l.bf16 %v12803_v60 }
0x3fe5   :  { %15050 = vmatprep.subr.mxu1 %v16343_v6 }
0x3fe6   :  { %15051 = vmatpush3.msra.mxu1 %v12792_v1 }
0x3fe7   :  { %15052 = vmatprep.subr.mxu1 %v16343_v6 }
0x3fe8   :  { %15053 = vmatpush3.msra.mxu1 %v12789_v15 }
0x3fe9   :  { %15054 = vmatprep.subr.mxu1 %v16343_v6 }
0x3fea   :  { %15055 = vmatpush3.msra.mxu1 %v12788_v34 }
0x3feb   :  { %15056 = vmatprep.subr.mxu1 %v16343_v6 }
0x3fec   :  { %15057 = vmatpush3.msra.mxu1 %v12785_v36 }
0x3fed   :  { %15058 = vmatprep.subr.mxu1 %v16343_v6 }
0x3fee   :  { %15059 = vmatpush3.msra.mxu1 %v12784_v39 }
0x3fef   :  { %15060 = vmatprep.subr.mxu1 %v16343_v6 }
0x3ff0   :  { %15061 = vmatpush3.msra.mxu1 %v12781_v25 }
0x3ff1   :  { %15062 = vmatprep.subr.mxu1 %v16343_v6 }
0x3ff2   :  { %15063 = vmatpush3.msra.mxu1 %v12780_v49 }
0x3ff3   :  { %15064 = vmatprep.subr.mxu1 %v16343_v6 }
0x3ff4   :  { %15065 = vmatpush3.msra.mxu1 %v12777_v18 }
0x3ff5   :  { %15066 = vmatprep.subr.mxu1 %v16343_v6 }
0x409a   :  { %v10737_v13 = vpop.f32.mrf.mxu1 }
0x409b   :  { %v10738_v35 = vadd.f32 %v11670_v50, %v10737_v13  ;;  %v12776_v50 = vunpack.c.l.bf16 %v13144_v46  ;;  %v13164_v46 = vld [vmem:[#allocation56 + $0x78] sm:$0xff]  }
0x409c   :  { %v15004_v5 = vpop.f32.mrf.mxu1  ;;  %v12865_v49 = vunpack.c.h.bf16 %v13164_v46  ;;  %v12864_v18 = vunpack.c.l.bf16 %v13164_v46 }
0x409d   :  { %v10743_v31 = vsel %vm1102_vm13, %v10738_v35, 0.0  ;;  %15067 = vmatpush3.msra.mxu1 %v12776_v50  ;;  %v13163_v50 = vld [vmem:[#allocation56 + $0x70] sm:$0xff]  }
0x409e   :  { %10744 = vadd.xlane.f32.xlu1 %v10743_v31  ;;  %15068 = vmatprep.subr.mxu1 %v16343_v6 }
0x40a2   :  { %8292 = vadd.xlane.f32.xlu1 %v8291_v55 }
0x4127   :  { %v10745_v2 = vpop.xlane.xlu1 %10744 }
0x4128   :  { %v10746_v61 = vmul.f32 0.0078125, %v10745_v2 }
0x412a   :  { %v17502_v20 = vsub.f32 %v10738_v35, %v10746_v61 }
0x412b   :  { %v8293_v28 = vpop.xlane.xlu1 %8292 }
0x412c   :  { %v8295_v40 = vmul.f32 0.0078125, %v8293_v28  ;;  %v10748_v42 = vmul.f32 %v17502_v20, %v17502_v20  ;;  %v11647_v28 = vld [vmem:[#allocation26] ss:$0 sm:$0xff] }
0x412e   :  { %v17506_v56 = vsub.f32 %v8286_v12, %v8295_v40  ;;  %v10749_v58 = vsel %vm1102_vm13, %v10748_v42, 0.0 }
0x412f   :  { %10750 = vadd.xlane.f32.xlu0 %v10749_v58  ;;  %v12771_v58 = vld [vmem:[#allocation55] sm:$0xff]  }
0x4130   :  { %v8297_v4 = vmul.f32 %v17506_v56, %v17506_v56 }
0x4132   :  { %v8298_v62 = vsel %vm1102_vm13, %v8297_v4, 0.0  ;;  %v12773_v4 = vunpack.c.h.bf16 %v12771_v58 }
0x4133   :  { %8299 = vadd.xlane.f32.xlu0 %v8298_v62  ;;  %v12772_v62 = vunpack.c.l.bf16 %v12771_v58 }
0x4134   :  { %15069 = vmatpush3.msra.mxu1 %v12773_v4 }
0x4135   :  { %15070 = vmatprep.subr.mxu1 %v16343_v6 }
0x4136   :  { %15071 = vmatpush3.msra.mxu1 %v12772_v62  ;;  %v11676_v62 = vld [vmem:[%s17683_s11] ss:$0 sm:$0xff] }
0x4137   :  { %15110 = vmatprep.subr.mxu1 %v16343_v6 }
0x41b8   :  { %v10751_v51 = vpop.xlane.xlu0 %10750 }
0x41b9   :  { %v10752_v13 = vmul.f32 0.0078125, %v10751_v51  ;;  %v12861_v51 = vunpack.c.h.bf16 %v13163_v50 }
0x41bb   :  { %v10753_v35 = vadd.f32 1e-05, %v10752_v13  ;;  %v12860_v13 = vunpack.c.l.bf16 %v13163_v50 }
0x41bc   :  { %v8300_v5 = vpop.xlane.xlu0 %8299 }
0x41bd   :  { %15409 = vrsqrt.f32 %v10753_v35  ;;  %v8301_v12 = vmul.f32 0.0078125, %v8300_v5  ;;  %v13162_v35 = vld [vmem:[#allocation56 + $0x68] sm:$0xff]  }
0x41be   :  { %v12857_v5 = vunpack.c.h.bf16 %v13162_v35 }
0x41bf   :  { %v8302_v31 = vadd.f32 1e-05, %v8301_v12  ;;  %v12856_v12 = vunpack.c.l.bf16 %v13162_v35 }
0x41c1   :  { %15411 = vrsqrt.f32 %v8302_v31  ;;  %v13161_v31 = vld [vmem:[#allocation56 + $0x60] sm:$0xff]  }
0x41ca   :  { %v15410_v55 = vpop.eup %15409 }
0x41cb   :  { %v10755_v3 = vmul.f32 %v15410_v55, %v17502_v20  ;;  %v11673_v20 = vld [vmem:[#allocation53] ss:$0 sm:$0xff]  ;;  %v12853_v55 = vunpack.c.h.bf16 %v13161_v31 }
0x41cd   :  { %v10762_v22 = vmul.f32 %v11671_v14, %v10755_v3  ;;  %v12852_v14 = vunpack.c.l.bf16 %v13161_v31  ;;  %v13160_v3 = vld [vmem:[#allocation56 + $0x58] sm:$0xff]  }
0x41ce   :  { %v15412_v45 = vpop.eup %15411 }
0x41cf   :  { %v10769_v2 = vadd.f32 %v11672_v11, %v10762_v22  ;;  %v8304_v61 = vmul.f32 %v15412_v45, %v17506_v56  ;;  %v12849_v11 = vunpack.c.h.bf16 %v13160_v3  ;;  %v12848_v22 = vunpack.c.l.bf16 %v13160_v3  ;;  %v13159_v45 = vld [vmem:[#allocation56 + $0x50] sm:$0xff]  }
0x41d1   :  { %15038 = vmatmul.mubr.f32.vlgmr.msra.gmra.mxu0 %v10769_v2  ;;  %v8311_v40 = vmul.f32 %v11646_v48, %v8304_v61  ;;  %v12845_v48 = vunpack.c.h.bf16 %v13159_v45  ;;  %v12844_v2 = vunpack.c.l.bf16 %v13159_v45  ;;  %v13158_v61 = vld [vmem:[#allocation56 + $0x48] sm:$0xff]  }
0x41d2   :  { %15107 = vmatprep.mubr.msk.f32.mxu0 %vm16344_vm3, %v16343_v6  ;;  %15076 = vmatpush3.msra.mxu0 %v12833_v8 }
0x41d3   :  { %v8318_v42 = vadd.f32 %v11647_v28, %v8311_v40  ;;  %15077 = vmatprep.subr.mxu0 %v16343_v6  ;;  %v12841_v28 = vunpack.c.h.bf16 %v13158_v61  ;;  %v12840_v40 = vunpack.c.l.bf16 %v13158_v61 }
0x41d4   :  { %15078 = vmatpush3.msra.mxu0 %v12832_v27 }
0x41d5   :  { %8319 = vst [vmem:[#allocation59] sm:$0x3] %v8318_v42  ;;  %15079 = vmatprep.subr.mxu0 %v16343_v6  ;;  %v12835_v42 = vld [vmem:[#allocation56 + $0x40] sm:$0xff]  }
0x41d6   :  { %15080 = vmatpush3.msra.mxu0 %v12829_v41  ;;  %v12837_v58 = vunpack.c.h.bf16 %v12835_v42  ;;  %v12836_v4 = vunpack.c.l.bf16 %v12835_v42  ;;  %v13171_v41 = vld [vmem:[%s17684_s17 + $0x38] sm:$0xff]  }
0x41d7   :  { %15081 = vmatprep.subr.mxu0 %v16343_v6  ;;  %v12896_v54 = vunpack.c.l.bf16 %v13171_v41 }
0x41d8   :  { %15082 = vmatpush3.msra.mxu0 %v12828_v43  ;;  %v12897_v43 = vunpack.c.h.bf16 %v13171_v41 }
0x41d9   :  { %15083 = vmatprep.subr.mxu0 %v16343_v6 }
0x41da   :  { %15084 = vmatpush3.msra.mxu0 %v12825_v26  ;;  %v13170_v26 = vld [vmem:[%s17684_s17 + $0x30] sm:$0xff]  }
0x41db   :  { %15085 = vmatprep.subr.mxu0 %v16343_v6  ;;  %v12892_v53 = vunpack.c.l.bf16 %v13170_v26 }
0x41dc   :  { %15086 = vmatpush3.msra.mxu0 %v12824_v16  ;;  %v12893_v16 = vunpack.c.h.bf16 %v13170_v26 }
0x41dd   :  { %15087 = vmatprep.subr.mxu0 %v16343_v6 }
0x41de   :  { %15088 = vmatpush3.msra.mxu0 %v12821_v47  ;;  %v13169_v47 = vld [vmem:[%s17684_s17 + $0x28] sm:$0xff]  }
0x41df   :  { %15089 = vmatprep.subr.mxu0 %v16343_v6  ;;  %v12888_v0 = vunpack.c.l.bf16 %v13169_v47 }
0x41e0   :  { %15090 = vmatpush3.msra.mxu0 %v12820_v63  ;;  %v12889_v63 = vunpack.c.h.bf16 %v13169_v47 }
0x41e1   :  { %15091 = vmatprep.subr.mxu0 %v16343_v6 }
0x41e2   :  { %15092 = vmatpush3.msra.mxu0 %v12817_v17  ;;  %v13168_v17 = vld [vmem:[%s17684_s17 + $0x20] sm:$0xff]  }
0x41e3   :  { %15093 = vmatprep.subr.mxu0 %v16343_v6  ;;  %v12884_v19 = vunpack.c.l.bf16 %v13168_v17 }
0x41e4   :  { %15094 = vmatpush3.msra.mxu0 %v12816_v44  ;;  %v12885_v44 = vunpack.c.h.bf16 %v13168_v17 }
0x41e5   :  { %15095 = vmatprep.subr.mxu0 %v16343_v6 }
0x41e6   :  { %15096 = vmatpush3.msra.mxu0 %v12813_v21  ;;  %v13167_v21 = vld [vmem:[%s17684_s17 + $0x18] sm:$0xff]  }
0x41e7   :  { %15097 = vmatprep.subr.mxu0 %v16343_v6  ;;  %v12880_v38 = vunpack.c.l.bf16 %v13167_v21 }
0x41e8   :  { %15098 = vmatpush3.msra.mxu0 %v12812_v9  ;;  %v12881_v9 = vunpack.c.h.bf16 %v13167_v21 }
0x41e9   :  { %15099 = vmatprep.subr.mxu0 %v16343_v6 }
0x41ea   :  { %15100 = vmatpush3.msra.mxu0 %v12809_v24  ;;  %v13166_v24 = vld [vmem:[%s17684_s17 + $0x10] sm:$0xff]  }
0x41eb   :  { %15101 = vmatprep.subr.mxu0 %v16343_v6  ;;  %v12876_v60 = vunpack.c.l.bf16 %v13166_v24 }
0x41ec   :  { %15102 = vmatpush3.msra.mxu0 %v12808_v52  ;;  %v12877_v52 = vunpack.c.h.bf16 %v13166_v24 }
0x41ed   :  { %15103 = vmatprep.subr.mxu0 %v16343_v6 }
0x41ee   :  { %15104 = vmatpush3.msra.mxu0 %v12805_v29  ;;  %v13165_v29 = vld [vmem:[%s17684_s17 + $0x8] sm:$0xff]  }
0x41ef   :  { %15105 = vmatprep.subr.mxu0 %v16343_v6 }
0x41f0   :  { %15106 = vmatpush3.msra.mxu0 %v12804_v33  ;;  %v12873_v33 = vunpack.c.h.bf16 %v13165_v29 }
0x41f1   :  { %15145 = vmatprep.subr.mxu0 %v16343_v6 }
0x4291   :  { %v10875_v10 = vpop.f32.mrf.mxu0 }
0x4292   :  { %v10876_v56 = vadd.f32 %v11673_v20, %v10875_v10 }
0x4293   :  { %v15039_v59 = vpop.f32.mrf.mxu0 }
0x4294   :  { %10879 = vst [vmem:[#allocation60] sm:$0x3] %v10876_v56  ;;  %15073 = vmatmul.mubr.f32.vlgmr.msra.gmra.mxu1 %v10876_v56 }
0x4295   :  { %15142 = vmatprep.mubr.msk.f32.mxu1 %vm16344_vm3, %v16343_v6  ;;  %15111 = vmatpush3.msra.mxu1 %v12865_v49 }
0x4296   :  { %15112 = vmatprep.subr.mxu1 %v16343_v6 }
0x4297   :  { %15113 = vmatpush3.msra.mxu1 %v12864_v18 }
0x4298   :  { %15114 = vmatprep.subr.mxu1 %v16343_v6 }
0x4299   :  { %15115 = vmatpush3.msra.mxu1 %v12861_v51 }
0x429a   :  { %15116 = vmatprep.subr.mxu1 %v16343_v6 }
0x429b   :  { %15117 = vmatpush3.msra.mxu1 %v12860_v13 }
0x429c   :  { %15118 = vmatprep.subr.mxu1 %v16343_v6 }
0x429d   :  { %15119 = vmatpush3.msra.mxu1 %v12857_v5 }
0x429e   :  { %15120 = vmatprep.subr.mxu1 %v16343_v6 }
0x429f   :  { %15121 = vmatpush3.msra.mxu1 %v12856_v12 }
0x42a0   :  { %15122 = vmatprep.subr.mxu1 %v16343_v6 }
0x42a1   :  { %15123 = vmatpush3.msra.mxu1 %v12853_v55 }
0x42a2   :  { %15124 = vmatprep.subr.mxu1 %v16343_v6 }
0x42a3   :  { %15125 = vmatpush3.msra.mxu1 %v12852_v14 }
0x42a4   :  { %15126 = vmatprep.subr.mxu1 %v16343_v6 }
0x42a5   :  { %15127 = vmatpush3.msra.mxu1 %v12849_v11 }
0x42a6   :  { %15128 = vmatprep.subr.mxu1 %v16343_v6 }
0x42a7   :  { %15129 = vmatpush3.msra.mxu1 %v12848_v22 }
0x42a8   :  { %15130 = vmatprep.subr.mxu1 %v16343_v6 }
0x42a9   :  { %15131 = vmatpush3.msra.mxu1 %v12845_v48 }
0x42aa   :  { %15132 = vmatprep.subr.mxu1 %v16343_v6 }
0x42ab   :  { %15133 = vmatpush3.msra.mxu1 %v12844_v2 }
0x42ac   :  { %15134 = vmatprep.subr.mxu1 %v16343_v6 }
0x42ad   :  { %15135 = vmatpush3.msra.mxu1 %v12841_v28 }
0x42ae   :  { %15136 = vmatprep.subr.mxu1 %v16343_v6 }
0x42af   :  { %15137 = vmatpush3.msra.mxu1 %v12840_v40 }
0x42b0   :  { %15138 = vmatprep.subr.mxu1 %v16343_v6 }
0x42b1   :  { %15139 = vmatpush3.msra.mxu1 %v12837_v58 }
0x42b2   :  { %15140 = vmatprep.subr.mxu1 %v16343_v6 }
0x42b3   :  { %15141 = vmatpush3.msra.mxu1 %v12836_v4 }
0x4354   :  { %v10985_v1 = vpop.f32.mrf.mxu1 }
0x4355   :  { %v10986_v15 = vadd.f32 %v11674_v32, %v10985_v1  ;;  %v12872_v32 = vunpack.c.l.bf16 %v13165_v29  ;;  %v12867_v1 = vld [vmem:[%s17684_s17] sm:$0xff]  }
0x4356   :  { %v15074_v23 = vpop.f32.mrf.mxu1 }
0x4357   :  { %v11675_v34 = vmul.f32 -1.442695, %v10986_v15  ;;  %v12868_v23 = vunpack.c.l.bf16 %v12867_v1 }
0x4359   :  { %15413 = vpow2.f32 %v11675_v34  ;;  %v11679_v34 = vld [vmem:[%s17683_s11 + $0x1] ss:$0 sm:$0xff] }
0x4366   :  { %v15414_v36 = vpop.eup %15413 }
0x4367   :  { %v10992_v37 = vadd.f32 1.0, %v15414_v36 }
0x4369   :  { %15415 = vrcp.f32 %v10992_v37 }
0x4376   :  { %v15416_v39 = vpop.eup %15415 }
0x4377   :  { %v10995_v25 = vmul.f32 %v15416_v39, %v10986_v15  ;;  %v12869_v15 = vunpack.c.h.bf16 %v12867_v1 }
0x4379   :  { %15108 = vmatmul.mubr.f32.vlgmr.msra.gmra.mxu0 %v10995_v25 }
0x437a   :  { %15177 = vmatprep.mubr.msk.f32.mxu0 %vm16344_vm3, %v16343_v6  ;;  %15146 = vmatpush3.msra.mxu0 %v12897_v43 }
0x437b   :  { %15147 = vmatprep.subr.mxu0 %v16343_v6 }
0x437c   :  { %15148 = vmatpush3.msra.mxu0 %v12896_v54 }
0x437d   :  { %15149 = vmatprep.subr.mxu0 %v16343_v6 }
0x437e   :  { %15150 = vmatpush3.msra.mxu0 %v12893_v16 }
0x437f   :  { %15151 = vmatprep.subr.mxu0 %v16343_v6 }
0x4380   :  { %15152 = vmatpush3.msra.mxu0 %v12892_v53 }
0x4381   :  { %15153 = vmatprep.subr.mxu0 %v16343_v6 }
0x4382   :  { %15154 = vmatpush3.msra.mxu0 %v12889_v63 }
0x4383   :  { %15155 = vmatprep.subr.mxu0 %v16343_v6 }
0x4384   :  { %15156 = vmatpush3.msra.mxu0 %v12888_v0 }
0x4385   :  { %15157 = vmatprep.subr.mxu0 %v16343_v6 }
0x4386   :  { %15158 = vmatpush3.msra.mxu0 %v12885_v44 }
0x4387   :  { %15159 = vmatprep.subr.mxu0 %v16343_v6 }
0x4388   :  { %15160 = vmatpush3.msra.mxu0 %v12884_v19 }
0x4389   :  { %15161 = vmatprep.subr.mxu0 %v16343_v6 }
0x438a   :  { %15162 = vmatpush3.msra.mxu0 %v12881_v9 }
0x438b   :  { %15163 = vmatprep.subr.mxu0 %v16343_v6 }
0x438c   :  { %15164 = vmatpush3.msra.mxu0 %v12880_v38 }
0x438d   :  { %15165 = vmatprep.subr.mxu0 %v16343_v6 }
0x438e   :  { %15166 = vmatpush3.msra.mxu0 %v12877_v52 }
0x438f   :  { %15167 = vmatprep.subr.mxu0 %v16343_v6 }
0x4390   :  { %15168 = vmatpush3.msra.mxu0 %v12876_v60 }
0x4391   :  { %15169 = vmatprep.subr.mxu0 %v16343_v6 }
0x4392   :  { %15170 = vmatpush3.msra.mxu0 %v12873_v33 }
0x4393   :  { %15171 = vmatprep.subr.mxu0 %v16343_v6 }
0x4394   :  { %15172 = vmatpush3.msra.mxu0 %v12872_v32 }
0x4395   :  { %15173 = vmatprep.subr.mxu0 %v16343_v6 }
0x4396   :  { %15174 = vmatpush3.msra.mxu0 %v12869_v15 }
0x4397   :  { %15175 = vmatprep.subr.mxu0 %v16343_v6 }
0x4398   :  { %15176 = vmatpush3.msra.mxu0 %v12868_v23 }
0x4439   :  { %v11101_v20 = vpop.f32.mrf.mxu0 }
0x443a   :  { %v11102_v10 = vadd.f32 %v11676_v62, %v11101_v20 }
0x443b   :  { %v15109_v56 = vpop.f32.mrf.mxu0 }
0x443c   :  { %v11677_v59 = vmul.f32 -1.442695, %v11102_v10 }
0x443e   :  { %15417 = vpow2.f32 %v11677_v59 }
0x444b   :  { %v15418_v7 = vpop.eup %15417 }
0x444c   :  { %v11108_v8 = vadd.f32 1.0, %v15418_v7 }
0x444e   :  { %15419 = vrcp.f32 %v11108_v8 }
0x445b   :  { %v15420_v27 = vpop.eup %15419 }
0x445c   :  { %v11111_v30 = vmul.f32 %v15420_v27, %v11102_v10 }
0x445e   :  { %15143 = vmatmul.mubr.f32.vlgmr.msra.gmra.mxu1 %v11111_v30 }
0x451e   :  { %v11219_v36 = vpop.f32.mrf.mxu1 }
0x451f   :  { %v11220_v37 = vadd.f32 %v11679_v34, %v11219_v36 }
0x4520   :  { %v15144_v39 = vpop.f32.mrf.mxu1 }
0x4521   :  { %v11680_v25 = vmul.f32 -1.442695, %v11220_v37 }
0x4523   :  { %15421 = vpow2.f32 %v11680_v25 }
0x4530   :  { %v15422_v46 = vpop.eup %15421 }
0x4531   :  { %v11226_v49 = vadd.f32 1.0, %v15422_v46 }
0x4533   :  { %15423 = vrcp.f32 %v11226_v49 }
0x4540   :  { %v15424_v18 = vpop.eup %15423 }
0x4541   :  { %v11229_v50 = vmul.f32 %v15424_v18, %v11220_v37 }
0x4543   :  { %15178 = vmatmul.mubr.f32.vlgmr.msra.gmra.mxu0 %v11229_v50 }
0x4544   :  { %16180 = shalt.err (!%p16177_p7)
}
0x4545   :  { %11370 = dma.vmem_to_hbm [thread:$0]  %s11368_s0, 32, %s16596_s3, [#allocation4]  }
0x4546   :  { %s16189_s8 = scalar_lea.vmem %s11378_s15, 32  ;;  %p16194_p9 = scmp.lt.s32.totalorder %s11378_s15, %s11378_s15 }
0x4547   :  { %p16190_p8 = scmp.ne.s32.totalorder %s11378_s15, %s16189_s8  ;;  %p16195_p10 = scmp.lt.s32.totalorder %s16189_s8, %s16189_s8 }
0x4549   :  { %p16196_p11 = por %p16195_p10, %p16194_p9 }
0x454b   :  { %p16197_p12 = pnand %p16196_p11, %p16190_p8 }
0x454d   :  { %16200 = shalt.err (!%p16197_p12)
}
0x454e   :  { %11380 = dma.vmem_to_hbm [thread:$0]  %s11378_s15, 32, %s16601_s13, [#allocation61]   ;;  %v11681_v6 = vld [vmem:[#allocation58] ss:$0 sm:$0xff]  ;;  %vm11339_vm3 = vcmp.lt.s32.totalorder %v16719_v57, 5  ;;  %vm11359_vm5 = vcmask 74752  }
0x4603   :  { %v11335_v51 = vpop.f32.mrf.mxu0 }
0x4604   :  { %v11336_v13 = vadd.f32 %v11681_v6, %v11335_v51 }
0x4605   :  { %v15179_v35 = vpop.f32.mrf.mxu0 }
0x4606   :  { %v11343_v5 = vand.u32 2147483647, %v11336_v13  ;;  %v11340_v61 = vmax.f32 %v11336_v13, 0.0  ;;  %vm11341_vm4 = vcmp.ne.f32.partialorder %v11336_v13, %v11336_v13 }
0x4608   :  { %v11344_v12 = vsub.f32 0.0, %v11343_v5 }
0x460a   :  { %v11345_v31 = vmul.f32 1.442695, %v11344_v12 }
0x460c   :  { %15425 = vpow2.f32 %v11345_v31 }
0x4619   :  { %v15426_v55 = vpop.eup %15425 }
0x461a   :  { %v11347_v14 = vadd.f32 1.0, %v15426_v55  ;;  %v11350_v3 = vmul.f32 -0.5, %v15426_v55  ;;  %v11353_v22 = vand.u32 2147483647, %v15426_v55 }
0x461c   :  { %15427 = vlog2.f32 %v11347_v14  ;;  %v11351_v11 = vadd.f32 1.0, %v11350_v3  ;;  %vm11354_vm2 = vcmp.lt.f32.partialorder %v11353_v22, 0.0004427343 }
0x461e   :  { %v11352_v2 = vmul.f32 %v15426_v55, %v11351_v11 }
0x4629   :  { %v15428_v45 = vpop.eup %15427 }
0x462a   :  { %v11349_v48 = vmul.f32 0.6931472, %v15428_v45 }
0x462c   :  { %v11355_v28 = vsel %vm11354_vm2, %v11352_v2, %v11349_v48 }
0x462d   :  { %v11356_v40 = vadd.f32 %v11355_v28, %v11340_v61 }
0x462f   :  { %v11357_v42 = vsel %vm11341_vm4, %v11336_v13, %v11356_v40 }
0x4630   :  { %v11358_v58 = vsel %vm11339_vm3, %v11336_v13, %v11357_v42 }
0x4631   :  { %11360 = vst.msk [vmem:[%s16606_s25] sm:$0x3] %vm11359_vm5, %v11358_v58 }
0x4632   :  { %16247 = dma.done.wait [#allocation4], 32  }
0x4633   :  { %16248 = vsyncadd [#allocation4], 4294967264 }
0x4634   :  { %16249 = dma.done.wait [#allocation61], 32  }
0x4635   :  { %16250 = vsyncadd [#allocation61], 4294967264 }
0x4636   :  { %11391 = vsyncpa [#allocation3], 1 }
0x4637   :  { %11392 = vsyncpa [#allocation6], 1 }
0x4638   :  { %11393 = vsyncpa [#allocation9], 1 }
0x4639   :  { %11394 = vsyncpa [#allocation12], 1 }
0x463a   :  { %11395 = vsyncpa [#allocation15], 1 }
0x463b   :  { %11396 = vsyncpa [#allocation18], 1 }
0x463c   :  { %11397 = vsyncpa [#allocation21], 1 }
0x463d   :  { %11398 = vsyncpa [#allocation24], 1 }
0x463e   :  { %11399 = vsyncpa [#allocation27], 1 }
0x463f   :  { %11400 = vsyncpa [#allocation30], 1 }
0x4640   :  { %11401 = vsyncpa [#allocation33], 1 }
0x4641   :  { %11402 = vsyncpa [#allocation36], 1 }
0x4642   :  { %11403 = vsyncpa [#allocation39], 1 }
0x4643   :  { %11404 = vsyncpa [#allocation42], 1 }
0x4644   :  { %11405 = vsyncpa [#allocation45], 1 }
0x4645   :  { %11406 = vsyncpa [#allocation48], 1 }
0x4646   :  { %11407 = vsyncpa [#allocation51], 1 }
0x4647   :  { %11408 = vsyncpa [#allocation54], 1 }
0x4648   :  { %11409 = vsyncpa [#allocation57], 1 }
0x4649   :  { %11410 = vsyncpa [#allocation4], 1 }
0x464a   :  { %11411 = vsyncpa [#allocation61], 1 }

</bundles_post_ra>
